<compile_context>
chip_gen: v7x
topology: tpu7x:2x2x1
jax: 0.10.0
libtpu: 0.0.40
codegen_flags: <defaults>
</compile_context>

<pallas_src>
import functools

import jax
import jax.numpy as jnp
from jax.experimental import pallas as pl
from jax.experimental.pallas import tpu as pltpu


# ----------------------------------------------------------------------------
# Helpers
# ----------------------------------------------------------------------------
def _pad128(n):
    return ((n + 127) // 128) * 128


def _block_rows(m, c, bytes_per_elem=2, budget=2 << 20):
    """Largest row-block that divides m, is a multiple of 8 (or == m) and keeps a
    single block under ~budget bytes (multi-MiB lane-dense HBM streams)."""
    cap = max(8, (budget // (c * bytes_per_elem)) // 8 * 8)
    if m <= cap:
        return m
    r = cap
    while r >= 8:
        if m % r == 0:
            return r
        r -= 8
    return m


def _pick_toh(oh, cap=8):
    if oh <= cap:
        return oh
    for t in range(cap, 0, -1):
        if oh % t == 0:
            return t
    return 1


# ----------------------------------------------------------------------------
# Tiled matmul (1x1 convs / head conv / classifier): bf16 MXU, f32 VMEM scratch
# ----------------------------------------------------------------------------
def _matmul_kernel(a_ref, b_ref, bias_ref, o_ref, acc_ref):
    k = pl.program_id(2)
    prod = jnp.dot(a_ref[...], b_ref[...], preferred_element_type=jnp.float32)

    @pl.when(k == 0)
    def _():
        acc_ref[...] = prod                       # direct store: no zero-init RMW

    @pl.when(k > 0)
    def _():
        acc_ref[...] += prod

    @pl.when(k == pl.num_programs(2) - 1)
    def _():
        o_ref[...] = (acc_ref[...] + bias_ref[...]).astype(o_ref.dtype)


def pallas_matmul(a, b, bias=None, out_dtype=jnp.bfloat16):
    """C = A @ B (+ bias). A/B pre-padded to 128-multiples -> no per-call pad/slice."""
    m, k = a.shape
    k2, n = b.shape
    assert k == k2 and n % 128 == 0 and k % 128 == 0, (a.shape, b.shape)
    if bias is None:
        bias = jnp.zeros((1, n), jnp.float32)
    a = a.astype(jnp.bfloat16)
    b = b.astype(jnp.bfloat16)

    if m <= 512:
        tm = m
    else:
        tm = next((t for t in (512, 256, 128, 64, 32, 16, 8) if m % t == 0), m)
    tn = 256 if (n % 256 == 0 and n >= 512) else 128
    tk = k if k <= 2048 else next((t for t in (1024, 512, 256, 128) if k % t == 0), 128)
    grid = (m // tm, n // tn, k // tk)

    return pl.pallas_call(
        _matmul_kernel,
        out_shape=jax.ShapeDtypeStruct((m, n), out_dtype),
        grid=grid,
        in_specs=[pl.BlockSpec((tm, tk), lambda i, j, kk: (i, kk)),
                  pl.BlockSpec((tk, tn), lambda i, j, kk: (kk, j)),
                  pl.BlockSpec((1, tn), lambda i, j, kk: (0, j))],
        out_specs=pl.BlockSpec((tm, tn), lambda i, j, kk: (i, j)),
        scratch_shapes=[pltpu.VMEM((tm, tn), jnp.float32)],
        compiler_params=pltpu.CompilerParams(
            dimension_semantics=("parallel", "parallel", "arbitrary"),
            vmem_limit_bytes=32 * 1024 * 1024),
    )(a, b, bias)


# ----------------------------------------------------------------------------
# Fused k x k conv: shifted-window matmuls, no im2col; emits SE pooling sums
# ----------------------------------------------------------------------------
def _conv_kernel(x_ref, w_ref, b_ref, o_ref, ps_ref, *, KH, KW, TOH, OW):
    # x_ref : (1, Hin, Win, Ci)  spatially padded (phase-shuffled if strided) image
    # w_ref : (KH*KW, Ci, TCo)   per-tap weight matrices
    # b_ref : (1, TCo) f32
    # o_ref : (1, TOH, OW, TCo) bf16
    # ps_ref: (1, 8, TCo) f32    per-(sample, co-tile) channel sums (row 0 used)
    i = pl.program_id(2)

    @pl.when(i == 0)
    def _():
        ps_ref[...] = jnp.zeros_like(ps_ref)

    tco = o_ref.shape[-1]
    bias = b_ref[...]
    csum = jnp.zeros((1, tco), jnp.float32)
    for t in range(TOH):                                  # static unroll
        row = i * TOH + t
        acc = jnp.zeros((OW, tco), jnp.float32)
        for kh in range(KH):
            for kw in range(KW):
                a = x_ref[0, row + kh, kw:kw + OW, :]     # (OW, Ci) shifted window
                acc = acc + jnp.dot(a, w_ref[kh * KW + kw],
                                    preferred_element_type=jnp.float32)
        acc = acc + bias
        csum = csum + jnp.sum(acc, axis=0, keepdims=True)
        o_ref[0, t] = acc.astype(o_ref.dtype)
    ps_ref[0, 0:1, :] += csum


def conv_kxk(x, taps, bias, ksize, stride, pad):
    """x: (N,H,W,Cp) bf16. taps prepared at init: (KK, Ci', Co) bf16.
    Returns (y bf16 (N,OH,OW,Co), pooled mean f32 (N,Co))."""
    n, h, w, _ = x.shape
    oh = (h + 2 * pad - ksize) // stride + 1
    ow = (w + 2 * pad - ksize) // stride + 1
    xp = jnp.pad(x, ((0, 0), (pad, pad), (pad, pad), (0, 0)))
    if stride == 2:
        if xp.shape[1] % 2:
            xp = jnp.pad(xp, ((0, 0), (0, 1), (0, 0), (0, 0)))
        if xp.shape[2] % 2:
            xp = jnp.pad(xp, ((0, 0), (0, 0), (0, 1), (0, 0)))
        # space-to-depth: the strided conv becomes a stride-1 conv over 4x channels.
        xp = jnp.concatenate([xp[:, rh::2, rw::2, :]
                              for rh in range(2) for rw in range(2)], axis=-1)
        khe = kwe = (ksize + 1) // 2
    else:
        khe = kwe = ksize

    kk, cik, co = taps.shape
    hin, win = xp.shape[1], xp.shape[2]
    assert kk == khe * kwe and cik == xp.shape[3]

    tco = 256 if (co % 256 == 0 and kk * cik * 256 * 2 <= (6 << 20)) else 128
    toh = _pick_toh(oh)
    grid = (n, co // tco, oh // toh)
    kernel = functools.partial(_conv_kernel, KH=khe, KW=kwe, TOH=toh, OW=ow)

    # TODO(synk): for large spatial inputs, tile H with a halo (manual DMA) instead
    # of keeping the whole per-sample image resident, and double-buffer it.
    y, psum = pl.pallas_call(
        kernel,
        out_shape=(jax.ShapeDtypeStruct((n, oh, ow, co), jnp.bfloat16),
                   jax.ShapeDtypeStruct((n, 8, co), jnp.float32)),
        grid=grid,
        in_specs=[pl.BlockSpec((1, hin, win, cik), lambda b, j, i: (b, 0, 0, 0)),
                  pl.BlockSpec((kk, cik, tco), lambda b, j, i: (0, 0, j)),
                  pl.BlockSpec((1, tco), lambda b, j, i: (0, j))],
        out_specs=(pl.BlockSpec((1, toh, ow, tco), lambda b, j, i: (b, i, 0, j)),
                   pl.BlockSpec((1, 8, tco), lambda b, j, i: (b, 0, j))),
        compiler_params=pltpu.CompilerParams(
            dimension_semantics=("parallel", "parallel", "arbitrary"),
            vmem_limit_bytes=40 * 1024 * 1024),
    )(xp, taps, bias)
    pooled = psum[:, 0, :] / float(oh * ow)
    return y, pooled


# ----------------------------------------------------------------------------
# Single-pass BatchNorm statistics + fused affine / swish / residual
# ----------------------------------------------------------------------------
def _bn_stats_kernel(x_ref, o_ref):
    x = x_ref[...].astype(jnp.float32)
    o_ref[0, 0, :] = jnp.sum(x, axis=0)
    o_ref[0, 1, :] = jnp.sum(x * x, axis=0)


def _affine_kernel(x_ref, scale_ref, shift_ref, *rest, swish):
    if len(rest) == 2:
        res_ref, o_ref = rest
    else:
        (o_ref,) = rest
        res_ref = None
    y = x_ref[...].astype(jnp.float32) * scale_ref[...] + shift_ref[...]
    if swish:
        y = y * jax.nn.sigmoid(y)
    if res_ref is not None:
        y = y + res_ref[...].astype(jnp.float32)
    o_ref[...] = y.astype(o_ref.dtype)


def pallas_affine(x2d, scale, shift, swish, residual=None):
    m, c = x2d.shape
    bm = _block_rows(m, c)
    in_specs = [pl.BlockSpec((bm, c), lambda i: (i, 0)),
                pl.BlockSpec((1, c), lambda i: (0, 0)),
                pl.BlockSpec((1, c), lambda i: (0, 0))]
    args = [x2d, scale.reshape(1, c).astype(jnp.float32),
            shift.reshape(1, c).astype(jnp.float32)]
    if residual is not None:
        in_specs.append(pl.BlockSpec((bm, c), lambda i: (i, 0)))
        args.append(residual)
    return pl.pallas_call(
        functools.partial(_affine_kernel, swish=swish),
        out_shape=jax.ShapeDtypeStruct((m, c), jnp.bfloat16),
        grid=(m // bm,),
        in_specs=in_specs,
        out_specs=pl.BlockSpec((bm, c), lambda i: (i, 0)),
        compiler_params=pltpu.CompilerParams(
            dimension_semantics=("parallel",),
            vmem_limit_bytes=32 * 1024 * 1024),
    )(*args)


def batchnorm_affine(x2d, gamma, beta, swish, residual=None, eps=1e-5):
    """Training-mode BatchNorm2d (batch stats, biased var) + swish + residual."""
    m, c = x2d.shape
    bm = _block_rows(m, c)
    nt = m // bm
    parts = pl.pallas_call(
        _bn_stats_kernel,
        out_shape=jax.ShapeDtypeStruct((nt, 2, c), jnp.float32),
        grid=(nt,),
        in_specs=[pl.BlockSpec((bm, c), lambda i: (i, 0))],
        out_specs=pl.BlockSpec((1, 2, c), lambda i: (i, 0, 0)),
        compiler_params=pltpu.CompilerParams(
            dimension_semantics=("parallel",),
            vmem_limit_bytes=32 * 1024 * 1024),
    )(x2d)
    s = jnp.sum(parts, axis=0)
    mean = s[0] / m
    var = jnp.maximum(s[1] / m - mean * mean, 0.0)
    scale = gamma * jax.lax.rsqrt(var + eps)
    shift = beta - mean * scale
    return pallas_affine(x2d, scale, shift, swish, residual)


# ----------------------------------------------------------------------------
# Squeeze-and-Excite: fused MLP kernel + per-sample channel re-scale kernel
# ----------------------------------------------------------------------------
def _se_mlp_kernel(x_ref, w1_ref, b1_ref, w2_ref, b2_ref, o_ref):
    h = jnp.dot(x_ref[...], w1_ref[...],
                preferred_element_type=jnp.float32) + b1_ref[...]
    h = jnp.maximum(h, 0.0)
    r = jnp.dot(h.astype(w2_ref.dtype), w2_ref[...],
                preferred_element_type=jnp.float32) + b2_ref[...]
    o_ref[...] = jax.nn.sigmoid(r)


def pallas_se_mlp(pooled, se_p):
    n, c = pooled.shape
    r = se_p["w1"].shape[1]
    return pl.pallas_call(
        _se_mlp_kernel,
        out_shape=jax.ShapeDtypeStruct((n, c), jnp.float32),
        grid=(1,),
        in_specs=[pl.BlockSpec((n, c), lambda i: (0, 0)),
                  pl.BlockSpec((c, r), lambda i: (0, 0)),
                  pl.BlockSpec((1, r), lambda i: (0, 0)),
                  pl.BlockSpec((r, c), lambda i: (0, 0)),
                  pl.BlockSpec((1, c), lambda i: (0, 0))],
        out_specs=pl.BlockSpec((n, c), lambda i: (0, 0)),
    )(pooled.astype(jnp.bfloat16), se_p["w1"], se_p["b1"], se_p["w2"], se_p["b2"])


def _scale_kernel(x_ref, r_ref, o_ref):
    o_ref[...] = (x_ref[...].astype(jnp.float32) * r_ref[...]).astype(o_ref.dtype)


def pallas_channel_scale(x, r):
    n, h, w, c = x.shape
    hw = h * w
    xr = x.reshape(n, hw, c)
    rr = r.reshape(n, 1, c).astype(jnp.float32)
    bhw = _block_rows(hw, c)
    out = pl.pallas_call(
        _scale_kernel,
        out_shape=jax.ShapeDtypeStruct((n, hw, c), jnp.bfloat16),
        grid=(n, hw // bhw),
        in_specs=[pl.BlockSpec((1, bhw, c), lambda b, i: (b, i, 0)),
                  pl.BlockSpec((1, 1, c), lambda b, i: (b, 0, 0))],
        out_specs=pl.BlockSpec((1, bhw, c), lambda b, i: (b, i, 0)),
        compiler_params=pltpu.CompilerParams(
            dimension_semantics=("parallel", "parallel"),
            vmem_limit_bytes=32 * 1024 * 1024),
    )(xr, rr)
    return out.reshape(n, h, w, c)


# ----------------------------------------------------------------------------
# Parameter init: weights generated in torch layout, prepped/padded ONCE here
# ----------------------------------------------------------------------------
def _normal(key, shape, scale):
    return scale * jax.random.normal(key, shape, dtype=jnp.float32)


def _prep_conv_taps(w, stride, cp_in, cp_out):
    cout, cin, kh_, kw_ = w.shape
    if stride == 1:
        t = jnp.transpose(w, (2, 3, 1, 0))                       # (KH,KW,cin,cout)
        taps = jnp.zeros((kh_, kw_, cp_in, cp_out), jnp.float32)
        taps = taps.at[:, :, :cin, :cout].set(t)
        taps = taps.reshape(kh_ * kw_, cp_in, cp_out)
    else:  # stride 2: phase (space-to-depth) decomposition, matches conv_kxk shuffle
        khe, kwe = (kh_ + 1) // 2, (kw_ + 1) // 2
        wp = jnp.zeros((cout, cin, 2 * khe, 2 * kwe), jnp.float32)
        wp = wp.at[:, :, :kh_, :kw_].set(w)
        wp = wp.reshape(cout, cin, khe, 2, kwe, 2)
        t = jnp.transpose(wp, (2, 4, 3, 5, 1, 0))                # (qh,qw,rh,rw,ci,co)
        taps = jnp.zeros((khe, kwe, 2, 2, cp_in, cp_out), jnp.float32)
        taps = taps.at[..., :cin, :cout].set(t)
        taps = taps.reshape(khe * kwe, 4 * cp_in, cp_out)
    return taps.astype(jnp.bfloat16)


def _init_basic_block(key, cin, cout):
    w = _normal(key, (cout, cin), 1.0 / (cin ** 0.5))
    cpi, cpo = _pad128(cin), _pad128(cout)
    wp = jnp.zeros((cpi, cpo), jnp.float32).at[:cin, :cout].set(w.T)
    return {"w": wp.astype(jnp.bfloat16),
            "gamma": jnp.zeros((cpo,), jnp.float32).at[:cout].set(1.0),
            "beta": jnp.zeros((cpo,), jnp.float32)}


def _init_spatial_conv(key, cin, cout, k, stride, bias):
    kw_, kb_ = jax.random.split(key)
    w = _normal(kw_, (cout, cin, k, k), 1.0 / ((cin * k * k) ** 0.5))
    cpi, cpo = _pad128(cin), _pad128(cout)
    taps = _prep_conv_taps(w, stride, cpi, cpo)
    bp = jnp.zeros((1, cpo), jnp.float32)
    if bias:
        bp = bp.at[0, :cout].set(_normal(kb_, (cout,), 0.01))
    return taps, bp


def _init_se(key, mid):
    red = mid // 4
    mp, rp = _pad128(mid), _pad128(red)
    k1, k2 = jax.random.split(key)
    w1 = _normal(k1, (red, mid), 1.0 / (mid ** 0.5))   # torch fc1.weight layout
    w2 = _normal(k2, (mid, red), 1.0 / (red ** 0.5))   # torch fc2.weight layout
    return {
        "w1": jnp.zeros((mp, rp), jnp.float32).at[:mid, :red].set(w1.T).astype(jnp.bfloat16),
        "b1": jnp.zeros((1, rp), jnp.float32),
        "w2": jnp.zeros((rp, mp), jnp.float32).at[:red, :mid].set(w2.T).astype(jnp.bfloat16),
        "b2": jnp.zeros((1, mp), jnp.float32),
    }


# (inc, outc, expand_ratio, kernel_size, downsize, se)
MBCONV_CFGS = [
    (32, 16, 1, 3, True, False),                                    # stage2
    (16, 24, 6, 3, True, True), (24, 24, 6, 3, False, True),        # stage3
    (24, 40, 6, 5, True, True), (40, 40, 6, 5, False, True),        # stage4
    (40, 80, 6, 3, True, True), (80, 80, 6, 3, False, True),
    (80, 80, 6, 3, False, True),                                    # stage5
    (80, 112, 6, 5, False, True), (112, 112, 6, 5, False, True),
    (112, 112, 6, 5, False, True),                                  # stage6
    (112, 192, 6, 5, True, True), (192, 192, 6, 5, False, True),
    (192, 192, 6, 5, False, True), (192, 192, 6, 5, False, True),   # stage7
    (192, 320, 6, 3, False, True),                                  # stage8
]


def _init_mbconv(key, inc, outc, expand_ratio, ksize, downsize, se):
    ks = jax.random.split(key, 4)
    mid = inc * expand_ratio
    p = {"b1": _init_basic_block(ks[0], inc, mid)}
    p["dw_taps"], p["dw_b"] = _init_spatial_conv(
        ks[1], mid, mid, ksize, 2 if downsize else 1, bias=True)
    p["se"] = _init_se(ks[2], mid) if se else None
    p["b2"] = _init_basic_block(ks[3], mid, outc)
    return p


def init_efficientnet(key):
    n_mb = len(MBCONV_CFGS)
    keys = jax.random.split(key, n_mb + 3)
    params = {}
    params["stage1_taps"], params["stage1_b"] = _init_spatial_conv(
        keys[0], 3, 32, 3, 1, bias=False)
    params["mbconvs"] = [_init_mbconv(keys[1 + i], *cfg)
                         for i, cfg in enumerate(MBCONV_CFGS)]
    kh1, kh2 = jax.random.split(keys[n_mb + 1])
    hw = _normal(kh1, (1280, 320), 1.0 / (320 ** 0.5))
    params["head_w"] = (jnp.zeros((_pad128(320), 1280), jnp.float32)
                        .at[:320, :].set(hw.T).astype(jnp.bfloat16))
    params["head_b"] = _normal(kh2, (1, 1280), 0.01)
    kf1, kf2 = jax.random.split(keys[n_mb + 2])
    fw = _normal(kf1, (1000, 1280), 1.0 / (1280 ** 0.5))
    params["fc_w"] = (jnp.zeros((1280, 1024), jnp.float32)
                      .at[:, :1000].set(fw.T).astype(jnp.bfloat16))
    params["fc_b"] = (jnp.zeros((1, 1024), jnp.float32)
                      .at[0, :1000].set(_normal(kf2, (1000,), 0.01)))
    return params


# ----------------------------------------------------------------------------
# Forward pass
# ----------------------------------------------------------------------------
def mbconv(p, x, inc, outc, expand_ratio, ksize, downsize, se):
    n, h, w, cp = x.shape
    res = x
    # block1: 1x1 conv -> BN -> swish
    y = pallas_matmul(x.reshape(n * h * w, cp), p["b1"]["w"])
    y = batchnorm_affine(y, p["b1"]["gamma"], p["b1"]["beta"], swish=True)
    mid_p = y.shape[-1]
    y = y.reshape(n, h, w, mid_p)
    # "dw" conv (full kxk conv with bias, no BN/swish -- matches reference module)
    y, pooled = conv_kxk(y, p["dw_taps"], p["dw_b"], ksize,
                         2 if downsize else 1, ksize // 2)
    if se:
        r = pallas_se_mlp(pooled, p["se"])
        y = pallas_channel_scale(y, r)
    # block2: 1x1 conv -> BN (+ residual fused into the affine kernel)
    oh, ow = y.shape[1], y.shape[2]
    z = pallas_matmul(y.reshape(n * oh * ow, mid_p), p["b2"]["w"])
    add_res = (inc == outc) and (not downsize)
    resid = res.reshape(-1, res.shape[-1]) if add_res else None
    z = batchnorm_affine(z, p["b2"]["gamma"], p["b2"]["beta"], swish=False,
                         residual=resid)
    return z.reshape(n, oh, ow, -1)


def efficientnet_forward(params, x_nchw):
    x = jnp.transpose(x_nchw, (0, 2, 3, 1)).astype(jnp.bfloat16)     # NCHW -> NHWC
    x = jnp.pad(x, ((0, 0), (0, 0), (0, 0), (0, _pad128(x.shape[-1]) - x.shape[-1])))
    # stage1: plain 3x3 conv (no BN / activation)
    x, _ = conv_kxk(x, params["stage1_taps"], params["stage1_b"], 3, 1, 1)
    # stages 2..8 (MBConv stack)
    for cfg, p in zip(MBCONV_CFGS, params["mbconvs"]):
        x = mbconv(p, x, *cfg)
    # stage9: 1x1 conv -> global avg pool -> flatten -> linear
    n, h, w, cp = x.shape
    y = pallas_matmul(x.reshape(n * h * w, cp), params["head_w"], params["head_b"])
    y = y.reshape(n, h, w, -1)
    pooled = jnp.mean(y.astype(jnp.float32), axis=(1, 2))             # (N, 1280)
    logits = pallas_matmul(pooled, params["fc_w"], params["fc_b"],
                           out_dtype=jnp.float32)
    # TODO(synk): fold BN statistics into the 1x1-conv matmul epilogue to save the
    # remaining stats read of each activation.
    return logits[:, :1000]


# ----------------------------------------------------------------------------
if __name__ == "__main__":
    key = jax.random.PRNGKey(0)
    pkey, xkey = jax.random.split(key)
    params = init_efficientnet(pkey)
    # Small input consistent with the module (torch.rand(5,3,224,224) scaled down)
    x = jax.random.uniform(xkey, (2, 3, 32, 32), dtype=jnp.float32)
    out = efficientnet_forward(params, x)
    out = jax.block_until_ready(out)
    assert out.shape == (2, 1000), out.shape
    assert bool(jnp.all(jnp.isfinite(out)))
    print("KERNEL_OK")
</pallas_src>

<mosaic_0001>
module attributes {stable_mosaic.version = 11 : i64} {
  func.func @_conv_kernel(%arg0: i32, %arg1: i32, %arg2: i32, %arg3: memref<1x34x34x128xbf16, #tpu.memory_space<vmem>>, %arg4: memref<9x128x128xbf16, #tpu.memory_space<vmem>>, %arg5: memref<1x128xf32, #tpu.memory_space<vmem>>, %arg6: memref<1x8x32x128xbf16, #tpu.memory_space<vmem>>, %arg7: memref<1x8x128xf32, #tpu.memory_space<vmem>>) attributes {dimension_semantics = [#tpu.dimension_semantics<parallel>, #tpu.dimension_semantics<parallel>, #tpu.dimension_semantics<arbitrary>], iteration_bounds = array<i64: 2, 1, 4>, scalar_prefetch = 0 : i64, scratch_operands = 0 : i64, tpu.core_type = #tpu.core_type<tc>, window_params = [{transform_indices = @transform_0, window_bounds = array<i64: 1, 34, 34, 128>}, {transform_indices = @transform_1, window_bounds = array<i64: 9, 128, 128>}, {transform_indices = @transform_2, window_bounds = array<i64: 1, 128>}, {transform_indices = @transform_3, window_bounds = array<i64: 1, 8, 32, 128>}, {transform_indices = @transform_4, window_bounds = array<i64: 1, 8, 128>}]} {
    %c0_i32 = arith.constant 0 : i32
    %0 = arith.cmpi eq, %arg2, %c0_i32 : i32
    %1 = arith.extui %0 : i1 to i32
    %c0_i32_0 = arith.constant 0 : i32
    %2 = arith.cmpi ne, %1, %c0_i32_0 : i32
    scf.if %2 {
      %cst_632 = arith.constant 0.000000e+00 : f32
      %683 = vector.broadcast %cst_632 : f32 to vector<1x8x128xf32>
      %c0_633 = arith.constant 0 : index
      %c0_634 = arith.constant 0 : index
      %c0_635 = arith.constant 0 : index
      %684 = vector.load %arg7[%c0_633, %c0_634, %c0_635] : memref<1x8x128xf32, #tpu.memory_space<vmem>>, vector<1x8x128xf32>
      tpu.vector_store %arg7[%c0_633, %c0_634, %c0_635], %683 {strides = array<i32>} : memref<1x8x128xf32, #tpu.memory_space<vmem>>, vector<1x8x128xf32>,
    } else {
    }
    %c0 = arith.constant 0 : index
    %c0_1 = arith.constant 0 : index
    %3 = vector.load %arg5[%c0, %c0_1] : memref<1x128xf32, #tpu.memory_space<vmem>>, vector<1x128xf32>
    %cst = arith.constant 0.000000e+00 : f32
    %4 = vector.broadcast %cst : f32 to vector<1x128xf32>
    %c8_i32 = arith.constant 8 : i32
    %5 = arith.muli %arg2, %c8_i32 : i32
    %c0_i32_2 = arith.constant 0 : i32
    %6 = arith.addi %5, %c0_i32_2 : i32
    %cst_3 = arith.constant 0.000000e+00 : f32
    %7 = vector.broadcast %cst_3 : f32 to vector<32x128xf32>
    %c0_i32_4 = arith.constant 0 : i32
    %8 = arith.addi %6, %c0_i32_4 : i32
    %c0_5 = arith.constant 0 : index
    %9 = arith.index_cast %8 : i32 to index
    %c0_6 = arith.constant 0 : index
    %c0_7 = arith.constant 0 : index
    %10 = vector.load %arg3[%c0_5, %9, %c0_6, %c0_7] : memref<1x34x34x128xbf16, #tpu.memory_space<vmem>>, vector<1x1x32x128xbf16>
    %11 = vector.shape_cast %10 : vector<1x1x32x128xbf16> to vector<32x128xbf16>
    %c0_8 = arith.constant 0 : index
    %c0_9 = arith.constant 0 : index
    %c0_10 = arith.constant 0 : index
    %12 = vector.load %arg4[%c0_8, %c0_9, %c0_10] : memref<9x128x128xbf16, #tpu.memory_space<vmem>>, vector<1x128x128xbf16>
    %13 = vector.shape_cast %12 : vector<1x128x128xbf16> to vector<128x128xbf16>
    %cst_11 = arith.constant dense<0.000000e+00> : vector<32x128xf32>
    %14 = tpu.matmul %11, %13, %cst_11 {dimension_numbers = #tpu.dot_dimension_numbers<[1], [0], [0], [1], [0, 0, 1, 1], [], []>} : vector<32x128xbf16>, vector<128x128xbf16>, vector<32x128xf32> -> vector<32x128xf32>
    %15 = arith.addf %7, %14 : vector<32x128xf32>
    %c0_i32_12 = arith.constant 0 : i32
    %16 = arith.addi %6, %c0_i32_12 : i32
    %c0_13 = arith.constant 0 : index
    %17 = arith.index_cast %16 : i32 to index
    %c1 = arith.constant 1 : index
    %c0_14 = arith.constant 0 : index
    %18 = vector.load %arg3[%c0_13, %17, %c1, %c0_14] : memref<1x34x34x128xbf16, #tpu.memory_space<vmem>>, vector<1x1x32x128xbf16>
    %19 = vector.shape_cast %18 : vector<1x1x32x128xbf16> to vector<32x128xbf16>
    %c1_15 = arith.constant 1 : index
    %c0_16 = arith.constant 0 : index
    %c0_17 = arith.constant 0 : index
    %20 = vector.load %arg4[%c1_15, %c0_16, %c0_17] : memref<9x128x128xbf16, #tpu.memory_space<vmem>>, vector<1x128x128xbf16>
    %21 = vector.shape_cast %20 : vector<1x128x128xbf16> to vector<128x128xbf16>
    %cst_18 = arith.constant dense<0.000000e+00> : vector<32x128xf32>
    %22 = tpu.matmul %19, %21, %cst_18 {dimension_numbers = #tpu.dot_dimension_numbers<[1], [0], [0], [1], [0, 0, 1, 1], [], []>} : vector<32x128xbf16>, vector<128x128xbf16>, vector<32x128xf32> -> vector<32x128xf32>
    %23 = arith.addf %15, %22 : vector<32x128xf32>
    %c0_i32_19 = arith.constant 0 : i32
    %24 = arith.addi %6, %c0_i32_19 : i32
    %c0_20 = arith.constant 0 : index
    %25 = arith.index_cast %24 : i32 to index
    %c2 = arith.constant 2 : index
    %c0_21 = arith.constant 0 : index
    %26 = vector.load %arg3[%c0_20, %25, %c2, %c0_21] : memref<1x34x34x128xbf16, #tpu.memory_space<vmem>>, vector<1x1x32x128xbf16>
    %27 = vector.shape_cast %26 : vector<1x1x32x128xbf16> to vector<32x128xbf16>
    %c2_22 = arith.constant 2 : index
    %c0_23 = arith.constant 0 : index
    %c0_24 = arith.constant 0 : index
    %28 = vector.load %arg4[%c2_22, %c0_23, %c0_24] : memref<9x128x128xbf16, #tpu.memory_space<vmem>>, vector<1x128x128xbf16>
    %29 = vector.shape_cast %28 : vector<1x128x128xbf16> to vector<128x128xbf16>
    %cst_25 = arith.constant dense<0.000000e+00> : vector<32x128xf32>
    %30 = tpu.matmul %27, %29, %cst_25 {dimension_numbers = #tpu.dot_dimension_numbers<[1], [0], [0], [1], [0, 0, 1, 1], [], []>} : vector<32x128xbf16>, vector<128x128xbf16>, vector<32x128xf32> -> vector<32x128xf32>
    %31 = arith.addf %23, %30 : vector<32x128xf32>
    %c1_i32 = arith.constant 1 : i32
    %32 = arith.addi %6, %c1_i32 : i32
    %c0_26 = arith.constant 0 : index
    %33 = arith.index_cast %32 : i32 to index
    %c0_27 = arith.constant 0 : index
    %c0_28 = arith.constant 0 : index
    %34 = vector.load %arg3[%c0_26, %33, %c0_27, %c0_28] : memref<1x34x34x128xbf16, #tpu.memory_space<vmem>>, vector<1x1x32x128xbf16>
    %35 = vector.shape_cast %34 : vector<1x1x32x128xbf16> to vector<32x128xbf16>
    %c3 = arith.constant 3 : index
    %c0_29 = arith.constant 0 : index
    %c0_30 = arith.constant 0 : index
    %36 = vector.load %arg4[%c3, %c0_29, %c0_30] : memref<9x128x128xbf16, #tpu.memory_space<vmem>>, vector<1x128x128xbf16>
    %37 = vector.shape_cast %36 : vector<1x128x128xbf16> to vector<128x128xbf16>
    %cst_31 = arith.constant dense<0.000000e+00> : vector<32x128xf32>
    %38 = tpu.matmul %35, %37, %cst_31 {dimension_numbers = #tpu.dot_dimension_numbers<[1], [0], [0], [1], [0, 0, 1, 1], [], []>} : vector<32x128xbf16>, vector<128x128xbf16>, vector<32x128xf32> -> vector<32x128xf32>
    %39 = arith.addf %31, %38 : vector<32x128xf32>
    %c1_i32_32 = arith.constant 1 : i32
    %40 = arith.addi %6, %c1_i32_32 : i32
    %c0_33 = arith.constant 0 : index
    %41 = arith.index_cast %40 : i32 to index
    %c1_34 = arith.constant 1 : index
    %c0_35 = arith.constant 0 : index
    %42 = vector.load %arg3[%c0_33, %41, %c1_34, %c0_35] : memref<1x34x34x128xbf16, #tpu.memory_space<vmem>>, vector<1x1x32x128xbf16>
    %43 = vector.shape_cast %42 : vector<1x1x32x128xbf16> to vector<32x128xbf16>
    %c4 = arith.constant 4 : index
    %c0_36 = arith.constant 0 : index
    %c0_37 = arith.constant 0 : index
    %44 = vector.load %arg4[%c4, %c0_36, %c0_37] : memref<9x128x128xbf16, #tpu.memory_space<vmem>>, vector<1x128x128xbf16>
    %45 = vector.shape_cast %44 : vector<1x128x128xbf16> to vector<128x128xbf16>
    %cst_38 = arith.constant dense<0.000000e+00> : vector<32x128xf32>
    %46 = tpu.matmul %43, %45, %cst_38 {dimension_numbers = #tpu.dot_dimension_numbers<[1], [0], [0], [1], [0, 0, 1, 1], [], []>} : vector<32x128xbf16>, vector<128x128xbf16>, vector<32x128xf32> -> vector<32x128xf32>
    %47 = arith.addf %39, %46 : vector<32x128xf32>
    %c1_i32_39 = arith.constant 1 : i32
    %48 = arith.addi %6, %c1_i32_39 : i32
    %c0_40 = arith.constant 0 : index
    %49 = arith.index_cast %48 : i32 to index
    %c2_41 = arith.constant 2 : index
    %c0_42 = arith.constant 0 : index
    %50 = vector.load %arg3[%c0_40, %49, %c2_41, %c0_42] : memref<1x34x34x128xbf16, #tpu.memory_space<vmem>>, vector<1x1x32x128xbf16>
    %51 = vector.shape_cast %50 : vector<1x1x32x128xbf16> to vector<32x128xbf16>
    %c5 = arith.constant 5 : index
    %c0_43 = arith.constant 0 : index
    %c0_44 = arith.constant 0 : index
    %52 = vector.load %arg4[%c5, %c0_43, %c0_44] : memref<9x128x128xbf16, #tpu.memory_space<vmem>>, vector<1x128x128xbf16>
    %53 = vector.shape_cast %52 : vector<1x128x128xbf16> to vector<128x128xbf16>
    %cst_45 = arith.constant dense<0.000000e+00> : vector<32x128xf32>
    %54 = tpu.matmul %51, %53, %cst_45 {dimension_numbers = #tpu.dot_dimension_numbers<[1], [0], [0], [1], [0, 0, 1, 1], [], []>} : vector<32x128xbf16>, vector<128x128xbf16>, vector<32x128xf32> -> vector<32x128xf32>
    %55 = arith.addf %47, %54 : vector<32x128xf32>
    %c2_i32 = arith.constant 2 : i32
    %56 = arith.addi %6, %c2_i32 : i32
    %c0_46 = arith.constant 0 : index
    %57 = arith.index_cast %56 : i32 to index
    %c0_47 = arith.constant 0 : index
    %c0_48 = arith.constant 0 : index
    %58 = vector.load %arg3[%c0_46, %57, %c0_47, %c0_48] : memref<1x34x34x128xbf16, #tpu.memory_space<vmem>>, vector<1x1x32x128xbf16>
    %59 = vector.shape_cast %58 : vector<1x1x32x128xbf16> to vector<32x128xbf16>
    %c6 = arith.constant 6 : index
    %c0_49 = arith.constant 0 : index
    %c0_50 = arith.constant 0 : index
    %60 = vector.load %arg4[%c6, %c0_49, %c0_50] : memref<9x128x128xbf16, #tpu.memory_space<vmem>>, vector<1x128x128xbf16>
    %61 = vector.shape_cast %60 : vector<1x128x128xbf16> to vector<128x128xbf16>
    %cst_51 = arith.constant dense<0.000000e+00> : vector<32x128xf32>
    %62 = tpu.matmul %59, %61, %cst_51 {dimension_numbers = #tpu.dot_dimension_numbers<[1], [0], [0], [1], [0, 0, 1, 1], [], []>} : vector<32x128xbf16>, vector<128x128xbf16>, vector<32x128xf32> -> vector<32x128xf32>
    %63 = arith.addf %55, %62 : vector<32x128xf32>
    %c2_i32_52 = arith.constant 2 : i32
    %64 = arith.addi %6, %c2_i32_52 : i32
    %c0_53 = arith.constant 0 : index
    %65 = arith.index_cast %64 : i32 to index
    %c1_54 = arith.constant 1 : index
    %c0_55 = arith.constant 0 : index
    %66 = vector.load %arg3[%c0_53, %65, %c1_54, %c0_55] : memref<1x34x34x128xbf16, #tpu.memory_space<vmem>>, vector<1x1x32x128xbf16>
    %67 = vector.shape_cast %66 : vector<1x1x32x128xbf16> to vector<32x128xbf16>
    %c7 = arith.constant 7 : index
    %c0_56 = arith.constant 0 : index
    %c0_57 = arith.constant 0 : index
    %68 = vector.load %arg4[%c7, %c0_56, %c0_57] : memref<9x128x128xbf16, #tpu.memory_space<vmem>>, vector<1x128x128xbf16>
    %69 = vector.shape_cast %68 : vector<1x128x128xbf16> to vector<128x128xbf16>
    %cst_58 = arith.constant dense<0.000000e+00> : vector<32x128xf32>
    %70 = tpu.matmul %67, %69, %cst_58 {dimension_numbers = #tpu.dot_dimension_numbers<[1], [0], [0], [1], [0, 0, 1, 1], [], []>} : vector<32x128xbf16>, vector<128x128xbf16>, vector<32x128xf32> -> vector<32x128xf32>
    %71 = arith.addf %63, %70 : vector<32x128xf32>
    %c2_i32_59 = arith.constant 2 : i32
    %72 = arith.addi %6, %c2_i32_59 : i32
    %c0_60 = arith.constant 0 : index
    %73 = arith.index_cast %72 : i32 to index
    %c2_61 = arith.constant 2 : index
    %c0_62 = arith.constant 0 : index
    %74 = vector.load %arg3[%c0_60, %73, %c2_61, %c0_62] : memref<1x34x34x128xbf16, #tpu.memory_space<vmem>>, vector<1x1x32x128xbf16>
    %75 = vector.shape_cast %74 : vector<1x1x32x128xbf16> to vector<32x128xbf16>
    %c8 = arith.constant 8 : index
    %c0_63 = arith.constant 0 : index
    %c0_64 = arith.constant 0 : index
    %76 = vector.load %arg4[%c8, %c0_63, %c0_64] : memref<9x128x128xbf16, #tpu.memory_space<vmem>>, vector<1x128x128xbf16>
    %77 = vector.shape_cast %76 : vector<1x128x128xbf16> to vector<128x128xbf16>
    %cst_65 = arith.constant dense<0.000000e+00> : vector<32x128xf32>
    %78 = tpu.matmul %75, %77, %cst_65 {dimension_numbers = #tpu.dot_dimension_numbers<[1], [0], [0], [1], [0, 0, 1, 1], [], []>} : vector<32x128xbf16>, vector<128x128xbf16>, vector<32x128xf32> -> vector<32x128xf32>
    %79 = arith.addf %71, %78 : vector<32x128xf32>
    %80 = vector.broadcast %3 : vector<1x128xf32> to vector<32x128xf32>
    %81 = arith.addf %79, %80 : vector<32x128xf32>
    %cst_66 = arith.constant dense<0.000000e+00> : vector<128xf32>
    %82 = vector.multi_reduction <add>, %81, %cst_66 [0] : vector<32x128xf32> to vector<128xf32>
    %83 = vector.shape_cast %82 : vector<128xf32> to vector<1x128xf32>
    %84 = arith.addf %4, %83 : vector<1x128xf32>
    %85 = arith.truncf %81 : vector<32x128xf32> to vector<32x128xbf16>
    %c0_67 = arith.constant 0 : index
    %c0_68 = arith.constant 0 : index
    %c0_69 = arith.constant 0 : index
    %c0_70 = arith.constant 0 : index
    %86 = vector.load %arg6[%c0_67, %c0_68, %c0_69, %c0_70] : memref<1x8x32x128xbf16, #tpu.memory_space<vmem>>, vector<1x1x32x128xbf16>
    %87 = vector.shape_cast %86 : vector<1x1x32x128xbf16> to vector<32x128xbf16>
    %88 = vector.shape_cast %85 : vector<32x128xbf16> to vector<1x1x32x128xbf16>
    tpu.vector_store %arg6[%c0_67, %c0_68, %c0_69, %c0_70], %88 {strides = array<i32>} : memref<1x8x32x128xbf16, #tpu.memory_space<vmem>>, vector<1x1x32x128xbf16>,
    %c8_i32_71 = arith.constant 8 : i32
    %89 = arith.muli %arg2, %c8_i32_71 : i32
    %c1_i32_72 = arith.constant 1 : i32
    %90 = arith.addi %89, %c1_i32_72 : i32
    %cst_73 = arith.constant 0.000000e+00 : f32
    %91 = vector.broadcast %cst_73 : f32 to vector<32x128xf32>
    %c0_i32_74 = arith.constant 0 : i32
    %92 = arith.addi %90, %c0_i32_74 : i32
    %c0_75 = arith.constant 0 : index
    %93 = arith.index_cast %92 : i32 to index
    %c0_76 = arith.constant 0 : index
    %c0_77 = arith.constant 0 : index
    %94 = vector.load %arg3[%c0_75, %93, %c0_76, %c0_77] : memref<1x34x34x128xbf16, #tpu.memory_space<vmem>>, vector<1x1x32x128xbf16>
    %95 = vector.shape_cast %94 : vector<1x1x32x128xbf16> to vector<32x128xbf16>
    %c0_78 = arith.constant 0 : index
    %c0_79 = arith.constant 0 : index
    %c0_80 = arith.constant 0 : index
    %96 = vector.load %arg4[%c0_78, %c0_79, %c0_80] : memref<9x128x128xbf16, #tpu.memory_space<vmem>>, vector<1x128x128xbf16>
    %97 = vector.shape_cast %96 : vector<1x128x128xbf16> to vector<128x128xbf16>
    %cst_81 = arith.constant dense<0.000000e+00> : vector<32x128xf32>
    %98 = tpu.matmul %95, %97, %cst_81 {dimension_numbers = #tpu.dot_dimension_numbers<[1], [0], [0], [1], [0, 0, 1, 1], [], []>} : vector<32x128xbf16>, vector<128x128xbf16>, vector<32x128xf32> -> vector<32x128xf32>
    %99 = arith.addf %91, %98 : vector<32x128xf32>
    %c0_i32_82 = arith.constant 0 : i32
    %100 = arith.addi %90, %c0_i32_82 : i32
    %c0_83 = arith.constant 0 : index
    %101 = arith.index_cast %100 : i32 to index
    %c1_84 = arith.constant 1 : index
    %c0_85 = arith.constant 0 : index
    %102 = vector.load %arg3[%c0_83, %101, %c1_84, %c0_85] : memref<1x34x34x128xbf16, #tpu.memory_space<vmem>>, vector<1x1x32x128xbf16>
    %103 = vector.shape_cast %102 : vector<1x1x32x128xbf16> to vector<32x128xbf16>
    %c1_86 = arith.constant 1 : index
    %c0_87 = arith.constant 0 : index
    %c0_88 = arith.constant 0 : index
    %104 = vector.load %arg4[%c1_86, %c0_87, %c0_88] : memref<9x128x128xbf16, #tpu.memory_space<vmem>>, vector<1x128x128xbf16>
    %105 = vector.shape_cast %104 : vector<1x128x128xbf16> to vector<128x128xbf16>
    %cst_89 = arith.constant dense<0.000000e+00> : vector<32x128xf32>
    %106 = tpu.matmul %103, %105, %cst_89 {dimension_numbers = #tpu.dot_dimension_numbers<[1], [0], [0], [1], [0, 0, 1, 1], [], []>} : vector<32x128xbf16>, vector<128x128xbf16>, vector<32x128xf32> -> vector<32x128xf32>
    %107 = arith.addf %99, %106 : vector<32x128xf32>
    %c0_i32_90 = arith.constant 0 : i32
    %108 = arith.addi %90, %c0_i32_90 : i32
    %c0_91 = arith.constant 0 : index
    %109 = arith.index_cast %108 : i32 to index
    %c2_92 = arith.constant 2 : index
    %c0_93 = arith.constant 0 : index
    %110 = vector.load %arg3[%c0_91, %109, %c2_92, %c0_93] : memref<1x34x34x128xbf16, #tpu.memory_space<vmem>>, vector<1x1x32x128xbf16>
    %111 = vector.shape_cast %110 : vector<1x1x32x128xbf16> to vector<32x128xbf16>
    %c2_94 = arith.constant 2 : index
    %c0_95 = arith.constant 0 : index
    %c0_96 = arith.constant 0 : index
    %112 = vector.load %arg4[%c2_94, %c0_95, %c0_96] : memref<9x128x128xbf16, #tpu.memory_space<vmem>>, vector<1x128x128xbf16>
    %113 = vector.shape_cast %112 : vector<1x128x128xbf16> to vector<128x128xbf16>
    %cst_97 = arith.constant dense<0.000000e+00> : vector<32x128xf32>
    %114 = tpu.matmul %111, %113, %cst_97 {dimension_numbers = #tpu.dot_dimension_numbers<[1], [0], [0], [1], [0, 0, 1, 1], [], []>} : vector<32x128xbf16>, vector<128x128xbf16>, vector<32x128xf32> -> vector<32x128xf32>
    %115 = arith.addf %107, %114 : vector<32x128xf32>
    %c1_i32_98 = arith.constant 1 : i32
    %116 = arith.addi %90, %c1_i32_98 : i32
    %c0_99 = arith.constant 0 : index
    %117 = arith.index_cast %116 : i32 to index
    %c0_100 = arith.constant 0 : index
    %c0_101 = arith.constant 0 : index
    %118 = vector.load %arg3[%c0_99, %117, %c0_100, %c0_101] : memref<1x34x34x128xbf16, #tpu.memory_space<vmem>>, vector<1x1x32x128xbf16>
    %119 = vector.shape_cast %118 : vector<1x1x32x128xbf16> to vector<32x128xbf16>
    %c3_102 = arith.constant 3 : index
    %c0_103 = arith.constant 0 : index
    %c0_104 = arith.constant 0 : index
    %120 = vector.load %arg4[%c3_102, %c0_103, %c0_104] : memref<9x128x128xbf16, #tpu.memory_space<vmem>>, vector<1x128x128xbf16>
    %121 = vector.shape_cast %120 : vector<1x128x128xbf16> to vector<128x128xbf16>
    %cst_105 = arith.constant dense<0.000000e+00> : vector<32x128xf32>
    %122 = tpu.matmul %119, %121, %cst_105 {dimension_numbers = #tpu.dot_dimension_numbers<[1], [0], [0], [1], [0, 0, 1, 1], [], []>} : vector<32x128xbf16>, vector<128x128xbf16>, vector<32x128xf32> -> vector<32x128xf32>
    %123 = arith.addf %115, %122 : vector<32x128xf32>
    %c1_i32_106 = arith.constant 1 : i32
    %124 = arith.addi %90, %c1_i32_106 : i32
    %c0_107 = arith.constant 0 : index
    %125 = arith.index_cast %124 : i32 to index
    %c1_108 = arith.constant 1 : index
    %c0_109 = arith.constant 0 : index
    %126 = vector.load %arg3[%c0_107, %125, %c1_108, %c0_109] : memref<1x34x34x128xbf16, #tpu.memory_space<vmem>>, vector<1x1x32x128xbf16>
    %127 = vector.shape_cast %126 : vector<1x1x32x128xbf16> to vector<32x128xbf16>
    %c4_110 = arith.constant 4 : index
    %c0_111 = arith.constant 0 : index
    %c0_112 = arith.constant 0 : index
    %128 = vector.load %arg4[%c4_110, %c0_111, %c0_112] : memref<9x128x128xbf16, #tpu.memory_space<vmem>>, vector<1x128x128xbf16>
    %129 = vector.shape_cast %128 : vector<1x128x128xbf16> to vector<128x128xbf16>
    %cst_113 = arith.constant dense<0.000000e+00> : vector<32x128xf32>
    %130 = tpu.matmul %127, %129, %cst_113 {dimension_numbers = #tpu.dot_dimension_numbers<[1], [0], [0], [1], [0, 0, 1, 1], [], []>} : vector<32x128xbf16>, vector<128x128xbf16>, vector<32x128xf32> -> vector<32x128xf32>
    %131 = arith.addf %123, %130 : vector<32x128xf32>
    %c1_i32_114 = arith.constant 1 : i32
    %132 = arith.addi %90, %c1_i32_114 : i32
    %c0_115 = arith.constant 0 : index
    %133 = arith.index_cast %132 : i32 to index
    %c2_116 = arith.constant 2 : index
    %c0_117 = arith.constant 0 : index
    %134 = vector.load %arg3[%c0_115, %133, %c2_116, %c0_117] : memref<1x34x34x128xbf16, #tpu.memory_space<vmem>>, vector<1x1x32x128xbf16>
    %135 = vector.shape_cast %134 : vector<1x1x32x128xbf16> to vector<32x128xbf16>
    %c5_118 = arith.constant 5 : index
    %c0_119 = arith.constant 0 : index
    %c0_120 = arith.constant 0 : index
    %136 = vector.load %arg4[%c5_118, %c0_119, %c0_120] : memref<9x128x128xbf16, #tpu.memory_space<vmem>>, vector<1x128x128xbf16>
    %137 = vector.shape_cast %136 : vector<1x128x128xbf16> to vector<128x128xbf16>
    %cst_121 = arith.constant dense<0.000000e+00> : vector<32x128xf32>
    %138 = tpu.matmul %135, %137, %cst_121 {dimension_numbers = #tpu.dot_dimension_numbers<[1], [0], [0], [1], [0, 0, 1, 1], [], []>} : vector<32x128xbf16>, vector<128x128xbf16>, vector<32x128xf32> -> vector<32x128xf32>
    %139 = arith.addf %131, %138 : vector<32x128xf32>
    %c2_i32_122 = arith.constant 2 : i32
    %140 = arith.addi %90, %c2_i32_122 : i32
    %c0_123 = arith.constant 0 : index
    %141 = arith.index_cast %140 : i32 to index
    %c0_124 = arith.constant 0 : index
    %c0_125 = arith.constant 0 : index
    %142 = vector.load %arg3[%c0_123, %141, %c0_124, %c0_125] : memref<1x34x34x128xbf16, #tpu.memory_space<vmem>>, vector<1x1x32x128xbf16>
    %143 = vector.shape_cast %142 : vector<1x1x32x128xbf16> to vector<32x128xbf16>
    %c6_126 = arith.constant 6 : index
    %c0_127 = arith.constant 0 : index
    %c0_128 = arith.constant 0 : index
    %144 = vector.load %arg4[%c6_126, %c0_127, %c0_128] : memref<9x128x128xbf16, #tpu.memory_space<vmem>>, vector<1x128x128xbf16>
    %145 = vector.shape_cast %144 : vector<1x128x128xbf16> to vector<128x128xbf16>
    %cst_129 = arith.constant dense<0.000000e+00> : vector<32x128xf32>
    %146 = tpu.matmul %143, %145, %cst_129 {dimension_numbers = #tpu.dot_dimension_numbers<[1], [0], [0], [1], [0, 0, 1, 1], [], []>} : vector<32x128xbf16>, vector<128x128xbf16>, vector<32x128xf32> -> vector<32x128xf32>
    %147 = arith.addf %139, %146 : vector<32x128xf32>
    %c2_i32_130 = arith.constant 2 : i32
    %148 = arith.addi %90, %c2_i32_130 : i32
    %c0_131 = arith.constant 0 : index
    %149 = arith.index_cast %148 : i32 to index
    %c1_132 = arith.constant 1 : index
    %c0_133 = arith.constant 0 : index
    %150 = vector.load %arg3[%c0_131, %149, %c1_132, %c0_133] : memref<1x34x34x128xbf16, #tpu.memory_space<vmem>>, vector<1x1x32x128xbf16>
    %151 = vector.shape_cast %150 : vector<1x1x32x128xbf16> to vector<32x128xbf16>
    %c7_134 = arith.constant 7 : index
    %c0_135 = arith.constant 0 : index
    %c0_136 = arith.constant 0 : index
    %152 = vector.load %arg4[%c7_134, %c0_135, %c0_136] : memref<9x128x128xbf16, #tpu.memory_space<vmem>>, vector<1x128x128xbf16>
    %153 = vector.shape_cast %152 : vector<1x128x128xbf16> to vector<128x128xbf16>
    %cst_137 = arith.constant dense<0.000000e+00> : vector<32x128xf32>
    %154 = tpu.matmul %151, %153, %cst_137 {dimension_numbers = #tpu.dot_dimension_numbers<[1], [0], [0], [1], [0, 0, 1, 1], [], []>} : vector<32x128xbf16>, vector<128x128xbf16>, vector<32x128xf32> -> vector<32x128xf32>
    %155 = arith.addf %147, %154 : vector<32x128xf32>
    %c2_i32_138 = arith.constant 2 : i32
    %156 = arith.addi %90, %c2_i32_138 : i32
    %c0_139 = arith.constant 0 : index
    %157 = arith.index_cast %156 : i32 to index
    %c2_140 = arith.constant 2 : index
    %c0_141 = arith.constant 0 : index
    %158 = vector.load %arg3[%c0_139, %157, %c2_140, %c0_141] : memref<1x34x34x128xbf16, #tpu.memory_space<vmem>>, vector<1x1x32x128xbf16>
    %159 = vector.shape_cast %158 : vector<1x1x32x128xbf16> to vector<32x128xbf16>
    %c8_142 = arith.constant 8 : index
    %c0_143 = arith.constant 0 : index
    %c0_144 = arith.constant 0 : index
    %160 = vector.load %arg4[%c8_142, %c0_143, %c0_144] : memref<9x128x128xbf16, #tpu.memory_space<vmem>>, vector<1x128x128xbf16>
    %161 = vector.shape_cast %160 : vector<1x128x128xbf16> to vector<128x128xbf16>
    %cst_145 = arith.constant dense<0.000000e+00> : vector<32x128xf32>
    %162 = tpu.matmul %159, %161, %cst_145 {dimension_numbers = #tpu.dot_dimension_numbers<[1], [0], [0], [1], [0, 0, 1, 1], [], []>} : vector<32x128xbf16>, vector<128x128xbf16>, vector<32x128xf32> -> vector<32x128xf32>
    %163 = arith.addf %155, %162 : vector<32x128xf32>
    %164 = vector.broadcast %3 : vector<1x128xf32> to vector<32x128xf32>
    %165 = arith.addf %163, %164 : vector<32x128xf32>
    %cst_146 = arith.constant dense<0.000000e+00> : vector<128xf32>
    %166 = vector.multi_reduction <add>, %165, %cst_146 [0] : vector<32x128xf32> to vector<128xf32>
    %167 = vector.shape_cast %166 : vector<128xf32> to vector<1x128xf32>
    %168 = arith.addf %84, %167 : vector<1x128xf32>
    %169 = arith.truncf %165 : vector<32x128xf32> to vector<32x128xbf16>
    %c0_147 = arith.constant 0 : index
    %c1_148 = arith.constant 1 : index
    %c0_149 = arith.constant 0 : index
    %c0_150 = arith.constant 0 : index
    %170 = vector.load %arg6[%c0_147, %c1_148, %c0_149, %c0_150] : memref<1x8x32x128xbf16, #tpu.memory_space<vmem>>, vector<1x1x32x128xbf16>
    %171 = vector.shape_cast %170 : vector<1x1x32x128xbf16> to vector<32x128xbf16>
    %172 = vector.shape_cast %169 : vector<32x128xbf16> to vector<1x1x32x128xbf16>
    tpu.vector_store %arg6[%c0_147, %c1_148, %c0_149, %c0_150], %172 {strides = array<i32>} : memref<1x8x32x128xbf16, #tpu.memory_space<vmem>>, vector<1x1x32x128xbf16>,
    %c8_i32_151 = arith.constant 8 : i32
    %173 = arith.muli %arg2, %c8_i32_151 : i32
    %c2_i32_152 = arith.constant 2 : i32
    %174 = arith.addi %173, %c2_i32_152 : i32
    %cst_153 = arith.constant 0.000000e+00 : f32
    %175 = vector.broadcast %cst_153 : f32 to vector<32x128xf32>
    %c0_i32_154 = arith.constant 0 : i32
    %176 = arith.addi %174, %c0_i32_154 : i32
    %c0_155 = arith.constant 0 : index
    %177 = arith.index_cast %176 : i32 to index
    %c0_156 = arith.constant 0 : index
    %c0_157 = arith.constant 0 : index
    %178 = vector.load %arg3[%c0_155, %177, %c0_156, %c0_157] : memref<1x34x34x128xbf16, #tpu.memory_space<vmem>>, vector<1x1x32x128xbf16>
    %179 = vector.shape_cast %178 : vector<1x1x32x128xbf16> to vector<32x128xbf16>
    %c0_158 = arith.constant 0 : index
    %c0_159 = arith.constant 0 : index
    %c0_160 = arith.constant 0 : index
    %180 = vector.load %arg4[%c0_158, %c0_159, %c0_160] : memref<9x128x128xbf16, #tpu.memory_space<vmem>>, vector<1x128x128xbf16>
    %181 = vector.shape_cast %180 : vector<1x128x128xbf16> to vector<128x128xbf16>
    %cst_161 = arith.constant dense<0.000000e+00> : vector<32x128xf32>
    %182 = tpu.matmul %179, %181, %cst_161 {dimension_numbers = #tpu.dot_dimension_numbers<[1], [0], [0], [1], [0, 0, 1, 1], [], []>} : vector<32x128xbf16>, vector<128x128xbf16>, vector<32x128xf32> -> vector<32x128xf32>
    %183 = arith.addf %175, %182 : vector<32x128xf32>
    %c0_i32_162 = arith.constant 0 : i32
    %184 = arith.addi %174, %c0_i32_162 : i32
    %c0_163 = arith.constant 0 : index
    %185 = arith.index_cast %184 : i32 to index
    %c1_164 = arith.constant 1 : index
    %c0_165 = arith.constant 0 : index
    %186 = vector.load %arg3[%c0_163, %185, %c1_164, %c0_165] : memref<1x34x34x128xbf16, #tpu.memory_space<vmem>>, vector<1x1x32x128xbf16>
    %187 = vector.shape_cast %186 : vector<1x1x32x128xbf16> to vector<32x128xbf16>
    %c1_166 = arith.constant 1 : index
    %c0_167 = arith.constant 0 : index
    %c0_168 = arith.constant 0 : index
    %188 = vector.load %arg4[%c1_166, %c0_167, %c0_168] : memref<9x128x128xbf16, #tpu.memory_space<vmem>>, vector<1x128x128xbf16>
    %189 = vector.shape_cast %188 : vector<1x128x128xbf16> to vector<128x128xbf16>
    %cst_169 = arith.constant dense<0.000000e+00> : vector<32x128xf32>
    %190 = tpu.matmul %187, %189, %cst_169 {dimension_numbers = #tpu.dot_dimension_numbers<[1], [0], [0], [1], [0, 0, 1, 1], [], []>} : vector<32x128xbf16>, vector<128x128xbf16>, vector<32x128xf32> -> vector<32x128xf32>
    %191 = arith.addf %183, %190 : vector<32x128xf32>
    %c0_i32_170 = arith.constant 0 : i32
    %192 = arith.addi %174, %c0_i32_170 : i32
    %c0_171 = arith.constant 0 : index
    %193 = arith.index_cast %192 : i32 to index
    %c2_172 = arith.constant 2 : index
    %c0_173 = arith.constant 0 : index
    %194 = vector.load %arg3[%c0_171, %193, %c2_172, %c0_173] : memref<1x34x34x128xbf16, #tpu.memory_space<vmem>>, vector<1x1x32x128xbf16>
    %195 = vector.shape_cast %194 : vector<1x1x32x128xbf16> to vector<32x128xbf16>
    %c2_174 = arith.constant 2 : index
    %c0_175 = arith.constant 0 : index
    %c0_176 = arith.constant 0 : index
    %196 = vector.load %arg4[%c2_174, %c0_175, %c0_176] : memref<9x128x128xbf16, #tpu.memory_space<vmem>>, vector<1x128x128xbf16>
    %197 = vector.shape_cast %196 : vector<1x128x128xbf16> to vector<128x128xbf16>
    %cst_177 = arith.constant dense<0.000000e+00> : vector<32x128xf32>
    %198 = tpu.matmul %195, %197, %cst_177 {dimension_numbers = #tpu.dot_dimension_numbers<[1], [0], [0], [1], [0, 0, 1, 1], [], []>} : vector<32x128xbf16>, vector<128x128xbf16>, vector<32x128xf32> -> vector<32x128xf32>
    %199 = arith.addf %191, %198 : vector<32x128xf32>
    %c1_i32_178 = arith.constant 1 : i32
    %200 = arith.addi %174, %c1_i32_178 : i32
    %c0_179 = arith.constant 0 : index
    %201 = arith.index_cast %200 : i32 to index
    %c0_180 = arith.constant 0 : index
    %c0_181 = arith.constant 0 : index
    %202 = vector.load %arg3[%c0_179, %201, %c0_180, %c0_181] : memref<1x34x34x128xbf16, #tpu.memory_space<vmem>>, vector<1x1x32x128xbf16>
    %203 = vector.shape_cast %202 : vector<1x1x32x128xbf16> to vector<32x128xbf16>
    %c3_182 = arith.constant 3 : index
    %c0_183 = arith.constant 0 : index
    %c0_184 = arith.constant 0 : index
    %204 = vector.load %arg4[%c3_182, %c0_183, %c0_184] : memref<9x128x128xbf16, #tpu.memory_space<vmem>>, vector<1x128x128xbf16>
    %205 = vector.shape_cast %204 : vector<1x128x128xbf16> to vector<128x128xbf16>
    %cst_185 = arith.constant dense<0.000000e+00> : vector<32x128xf32>
    %206 = tpu.matmul %203, %205, %cst_185 {dimension_numbers = #tpu.dot_dimension_numbers<[1], [0], [0], [1], [0, 0, 1, 1], [], []>} : vector<32x128xbf16>, vector<128x128xbf16>, vector<32x128xf32> -> vector<32x128xf32>
    %207 = arith.addf %199, %206 : vector<32x128xf32>
    %c1_i32_186 = arith.constant 1 : i32
    %208 = arith.addi %174, %c1_i32_186 : i32
    %c0_187 = arith.constant 0 : index
    %209 = arith.index_cast %208 : i32 to index
    %c1_188 = arith.constant 1 : index
    %c0_189 = arith.constant 0 : index
    %210 = vector.load %arg3[%c0_187, %209, %c1_188, %c0_189] : memref<1x34x34x128xbf16, #tpu.memory_space<vmem>>, vector<1x1x32x128xbf16>
    %211 = vector.shape_cast %210 : vector<1x1x32x128xbf16> to vector<32x128xbf16>
    %c4_190 = arith.constant 4 : index
    %c0_191 = arith.constant 0 : index
    %c0_192 = arith.constant 0 : index
    %212 = vector.load %arg4[%c4_190, %c0_191, %c0_192] : memref<9x128x128xbf16, #tpu.memory_space<vmem>>, vector<1x128x128xbf16>
    %213 = vector.shape_cast %212 : vector<1x128x128xbf16> to vector<128x128xbf16>
    %cst_193 = arith.constant dense<0.000000e+00> : vector<32x128xf32>
    %214 = tpu.matmul %211, %213, %cst_193 {dimension_numbers = #tpu.dot_dimension_numbers<[1], [0], [0], [1], [0, 0, 1, 1], [], []>} : vector<32x128xbf16>, vector<128x128xbf16>, vector<32x128xf32> -> vector<32x128xf32>
    %215 = arith.addf %207, %214 : vector<32x128xf32>
    %c1_i32_194 = arith.constant 1 : i32
    %216 = arith.addi %174, %c1_i32_194 : i32
    %c0_195 = arith.constant 0 : index
    %217 = arith.index_cast %216 : i32 to index
    %c2_196 = arith.constant 2 : index
    %c0_197 = arith.constant 0 : index
    %218 = vector.load %arg3[%c0_195, %217, %c2_196, %c0_197] : memref<1x34x34x128xbf16, #tpu.memory_space<vmem>>, vector<1x1x32x128xbf16>
    %219 = vector.shape_cast %218 : vector<1x1x32x128xbf16> to vector<32x128xbf16>
    %c5_198 = arith.constant 5 : index
    %c0_199 = arith.constant 0 : index
    %c0_200 = arith.constant 0 : index
    %220 = vector.load %arg4[%c5_198, %c0_199, %c0_200] : memref<9x128x128xbf16, #tpu.memory_space<vmem>>, vector<1x128x128xbf16>
    %221 = vector.shape_cast %220 : vector<1x128x128xbf16> to vector<128x128xbf16>
    %cst_201 = arith.constant dense<0.000000e+00> : vector<32x128xf32>
    %222 = tpu.matmul %219, %221, %cst_201 {dimension_numbers = #tpu.dot_dimension_numbers<[1], [0], [0], [1], [0, 0, 1, 1], [], []>} : vector<32x128xbf16>, vector<128x128xbf16>, vector<32x128xf32> -> vector<32x128xf32>
    %223 = arith.addf %215, %222 : vector<32x128xf32>
    %c2_i32_202 = arith.constant 2 : i32
    %224 = arith.addi %174, %c2_i32_202 : i32
    %c0_203 = arith.constant 0 : index
    %225 = arith.index_cast %224 : i32 to index
    %c0_204 = arith.constant 0 : index
    %c0_205 = arith.constant 0 : index
    %226 = vector.load %arg3[%c0_203, %225, %c0_204, %c0_205] : memref<1x34x34x128xbf16, #tpu.memory_space<vmem>>, vector<1x1x32x128xbf16>
    %227 = vector.shape_cast %226 : vector<1x1x32x128xbf16> to vector<32x128xbf16>
    %c6_206 = arith.constant 6 : index
    %c0_207 = arith.constant 0 : index
    %c0_208 = arith.constant 0 : index
    %228 = vector.load %arg4[%c6_206, %c0_207, %c0_208] : memref<9x128x128xbf16, #tpu.memory_space<vmem>>, vector<1x128x128xbf16>
    %229 = vector.shape_cast %228 : vector<1x128x128xbf16> to vector<128x128xbf16>
    %cst_209 = arith.constant dense<0.000000e+00> : vector<32x128xf32>
    %230 = tpu.matmul %227, %229, %cst_209 {dimension_numbers = #tpu.dot_dimension_numbers<[1], [0], [0], [1], [0, 0, 1, 1], [], []>} : vector<32x128xbf16>, vector<128x128xbf16>, vector<32x128xf32> -> vector<32x128xf32>
    %231 = arith.addf %223, %230 : vector<32x128xf32>
    %c2_i32_210 = arith.constant 2 : i32
    %232 = arith.addi %174, %c2_i32_210 : i32
    %c0_211 = arith.constant 0 : index
    %233 = arith.index_cast %232 : i32 to index
    %c1_212 = arith.constant 1 : index
    %c0_213 = arith.constant 0 : index
    %234 = vector.load %arg3[%c0_211, %233, %c1_212, %c0_213] : memref<1x34x34x128xbf16, #tpu.memory_space<vmem>>, vector<1x1x32x128xbf16>
    %235 = vector.shape_cast %234 : vector<1x1x32x128xbf16> to vector<32x128xbf16>
    %c7_214 = arith.constant 7 : index
    %c0_215 = arith.constant 0 : index
    %c0_216 = arith.constant 0 : index
    %236 = vector.load %arg4[%c7_214, %c0_215, %c0_216] : memref<9x128x128xbf16, #tpu.memory_space<vmem>>, vector<1x128x128xbf16>
    %237 = vector.shape_cast %236 : vector<1x128x128xbf16> to vector<128x128xbf16>
    %cst_217 = arith.constant dense<0.000000e+00> : vector<32x128xf32>
    %238 = tpu.matmul %235, %237, %cst_217 {dimension_numbers = #tpu.dot_dimension_numbers<[1], [0], [0], [1], [0, 0, 1, 1], [], []>} : vector<32x128xbf16>, vector<128x128xbf16>, vector<32x128xf32> -> vector<32x128xf32>
    %239 = arith.addf %231, %238 : vector<32x128xf32>
    %c2_i32_218 = arith.constant 2 : i32
    %240 = arith.addi %174, %c2_i32_218 : i32
    %c0_219 = arith.constant 0 : index
    %241 = arith.index_cast %240 : i32 to index
    %c2_220 = arith.constant 2 : index
    %c0_221 = arith.constant 0 : index
    %242 = vector.load %arg3[%c0_219, %241, %c2_220, %c0_221] : memref<1x34x34x128xbf16, #tpu.memory_space<vmem>>, vector<1x1x32x128xbf16>
    %243 = vector.shape_cast %242 : vector<1x1x32x128xbf16> to vector<32x128xbf16>
    %c8_222 = arith.constant 8 : index
    %c0_223 = arith.constant 0 : index
    %c0_224 = arith.constant 0 : index
    %244 = vector.load %arg4[%c8_222, %c0_223, %c0_224] : memref<9x128x128xbf16, #tpu.memory_space<vmem>>, vector<1x128x128xbf16>
    %245 = vector.shape_cast %244 : vector<1x128x128xbf16> to vector<128x128xbf16>
    %cst_225 = arith.constant dense<0.000000e+00> : vector<32x128xf32>
    %246 = tpu.matmul %243, %245, %cst_225 {dimension_numbers = #tpu.dot_dimension_numbers<[1], [0], [0], [1], [0, 0, 1, 1], [], []>} : vector<32x128xbf16>, vector<128x128xbf16>, vector<32x128xf32> -> vector<32x128xf32>
    %247 = arith.addf %239, %246 : vector<32x128xf32>
    %248 = vector.broadcast %3 : vector<1x128xf32> to vector<32x128xf32>
    %249 = arith.addf %247, %248 : vector<32x128xf32>
    %cst_226 = arith.constant dense<0.000000e+00> : vector<128xf32>
    %250 = vector.multi_reduction <add>, %249, %cst_226 [0] : vector<32x128xf32> to vector<128xf32>
    %251 = vector.shape_cast %250 : vector<128xf32> to vector<1x128xf32>
    %252 = arith.addf %168, %251 : vector<1x128xf32>
    %253 = arith.truncf %249 : vector<32x128xf32> to vector<32x128xbf16>
    %c0_227 = arith.constant 0 : index
    %c2_228 = arith.constant 2 : index
    %c0_229 = arith.constant 0 : index
    %c0_230 = arith.constant 0 : index
    %254 = vector.load %arg6[%c0_227, %c2_228, %c0_229, %c0_230] : memref<1x8x32x128xbf16, #tpu.memory_space<vmem>>, vector<1x1x32x128xbf16>
    %255 = vector.shape_cast %254 : vector<1x1x32x128xbf16> to vector<32x128xbf16>
    %256 = vector.shape_cast %253 : vector<32x128xbf16> to vector<1x1x32x128xbf16>
    tpu.vector_store %arg6[%c0_227, %c2_228, %c0_229, %c0_230], %256 {strides = array<i32>} : memref<1x8x32x128xbf16, #tpu.memory_space<vmem>>, vector<1x1x32x128xbf16>,
    %c8_i32_231 = arith.constant 8 : i32
    %257 = arith.muli %arg2, %c8_i32_231 : i32
    %c3_i32 = arith.constant 3 : i32
    %258 = arith.addi %257, %c3_i32 : i32
    %cst_232 = arith.constant 0.000000e+00 : f32
    %259 = vector.broadcast %cst_232 : f32 to vector<32x128xf32>
    %c0_i32_233 = arith.constant 0 : i32
    %260 = arith.addi %258, %c0_i32_233 : i32
    %c0_234 = arith.constant 0 : index
    %261 = arith.index_cast %260 : i32 to index
    %c0_235 = arith.constant 0 : index
    %c0_236 = arith.constant 0 : index
    %262 = vector.load %arg3[%c0_234, %261, %c0_235, %c0_236] : memref<1x34x34x128xbf16, #tpu.memory_space<vmem>>, vector<1x1x32x128xbf16>
    %263 = vector.shape_cast %262 : vector<1x1x32x128xbf16> to vector<32x128xbf16>
    %c0_237 = arith.constant 0 : index
    %c0_238 = arith.constant 0 : index
    %c0_239 = arith.constant 0 : index
    %264 = vector.load %arg4[%c0_237, %c0_238, %c0_239] : memref<9x128x128xbf16, #tpu.memory_space<vmem>>, vector<1x128x128xbf16>
    %265 = vector.shape_cast %264 : vector<1x128x128xbf16> to vector<128x128xbf16>
    %cst_240 = arith.constant dense<0.000000e+00> : vector<32x128xf32>
    %266 = tpu.matmul %263, %265, %cst_240 {dimension_numbers = #tpu.dot_dimension_numbers<[1], [0], [0], [1], [0, 0, 1, 1], [], []>} : vector<32x128xbf16>, vector<128x128xbf16>, vector<32x128xf32> -> vector<32x128xf32>
    %267 = arith.addf %259, %266 : vector<32x128xf32>
    %c0_i32_241 = arith.constant 0 : i32
    %268 = arith.addi %258, %c0_i32_241 : i32
    %c0_242 = arith.constant 0 : index
    %269 = arith.index_cast %268 : i32 to index
    %c1_243 = arith.constant 1 : index
    %c0_244 = arith.constant 0 : index
    %270 = vector.load %arg3[%c0_242, %269, %c1_243, %c0_244] : memref<1x34x34x128xbf16, #tpu.memory_space<vmem>>, vector<1x1x32x128xbf16>
    %271 = vector.shape_cast %270 : vector<1x1x32x128xbf16> to vector<32x128xbf16>
    %c1_245 = arith.constant 1 : index
    %c0_246 = arith.constant 0 : index
    %c0_247 = arith.constant 0 : index
    %272 = vector.load %arg4[%c1_245, %c0_246, %c0_247] : memref<9x128x128xbf16, #tpu.memory_space<vmem>>, vector<1x128x128xbf16>
    %273 = vector.shape_cast %272 : vector<1x128x128xbf16> to vector<128x128xbf16>
    %cst_248 = arith.constant dense<0.000000e+00> : vector<32x128xf32>
    %274 = tpu.matmul %271, %273, %cst_248 {dimension_numbers = #tpu.dot_dimension_numbers<[1], [0], [0], [1], [0, 0, 1, 1], [], []>} : vector<32x128xbf16>, vector<128x128xbf16>, vector<32x128xf32> -> vector<32x128xf32>
    %275 = arith.addf %267, %274 : vector<32x128xf32>
    %c0_i32_249 = arith.constant 0 : i32
    %276 = arith.addi %258, %c0_i32_249 : i32
    %c0_250 = arith.constant 0 : index
    %277 = arith.index_cast %276 : i32 to index
    %c2_251 = arith.constant 2 : index
    %c0_252 = arith.constant 0 : index
    %278 = vector.load %arg3[%c0_250, %277, %c2_251, %c0_252] : memref<1x34x34x128xbf16, #tpu.memory_space<vmem>>, vector<1x1x32x128xbf16>
    %279 = vector.shape_cast %278 : vector<1x1x32x128xbf16> to vector<32x128xbf16>
    %c2_253 = arith.constant 2 : index
    %c0_254 = arith.constant 0 : index
    %c0_255 = arith.constant 0 : index
    %280 = vector.load %arg4[%c2_253, %c0_254, %c0_255] : memref<9x128x128xbf16, #tpu.memory_space<vmem>>, vector<1x128x128xbf16>
    %281 = vector.shape_cast %280 : vector<1x128x128xbf16> to vector<128x128xbf16>
    %cst_256 = arith.constant dense<0.000000e+00> : vector<32x128xf32>
    %282 = tpu.matmul %279, %281, %cst_256 {dimension_numbers = #tpu.dot_dimension_numbers<[1], [0], [0], [1], [0, 0, 1, 1], [], []>} : vector<32x128xbf16>, vector<128x128xbf16>, vector<32x128xf32> -> vector<32x128xf32>
    %283 = arith.addf %275, %282 : vector<32x128xf32>
    %c1_i32_257 = arith.constant 1 : i32
    %284 = arith.addi %258, %c1_i32_257 : i32
    %c0_258 = arith.constant 0 : index
    %285 = arith.index_cast %284 : i32 to index
    %c0_259 = arith.constant 0 : index
    %c0_260 = arith.constant 0 : index
    %286 = vector.load %arg3[%c0_258, %285, %c0_259, %c0_260] : memref<1x34x34x128xbf16, #tpu.memory_space<vmem>>, vector<1x1x32x128xbf16>
    %287 = vector.shape_cast %286 : vector<1x1x32x128xbf16> to vector<32x128xbf16>
    %c3_261 = arith.constant 3 : index
    %c0_262 = arith.constant 0 : index
    %c0_263 = arith.constant 0 : index
    %288 = vector.load %arg4[%c3_261, %c0_262, %c0_263] : memref<9x128x128xbf16, #tpu.memory_space<vmem>>, vector<1x128x128xbf16>
    %289 = vector.shape_cast %288 : vector<1x128x128xbf16> to vector<128x128xbf16>
    %cst_264 = arith.constant dense<0.000000e+00> : vector<32x128xf32>
    %290 = tpu.matmul %287, %289, %cst_264 {dimension_numbers = #tpu.dot_dimension_numbers<[1], [0], [0], [1], [0, 0, 1, 1], [], []>} : vector<32x128xbf16>, vector<128x128xbf16>, vector<32x128xf32> -> vector<32x128xf32>
    %291 = arith.addf %283, %290 : vector<32x128xf32>
    %c1_i32_265 = arith.constant 1 : i32
    %292 = arith.addi %258, %c1_i32_265 : i32
    %c0_266 = arith.constant 0 : index
    %293 = arith.index_cast %292 : i32 to index
    %c1_267 = arith.constant 1 : index
    %c0_268 = arith.constant 0 : index
    %294 = vector.load %arg3[%c0_266, %293, %c1_267, %c0_268] : memref<1x34x34x128xbf16, #tpu.memory_space<vmem>>, vector<1x1x32x128xbf16>
    %295 = vector.shape_cast %294 : vector<1x1x32x128xbf16> to vector<32x128xbf16>
    %c4_269 = arith.constant 4 : index
    %c0_270 = arith.constant 0 : index
    %c0_271 = arith.constant 0 : index
    %296 = vector.load %arg4[%c4_269, %c0_270, %c0_271] : memref<9x128x128xbf16, #tpu.memory_space<vmem>>, vector<1x128x128xbf16>
    %297 = vector.shape_cast %296 : vector<1x128x128xbf16> to vector<128x128xbf16>
    %cst_272 = arith.constant dense<0.000000e+00> : vector<32x128xf32>
    %298 = tpu.matmul %295, %297, %cst_272 {dimension_numbers = #tpu.dot_dimension_numbers<[1], [0], [0], [1], [0, 0, 1, 1], [], []>} : vector<32x128xbf16>, vector<128x128xbf16>, vector<32x128xf32> -> vector<32x128xf32>
    %299 = arith.addf %291, %298 : vector<32x128xf32>
    %c1_i32_273 = arith.constant 1 : i32
    %300 = arith.addi %258, %c1_i32_273 : i32
    %c0_274 = arith.constant 0 : index
    %301 = arith.index_cast %300 : i32 to index
    %c2_275 = arith.constant 2 : index
    %c0_276 = arith.constant 0 : index
    %302 = vector.load %arg3[%c0_274, %301, %c2_275, %c0_276] : memref<1x34x34x128xbf16, #tpu.memory_space<vmem>>, vector<1x1x32x128xbf16>
    %303 = vector.shape_cast %302 : vector<1x1x32x128xbf16> to vector<32x128xbf16>
    %c5_277 = arith.constant 5 : index
    %c0_278 = arith.constant 0 : index
    %c0_279 = arith.constant 0 : index
    %304 = vector.load %arg4[%c5_277, %c0_278, %c0_279] : memref<9x128x128xbf16, #tpu.memory_space<vmem>>, vector<1x128x128xbf16>
    %305 = vector.shape_cast %304 : vector<1x128x128xbf16> to vector<128x128xbf16>
    %cst_280 = arith.constant dense<0.000000e+00> : vector<32x128xf32>
    %306 = tpu.matmul %303, %305, %cst_280 {dimension_numbers = #tpu.dot_dimension_numbers<[1], [0], [0], [1], [0, 0, 1, 1], [], []>} : vector<32x128xbf16>, vector<128x128xbf16>, vector<32x128xf32> -> vector<32x128xf32>
    %307 = arith.addf %299, %306 : vector<32x128xf32>
    %c2_i32_281 = arith.constant 2 : i32
    %308 = arith.addi %258, %c2_i32_281 : i32
    %c0_282 = arith.constant 0 : index
    %309 = arith.index_cast %308 : i32 to index
    %c0_283 = arith.constant 0 : index
    %c0_284 = arith.constant 0 : index
    %310 = vector.load %arg3[%c0_282, %309, %c0_283, %c0_284] : memref<1x34x34x128xbf16, #tpu.memory_space<vmem>>, vector<1x1x32x128xbf16>
    %311 = vector.shape_cast %310 : vector<1x1x32x128xbf16> to vector<32x128xbf16>
    %c6_285 = arith.constant 6 : index
    %c0_286 = arith.constant 0 : index
    %c0_287 = arith.constant 0 : index
    %312 = vector.load %arg4[%c6_285, %c0_286, %c0_287] : memref<9x128x128xbf16, #tpu.memory_space<vmem>>, vector<1x128x128xbf16>
    %313 = vector.shape_cast %312 : vector<1x128x128xbf16> to vector<128x128xbf16>
    %cst_288 = arith.constant dense<0.000000e+00> : vector<32x128xf32>
    %314 = tpu.matmul %311, %313, %cst_288 {dimension_numbers = #tpu.dot_dimension_numbers<[1], [0], [0], [1], [0, 0, 1, 1], [], []>} : vector<32x128xbf16>, vector<128x128xbf16>, vector<32x128xf32> -> vector<32x128xf32>
    %315 = arith.addf %307, %314 : vector<32x128xf32>
    %c2_i32_289 = arith.constant 2 : i32
    %316 = arith.addi %258, %c2_i32_289 : i32
    %c0_290 = arith.constant 0 : index
    %317 = arith.index_cast %316 : i32 to index
    %c1_291 = arith.constant 1 : index
    %c0_292 = arith.constant 0 : index
    %318 = vector.load %arg3[%c0_290, %317, %c1_291, %c0_292] : memref<1x34x34x128xbf16, #tpu.memory_space<vmem>>, vector<1x1x32x128xbf16>
    %319 = vector.shape_cast %318 : vector<1x1x32x128xbf16> to vector<32x128xbf16>
    %c7_293 = arith.constant 7 : index
    %c0_294 = arith.constant 0 : index
    %c0_295 = arith.constant 0 : index
    %320 = vector.load %arg4[%c7_293, %c0_294, %c0_295] : memref<9x128x128xbf16, #tpu.memory_space<vmem>>, vector<1x128x128xbf16>
    %321 = vector.shape_cast %320 : vector<1x128x128xbf16> to vector<128x128xbf16>
    %cst_296 = arith.constant dense<0.000000e+00> : vector<32x128xf32>
    %322 = tpu.matmul %319, %321, %cst_296 {dimension_numbers = #tpu.dot_dimension_numbers<[1], [0], [0], [1], [0, 0, 1, 1], [], []>} : vector<32x128xbf16>, vector<128x128xbf16>, vector<32x128xf32> -> vector<32x128xf32>
    %323 = arith.addf %315, %322 : vector<32x128xf32>
    %c2_i32_297 = arith.constant 2 : i32
    %324 = arith.addi %258, %c2_i32_297 : i32
    %c0_298 = arith.constant 0 : index
    %325 = arith.index_cast %324 : i32 to index
    %c2_299 = arith.constant 2 : index
    %c0_300 = arith.constant 0 : index
    %326 = vector.load %arg3[%c0_298, %325, %c2_299, %c0_300] : memref<1x34x34x128xbf16, #tpu.memory_space<vmem>>, vector<1x1x32x128xbf16>
    %327 = vector.shape_cast %326 : vector<1x1x32x128xbf16> to vector<32x128xbf16>
    %c8_301 = arith.constant 8 : index
    %c0_302 = arith.constant 0 : index
    %c0_303 = arith.constant 0 : index
    %328 = vector.load %arg4[%c8_301, %c0_302, %c0_303] : memref<9x128x128xbf16, #tpu.memory_space<vmem>>, vector<1x128x128xbf16>
    %329 = vector.shape_cast %328 : vector<1x128x128xbf16> to vector<128x128xbf16>
    %cst_304 = arith.constant dense<0.000000e+00> : vector<32x128xf32>
    %330 = tpu.matmul %327, %329, %cst_304 {dimension_numbers = #tpu.dot_dimension_numbers<[1], [0], [0], [1], [0, 0, 1, 1], [], []>} : vector<32x128xbf16>, vector<128x128xbf16>, vector<32x128xf32> -> vector<32x128xf32>
    %331 = arith.addf %323, %330 : vector<32x128xf32>
    %332 = vector.broadcast %3 : vector<1x128xf32> to vector<32x128xf32>
    %333 = arith.addf %331, %332 : vector<32x128xf32>
    %cst_305 = arith.constant dense<0.000000e+00> : vector<128xf32>
    %334 = vector.multi_reduction <add>, %333, %cst_305 [0] : vector<32x128xf32> to vector<128xf32>
    %335 = vector.shape_cast %334 : vector<128xf32> to vector<1x128xf32>
    %336 = arith.addf %252, %335 : vector<1x128xf32>
    %337 = arith.truncf %333 : vector<32x128xf32> to vector<32x128xbf16>
    %c0_306 = arith.constant 0 : index
    %c3_307 = arith.constant 3 : index
    %c0_308 = arith.constant 0 : index
    %c0_309 = arith.constant 0 : index
    %338 = vector.load %arg6[%c0_306, %c3_307, %c0_308, %c0_309] : memref<1x8x32x128xbf16, #tpu.memory_space<vmem>>, vector<1x1x32x128xbf16>
    %339 = vector.shape_cast %338 : vector<1x1x32x128xbf16> to vector<32x128xbf16>
    %340 = vector.shape_cast %337 : vector<32x128xbf16> to vector<1x1x32x128xbf16>
    tpu.vector_store %arg6[%c0_306, %c3_307, %c0_308, %c0_309], %340 {strides = array<i32>} : memref<1x8x32x128xbf16, #tpu.memory_space<vmem>>, vector<1x1x32x128xbf16>,
    %c8_i32_310 = arith.constant 8 : i32
    %341 = arith.muli %arg2, %c8_i32_310 : i32
    %c4_i32 = arith.constant 4 : i32
    %342 = arith.addi %341, %c4_i32 : i32
    %cst_311 = arith.constant 0.000000e+00 : f32
    %343 = vector.broadcast %cst_311 : f32 to vector<32x128xf32>
    %c0_i32_312 = arith.constant 0 : i32
    %344 = arith.addi %342, %c0_i32_312 : i32
    %c0_313 = arith.constant 0 : index
    %345 = arith.index_cast %344 : i32 to index
    %c0_314 = arith.constant 0 : index
    %c0_315 = arith.constant 0 : index
    %346 = vector.load %arg3[%c0_313, %345, %c0_314, %c0_315] : memref<1x34x34x128xbf16, #tpu.memory_space<vmem>>, vector<1x1x32x128xbf16>
    %347 = vector.shape_cast %346 : vector<1x1x32x128xbf16> to vector<32x128xbf16>
    %c0_316 = arith.constant 0 : index
    %c0_317 = arith.constant 0 : index
    %c0_318 = arith.constant 0 : index
    %348 = vector.load %arg4[%c0_316, %c0_317, %c0_318] : memref<9x128x128xbf16, #tpu.memory_space<vmem>>, vector<1x128x128xbf16>
    %349 = vector.shape_cast %348 : vector<1x128x128xbf16> to vector<128x128xbf16>
    %cst_319 = arith.constant dense<0.000000e+00> : vector<32x128xf32>
    %350 = tpu.matmul %347, %349, %cst_319 {dimension_numbers = #tpu.dot_dimension_numbers<[1], [0], [0], [1], [0, 0, 1, 1], [], []>} : vector<32x128xbf16>, vector<128x128xbf16>, vector<32x128xf32> -> vector<32x128xf32>
    %351 = arith.addf %343, %350 : vector<32x128xf32>
    %c0_i32_320 = arith.constant 0 : i32
    %352 = arith.addi %342, %c0_i32_320 : i32
    %c0_321 = arith.constant 0 : index
    %353 = arith.index_cast %352 : i32 to index
    %c1_322 = arith.constant 1 : index
    %c0_323 = arith.constant 0 : index
    %354 = vector.load %arg3[%c0_321, %353, %c1_322, %c0_323] : memref<1x34x34x128xbf16, #tpu.memory_space<vmem>>, vector<1x1x32x128xbf16>
    %355 = vector.shape_cast %354 : vector<1x1x32x128xbf16> to vector<32x128xbf16>
    %c1_324 = arith.constant 1 : index
    %c0_325 = arith.constant 0 : index
    %c0_326 = arith.constant 0 : index
    %356 = vector.load %arg4[%c1_324, %c0_325, %c0_326] : memref<9x128x128xbf16, #tpu.memory_space<vmem>>, vector<1x128x128xbf16>
    %357 = vector.shape_cast %356 : vector<1x128x128xbf16> to vector<128x128xbf16>
    %cst_327 = arith.constant dense<0.000000e+00> : vector<32x128xf32>
    %358 = tpu.matmul %355, %357, %cst_327 {dimension_numbers = #tpu.dot_dimension_numbers<[1], [0], [0], [1], [0, 0, 1, 1], [], []>} : vector<32x128xbf16>, vector<128x128xbf16>, vector<32x128xf32> -> vector<32x128xf32>
    %359 = arith.addf %351, %358 : vector<32x128xf32>
    %c0_i32_328 = arith.constant 0 : i32
    %360 = arith.addi %342, %c0_i32_328 : i32
    %c0_329 = arith.constant 0 : index
    %361 = arith.index_cast %360 : i32 to index
    %c2_330 = arith.constant 2 : index
    %c0_331 = arith.constant 0 : index
    %362 = vector.load %arg3[%c0_329, %361, %c2_330, %c0_331] : memref<1x34x34x128xbf16, #tpu.memory_space<vmem>>, vector<1x1x32x128xbf16>
    %363 = vector.shape_cast %362 : vector<1x1x32x128xbf16> to vector<32x128xbf16>
    %c2_332 = arith.constant 2 : index
    %c0_333 = arith.constant 0 : index
    %c0_334 = arith.constant 0 : index
    %364 = vector.load %arg4[%c2_332, %c0_333, %c0_334] : memref<9x128x128xbf16, #tpu.memory_space<vmem>>, vector<1x128x128xbf16>
    %365 = vector.shape_cast %364 : vector<1x128x128xbf16> to vector<128x128xbf16>
    %cst_335 = arith.constant dense<0.000000e+00> : vector<32x128xf32>
    %366 = tpu.matmul %363, %365, %cst_335 {dimension_numbers = #tpu.dot_dimension_numbers<[1], [0], [0], [1], [0, 0, 1, 1], [], []>} : vector<32x128xbf16>, vector<128x128xbf16>, vector<32x128xf32> -> vector<32x128xf32>
    %367 = arith.addf %359, %366 : vector<32x128xf32>
    %c1_i32_336 = arith.constant 1 : i32
    %368 = arith.addi %342, %c1_i32_336 : i32
    %c0_337 = arith.constant 0 : index
    %369 = arith.index_cast %368 : i32 to index
    %c0_338 = arith.constant 0 : index
    %c0_339 = arith.constant 0 : index
    %370 = vector.load %arg3[%c0_337, %369, %c0_338, %c0_339] : memref<1x34x34x128xbf16, #tpu.memory_space<vmem>>, vector<1x1x32x128xbf16>
    %371 = vector.shape_cast %370 : vector<1x1x32x128xbf16> to vector<32x128xbf16>
    %c3_340 = arith.constant 3 : index
    %c0_341 = arith.constant 0 : index
    %c0_342 = arith.constant 0 : index
    %372 = vector.load %arg4[%c3_340, %c0_341, %c0_342] : memref<9x128x128xbf16, #tpu.memory_space<vmem>>, vector<1x128x128xbf16>
    %373 = vector.shape_cast %372 : vector<1x128x128xbf16> to vector<128x128xbf16>
    %cst_343 = arith.constant dense<0.000000e+00> : vector<32x128xf32>
    %374 = tpu.matmul %371, %373, %cst_343 {dimension_numbers = #tpu.dot_dimension_numbers<[1], [0], [0], [1], [0, 0, 1, 1], [], []>} : vector<32x128xbf16>, vector<128x128xbf16>, vector<32x128xf32> -> vector<32x128xf32>
    %375 = arith.addf %367, %374 : vector<32x128xf32>
    %c1_i32_344 = arith.constant 1 : i32
    %376 = arith.addi %342, %c1_i32_344 : i32
    %c0_345 = arith.constant 0 : index
    %377 = arith.index_cast %376 : i32 to index
    %c1_346 = arith.constant 1 : index
    %c0_347 = arith.constant 0 : index
    %378 = vector.load %arg3[%c0_345, %377, %c1_346, %c0_347] : memref<1x34x34x128xbf16, #tpu.memory_space<vmem>>, vector<1x1x32x128xbf16>
    %379 = vector.shape_cast %378 : vector<1x1x32x128xbf16> to vector<32x128xbf16>
    %c4_348 = arith.constant 4 : index
    %c0_349 = arith.constant 0 : index
    %c0_350 = arith.constant 0 : index
    %380 = vector.load %arg4[%c4_348, %c0_349, %c0_350] : memref<9x128x128xbf16, #tpu.memory_space<vmem>>, vector<1x128x128xbf16>
    %381 = vector.shape_cast %380 : vector<1x128x128xbf16> to vector<128x128xbf16>
    %cst_351 = arith.constant dense<0.000000e+00> : vector<32x128xf32>
    %382 = tpu.matmul %379, %381, %cst_351 {dimension_numbers = #tpu.dot_dimension_numbers<[1], [0], [0], [1], [0, 0, 1, 1], [], []>} : vector<32x128xbf16>, vector<128x128xbf16>, vector<32x128xf32> -> vector<32x128xf32>
    %383 = arith.addf %375, %382 : vector<32x128xf32>
    %c1_i32_352 = arith.constant 1 : i32
    %384 = arith.addi %342, %c1_i32_352 : i32
    %c0_353 = arith.constant 0 : index
    %385 = arith.index_cast %384 : i32 to index
    %c2_354 = arith.constant 2 : index
    %c0_355 = arith.constant 0 : index
    %386 = vector.load %arg3[%c0_353, %385, %c2_354, %c0_355] : memref<1x34x34x128xbf16, #tpu.memory_space<vmem>>, vector<1x1x32x128xbf16>
    %387 = vector.shape_cast %386 : vector<1x1x32x128xbf16> to vector<32x128xbf16>
    %c5_356 = arith.constant 5 : index
    %c0_357 = arith.constant 0 : index
    %c0_358 = arith.constant 0 : index
    %388 = vector.load %arg4[%c5_356, %c0_357, %c0_358] : memref<9x128x128xbf16, #tpu.memory_space<vmem>>, vector<1x128x128xbf16>
    %389 = vector.shape_cast %388 : vector<1x128x128xbf16> to vector<128x128xbf16>
    %cst_359 = arith.constant dense<0.000000e+00> : vector<32x128xf32>
    %390 = tpu.matmul %387, %389, %cst_359 {dimension_numbers = #tpu.dot_dimension_numbers<[1], [0], [0], [1], [0, 0, 1, 1], [], []>} : vector<32x128xbf16>, vector<128x128xbf16>, vector<32x128xf32> -> vector<32x128xf32>
    %391 = arith.addf %383, %390 : vector<32x128xf32>
    %c2_i32_360 = arith.constant 2 : i32
    %392 = arith.addi %342, %c2_i32_360 : i32
    %c0_361 = arith.constant 0 : index
    %393 = arith.index_cast %392 : i32 to index
    %c0_362 = arith.constant 0 : index
    %c0_363 = arith.constant 0 : index
    %394 = vector.load %arg3[%c0_361, %393, %c0_362, %c0_363] : memref<1x34x34x128xbf16, #tpu.memory_space<vmem>>, vector<1x1x32x128xbf16>
    %395 = vector.shape_cast %394 : vector<1x1x32x128xbf16> to vector<32x128xbf16>
    %c6_364 = arith.constant 6 : index
    %c0_365 = arith.constant 0 : index
    %c0_366 = arith.constant 0 : index
    %396 = vector.load %arg4[%c6_364, %c0_365, %c0_366] : memref<9x128x128xbf16, #tpu.memory_space<vmem>>, vector<1x128x128xbf16>
    %397 = vector.shape_cast %396 : vector<1x128x128xbf16> to vector<128x128xbf16>
    %cst_367 = arith.constant dense<0.000000e+00> : vector<32x128xf32>
    %398 = tpu.matmul %395, %397, %cst_367 {dimension_numbers = #tpu.dot_dimension_numbers<[1], [0], [0], [1], [0, 0, 1, 1], [], []>} : vector<32x128xbf16>, vector<128x128xbf16>, vector<32x128xf32> -> vector<32x128xf32>
    %399 = arith.addf %391, %398 : vector<32x128xf32>
    %c2_i32_368 = arith.constant 2 : i32
    %400 = arith.addi %342, %c2_i32_368 : i32
    %c0_369 = arith.constant 0 : index
    %401 = arith.index_cast %400 : i32 to index
    %c1_370 = arith.constant 1 : index
    %c0_371 = arith.constant 0 : index
    %402 = vector.load %arg3[%c0_369, %401, %c1_370, %c0_371] : memref<1x34x34x128xbf16, #tpu.memory_space<vmem>>, vector<1x1x32x128xbf16>
    %403 = vector.shape_cast %402 : vector<1x1x32x128xbf16> to vector<32x128xbf16>
    %c7_372 = arith.constant 7 : index
    %c0_373 = arith.constant 0 : index
    %c0_374 = arith.constant 0 : index
    %404 = vector.load %arg4[%c7_372, %c0_373, %c0_374] : memref<9x128x128xbf16, #tpu.memory_space<vmem>>, vector<1x128x128xbf16>
    %405 = vector.shape_cast %404 : vector<1x128x128xbf16> to vector<128x128xbf16>
    %cst_375 = arith.constant dense<0.000000e+00> : vector<32x128xf32>
    %406 = tpu.matmul %403, %405, %cst_375 {dimension_numbers = #tpu.dot_dimension_numbers<[1], [0], [0], [1], [0, 0, 1, 1], [], []>} : vector<32x128xbf16>, vector<128x128xbf16>, vector<32x128xf32> -> vector<32x128xf32>
    %407 = arith.addf %399, %406 : vector<32x128xf32>
    %c2_i32_376 = arith.constant 2 : i32
    %408 = arith.addi %342, %c2_i32_376 : i32
    %c0_377 = arith.constant 0 : index
    %409 = arith.index_cast %408 : i32 to index
    %c2_378 = arith.constant 2 : index
    %c0_379 = arith.constant 0 : index
    %410 = vector.load %arg3[%c0_377, %409, %c2_378, %c0_379] : memref<1x34x34x128xbf16, #tpu.memory_space<vmem>>, vector<1x1x32x128xbf16>
    %411 = vector.shape_cast %410 : vector<1x1x32x128xbf16> to vector<32x128xbf16>
    %c8_380 = arith.constant 8 : index
    %c0_381 = arith.constant 0 : index
    %c0_382 = arith.constant 0 : index
    %412 = vector.load %arg4[%c8_380, %c0_381, %c0_382] : memref<9x128x128xbf16, #tpu.memory_space<vmem>>, vector<1x128x128xbf16>
    %413 = vector.shape_cast %412 : vector<1x128x128xbf16> to vector<128x128xbf16>
    %cst_383 = arith.constant dense<0.000000e+00> : vector<32x128xf32>
    %414 = tpu.matmul %411, %413, %cst_383 {dimension_numbers = #tpu.dot_dimension_numbers<[1], [0], [0], [1], [0, 0, 1, 1], [], []>} : vector<32x128xbf16>, vector<128x128xbf16>, vector<32x128xf32> -> vector<32x128xf32>
    %415 = arith.addf %407, %414 : vector<32x128xf32>
    %416 = vector.broadcast %3 : vector<1x128xf32> to vector<32x128xf32>
    %417 = arith.addf %415, %416 : vector<32x128xf32>
    %cst_384 = arith.constant dense<0.000000e+00> : vector<128xf32>
    %418 = vector.multi_reduction <add>, %417, %cst_384 [0] : vector<32x128xf32> to vector<128xf32>
    %419 = vector.shape_cast %418 : vector<128xf32> to vector<1x128xf32>
    %420 = arith.addf %336, %419 : vector<1x128xf32>
    %421 = arith.truncf %417 : vector<32x128xf32> to vector<32x128xbf16>
    %c0_385 = arith.constant 0 : index
    %c4_386 = arith.constant 4 : index
    %c0_387 = arith.constant 0 : index
    %c0_388 = arith.constant 0 : index
    %422 = vector.load %arg6[%c0_385, %c4_386, %c0_387, %c0_388] : memref<1x8x32x128xbf16, #tpu.memory_space<vmem>>, vector<1x1x32x128xbf16>
    %423 = vector.shape_cast %422 : vector<1x1x32x128xbf16> to vector<32x128xbf16>
    %424 = vector.shape_cast %421 : vector<32x128xbf16> to vector<1x1x32x128xbf16>
    tpu.vector_store %arg6[%c0_385, %c4_386, %c0_387, %c0_388], %424 {strides = array<i32>} : memref<1x8x32x128xbf16, #tpu.memory_space<vmem>>, vector<1x1x32x128xbf16>,
    %c8_i32_389 = arith.constant 8 : i32
    %425 = arith.muli %arg2, %c8_i32_389 : i32
    %c5_i32 = arith.constant 5 : i32
    %426 = arith.addi %425, %c5_i32 : i32
    %cst_390 = arith.constant 0.000000e+00 : f32
    %427 = vector.broadcast %cst_390 : f32 to vector<32x128xf32>
    %c0_i32_391 = arith.constant 0 : i32
    %428 = arith.addi %426, %c0_i32_391 : i32
    %c0_392 = arith.constant 0 : index
    %429 = arith.index_cast %428 : i32 to index
    %c0_393 = arith.constant 0 : index
    %c0_394 = arith.constant 0 : index
    %430 = vector.load %arg3[%c0_392, %429, %c0_393, %c0_394] : memref<1x34x34x128xbf16, #tpu.memory_space<vmem>>, vector<1x1x32x128xbf16>
    %431 = vector.shape_cast %430 : vector<1x1x32x128xbf16> to vector<32x128xbf16>
    %c0_395 = arith.constant 0 : index
    %c0_396 = arith.constant 0 : index
    %c0_397 = arith.constant 0 : index
    %432 = vector.load %arg4[%c0_395, %c0_396, %c0_397] : memref<9x128x128xbf16, #tpu.memory_space<vmem>>, vector<1x128x128xbf16>
    %433 = vector.shape_cast %432 : vector<1x128x128xbf16> to vector<128x128xbf16>
    %cst_398 = arith.constant dense<0.000000e+00> : vector<32x128xf32>
    %434 = tpu.matmul %431, %433, %cst_398 {dimension_numbers = #tpu.dot_dimension_numbers<[1], [0], [0], [1], [0, 0, 1, 1], [], []>} : vector<32x128xbf16>, vector<128x128xbf16>, vector<32x128xf32> -> vector<32x128xf32>
    %435 = arith.addf %427, %434 : vector<32x128xf32>
    %c0_i32_399 = arith.constant 0 : i32
    %436 = arith.addi %426, %c0_i32_399 : i32
    %c0_400 = arith.constant 0 : index
    %437 = arith.index_cast %436 : i32 to index
    %c1_401 = arith.constant 1 : index
    %c0_402 = arith.constant 0 : index
    %438 = vector.load %arg3[%c0_400, %437, %c1_401, %c0_402] : memref<1x34x34x128xbf16, #tpu.memory_space<vmem>>, vector<1x1x32x128xbf16>
    %439 = vector.shape_cast %438 : vector<1x1x32x128xbf16> to vector<32x128xbf16>
    %c1_403 = arith.constant 1 : index
    %c0_404 = arith.constant 0 : index
    %c0_405 = arith.constant 0 : index
    %440 = vector.load %arg4[%c1_403, %c0_404, %c0_405] : memref<9x128x128xbf16, #tpu.memory_space<vmem>>, vector<1x128x128xbf16>
    %441 = vector.shape_cast %440 : vector<1x128x128xbf16> to vector<128x128xbf16>
    %cst_406 = arith.constant dense<0.000000e+00> : vector<32x128xf32>
    %442 = tpu.matmul %439, %441, %cst_406 {dimension_numbers = #tpu.dot_dimension_numbers<[1], [0], [0], [1], [0, 0, 1, 1], [], []>} : vector<32x128xbf16>, vector<128x128xbf16>, vector<32x128xf32> -> vector<32x128xf32>
    %443 = arith.addf %435, %442 : vector<32x128xf32>
    %c0_i32_407 = arith.constant 0 : i32
    %444 = arith.addi %426, %c0_i32_407 : i32
    %c0_408 = arith.constant 0 : index
    %445 = arith.index_cast %444 : i32 to index
    %c2_409 = arith.constant 2 : index
    %c0_410 = arith.constant 0 : index
    %446 = vector.load %arg3[%c0_408, %445, %c2_409, %c0_410] : memref<1x34x34x128xbf16, #tpu.memory_space<vmem>>, vector<1x1x32x128xbf16>
    %447 = vector.shape_cast %446 : vector<1x1x32x128xbf16> to vector<32x128xbf16>
    %c2_411 = arith.constant 2 : index
    %c0_412 = arith.constant 0 : index
    %c0_413 = arith.constant 0 : index
    %448 = vector.load %arg4[%c2_411, %c0_412, %c0_413] : memref<9x128x128xbf16, #tpu.memory_space<vmem>>, vector<1x128x128xbf16>
    %449 = vector.shape_cast %448 : vector<1x128x128xbf16> to vector<128x128xbf16>
    %cst_414 = arith.constant dense<0.000000e+00> : vector<32x128xf32>
    %450 = tpu.matmul %447, %449, %cst_414 {dimension_numbers = #tpu.dot_dimension_numbers<[1], [0], [0], [1], [0, 0, 1, 1], [], []>} : vector<32x128xbf16>, vector<128x128xbf16>, vector<32x128xf32> -> vector<32x128xf32>
    %451 = arith.addf %443, %450 : vector<32x128xf32>
    %c1_i32_415 = arith.constant 1 : i32
    %452 = arith.addi %426, %c1_i32_415 : i32
    %c0_416 = arith.constant 0 : index
    %453 = arith.index_cast %452 : i32 to index
    %c0_417 = arith.constant 0 : index
    %c0_418 = arith.constant 0 : index
    %454 = vector.load %arg3[%c0_416, %453, %c0_417, %c0_418] : memref<1x34x34x128xbf16, #tpu.memory_space<vmem>>, vector<1x1x32x128xbf16>
    %455 = vector.shape_cast %454 : vector<1x1x32x128xbf16> to vector<32x128xbf16>
    %c3_419 = arith.constant 3 : index
    %c0_420 = arith.constant 0 : index
    %c0_421 = arith.constant 0 : index
    %456 = vector.load %arg4[%c3_419, %c0_420, %c0_421] : memref<9x128x128xbf16, #tpu.memory_space<vmem>>, vector<1x128x128xbf16>
    %457 = vector.shape_cast %456 : vector<1x128x128xbf16> to vector<128x128xbf16>
    %cst_422 = arith.constant dense<0.000000e+00> : vector<32x128xf32>
    %458 = tpu.matmul %455, %457, %cst_422 {dimension_numbers = #tpu.dot_dimension_numbers<[1], [0], [0], [1], [0, 0, 1, 1], [], []>} : vector<32x128xbf16>, vector<128x128xbf16>, vector<32x128xf32> -> vector<32x128xf32>
    %459 = arith.addf %451, %458 : vector<32x128xf32>
    %c1_i32_423 = arith.constant 1 : i32
    %460 = arith.addi %426, %c1_i32_423 : i32
    %c0_424 = arith.constant 0 : index
    %461 = arith.index_cast %460 : i32 to index
    %c1_425 = arith.constant 1 : index
    %c0_426 = arith.constant 0 : index
    %462 = vector.load %arg3[%c0_424, %461, %c1_425, %c0_426] : memref<1x34x34x128xbf16, #tpu.memory_space<vmem>>, vector<1x1x32x128xbf16>
    %463 = vector.shape_cast %462 : vector<1x1x32x128xbf16> to vector<32x128xbf16>
    %c4_427 = arith.constant 4 : index
    %c0_428 = arith.constant 0 : index
    %c0_429 = arith.constant 0 : index
    %464 = vector.load %arg4[%c4_427, %c0_428, %c0_429] : memref<9x128x128xbf16, #tpu.memory_space<vmem>>, vector<1x128x128xbf16>
    %465 = vector.shape_cast %464 : vector<1x128x128xbf16> to vector<128x128xbf16>
    %cst_430 = arith.constant dense<0.000000e+00> : vector<32x128xf32>
    %466 = tpu.matmul %463, %465, %cst_430 {dimension_numbers = #tpu.dot_dimension_numbers<[1], [0], [0], [1], [0, 0, 1, 1], [], []>} : vector<32x128xbf16>, vector<128x128xbf16>, vector<32x128xf32> -> vector<32x128xf32>
    %467 = arith.addf %459, %466 : vector<32x128xf32>
    %c1_i32_431 = arith.constant 1 : i32
    %468 = arith.addi %426, %c1_i32_431 : i32
    %c0_432 = arith.constant 0 : index
    %469 = arith.index_cast %468 : i32 to index
    %c2_433 = arith.constant 2 : index
    %c0_434 = arith.constant 0 : index
    %470 = vector.load %arg3[%c0_432, %469, %c2_433, %c0_434] : memref<1x34x34x128xbf16, #tpu.memory_space<vmem>>, vector<1x1x32x128xbf16>
    %471 = vector.shape_cast %470 : vector<1x1x32x128xbf16> to vector<32x128xbf16>
    %c5_435 = arith.constant 5 : index
    %c0_436 = arith.constant 0 : index
    %c0_437 = arith.constant 0 : index
    %472 = vector.load %arg4[%c5_435, %c0_436, %c0_437] : memref<9x128x128xbf16, #tpu.memory_space<vmem>>, vector<1x128x128xbf16>
    %473 = vector.shape_cast %472 : vector<1x128x128xbf16> to vector<128x128xbf16>
    %cst_438 = arith.constant dense<0.000000e+00> : vector<32x128xf32>
    %474 = tpu.matmul %471, %473, %cst_438 {dimension_numbers = #tpu.dot_dimension_numbers<[1], [0], [0], [1], [0, 0, 1, 1], [], []>} : vector<32x128xbf16>, vector<128x128xbf16>, vector<32x128xf32> -> vector<32x128xf32>
    %475 = arith.addf %467, %474 : vector<32x128xf32>
    %c2_i32_439 = arith.constant 2 : i32
    %476 = arith.addi %426, %c2_i32_439 : i32
    %c0_440 = arith.constant 0 : index
    %477 = arith.index_cast %476 : i32 to index
    %c0_441 = arith.constant 0 : index
    %c0_442 = arith.constant 0 : index
    %478 = vector.load %arg3[%c0_440, %477, %c0_441, %c0_442] : memref<1x34x34x128xbf16, #tpu.memory_space<vmem>>, vector<1x1x32x128xbf16>
    %479 = vector.shape_cast %478 : vector<1x1x32x128xbf16> to vector<32x128xbf16>
    %c6_443 = arith.constant 6 : index
    %c0_444 = arith.constant 0 : index
    %c0_445 = arith.constant 0 : index
    %480 = vector.load %arg4[%c6_443, %c0_444, %c0_445] : memref<9x128x128xbf16, #tpu.memory_space<vmem>>, vector<1x128x128xbf16>
    %481 = vector.shape_cast %480 : vector<1x128x128xbf16> to vector<128x128xbf16>
    %cst_446 = arith.constant dense<0.000000e+00> : vector<32x128xf32>
    %482 = tpu.matmul %479, %481, %cst_446 {dimension_numbers = #tpu.dot_dimension_numbers<[1], [0], [0], [1], [0, 0, 1, 1], [], []>} : vector<32x128xbf16>, vector<128x128xbf16>, vector<32x128xf32> -> vector<32x128xf32>
    %483 = arith.addf %475, %482 : vector<32x128xf32>
    %c2_i32_447 = arith.constant 2 : i32
    %484 = arith.addi %426, %c2_i32_447 : i32
    %c0_448 = arith.constant 0 : index
    %485 = arith.index_cast %484 : i32 to index
    %c1_449 = arith.constant 1 : index
    %c0_450 = arith.constant 0 : index
    %486 = vector.load %arg3[%c0_448, %485, %c1_449, %c0_450] : memref<1x34x34x128xbf16, #tpu.memory_space<vmem>>, vector<1x1x32x128xbf16>
    %487 = vector.shape_cast %486 : vector<1x1x32x128xbf16> to vector<32x128xbf16>
    %c7_451 = arith.constant 7 : index
    %c0_452 = arith.constant 0 : index
    %c0_453 = arith.constant 0 : index
    %488 = vector.load %arg4[%c7_451, %c0_452, %c0_453] : memref<9x128x128xbf16, #tpu.memory_space<vmem>>, vector<1x128x128xbf16>
    %489 = vector.shape_cast %488 : vector<1x128x128xbf16> to vector<128x128xbf16>
    %cst_454 = arith.constant dense<0.000000e+00> : vector<32x128xf32>
    %490 = tpu.matmul %487, %489, %cst_454 {dimension_numbers = #tpu.dot_dimension_numbers<[1], [0], [0], [1], [0, 0, 1, 1], [], []>} : vector<32x128xbf16>, vector<128x128xbf16>, vector<32x128xf32> -> vector<32x128xf32>
    %491 = arith.addf %483, %490 : vector<32x128xf32>
    %c2_i32_455 = arith.constant 2 : i32
    %492 = arith.addi %426, %c2_i32_455 : i32
    %c0_456 = arith.constant 0 : index
    %493 = arith.index_cast %492 : i32 to index
    %c2_457 = arith.constant 2 : index
    %c0_458 = arith.constant 0 : index
    %494 = vector.load %arg3[%c0_456, %493, %c2_457, %c0_458] : memref<1x34x34x128xbf16, #tpu.memory_space<vmem>>, vector<1x1x32x128xbf16>
    %495 = vector.shape_cast %494 : vector<1x1x32x128xbf16> to vector<32x128xbf16>
    %c8_459 = arith.constant 8 : index
    %c0_460 = arith.constant 0 : index
    %c0_461 = arith.constant 0 : index
    %496 = vector.load %arg4[%c8_459, %c0_460, %c0_461] : memref<9x128x128xbf16, #tpu.memory_space<vmem>>, vector<1x128x128xbf16>
    %497 = vector.shape_cast %496 : vector<1x128x128xbf16> to vector<128x128xbf16>
    %cst_462 = arith.constant dense<0.000000e+00> : vector<32x128xf32>
    %498 = tpu.matmul %495, %497, %cst_462 {dimension_numbers = #tpu.dot_dimension_numbers<[1], [0], [0], [1], [0, 0, 1, 1], [], []>} : vector<32x128xbf16>, vector<128x128xbf16>, vector<32x128xf32> -> vector<32x128xf32>
    %499 = arith.addf %491, %498 : vector<32x128xf32>
    %500 = vector.broadcast %3 : vector<1x128xf32> to vector<32x128xf32>
    %501 = arith.addf %499, %500 : vector<32x128xf32>
    %cst_463 = arith.constant dense<0.000000e+00> : vector<128xf32>
    %502 = vector.multi_reduction <add>, %501, %cst_463 [0] : vector<32x128xf32> to vector<128xf32>
    %503 = vector.shape_cast %502 : vector<128xf32> to vector<1x128xf32>
    %504 = arith.addf %420, %503 : vector<1x128xf32>
    %505 = arith.truncf %501 : vector<32x128xf32> to vector<32x128xbf16>
    %c0_464 = arith.constant 0 : index
    %c5_465 = arith.constant 5 : index
    %c0_466 = arith.constant 0 : index
    %c0_467 = arith.constant 0 : index
    %506 = vector.load %arg6[%c0_464, %c5_465, %c0_466, %c0_467] : memref<1x8x32x128xbf16, #tpu.memory_space<vmem>>, vector<1x1x32x128xbf16>
    %507 = vector.shape_cast %506 : vector<1x1x32x128xbf16> to vector<32x128xbf16>
    %508 = vector.shape_cast %505 : vector<32x128xbf16> to vector<1x1x32x128xbf16>
    tpu.vector_store %arg6[%c0_464, %c5_465, %c0_466, %c0_467], %508 {strides = array<i32>} : memref<1x8x32x128xbf16, #tpu.memory_space<vmem>>, vector<1x1x32x128xbf16>,
    %c8_i32_468 = arith.constant 8 : i32
    %509 = arith.muli %arg2, %c8_i32_468 : i32
    %c6_i32 = arith.constant 6 : i32
    %510 = arith.addi %509, %c6_i32 : i32
    %cst_469 = arith.constant 0.000000e+00 : f32
    %511 = vector.broadcast %cst_469 : f32 to vector<32x128xf32>
    %c0_i32_470 = arith.constant 0 : i32
    %512 = arith.addi %510, %c0_i32_470 : i32
    %c0_471 = arith.constant 0 : index
    %513 = arith.index_cast %512 : i32 to index
    %c0_472 = arith.constant 0 : index
    %c0_473 = arith.constant 0 : index
    %514 = vector.load %arg3[%c0_471, %513, %c0_472, %c0_473] : memref<1x34x34x128xbf16, #tpu.memory_space<vmem>>, vector<1x1x32x128xbf16>
    %515 = vector.shape_cast %514 : vector<1x1x32x128xbf16> to vector<32x128xbf16>
    %c0_474 = arith.constant 0 : index
    %c0_475 = arith.constant 0 : index
    %c0_476 = arith.constant 0 : index
    %516 = vector.load %arg4[%c0_474, %c0_475, %c0_476] : memref<9x128x128xbf16, #tpu.memory_space<vmem>>, vector<1x128x128xbf16>
    %517 = vector.shape_cast %516 : vector<1x128x128xbf16> to vector<128x128xbf16>
    %cst_477 = arith.constant dense<0.000000e+00> : vector<32x128xf32>
    %518 = tpu.matmul %515, %517, %cst_477 {dimension_numbers = #tpu.dot_dimension_numbers<[1], [0], [0], [1], [0, 0, 1, 1], [], []>} : vector<32x128xbf16>, vector<128x128xbf16>, vector<32x128xf32> -> vector<32x128xf32>
    %519 = arith.addf %511, %518 : vector<32x128xf32>
    %c0_i32_478 = arith.constant 0 : i32
    %520 = arith.addi %510, %c0_i32_478 : i32
    %c0_479 = arith.constant 0 : index
    %521 = arith.index_cast %520 : i32 to index
    %c1_480 = arith.constant 1 : index
    %c0_481 = arith.constant 0 : index
    %522 = vector.load %arg3[%c0_479, %521, %c1_480, %c0_481] : memref<1x34x34x128xbf16, #tpu.memory_space<vmem>>, vector<1x1x32x128xbf16>
    %523 = vector.shape_cast %522 : vector<1x1x32x128xbf16> to vector<32x128xbf16>
    %c1_482 = arith.constant 1 : index
    %c0_483 = arith.constant 0 : index
    %c0_484 = arith.constant 0 : index
    %524 = vector.load %arg4[%c1_482, %c0_483, %c0_484] : memref<9x128x128xbf16, #tpu.memory_space<vmem>>, vector<1x128x128xbf16>
    %525 = vector.shape_cast %524 : vector<1x128x128xbf16> to vector<128x128xbf16>
    %cst_485 = arith.constant dense<0.000000e+00> : vector<32x128xf32>
    %526 = tpu.matmul %523, %525, %cst_485 {dimension_numbers = #tpu.dot_dimension_numbers<[1], [0], [0], [1], [0, 0, 1, 1], [], []>} : vector<32x128xbf16>, vector<128x128xbf16>, vector<32x128xf32> -> vector<32x128xf32>
    %527 = arith.addf %519, %526 : vector<32x128xf32>
    %c0_i32_486 = arith.constant 0 : i32
    %528 = arith.addi %510, %c0_i32_486 : i32
    %c0_487 = arith.constant 0 : index
    %529 = arith.index_cast %528 : i32 to index
    %c2_488 = arith.constant 2 : index
    %c0_489 = arith.constant 0 : index
    %530 = vector.load %arg3[%c0_487, %529, %c2_488, %c0_489] : memref<1x34x34x128xbf16, #tpu.memory_space<vmem>>, vector<1x1x32x128xbf16>
    %531 = vector.shape_cast %530 : vector<1x1x32x128xbf16> to vector<32x128xbf16>
    %c2_490 = arith.constant 2 : index
    %c0_491 = arith.constant 0 : index
    %c0_492 = arith.constant 0 : index
    %532 = vector.load %arg4[%c2_490, %c0_491, %c0_492] : memref<9x128x128xbf16, #tpu.memory_space<vmem>>, vector<1x128x128xbf16>
    %533 = vector.shape_cast %532 : vector<1x128x128xbf16> to vector<128x128xbf16>
    %cst_493 = arith.constant dense<0.000000e+00> : vector<32x128xf32>
    %534 = tpu.matmul %531, %533, %cst_493 {dimension_numbers = #tpu.dot_dimension_numbers<[1], [0], [0], [1], [0, 0, 1, 1], [], []>} : vector<32x128xbf16>, vector<128x128xbf16>, vector<32x128xf32> -> vector<32x128xf32>
    %535 = arith.addf %527, %534 : vector<32x128xf32>
    %c1_i32_494 = arith.constant 1 : i32
    %536 = arith.addi %510, %c1_i32_494 : i32
    %c0_495 = arith.constant 0 : index
    %537 = arith.index_cast %536 : i32 to index
    %c0_496 = arith.constant 0 : index
    %c0_497 = arith.constant 0 : index
    %538 = vector.load %arg3[%c0_495, %537, %c0_496, %c0_497] : memref<1x34x34x128xbf16, #tpu.memory_space<vmem>>, vector<1x1x32x128xbf16>
    %539 = vector.shape_cast %538 : vector<1x1x32x128xbf16> to vector<32x128xbf16>
    %c3_498 = arith.constant 3 : index
    %c0_499 = arith.constant 0 : index
    %c0_500 = arith.constant 0 : index
    %540 = vector.load %arg4[%c3_498, %c0_499, %c0_500] : memref<9x128x128xbf16, #tpu.memory_space<vmem>>, vector<1x128x128xbf16>
    %541 = vector.shape_cast %540 : vector<1x128x128xbf16> to vector<128x128xbf16>
    %cst_501 = arith.constant dense<0.000000e+00> : vector<32x128xf32>
    %542 = tpu.matmul %539, %541, %cst_501 {dimension_numbers = #tpu.dot_dimension_numbers<[1], [0], [0], [1], [0, 0, 1, 1], [], []>} : vector<32x128xbf16>, vector<128x128xbf16>, vector<32x128xf32> -> vector<32x128xf32>
    %543 = arith.addf %535, %542 : vector<32x128xf32>
    %c1_i32_502 = arith.constant 1 : i32
    %544 = arith.addi %510, %c1_i32_502 : i32
    %c0_503 = arith.constant 0 : index
    %545 = arith.index_cast %544 : i32 to index
    %c1_504 = arith.constant 1 : index
    %c0_505 = arith.constant 0 : index
    %546 = vector.load %arg3[%c0_503, %545, %c1_504, %c0_505] : memref<1x34x34x128xbf16, #tpu.memory_space<vmem>>, vector<1x1x32x128xbf16>
    %547 = vector.shape_cast %546 : vector<1x1x32x128xbf16> to vector<32x128xbf16>
    %c4_506 = arith.constant 4 : index
    %c0_507 = arith.constant 0 : index
    %c0_508 = arith.constant 0 : index
    %548 = vector.load %arg4[%c4_506, %c0_507, %c0_508] : memref<9x128x128xbf16, #tpu.memory_space<vmem>>, vector<1x128x128xbf16>
    %549 = vector.shape_cast %548 : vector<1x128x128xbf16> to vector<128x128xbf16>
    %cst_509 = arith.constant dense<0.000000e+00> : vector<32x128xf32>
    %550 = tpu.matmul %547, %549, %cst_509 {dimension_numbers = #tpu.dot_dimension_numbers<[1], [0], [0], [1], [0, 0, 1, 1], [], []>} : vector<32x128xbf16>, vector<128x128xbf16>, vector<32x128xf32> -> vector<32x128xf32>
    %551 = arith.addf %543, %550 : vector<32x128xf32>
    %c1_i32_510 = arith.constant 1 : i32
    %552 = arith.addi %510, %c1_i32_510 : i32
    %c0_511 = arith.constant 0 : index
    %553 = arith.index_cast %552 : i32 to index
    %c2_512 = arith.constant 2 : index
    %c0_513 = arith.constant 0 : index
    %554 = vector.load %arg3[%c0_511, %553, %c2_512, %c0_513] : memref<1x34x34x128xbf16, #tpu.memory_space<vmem>>, vector<1x1x32x128xbf16>
    %555 = vector.shape_cast %554 : vector<1x1x32x128xbf16> to vector<32x128xbf16>
    %c5_514 = arith.constant 5 : index
    %c0_515 = arith.constant 0 : index
    %c0_516 = arith.constant 0 : index
    %556 = vector.load %arg4[%c5_514, %c0_515, %c0_516] : memref<9x128x128xbf16, #tpu.memory_space<vmem>>, vector<1x128x128xbf16>
    %557 = vector.shape_cast %556 : vector<1x128x128xbf16> to vector<128x128xbf16>
    %cst_517 = arith.constant dense<0.000000e+00> : vector<32x128xf32>
    %558 = tpu.matmul %555, %557, %cst_517 {dimension_numbers = #tpu.dot_dimension_numbers<[1], [0], [0], [1], [0, 0, 1, 1], [], []>} : vector<32x128xbf16>, vector<128x128xbf16>, vector<32x128xf32> -> vector<32x128xf32>
    %559 = arith.addf %551, %558 : vector<32x128xf32>
    %c2_i32_518 = arith.constant 2 : i32
    %560 = arith.addi %510, %c2_i32_518 : i32
    %c0_519 = arith.constant 0 : index
    %561 = arith.index_cast %560 : i32 to index
    %c0_520 = arith.constant 0 : index
    %c0_521 = arith.constant 0 : index
    %562 = vector.load %arg3[%c0_519, %561, %c0_520, %c0_521] : memref<1x34x34x128xbf16, #tpu.memory_space<vmem>>, vector<1x1x32x128xbf16>
    %563 = vector.shape_cast %562 : vector<1x1x32x128xbf16> to vector<32x128xbf16>
    %c6_522 = arith.constant 6 : index
    %c0_523 = arith.constant 0 : index
    %c0_524 = arith.constant 0 : index
    %564 = vector.load %arg4[%c6_522, %c0_523, %c0_524] : memref<9x128x128xbf16, #tpu.memory_space<vmem>>, vector<1x128x128xbf16>
    %565 = vector.shape_cast %564 : vector<1x128x128xbf16> to vector<128x128xbf16>
    %cst_525 = arith.constant dense<0.000000e+00> : vector<32x128xf32>
    %566 = tpu.matmul %563, %565, %cst_525 {dimension_numbers = #tpu.dot_dimension_numbers<[1], [0], [0], [1], [0, 0, 1, 1], [], []>} : vector<32x128xbf16>, vector<128x128xbf16>, vector<32x128xf32> -> vector<32x128xf32>
    %567 = arith.addf %559, %566 : vector<32x128xf32>
    %c2_i32_526 = arith.constant 2 : i32
    %568 = arith.addi %510, %c2_i32_526 : i32
    %c0_527 = arith.constant 0 : index
    %569 = arith.index_cast %568 : i32 to index
    %c1_528 = arith.constant 1 : index
    %c0_529 = arith.constant 0 : index
    %570 = vector.load %arg3[%c0_527, %569, %c1_528, %c0_529] : memref<1x34x34x128xbf16, #tpu.memory_space<vmem>>, vector<1x1x32x128xbf16>
    %571 = vector.shape_cast %570 : vector<1x1x32x128xbf16> to vector<32x128xbf16>
    %c7_530 = arith.constant 7 : index
    %c0_531 = arith.constant 0 : index
    %c0_532 = arith.constant 0 : index
    %572 = vector.load %arg4[%c7_530, %c0_531, %c0_532] : memref<9x128x128xbf16, #tpu.memory_space<vmem>>, vector<1x128x128xbf16>
    %573 = vector.shape_cast %572 : vector<1x128x128xbf16> to vector<128x128xbf16>
    %cst_533 = arith.constant dense<0.000000e+00> : vector<32x128xf32>
    %574 = tpu.matmul %571, %573, %cst_533 {dimension_numbers = #tpu.dot_dimension_numbers<[1], [0], [0], [1], [0, 0, 1, 1], [], []>} : vector<32x128xbf16>, vector<128x128xbf16>, vector<32x128xf32> -> vector<32x128xf32>
    %575 = arith.addf %567, %574 : vector<32x128xf32>
    %c2_i32_534 = arith.constant 2 : i32
    %576 = arith.addi %510, %c2_i32_534 : i32
    %c0_535 = arith.constant 0 : index
    %577 = arith.index_cast %576 : i32 to index
    %c2_536 = arith.constant 2 : index
    %c0_537 = arith.constant 0 : index
    %578 = vector.load %arg3[%c0_535, %577, %c2_536, %c0_537] : memref<1x34x34x128xbf16, #tpu.memory_space<vmem>>, vector<1x1x32x128xbf16>
    %579 = vector.shape_cast %578 : vector<1x1x32x128xbf16> to vector<32x128xbf16>
    %c8_538 = arith.constant 8 : index
    %c0_539 = arith.constant 0 : index
    %c0_540 = arith.constant 0 : index
    %580 = vector.load %arg4[%c8_538, %c0_539, %c0_540] : memref<9x128x128xbf16, #tpu.memory_space<vmem>>, vector<1x128x128xbf16>
    %581 = vector.shape_cast %580 : vector<1x128x128xbf16> to vector<128x128xbf16>
    %cst_541 = arith.constant dense<0.000000e+00> : vector<32x128xf32>
    %582 = tpu.matmul %579, %581, %cst_541 {dimension_numbers = #tpu.dot_dimension_numbers<[1], [0], [0], [1], [0, 0, 1, 1], [], []>} : vector<32x128xbf16>, vector<128x128xbf16>, vector<32x128xf32> -> vector<32x128xf32>
    %583 = arith.addf %575, %582 : vector<32x128xf32>
    %584 = vector.broadcast %3 : vector<1x128xf32> to vector<32x128xf32>
    %585 = arith.addf %583, %584 : vector<32x128xf32>
    %cst_542 = arith.constant dense<0.000000e+00> : vector<128xf32>
    %586 = vector.multi_reduction <add>, %585, %cst_542 [0] : vector<32x128xf32> to vector<128xf32>
    %587 = vector.shape_cast %586 : vector<128xf32> to vector<1x128xf32>
    %588 = arith.addf %504, %587 : vector<1x128xf32>
    %589 = arith.truncf %585 : vector<32x128xf32> to vector<32x128xbf16>
    %c0_543 = arith.constant 0 : index
    %c6_544 = arith.constant 6 : index
    %c0_545 = arith.constant 0 : index
    %c0_546 = arith.constant 0 : index
    %590 = vector.load %arg6[%c0_543, %c6_544, %c0_545, %c0_546] : memref<1x8x32x128xbf16, #tpu.memory_space<vmem>>, vector<1x1x32x128xbf16>
    %591 = vector.shape_cast %590 : vector<1x1x32x128xbf16> to vector<32x128xbf16>
    %592 = vector.shape_cast %589 : vector<32x128xbf16> to vector<1x1x32x128xbf16>
    tpu.vector_store %arg6[%c0_543, %c6_544, %c0_545, %c0_546], %592 {strides = array<i32>} : memref<1x8x32x128xbf16, #tpu.memory_space<vmem>>, vector<1x1x32x128xbf16>,
    %c8_i32_547 = arith.constant 8 : i32
    %593 = arith.muli %arg2, %c8_i32_547 : i32
    %c7_i32 = arith.constant 7 : i32
    %594 = arith.addi %593, %c7_i32 : i32
    %cst_548 = arith.constant 0.000000e+00 : f32
    %595 = vector.broadcast %cst_548 : f32 to vector<32x128xf32>
    %c0_i32_549 = arith.constant 0 : i32
    %596 = arith.addi %594, %c0_i32_549 : i32
    %c0_550 = arith.constant 0 : index
    %597 = arith.index_cast %596 : i32 to index
    %c0_551 = arith.constant 0 : index
    %c0_552 = arith.constant 0 : index
    %598 = vector.load %arg3[%c0_550, %597, %c0_551, %c0_552] : memref<1x34x34x128xbf16, #tpu.memory_space<vmem>>, vector<1x1x32x128xbf16>
    %599 = vector.shape_cast %598 : vector<1x1x32x128xbf16> to vector<32x128xbf16>
    %c0_553 = arith.constant 0 : index
    %c0_554 = arith.constant 0 : index
    %c0_555 = arith.constant 0 : index
    %600 = vector.load %arg4[%c0_553, %c0_554, %c0_555] : memref<9x128x128xbf16, #tpu.memory_space<vmem>>, vector<1x128x128xbf16>
    %601 = vector.shape_cast %600 : vector<1x128x128xbf16> to vector<128x128xbf16>
    %cst_556 = arith.constant dense<0.000000e+00> : vector<32x128xf32>
    %602 = tpu.matmul %599, %601, %cst_556 {dimension_numbers = #tpu.dot_dimension_numbers<[1], [0], [0], [1], [0, 0, 1, 1], [], []>} : vector<32x128xbf16>, vector<128x128xbf16>, vector<32x128xf32> -> vector<32x128xf32>
    %603 = arith.addf %595, %602 : vector<32x128xf32>
    %c0_i32_557 = arith.constant 0 : i32
    %604 = arith.addi %594, %c0_i32_557 : i32
    %c0_558 = arith.constant 0 : index
    %605 = arith.index_cast %604 : i32 to index
    %c1_559 = arith.constant 1 : index
    %c0_560 = arith.constant 0 : index
    %606 = vector.load %arg3[%c0_558, %605, %c1_559, %c0_560] : memref<1x34x34x128xbf16, #tpu.memory_space<vmem>>, vector<1x1x32x128xbf16>
    %607 = vector.shape_cast %606 : vector<1x1x32x128xbf16> to vector<32x128xbf16>
    %c1_561 = arith.constant 1 : index
    %c0_562 = arith.constant 0 : index
    %c0_563 = arith.constant 0 : index
    %608 = vector.load %arg4[%c1_561, %c0_562, %c0_563] : memref<9x128x128xbf16, #tpu.memory_space<vmem>>, vector<1x128x128xbf16>
    %609 = vector.shape_cast %608 : vector<1x128x128xbf16> to vector<128x128xbf16>
    %cst_564 = arith.constant dense<0.000000e+00> : vector<32x128xf32>
    %610 = tpu.matmul %607, %609, %cst_564 {dimension_numbers = #tpu.dot_dimension_numbers<[1], [0], [0], [1], [0, 0, 1, 1], [], []>} : vector<32x128xbf16>, vector<128x128xbf16>, vector<32x128xf32> -> vector<32x128xf32>
    %611 = arith.addf %603, %610 : vector<32x128xf32>
    %c0_i32_565 = arith.constant 0 : i32
    %612 = arith.addi %594, %c0_i32_565 : i32
    %c0_566 = arith.constant 0 : index
    %613 = arith.index_cast %612 : i32 to index
    %c2_567 = arith.constant 2 : index
    %c0_568 = arith.constant 0 : index
    %614 = vector.load %arg3[%c0_566, %613, %c2_567, %c0_568] : memref<1x34x34x128xbf16, #tpu.memory_space<vmem>>, vector<1x1x32x128xbf16>
    %615 = vector.shape_cast %614 : vector<1x1x32x128xbf16> to vector<32x128xbf16>
    %c2_569 = arith.constant 2 : index
    %c0_570 = arith.constant 0 : index
    %c0_571 = arith.constant 0 : index
    %616 = vector.load %arg4[%c2_569, %c0_570, %c0_571] : memref<9x128x128xbf16, #tpu.memory_space<vmem>>, vector<1x128x128xbf16>
    %617 = vector.shape_cast %616 : vector<1x128x128xbf16> to vector<128x128xbf16>
    %cst_572 = arith.constant dense<0.000000e+00> : vector<32x128xf32>
    %618 = tpu.matmul %615, %617, %cst_572 {dimension_numbers = #tpu.dot_dimension_numbers<[1], [0], [0], [1], [0, 0, 1, 1], [], []>} : vector<32x128xbf16>, vector<128x128xbf16>, vector<32x128xf32> -> vector<32x128xf32>
    %619 = arith.addf %611, %618 : vector<32x128xf32>
    %c1_i32_573 = arith.constant 1 : i32
    %620 = arith.addi %594, %c1_i32_573 : i32
    %c0_574 = arith.constant 0 : index
    %621 = arith.index_cast %620 : i32 to index
    %c0_575 = arith.constant 0 : index
    %c0_576 = arith.constant 0 : index
    %622 = vector.load %arg3[%c0_574, %621, %c0_575, %c0_576] : memref<1x34x34x128xbf16, #tpu.memory_space<vmem>>, vector<1x1x32x128xbf16>
    %623 = vector.shape_cast %622 : vector<1x1x32x128xbf16> to vector<32x128xbf16>
    %c3_577 = arith.constant 3 : index
    %c0_578 = arith.constant 0 : index
    %c0_579 = arith.constant 0 : index
    %624 = vector.load %arg4[%c3_577, %c0_578, %c0_579] : memref<9x128x128xbf16, #tpu.memory_space<vmem>>, vector<1x128x128xbf16>
    %625 = vector.shape_cast %624 : vector<1x128x128xbf16> to vector<128x128xbf16>
    %cst_580 = arith.constant dense<0.000000e+00> : vector<32x128xf32>
    %626 = tpu.matmul %623, %625, %cst_580 {dimension_numbers = #tpu.dot_dimension_numbers<[1], [0], [0], [1], [0, 0, 1, 1], [], []>} : vector<32x128xbf16>, vector<128x128xbf16>, vector<32x128xf32> -> vector<32x128xf32>
    %627 = arith.addf %619, %626 : vector<32x128xf32>
    %c1_i32_581 = arith.constant 1 : i32
    %628 = arith.addi %594, %c1_i32_581 : i32
    %c0_582 = arith.constant 0 : index
    %629 = arith.index_cast %628 : i32 to index
    %c1_583 = arith.constant 1 : index
    %c0_584 = arith.constant 0 : index
    %630 = vector.load %arg3[%c0_582, %629, %c1_583, %c0_584] : memref<1x34x34x128xbf16, #tpu.memory_space<vmem>>, vector<1x1x32x128xbf16>
    %631 = vector.shape_cast %630 : vector<1x1x32x128xbf16> to vector<32x128xbf16>
    %c4_585 = arith.constant 4 : index
    %c0_586 = arith.constant 0 : index
    %c0_587 = arith.constant 0 : index
    %632 = vector.load %arg4[%c4_585, %c0_586, %c0_587] : memref<9x128x128xbf16, #tpu.memory_space<vmem>>, vector<1x128x128xbf16>
    %633 = vector.shape_cast %632 : vector<1x128x128xbf16> to vector<128x128xbf16>
    %cst_588 = arith.constant dense<0.000000e+00> : vector<32x128xf32>
    %634 = tpu.matmul %631, %633, %cst_588 {dimension_numbers = #tpu.dot_dimension_numbers<[1], [0], [0], [1], [0, 0, 1, 1], [], []>} : vector<32x128xbf16>, vector<128x128xbf16>, vector<32x128xf32> -> vector<32x128xf32>
    %635 = arith.addf %627, %634 : vector<32x128xf32>
    %c1_i32_589 = arith.constant 1 : i32
    %636 = arith.addi %594, %c1_i32_589 : i32
    %c0_590 = arith.constant 0 : index
    %637 = arith.index_cast %636 : i32 to index
    %c2_591 = arith.constant 2 : index
    %c0_592 = arith.constant 0 : index
    %638 = vector.load %arg3[%c0_590, %637, %c2_591, %c0_592] : memref<1x34x34x128xbf16, #tpu.memory_space<vmem>>, vector<1x1x32x128xbf16>
    %639 = vector.shape_cast %638 : vector<1x1x32x128xbf16> to vector<32x128xbf16>
    %c5_593 = arith.constant 5 : index
    %c0_594 = arith.constant 0 : index
    %c0_595 = arith.constant 0 : index
    %640 = vector.load %arg4[%c5_593, %c0_594, %c0_595] : memref<9x128x128xbf16, #tpu.memory_space<vmem>>, vector<1x128x128xbf16>
    %641 = vector.shape_cast %640 : vector<1x128x128xbf16> to vector<128x128xbf16>
    %cst_596 = arith.constant dense<0.000000e+00> : vector<32x128xf32>
    %642 = tpu.matmul %639, %641, %cst_596 {dimension_numbers = #tpu.dot_dimension_numbers<[1], [0], [0], [1], [0, 0, 1, 1], [], []>} : vector<32x128xbf16>, vector<128x128xbf16>, vector<32x128xf32> -> vector<32x128xf32>
    %643 = arith.addf %635, %642 : vector<32x128xf32>
    %c2_i32_597 = arith.constant 2 : i32
    %644 = arith.addi %594, %c2_i32_597 : i32
    %c0_598 = arith.constant 0 : index
    %645 = arith.index_cast %644 : i32 to index
    %c0_599 = arith.constant 0 : index
    %c0_600 = arith.constant 0 : index
    %646 = vector.load %arg3[%c0_598, %645, %c0_599, %c0_600] : memref<1x34x34x128xbf16, #tpu.memory_space<vmem>>, vector<1x1x32x128xbf16>
    %647 = vector.shape_cast %646 : vector<1x1x32x128xbf16> to vector<32x128xbf16>
    %c6_601 = arith.constant 6 : index
    %c0_602 = arith.constant 0 : index
    %c0_603 = arith.constant 0 : index
    %648 = vector.load %arg4[%c6_601, %c0_602, %c0_603] : memref<9x128x128xbf16, #tpu.memory_space<vmem>>, vector<1x128x128xbf16>
    %649 = vector.shape_cast %648 : vector<1x128x128xbf16> to vector<128x128xbf16>
    %cst_604 = arith.constant dense<0.000000e+00> : vector<32x128xf32>
    %650 = tpu.matmul %647, %649, %cst_604 {dimension_numbers = #tpu.dot_dimension_numbers<[1], [0], [0], [1], [0, 0, 1, 1], [], []>} : vector<32x128xbf16>, vector<128x128xbf16>, vector<32x128xf32> -> vector<32x128xf32>
    %651 = arith.addf %643, %650 : vector<32x128xf32>
    %c2_i32_605 = arith.constant 2 : i32
    %652 = arith.addi %594, %c2_i32_605 : i32
    %c0_606 = arith.constant 0 : index
    %653 = arith.index_cast %652 : i32 to index
    %c1_607 = arith.constant 1 : index
    %c0_608 = arith.constant 0 : index
    %654 = vector.load %arg3[%c0_606, %653, %c1_607, %c0_608] : memref<1x34x34x128xbf16, #tpu.memory_space<vmem>>, vector<1x1x32x128xbf16>
    %655 = vector.shape_cast %654 : vector<1x1x32x128xbf16> to vector<32x128xbf16>
    %c7_609 = arith.constant 7 : index
    %c0_610 = arith.constant 0 : index
    %c0_611 = arith.constant 0 : index
    %656 = vector.load %arg4[%c7_609, %c0_610, %c0_611] : memref<9x128x128xbf16, #tpu.memory_space<vmem>>, vector<1x128x128xbf16>
    %657 = vector.shape_cast %656 : vector<1x128x128xbf16> to vector<128x128xbf16>
    %cst_612 = arith.constant dense<0.000000e+00> : vector<32x128xf32>
    %658 = tpu.matmul %655, %657, %cst_612 {dimension_numbers = #tpu.dot_dimension_numbers<[1], [0], [0], [1], [0, 0, 1, 1], [], []>} : vector<32x128xbf16>, vector<128x128xbf16>, vector<32x128xf32> -> vector<32x128xf32>
    %659 = arith.addf %651, %658 : vector<32x128xf32>
    %c2_i32_613 = arith.constant 2 : i32
    %660 = arith.addi %594, %c2_i32_613 : i32
    %c0_614 = arith.constant 0 : index
    %661 = arith.index_cast %660 : i32 to index
    %c2_615 = arith.constant 2 : index
    %c0_616 = arith.constant 0 : index
    %662 = vector.load %arg3[%c0_614, %661, %c2_615, %c0_616] : memref<1x34x34x128xbf16, #tpu.memory_space<vmem>>, vector<1x1x32x128xbf16>
    %663 = vector.shape_cast %662 : vector<1x1x32x128xbf16> to vector<32x128xbf16>
    %c8_617 = arith.constant 8 : index
    %c0_618 = arith.constant 0 : index
    %c0_619 = arith.constant 0 : index
    %664 = vector.load %arg4[%c8_617, %c0_618, %c0_619] : memref<9x128x128xbf16, #tpu.memory_space<vmem>>, vector<1x128x128xbf16>
    %665 = vector.shape_cast %664 : vector<1x128x128xbf16> to vector<128x128xbf16>
    %cst_620 = arith.constant dense<0.000000e+00> : vector<32x128xf32>
    %666 = tpu.matmul %663, %665, %cst_620 {dimension_numbers = #tpu.dot_dimension_numbers<[1], [0], [0], [1], [0, 0, 1, 1], [], []>} : vector<32x128xbf16>, vector<128x128xbf16>, vector<32x128xf32> -> vector<32x128xf32>
    %667 = arith.addf %659, %666 : vector<32x128xf32>
    %668 = vector.broadcast %3 : vector<1x128xf32> to vector<32x128xf32>
    %669 = arith.addf %667, %668 : vector<32x128xf32>
    %cst_621 = arith.constant dense<0.000000e+00> : vector<128xf32>
    %670 = vector.multi_reduction <add>, %669, %cst_621 [0] : vector<32x128xf32> to vector<128xf32>
    %671 = vector.shape_cast %670 : vector<128xf32> to vector<1x128xf32>
    %672 = arith.addf %588, %671 : vector<1x128xf32>
    %673 = arith.truncf %669 : vector<32x128xf32> to vector<32x128xbf16>
    %c0_622 = arith.constant 0 : index
    %c7_623 = arith.constant 7 : index
    %c0_624 = arith.constant 0 : index
    %c0_625 = arith.constant 0 : index
    %674 = vector.load %arg6[%c0_622, %c7_623, %c0_624, %c0_625] : memref<1x8x32x128xbf16, #tpu.memory_space<vmem>>, vector<1x1x32x128xbf16>
    %675 = vector.shape_cast %674 : vector<1x1x32x128xbf16> to vector<32x128xbf16>
    %676 = vector.shape_cast %673 : vector<32x128xbf16> to vector<1x1x32x128xbf16>
    tpu.vector_store %arg6[%c0_622, %c7_623, %c0_624, %c0_625], %676 {strides = array<i32>} : memref<1x8x32x128xbf16, #tpu.memory_space<vmem>>, vector<1x1x32x128xbf16>,
    %c0_626 = arith.constant 0 : index
    %c0_627 = arith.constant 0 : index
    %c0_628 = arith.constant 0 : index
    %677 = vector.load %arg7[%c0_626, %c0_627, %c0_628] : memref<1x8x128xf32, #tpu.memory_space<vmem>>, vector<1x1x128xf32>
    %678 = vector.shape_cast %677 : vector<1x1x128xf32> to vector<1x128xf32>
    %679 = arith.addf %678, %672 : vector<1x128xf32>
    %c0_629 = arith.constant 0 : index
    %c0_630 = arith.constant 0 : index
    %c0_631 = arith.constant 0 : index
    %680 = vector.load %arg7[%c0_629, %c0_630, %c0_631] : memref<1x8x128xf32, #tpu.memory_space<vmem>>, vector<1x1x128xf32>
    %681 = vector.shape_cast %680 : vector<1x1x128xf32> to vector<1x128xf32>
    %682 = vector.shape_cast %679 : vector<1x128xf32> to vector<1x1x128xf32>
    tpu.vector_store %arg7[%c0_629, %c0_630, %c0_631], %682 {strides = array<i32>} : memref<1x8x128xf32, #tpu.memory_space<vmem>>, vector<1x1x128xf32>,
    return
  }
  func.func @transform_0(%arg0: i32, %arg1: i32, %arg2: i32) -> (i32, i32, i32, i32) {
    %c0_i32 = arith.constant 0 : i32
    %c0_i32_0 = arith.constant 0 : i32
    %c0_i32_1 = arith.constant 0 : i32
    %c0_i32_2 = arith.constant 0 : i32
    return %arg0, %c0_i32, %c0_i32_0, %c0_i32_1 : i32, i32, i32, i32
  }
  func.func @transform_1(%arg0: i32, %arg1: i32, %arg2: i32) -> (i32, i32, i32) {
    %c0_i32 = arith.constant 0 : i32
    %c0_i32_0 = arith.constant 0 : i32
    %c0_i32_1 = arith.constant 0 : i32
    return %c0_i32, %c0_i32_0, %arg1 : i32, i32, i32
  }
  func.func @transform_2(%arg0: i32, %arg1: i32, %arg2: i32) -> (i32, i32) {
    %c0_i32 = arith.constant 0 : i32
    %c0_i32_0 = arith.constant 0 : i32
    return %c0_i32, %arg1 : i32, i32
  }
  func.func @transform_3(%arg0: i32, %arg1: i32, %arg2: i32) -> (i32, i32, i32, i32) {
    %c0_i32 = arith.constant 0 : i32
    %c0_i32_0 = arith.constant 0 : i32
    return %arg0, %arg2, %c0_i32, %arg1 : i32, i32, i32, i32
  }
  func.func @transform_4(%arg0: i32, %arg1: i32, %arg2: i32) -> (i32, i32, i32) {
    %c0_i32 = arith.constant 0 : i32
    %c0_i32_0 = arith.constant 0 : i32
    return %arg0, %c0_i32, %arg1 : i32, i32, i32
  }
}

</mosaic_0001>

<bundles_post_ra>
// kernel: tpu_custom_call.1
= control target key start
LH: loop header
LB: loop body
LE: loop exit
PB: predicated region body
PF: predicated region fallthrough
CT: control target
= control target key end

     0   :  { %10 = vsyncpa [#allocation3], 0  ;;  %s19018_s0 = inlined_call_operand.vmem [shape: bf16[2,34,34,128], index: 0, kind: input, shape index: {}]   ;;  %s19019_s1 = inlined_call_operand.vmem [shape: bf16[9,128,128], index: 1, kind: input, shape index: {}]   ;;  %s19020_s2 = inlined_call_operand.vmem [shape: f32[1,128], index: 2, kind: input, shape index: {}]   ;;  %s19021_s3 = inlined_call_operand.hbm [shape: bf16[2,32,32,128], index: 3, kind: output, shape index: {0}]   ;;  %s19022_s4 = inlined_call_operand.hbm [shape: f32[2,8,128], index: 4, kind: output, shape index: {1}]  }
   0x1   :  { %12 = vsyncpa [#allocation3 + $0x1], 0 }
   0x2   :  { %13 = vsyncpa [#allocation5], 0 }
   0x3   :  { %15 = vsyncpa [#allocation5 + $0x1], 0  ;;  %s16249_s15 = smov 0   ;;  %s16251_s16 = smov 0  }
   0x4   :  { %s16253_s17 = smov 0   ;;  %s16255_s18 = smov 0  }
   0x5   :  { %s16257_s19 = smov 0   ;;  %s16259_s20 = smov 0  }
   0x6   :  { %s16261_s21 = smov 0   ;;  %s16263_s22 = smov 0  }
   0x7   :  { %s16265_s23 = smov 0   ;;  %s16267_s24 = smov 0  }
   0x8   :  { %s16269_s25 = smov 0  }
   0x9 LB: > { %19029 = sst [smem:[#allocation8_spill]] %s16209_s23  ;;  %s10680_s26 = sadd.s32 4294967295, %s16217_s25   ;;  %s16217_s25 = sphi %s16269_s25, %s21_s25   ;;  %s16213_s24 = sphi %s16267_s24, %s19046_s24   ;;  %s16209_s23 = sphi %s16265_s23, %s19045_s23   ;;  %s16205_s22 = sphi %s16263_s22, %s19044_s22   ;;  %s16201_s21 = sphi %s16261_s21, %s19043_s21   ;;  %s16197_s20 = sphi %s16259_s20, %s19052_s20   ;;  %s16193_s19 = sphi %s16257_s19, %s19051_s19   ;;  %s16189_s18 = sphi %s16255_s18, %s19050_s18   ;;  %s16185_s17 = sphi %s16253_s17, %s19049_s17   ;;  %s16181_s16 = sphi %s16251_s16, %s19048_s16   ;;  %s16177_s15 = sphi %s16249_s15, %s19047_s15  }
   0xa   : > { %19030 = sst [smem:[#allocation9_spill]] %s16213_s24  ;;  %s10681_s27 = sadd.s32 4294967294, %s16217_s25  }
   0xb   : > { %s33_s28 = sadd.s32 1, %s16209_s23  ;;  %s40_s29 = sadd.s32 1, %s16213_s24 }
   0xc   : > { %p34_p0 = scmp.ge.s32.totalorder %s33_s28, 4  ;;  %s129_s30 = sadd.s32 1, %s16197_s20 }
   0xd   : > { %p139_p1 = scmp.ne.s32.totalorder %s16197_s20, %s16193_s19  ;;  %p16311_p2 = scmp.eq.s32.totalorder %s10680_s26, 7 }
   0xe   : > { %s19054_s28 = smov (%p34_p0, %s33_s28), 0  ;;  %s19056_s29 = smov (!%p34_p0, %s40_s29), %s16213_s24 }
   0xf   : > { %19032 = sst [smem:[#allocation10_spill]] %s19054_s28  ;;  %s123_s6 = ssub.s32 %s16209_s23, %s19054_s28 }
  0x10   : > { %p16322_p3 = por %p16311_p2, %p139_p1  ;;  %p42_p4 = scmp.ge.s32.totalorder %s19056_s29, 2 }
  0x11   : > { %p145_p5 = scmp.ne.s32.totalorder %s16193_s19, %s16189_s18  ;;  %p16328_p6 = scmp.eq.s32.totalorder %s10681_s27, 7 }
  0x12   : > { %s157_s9 = sadd.s32 1, %s16185_s17  ;;  %s19058_s29 = smov (%p42_p4, %s19056_s29), 0 }
  0x13   : > { %19035 = sst [smem:[#allocation11_spill]] %s19058_s29  ;;  %p16337_p7 = por %p16328_p6, %p145_p5 }
  0x14   : > { %p167_p8 = scmp.ne.s32.totalorder %s16185_s17, %s16181_s16  ;;  %s122_s11 = ssub.s32 %s16213_s24, %s19058_s29 }
  0x15   : > { %p173_p9 = scmp.ne.s32.totalorder %s16181_s16, %s16177_s15  ;;  %s124_s12 = sor.u32 %s123_s6, %s122_s11 }
  0x16   : > { %p155_p10 = scmp.eq.s32.totalorder %s122_s11, 0  ;;  %p127_p11 = scmp.eq.s32.totalorder %s124_s12, 0 }
  0x17   : > { %p16349_p12 = por %p167_p8, %p16311_p2  ;;  %p16361_p13 = por %p173_p9, %p16328_p6 }
  0x18   : > { %s16354_s14 = scalar_select %p155_p10, %s16185_s17, %s157_s9  }
  0x19   : > { %s16357_s26 = scalar_select %p127_p11, %s16197_s20, %s129_s30  }
  0x1a   : > { %p10686_p0 = scmp.ge.s32.totalorder %s16217_s25, 1  ;;  %p213_p1 = scmp.lt.s32.totalorder %s16217_s25, 9 }
  0x1b   : > { %19038 = sst [smem:[#allocation12_spill]] %s16357_s26 }
  0x1c   : > { %p214_p4 = pnand %p10686_p0, %p213_p1 }
  0x1d   : > { %s19028_s5 = sand.u32 (!%p214_p4), 1, %s16193_s19   ;;  %s19027_s6 = sand.u32 (!%p214_p4), 1, %s16181_s16  }
  0x1e   : > { %217 = sbr.rel (%p214_p4) target bundleno = 1464 (0x5b8), region = 32  ;;  %s10687_s30 = sshll.u32 (!%p214_p4), %s19028_s5, 7 }
  0x1f   : > { %s10688_s8 = sshll.u32 (!%p214_p4), %s19027_s6, 3  ;;  %p251_p2 = scmp.lt.s32.totalorder (!%p214_p4), %s16205_s22, 1 }
  0x20   : > { %s16380_s24 = scalar_lea.vmem (!%p214_p4), [#allocation2], %s10687_s30  ;;  %s16382_s23 = scalar_lea.vmem (!%p214_p4), [#allocation4], %s10688_s8 }
  0x21   : > { %p10690_p5 = scmp.ne.s32.totalorder (!%p214_p4), %s16201_s21, 0 }
  0x25   : > { %s252_s9 = scalar_select %p251_p2, %s16205_s22, 1 }
  0x26   : > { %268 = sbr.rel (%p10690_p5) target bundleno = 45 (0x2d), region = 36  ;;  %v16219_v0 = vmov (!%p10690_p5), 0.0  }
  0x27   : > { %s15257_s11 = smul.u32 680, %s252_s9  ;;  %269 = vst [vmem:[%s16382_s23] sm:$0xff] (!%p10690_p5), %v16219_v0 }
  0x29   : > { %s16378_s28 = scalar_lea.vmem %s19018_s0, %s15257_s11 }
  0x2d PF: > { %v15361_v1 = vld [vmem:[%s19019_s1 + $0x40] sm:$0xff]   ;;  %v15363_v3 = vld [vmem:[%s19019_s1 + $0x48] sm:$0xff]   ;;  %v15365_v5 = vld [vmem:[%s19019_s1 + $0x50] sm:$0xff]   ;;  %s12712_s11 = smul.u32 160, %s16201_s21  ;;  %vm326_vm0 = vsmask.f32 7424 }
  0x2e   : > { %v15362_v2 = vld [vmem:[%s19019_s1 + $0x40] sm:$0xff]   ;;  %13561 = vmatprep.subr.bf16.mxu0 %v15361_v1  ;;  %v15364_v4 = vld [vmem:[%s19019_s1 + $0x48] sm:$0xff]   ;;  %v15366_v6 = vld [vmem:[%s19019_s1 + $0x50] sm:$0xff]   ;;  %vm566_vm1 = vcmask 1046528   ;;  %s12707_s30 = sshll.u32 %s16205_s22, 7  ;;  %s19040_s26 = sand.u32 1, %s16193_s19  }
  0x2f   : > { %13741 = vmatprep.subr.bf16.mxu1 %v15362_v2  ;;  %13562 = vmatpush3.bf16.msra.mxu0 %v15361_v1  ;;  %v15367_v7 = vld [vmem:[%s19019_s1 + $0x58] sm:$0xff]   ;;  %v15369_v9 = vld [vmem:[%s19019_s1 + $0x60] sm:$0xff]   ;;  %s16418_s9 = scalar_lea.vmem %s16378_s28, %s12712_s11  ;;  %v15371_v11 = vld [vmem:[%s19019_s1 + $0x68] sm:$0xff]   ;;  %s10488_s28 = sshll.u32 %s16380_s24, 4  ;;  %s18905_s28 = int_to_ptr.vmem [resolvable:$true] %s10488_s28 }
  0x30   : > { %13742 = vmatpush3.bf16.msra.mxu1 %v15362_v2  ;;  %13563 = vmatprep.subr.bf16.mxu0 %v15363_v3  ;;  %v15368_v8 = vld [vmem:[%s19019_s1 + $0x58] sm:$0xff]   ;;  %v15370_v10 = vld [vmem:[%s19019_s1 + $0x60] sm:$0xff]   ;;  %v15372_v14 = vld [vmem:[%s19019_s1 + $0x68] sm:$0xff]   ;;  %s18918_s12 = scalar_lea.sflag [#allocation3], %s19040_s26  ;;  %s16067_s29 = scalar_lea.vmem %s18905_s28, 2048 }
  0x31   : > { %13743 = vmatprep.subr.bf16.mxu1 %v15364_v4  ;;  %v275_v12 = vld [vmem:[%s16418_s9] sm:$0xf]  ;;  %v16425_v13 = vld [vmem:[%s16418_s9 + $0x4] sm:$0xf]  ;;  %v16434_v16 = vld [vmem:[%s16418_s9 + $0x8] sm:$0xff]   ;;  %p16068_p6 = scmp.ne.s32.totalorder %s18905_s28, %s16067_s29 }
  0x32   : > { %v16431_v15 = vcombine.low %v275_v12, %v16425_v13  ;;  %v15373_v17 = vld [vmem:[%s19019_s1 + $0x70] sm:$0xff]   ;;  %v335_v21 = vshll.u32 %v16434_v16, 16  ;;  %v16444_v22 = vld [vmem:[%s16418_s9 + $0x18] sm:$0xf]  ;;  %v16447_v23 = vld [vmem:[%s16418_s9 + $0x1c] sm:$0xff]   ;;  %v339_v32 = vshrl.u32 %v16434_v16, 16 }
  0x33   : > { %13564 = vmatpush3.bf16.msra.mxu0 %v15363_v3  ;;  %v10939_v18 = vld [vmem:[%s16418_s9 + $0x14] sm:$0xf]  ;;  %v1623_v28 = vshll.u32 %v16447_v23, 16  ;;  %v15375_v29 = vld [vmem:[%s19019_s1 + $0x78] sm:$0xff]   ;;  %v1627_v33 = vshrl.u32 %v16447_v23, 16  ;;  %v15379_v46 = vld [vmem:[%s19019_s1] sm:$0xff]   ;;  %p16069_p8 = pnand %p16068_p6, %p16322_p3 }
  0x34   : > { %13744 = vmatpush3.bf16.msra.mxu1 %v15364_v4  ;;  %13565 = vmatprep.subr.bf16.mxu0 %v15365_v5  ;;  %v328_v19 = vshrl.u32 %v16431_v15, 16  ;;  %v330_v20 = vshll.u32 %v16431_v15, 16  ;;  %v10960_v24 = vcombine.low %v10939_v18, %v16444_v22  ;;  %v15374_v25 = vld [vmem:[%s19019_s1 + $0x70] sm:$0xff]   ;;  %v337_v27 = vrot.slane %v335_v21, 1  ;;  %v15376_v39 = vld [vmem:[%s19019_s1 + $0x78] sm:$0xff]   ;;  %v15382_v50 = vld [vmem:[%s19019_s1] sm:$0xff]  }
  0x35   : > { %13745 = vmatprep.subr.bf16.mxu1 %v15366_v6  ;;  %v1625_v35 = vrot.slane %v1623_v28, 1  ;;  %v16460_v36 = vld [vmem:[%s16418_s9 + $0x10] ss:$0 sps:$4 sm:$0x11]   ;;  %v15385_v53 = vld [vmem:[%s19019_s1 + $0x8] sm:$0xff]   ;;  %v15389_v57 = vld [vmem:[%s19019_s1 + $0x18] sm:$0xff]   ;;  %p16070_p9 = pneg %p16069_p8 }
  0x36   : > { %v332_v26 = vrot.slane %v330_v20, 1  ;;  %v1616_v30 = vshrl.u32 %v10960_v24, 16  ;;  %v1618_v31 = vshll.u32 %v10960_v24, 16  ;;  %v16463_v38 = vld [vmem:[%s16418_s9 + $0x24] ss:$0 sps:$4 sm:$0x11]   ;;  %v341_v44 = vor.u32 %v339_v32, %v337_v27 }
  0x37   : > { %13566 = vmatpush3.bf16.msra.mxu0 %v15365_v5  ;;  %v343_v41 = vshll.u32 %v16460_v36, 16  ;;  %v1631_v43 = vshll.u32 %v16463_v38, 16  ;;  %v1629_v48 = vor.u32 %v1627_v33, %v1625_v35  ;;  %v15386_v54 = vld [vmem:[%s19019_s1 + $0x8] sm:$0xff]   ;;  %v15387_v55 = vld [vmem:[%s19019_s1 + $0x10] sm:$0xff]   ;;  %v15390_v58 = vld [vmem:[%s19019_s1 + $0x18] sm:$0xff]   ;;  %v1854_v12 = vrot.slane %v16447_v23, 1 }
  0x38   : > { %13746 = vmatpush3.bf16.msra.mxu1 %v15366_v6  ;;  %13567 = vmatprep.subr.bf16.mxu0 %v15367_v7  ;;  %v333_v34 = vor.u32 %v332_v26, %v328_v19  ;;  %v1620_v37 = vrot.slane %v1618_v31, 1  ;;  %v15388_v56 = vld [vmem:[%s19019_s1 + $0x10] sm:$0xff]   ;;  %v15391_v59 = vld [vmem:[%s19019_s1 + $0x20] sm:$0xff]   ;;  %v15393_v61 = vld [vmem:[%s19019_s1 + $0x28] sm:$0xff]   ;;  %v1856_v31 = vrot.slane %v16463_v38, 1 }
  0x39   : > { %13747 = vmatprep.subr.bf16.mxu1 %v15368_v8  ;;  %v345_v45 = vrot.slane %v343_v41, 1  ;;  %v1633_v49 = vrot.slane %v1631_v43, 1  ;;  %v15392_v60 = vld [vmem:[%s19019_s1 + $0x20] sm:$0xff]   ;;  %v15394_v62 = vld [vmem:[%s19019_s1 + $0x28] sm:$0xff]   ;;  %v15395_v63 = vld [vmem:[%s19019_s1 + $0x30] sm:$0xff]  }
  0x3a   : > { %v338_v40 = vsel %vm326_vm0, %v333_v34, %v337_v27  ;;  %v1621_v42 = vor.u32 %v1620_v37, %v1616_v30  ;;  %v15396_v0 = vld [vmem:[%s19019_s1 + $0x30] sm:$0xff]   ;;  %v15397_v1 = vld [vmem:[%s19019_s1 + $0x38] sm:$0xff]   ;;  %v545_v2 = vld [vmem:[%s16418_s9] sm:$0xe]  ;;  %v1857_v34 = vsel %vm566_vm1, %v1854_v12, %v1856_v31 }
  0x3b   : > { %13568 = vmatpush3.bf16.msra.mxu0 %v15367_v7  ;;  %13577 = vmatprep.mubr.bf16.mxu0 %v338_v40  ;;  %v346_v51 = vsel %vm326_vm0, %v341_v44, %v345_v45  ;;  %v1634_v52 = vsel %vm326_vm0, %v1629_v48, %v1633_v49  ;;  %v10979_v3 = vld [vmem:[%s16418_s9 + $0x14] sm:$0xe]  ;;  %v15398_v4 = vld [vmem:[%s19019_s1 + $0x38] sm:$0xff]   ;;  %v10745_v5 = vcombine.low %v545_v2, %v16425_v13  ;;  %v15399_v7 = vld [vmem:[%s19019_s1 + $0x80] sm:$0xff]  }
  0x3c   : > { %13748 = vmatpush3.bf16.msra.mxu1 %v15368_v8  ;;  %13569 = vmatprep.subr.bf16.mxu0 %v15369_v9  ;;  %v1626_v47 = vsel %vm326_vm0, %v1621_v42, %v1625_v35  ;;  %v10996_v6 = vcombine.low %v10979_v3, %v16444_v22  ;;  %v15400_v8 = vld [vmem:[%s19019_s1 + $0x80] sm:$0xff]   ;;  %v15401_v13 = vld [vmem:[%s19019_s1 + $0x88] sm:$0xff]   ;;  %v15403_v18 = vld [vmem:[%s19019_s1 + $0x90] sm:$0xff]  }
  0x3d   : > { %13749 = vmatprep.subr.bf16.mxu1 %v15370_v10  ;;  %13757 = vmatprep.mubr.bf16.mxu1 %v1626_v47  ;;  %v15404_v19 = vld [vmem:[%s19019_s1 + $0x90] sm:$0xff]   ;;  %v15406_v20 = vld [vmem:[%s19019_s1 + $0x98] sm:$0xff]   ;;  %v15407_v21 = vld [vmem:[%s19019_s1 + $0xa0] sm:$0xff]  }
  0x3e   : > { %v15408_v22 = vld [vmem:[%s19019_s1 + $0xa0] sm:$0xff]   ;;  %v15412_v26 = vld [vmem:[%s19019_s1 + $0xb0] sm:$0xff]   ;;  %v15413_v27 = vld [vmem:[%s19019_s1 + $0xb8] sm:$0xff]  }
  0x3f   : > { %13570 = vmatpush3.bf16.msra.mxu0 %v15369_v9  ;;  %v567_v9 = vrot.slane %v10745_v5, 1  ;;  %v15414_v28 = vld [vmem:[%s19019_s1 + $0xb8] sm:$0xff]   ;;  %v15416_v30 = vld [vmem:[%s19019_s1 + $0xc0] sm:$0xff]   ;;  %v15419_v35 = vld [vmem:[%s19019_s1 + $0xc8] sm:$0xff]  }
  0x40   : > { %13750 = vmatpush3.bf16.msra.mxu1 %v15370_v10  ;;  %13571 = vmatprep.subr.bf16.mxu0 %v15371_v11  ;;  %v568_v10 = vrot.slane %v16434_v16, 1  ;;  %v15418_v32 = vld [vmem:[%s19019_s1 + $0xc0] sm:$0xff]   ;;  %v15433_v37 = vld [vmem:[%s16418_s9 + $0x14] sm:$0xff]   ;;  %v15435_v38 = vld [vmem:[%s16418_s9 + $0x28] sm:$0xff]  }
  0x41   : > { %13751 = vmatprep.subr.bf16.mxu1 %v15372_v14  ;;  %v15422_v40 = vld [vmem:[%s19019_s1 + $0xd0] sm:$0xff]   ;;  %v15423_v41 = vld [vmem:[%s19019_s1 + $0xd8] sm:$0xff]   ;;  %v15425_v43 = vld [vmem:[%s19019_s1 + $0xe0] sm:$0xff]  }
  0x42   : > { %v15424_v42 = vld [vmem:[%s19019_s1 + $0xd8] sm:$0xff]   ;;  %v15426_v44 = vld [vmem:[%s19019_s1 + $0xe0] sm:$0xff]   ;;  %v10786_v45 = vld [vmem:[%s16418_s9 + $0x14] sm:$0xf] }
  0x43   : > { %13572 = vmatpush3.bf16.msra.mxu0 %v15371_v11  ;;  %v1853_v11 = vrot.slane %v10996_v6, 1  ;;  %v16622_v47 = vld [vmem:[%s16418_s9 + $0x18] sm:$0xf]  ;;  %v11035_v48 = vld [vmem:[%s16418_s9 + $0x28] sm:$0xf]  ;;  %v15434_v3 = vld [vmem:[%s19019_s1 + $0x100] sm:$0xff]  }
  0x44   : > { %13752 = vmatpush3.bf16.msra.mxu1 %v15372_v14  ;;  %13573 = vmatprep.subr.bf16.mxu0 %v15373_v17  ;;  %v15402_v14 = vld [vmem:[%s19019_s1 + $0x88] sm:$0xff]   ;;  %v15437_v5 = vld [vmem:[%s16418_s9 + $0x1c] sm:$0xff]  }
  0x45   : > { %13753 = vmatprep.subr.bf16.mxu1 %v15374_v25  ;;  %v16626_v49 = vld [vmem:[%s16418_s9 + $0x2c] sm:$0xf] }
  0x47   : > { %13574 = vmatpush3.bf16.msra.mxu0 %v15373_v17  ;;  %v1855_v17 = vsel %vm566_vm1, %v1853_v11, %v1854_v12  ;;  %v15439_v11 = vld [vmem:[%s19019_s1 + $0x108] sm:$0xff]  }
  0x48   : > { %13754 = vmatpush3.bf16.msra.mxu1 %v15374_v25  ;;  %13575 = vmatprep.subr.bf16.mxu0 %v15375_v29  ;;  %v15411_v25 = vld [vmem:[%s19019_s1 + $0xb0] sm:$0xff]   ;;  %v15440_v12 = vld [vmem:[%s19019_s1 + $0x108] sm:$0xff]  }
  0x49   : > { %13755 = vmatprep.subr.bf16.mxu1 %v15376_v39 }
  0x4b   : > { %13576 = vmatpush3.bf16.msra.mxu0 %v15375_v29  ;;  %v570_v29 = vrot.slane %v16460_v36, 1  ;;  %v15420_v36 = vld [vmem:[%s19019_s1 + $0xc8] sm:$0xff]  }
  0x4c   : > { %13756 = vmatpush3.bf16.msra.mxu1 %v15376_v39  ;;  %13581 = vmatprep.subr.bf16.mxu0 %v15379_v46  ;;  %v15421_v39 = vld [vmem:[%s19019_s1 + $0xd0] sm:$0xff]  }
  0x4d   : > { %13761 = vmatprep.subr.bf16.mxu1 %v15382_v50  ;;  %v571_v33 = vsel %vm566_vm1, %v568_v10, %v570_v29 }
  0x4e   : > { %13578 = vmatmul.mubr.bf16.vlgmr.msra.gmra.mrb[0].mxu0 %v346_v51  ;;  %v10807_v51 = vcombine.low %v10786_v45, %v16622_v47 }
  0x4f   : > { %13582 = vmatpush3.bf16.msra.mxu0 %v15379_v46  ;;  %13758 = vmatmul.mubr.bf16.vlgmr.msra.gmra.mrb[0].mxu1 %v1634_v52  ;;  %v15427_v46 = vld [vmem:[%s19019_s1 + $0xe8] sm:$0xff]   ;;  %v15429_v52 = vld [vmem:[%s19019_s1 + $0xf0] sm:$0xff]  }
  0x50   : > { %13762 = vmatpush3.bf16.msra.mxu1 %v15382_v50  ;;  %13583 = vmatprep.subr.bf16.mxu0 %v15385_v53  ;;  %v15428_v50 = vld [vmem:[%s19019_s1 + $0xe8] sm:$0xff]  }
  0x51   : > { %13763 = vmatprep.subr.bf16.mxu1 %v15386_v54  ;;  %13597 = vmatprep.mubr.bf16.mxu0 %v16431_v15  ;;  %v569_v15 = vsel %vm566_vm1, %v567_v9, %v568_v10 }
  0x52   : > { %13777 = vmatprep.mubr.bf16.mxu1 %v10960_v24  ;;  %v15410_v24 = vld [vmem:[%s19019_s1 + $0xa8] sm:$0xff]  }
  0x53   : > { %13584 = vmatpush3.bf16.msra.mxu0 %v15385_v53  ;;  %v11056_v53 = vcombine.low %v11035_v48, %v16626_v49 }
  0x54   : > { %13764 = vmatpush3.bf16.msra.mxu1 %v15386_v54  ;;  %13585 = vmatprep.subr.bf16.mxu0 %v15387_v55  ;;  %v15430_v54 = vld [vmem:[%s19019_s1 + $0xf0] sm:$0xff]  }
  0x55   : > { %13765 = vmatprep.subr.bf16.mxu1 %v15388_v56 }
  0x57   : > { %13586 = vmatpush3.bf16.msra.mxu0 %v15387_v55  ;;  %v16640_v55 = vld [vmem:[%s16418_s9 + $0x1c] sm:$0xff]  }
  0x58   : > { %13766 = vmatpush3.bf16.msra.mxu1 %v15388_v56  ;;  %13587 = vmatprep.subr.bf16.mxu0 %v15389_v57  ;;  %v851_v56 = vshll.u32 %v10807_v51, 16 }
  0x59   : > { %13767 = vmatprep.subr.bf16.mxu1 %v15390_v58 }
  0x5b   : > { %13588 = vmatpush3.bf16.msra.mxu0 %v15389_v57  ;;  %v16643_v57 = vld [vmem:[%s16418_s9 + $0x30] sm:$0xff]  }
  0x5c   : > { %13768 = vmatpush3.bf16.msra.mxu1 %v15390_v58  ;;  %13589 = vmatprep.subr.bf16.mxu0 %v15391_v59  ;;  %v15431_v58 = vld [vmem:[%s19019_s1 + $0xf8] sm:$0xff]   ;;  %v2272_v48 = vrot.slane %v16643_v57, 1 }
  0x5d   : > { %13769 = vmatprep.subr.bf16.mxu1 %v15392_v60 }
  0x5f   : > { %13590 = vmatpush3.bf16.msra.mxu0 %v15391_v59  ;;  %v2131_v59 = vshll.u32 %v11056_v53, 16 }
  0x60   : > { %13770 = vmatpush3.bf16.msra.mxu1 %v15392_v60  ;;  %13591 = vmatprep.subr.bf16.mxu0 %v15393_v61  ;;  %v15432_v60 = vld [vmem:[%s19019_s1 + $0xf8] sm:$0xff]  }
  0x61   : > { %13771 = vmatprep.subr.bf16.mxu1 %v15394_v62  ;;  %v2133_v2 = vrot.slane %v2131_v59, 1  ;;  %v15468_v59 = vld [vmem:[%s19019_s1 + $0x160] sm:$0xff]  }
  0x63   : > { %13592 = vmatpush3.bf16.msra.mxu0 %v15393_v61  ;;  %v849_v61 = vshrl.u32 %v10807_v51, 16 }
  0x64   : > { %13772 = vmatpush3.bf16.msra.mxu1 %v15394_v62  ;;  %13593 = vmatprep.subr.bf16.mxu0 %v15395_v63  ;;  %v856_v62 = vshll.u32 %v16640_v55, 16 }
  0x65   : > { %13773 = vmatprep.subr.bf16.mxu1 %v15396_v0 }
  0x67   : > { %13594 = vmatpush3.bf16.msra.mxu0 %v15395_v63  ;;  %v853_v63 = vrot.slane %v851_v56, 1  ;;  %v15465_v56 = vld [vmem:[%s19019_s1 + $0x158] sm:$0xff]  }
  0x68   : > { %13774 = vmatpush3.bf16.msra.mxu1 %v15396_v0  ;;  %13595 = vmatprep.subr.bf16.mxu0 %v15397_v1  ;;  %v2136_v0 = vshll.u32 %v16643_v57, 16 }
  0x69   : > { %13775 = vmatprep.subr.bf16.mxu1 %v15398_v4  ;;  %v854_v6 = vor.u32 %v853_v63, %v849_v61  ;;  %v15470_v61 = vld [vmem:[%s19019_s1 + $0x168] sm:$0xff]   ;;  %v15472_v63 = vld [vmem:[%s19019_s1 + $0x170] sm:$0xff]  }
  0x6a   : > { %v16663_v10 = vrot.slane %v2136_v0, 1  ;;  %v15473_v0 = vld [vmem:[%s19019_s1 + $0x178] sm:$0xff]  }
  0x6b   : > { %13596 = vmatpush3.bf16.msra.mxu0 %v15397_v1  ;;  %v2129_v1 = vshrl.u32 %v11056_v53, 16  ;;  %v15463_v53 = vld [vmem:[%s19019_s1 + $0x150] sm:$0xff]  }
  0x6c   : > { %13776 = vmatpush3.bf16.msra.mxu1 %v15398_v4  ;;  %13601 = vmatprep.subr.bf16.mxu0 %v15399_v7  ;;  %v15436_v4 = vld [vmem:[%s19019_s1 + $0x100] sm:$0xff]  }
  0x6d   : > { %13781 = vmatprep.subr.bf16.mxu1 %v15400_v8  ;;  %v2134_v9 = vor.u32 %v2133_v2, %v2129_v1  ;;  %v15474_v1 = vld [vmem:[%s19019_s1 + $0x178] sm:$0xff]  }
  0x6e   : > { %13598 = vmatmul.mubr.bf16.vlgmr.msra.gmra.mrb[0].mxu0 %v16434_v16  ;;  %v15405_v16 = vld [vmem:[%s19019_s1 + $0x98] sm:$0xff]  }
  0x6f   : > { %13602 = vmatpush3.bf16.msra.mxu0 %v15399_v7  ;;  %13778 = vmatmul.mubr.bf16.vlgmr.msra.gmra.mrb[0].mxu1 %v16447_v23  ;;  %v15409_v23 = vld [vmem:[%s19019_s1 + $0xa8] sm:$0xff]   ;;  %v16660_v7 = vrot.slane %v856_v62, 1  ;;  %v15471_v62 = vld [vmem:[%s19019_s1 + $0x170] sm:$0xff]  }
  0x70   : > { %13782 = vmatpush3.bf16.msra.mxu1 %v15400_v8  ;;  %13603 = vmatprep.subr.bf16.mxu0 %v15401_v13  ;;  %v15438_v8 = vld [vmem:[%s16418_s9 + $0x30] sm:$0xff]  }
  0x71   : > { %13783 = vmatprep.subr.bf16.mxu1 %v15402_v14  ;;  %13617 = vmatprep.mubr.bf16.mxu0 %v569_v15  ;;  %v15441_v15 = vld [vmem:[%s19019_s1 + $0x110] sm:$0xff]  }
  0x72   : > { %13797 = vmatprep.mubr.bf16.mxu1 %v1855_v17  ;;  %v15442_v17 = vld [vmem:[%s19019_s1 + $0x110] sm:$0xff]  }
  0x73   : > { %13604 = vmatpush3.bf16.msra.mxu0 %v15401_v13  ;;  %v859_v13 = vsel %vm326_vm0, %v854_v6, %v16660_v7 }
  0x74   : > { %13784 = vmatpush3.bf16.msra.mxu1 %v15402_v14  ;;  %13605 = vmatprep.subr.bf16.mxu0 %v15403_v18  ;;  %v2139_v14 = vsel %vm326_vm0, %v2134_v9, %v16663_v10  ;;  %v15480_v9 = vld [vmem:[%s19019_s1 + $0x188] sm:$0xff]  }
  0x75   : > { %13785 = vmatprep.subr.bf16.mxu1 %v15404_v19 }
  0x77   : > { %13606 = vmatpush3.bf16.msra.mxu0 %v15403_v18  ;;  %v15443_v18 = vld [vmem:[%s19019_s1 + $0x118] sm:$0xff]  }
  0x78   : > { %13786 = vmatpush3.bf16.msra.mxu1 %v15404_v19  ;;  %13607 = vmatprep.subr.bf16.mxu0 %v15405_v16  ;;  %v15444_v19 = vld [vmem:[%s19019_s1 + $0x118] sm:$0xff]  }
  0x79   : > { %13787 = vmatprep.subr.bf16.mxu1 %v15406_v20 }
  0x7b   : > { %13608 = vmatpush3.bf16.msra.mxu0 %v15405_v16  ;;  %v15445_v16 = vld [vmem:[%s19019_s1 + $0x120] sm:$0xff]  }
  0x7c   : > { %13788 = vmatpush3.bf16.msra.mxu1 %v15406_v20  ;;  %13609 = vmatprep.subr.bf16.mxu0 %v15407_v21  ;;  %v15446_v20 = vld [vmem:[%s19019_s1 + $0x120] sm:$0xff]  }
  0x7d   : > { %13789 = vmatprep.subr.bf16.mxu1 %v15408_v22 }
  0x7f   : > { %13610 = vmatpush3.bf16.msra.mxu0 %v15407_v21  ;;  %v15447_v21 = vld [vmem:[%s19019_s1 + $0x128] sm:$0xff]  }
  0x80   : > { %13790 = vmatpush3.bf16.msra.mxu1 %v15408_v22  ;;  %13611 = vmatprep.subr.bf16.mxu0 %v15409_v23  ;;  %v16697_v22 = vld [vmem:[%s16418_s9 + $0x24] ss:$0 sps:$4 sm:$0x11]  }
  0x81   : > { %13791 = vmatprep.subr.bf16.mxu1 %v15410_v24  ;;  %v864_v29 = vshll.u32 %v16697_v22, 16  ;;  %v995_v2 = vrot.slane %v16697_v22, 1 }
  0x83   : > { %13612 = vmatpush3.bf16.msra.mxu0 %v15409_v23  ;;  %v16700_v23 = vld [vmem:[%s16418_s9 + $0x38] ss:$0 sps:$4 sm:$0x11]  }
  0x84   : > { %13792 = vmatpush3.bf16.msra.mxu1 %v15410_v24  ;;  %13613 = vmatprep.subr.bf16.mxu0 %v15411_v25  ;;  %v15448_v24 = vld [vmem:[%s19019_s1 + $0x128] sm:$0xff]   ;;  %v2144_v31 = vshll.u32 %v16700_v23, 16 }
  0x85   : > { %13793 = vmatprep.subr.bf16.mxu1 %v15412_v26 }
  0x87   : > { %13614 = vmatpush3.bf16.msra.mxu0 %v15411_v25  ;;  %v15449_v25 = vld [vmem:[%s19019_s1 + $0x130] sm:$0xff]  }
  0x88   : > { %13794 = vmatpush3.bf16.msra.mxu1 %v15412_v26  ;;  %13615 = vmatprep.subr.bf16.mxu0 %v15413_v27  ;;  %v15450_v26 = vld [vmem:[%s19019_s1 + $0x130] sm:$0xff]  }
  0x89   : > { %13795 = vmatprep.subr.bf16.mxu1 %v15414_v28 }
  0x8b   : > { %13616 = vmatpush3.bf16.msra.mxu0 %v15413_v27  ;;  %v15451_v27 = vld [vmem:[%s19019_s1 + $0x138] sm:$0xff]  }
  0x8c   : > { %13796 = vmatpush3.bf16.msra.mxu1 %v15414_v28  ;;  %13621 = vmatprep.subr.bf16.mxu0 %v15416_v30  ;;  %v860_v28 = vshrl.u32 %v16640_v55, 16 }
  0x8d   : > { %13801 = vmatprep.subr.bf16.mxu1 %v15418_v32 }
  0x8e   : > { %13618 = vmatmul.mubr.bf16.vlgmr.msra.gmra.mrb[0].mxu0 %v571_v33  ;;  %v11067_v33 = vld [vmem:[%s16418_s9 + $0x28] sm:$0xe] }
  0x8f   : > { %13622 = vmatpush3.bf16.msra.mxu0 %v15416_v30  ;;  %13798 = vmatmul.mubr.bf16.vlgmr.msra.gmra.mrb[0].mxu1 %v1857_v34  ;;  %v2140_v30 = vshrl.u32 %v16643_v57, 16  ;;  %v15452_v34 = vld [vmem:[%s19019_s1 + $0x138] sm:$0xff]  }
  0x90   : > { %13802 = vmatpush3.bf16.msra.mxu1 %v15418_v32  ;;  %13623 = vmatprep.subr.bf16.mxu0 %v15419_v35  ;;  %v10818_v32 = vld [vmem:[%s16418_s9 + $0x14] sm:$0xe]  ;;  %v15466_v57 = vld [vmem:[%s19019_s1 + $0x158] sm:$0xff]  }
  0x91   : > { %13803 = vmatprep.subr.bf16.mxu1 %v15420_v36  ;;  %13637 = vmatprep.mubr.bf16.mxu0 %v15433_v37  ;;  %v862_v37 = vor.u32 %v860_v28, %v16660_v7  ;;  %v15490_v28 = vld [vmem:[%s19019_s1 + $0x1b0] sm:$0xff]  }
  0x92   : > { %13817 = vmatprep.mubr.bf16.mxu1 %v15435_v38  ;;  %v11084_v38 = vcombine.low %v11067_v33, %v16626_v49  ;;  %v15491_v33 = vld [vmem:[%s19019_s1 + $0x1b8] sm:$0xff]  }
  0x93   : > { %13624 = vmatpush3.bf16.msra.mxu0 %v15419_v35  ;;  %v866_v35 = vrot.slane %v864_v29, 1 }
  0x94   : > { %13804 = vmatpush3.bf16.msra.mxu1 %v15420_v36  ;;  %13625 = vmatprep.subr.bf16.mxu0 %v15421_v39  ;;  %v10835_v36 = vcombine.low %v10818_v32, %v16622_v47  ;;  %v2271_v47 = vrot.slane %v11084_v38, 1 }
  0x95   : > { %13805 = vmatprep.subr.bf16.mxu1 %v15422_v40  ;;  %v867_v45 = vsel %vm326_vm0, %v862_v37, %v866_v35 }
  0x97   : > { %13626 = vmatpush3.bf16.msra.mxu0 %v15421_v39  ;;  %v15455_v39 = vld [vmem:[%s19019_s1 + $0x140] sm:$0xff]  }
  0x98   : > { %13806 = vmatpush3.bf16.msra.mxu1 %v15422_v40  ;;  %13627 = vmatprep.subr.bf16.mxu0 %v15423_v41  ;;  %v2142_v40 = vor.u32 %v2140_v30, %v16663_v10  ;;  %v15493_v10 = vld [vmem:[%s16418_s9 + $0x28] sm:$0xff]  }
  0x99   : > { %13807 = vmatprep.subr.bf16.mxu1 %v15424_v42 }
  0x9b   : > { %13628 = vmatpush3.bf16.msra.mxu0 %v15423_v41  ;;  %v2146_v41 = vrot.slane %v2144_v31, 1  ;;  %v16848_v31 = vld [vmem:[%s16418_s9 + $0x44] sm:$0xff]  }
  0x9c   : > { %13808 = vmatpush3.bf16.msra.mxu1 %v15424_v42  ;;  %13629 = vmatprep.subr.bf16.mxu0 %v15425_v43  ;;  %v15458_v42 = vld [vmem:[%s19019_s1 + $0x140] sm:$0xff]   ;;  %v2558_v38 = vshll.u32 %v16848_v31, 16 }
  0x9d   : > { %13809 = vmatprep.subr.bf16.mxu1 %v15426_v44  ;;  %v2147_v49 = vsel %vm326_vm0, %v2142_v40, %v2146_v41  ;;  %v15496_v40 = vld [vmem:[%s19019_s1 + $0x1c0] sm:$0xff]   ;;  %v15497_v41 = vld [vmem:[%s16418_s9 + $0x30] sm:$0xff]  }
  0x9f   : > { %13630 = vmatpush3.bf16.msra.mxu0 %v15425_v43  ;;  %v992_v43 = vrot.slane %v10835_v36, 1 }
  0xa0   : > { %13810 = vmatpush3.bf16.msra.mxu1 %v15426_v44  ;;  %13631 = vmatprep.subr.bf16.mxu0 %v15427_v46  ;;  %v993_v44 = vrot.slane %v16640_v55, 1  ;;  %v15481_v55 = vld [vmem:[%s19019_s1 + $0x190] sm:$0xff]  }
  0xa1   : > { %13811 = vmatprep.subr.bf16.mxu1 %v15428_v50 }
  0xa2   : > { %v994_v51 = vsel %vm566_vm1, %v992_v43, %v993_v44  ;;  %v996_v6 = vsel %vm566_vm1, %v993_v44, %v995_v2  ;;  %v16866_v43 = vrot.slane %v2558_v38, 1  ;;  %v15498_v44 = vld [vmem:[%s16418_s9 + $0x44] sm:$0xff]  }
  0xa3   : > { %13632 = vmatpush3.bf16.msra.mxu0 %v15427_v46  ;;  %v15461_v46 = vld [vmem:[%s19019_s1 + $0x148] sm:$0xff]  }
  0xa4   : > { %13812 = vmatpush3.bf16.msra.mxu1 %v15428_v50  ;;  %13633 = vmatprep.subr.bf16.mxu0 %v15429_v52  ;;  %v15462_v50 = vld [vmem:[%s19019_s1 + $0x148] sm:$0xff]  }
  0xa5   : > { %13813 = vmatprep.subr.bf16.mxu1 %v15430_v54  ;;  %v10908_v2 = vld [vmem:[%s16418_s9 + $0x28] sm:$0xe] }
  0xa6   : > { %v15529_v38 = vld [vmem:[%s19019_s1 + $0x228] sm:$0xff]  }
  0xa7   : > { %13634 = vmatpush3.bf16.msra.mxu0 %v15429_v52  ;;  %v2273_v52 = vsel %vm566_vm1, %v2271_v47, %v2272_v48  ;;  %v15499_v47 = vld [vmem:[%s19019_s1 + $0x1c8] sm:$0xff]  }
  0xa8   : > { %13814 = vmatpush3.bf16.msra.mxu1 %v15430_v54  ;;  %13635 = vmatprep.subr.bf16.mxu0 %v15431_v58  ;;  %v15464_v54 = vld [vmem:[%s19019_s1 + $0x150] sm:$0xff]  }
  0xa9   : > { %13815 = vmatprep.subr.bf16.mxu1 %v15432_v60 }
  0xab   : > { %13636 = vmatpush3.bf16.msra.mxu0 %v15431_v58  ;;  %v15467_v58 = vld [vmem:[%s19019_s1 + $0x160] sm:$0xff]  }
  0xac   : > { %13816 = vmatpush3.bf16.msra.mxu1 %v15432_v60  ;;  %13641 = vmatprep.subr.bf16.mxu0 %v15434_v3  ;;  %v15469_v60 = vld [vmem:[%s19019_s1 + $0x168] sm:$0xff]  }
  0xad   : > { %13821 = vmatprep.subr.bf16.mxu1 %v15436_v4 }
  0xae   : > { %13638 = vmatmul.mubr.bf16.vlgmr.msra.gmra.mrb[0].mxu0 %v15437_v5  ;;  %v15478_v5 = vld [vmem:[%s19019_s1 + $0x180] sm:$0xff]  }
  0xaf   : > { %13642 = vmatpush3.bf16.msra.mxu0 %v15434_v3  ;;  %13818 = vmatmul.mubr.bf16.vlgmr.msra.gmra.mrb[0].mxu1 %v15438_v8  ;;  %v15476_v3 = vld [vmem:[%s19019_s1 + $0x180] sm:$0xff]   ;;  %v15479_v8 = vld [vmem:[%s19019_s1 + $0x188] sm:$0xff]  }
  0xb0   : > { %13822 = vmatpush3.bf16.msra.mxu1 %v15436_v4  ;;  %13643 = vmatprep.subr.bf16.mxu0 %v15439_v11  ;;  %v2274_v4 = vrot.slane %v16700_v23, 1  ;;  %v15488_v23 = vld [vmem:[%s19019_s1 + $0x1a8] sm:$0xff]  }
  0xb1   : > { %13823 = vmatprep.subr.bf16.mxu1 %v15440_v12  ;;  %13657 = vmatprep.mubr.bf16.mxu0 %v859_v13  ;;  %v15483_v13 = vld [vmem:[%s19019_s1 + $0x198] sm:$0xff]  }
  0xb2   : > { %13837 = vmatprep.mubr.bf16.mxu1 %v2139_v14  ;;  %v2275_v7 = vsel %vm566_vm1, %v2272_v48, %v2274_v4  ;;  %v15484_v14 = vld [vmem:[%s19019_s1 + $0x198] sm:$0xff]   ;;  %v15500_v48 = vld [vmem:[%s19019_s1 + $0x1c8] sm:$0xff]  }
  0xb3   : > { %13644 = vmatpush3.bf16.msra.mxu0 %v15439_v11  ;;  %v15495_v11 = vld [vmem:[%s16418_s9 + $0x3c] sm:$0xff]  }
  0xb4   : > { %13824 = vmatpush3.bf16.msra.mxu1 %v15440_v12  ;;  %13645 = vmatprep.subr.bf16.mxu0 %v15441_v15  ;;  %v15482_v12 = vld [vmem:[%s19019_s1 + $0x190] sm:$0xff]   ;;  %v15511_v4 = vld [vmem:[%s19019_s1 + $0x1f8] sm:$0xff]  }
  0xb5   : > { %13825 = vmatprep.subr.bf16.mxu1 %v15442_v17 }
  0xb7   : > { %13646 = vmatpush3.bf16.msra.mxu0 %v15441_v15  ;;  %v10876_v15 = vld [vmem:[%s16418_s9 + $0x28] sm:$0xf] }
  0xb8   : > { %13826 = vmatpush3.bf16.msra.mxu1 %v15442_v17  ;;  %13647 = vmatprep.subr.bf16.mxu0 %v15443_v18  ;;  %v15485_v17 = vld [vmem:[%s19019_s1 + $0x1a0] sm:$0xff]  }
  0xb9   : > { %13827 = vmatprep.subr.bf16.mxu1 %v15444_v19 }
  0xbb   : > { %13648 = vmatpush3.bf16.msra.mxu0 %v15443_v18  ;;  %v16820_v18 = vld [vmem:[%s16418_s9 + $0x2c] sm:$0xf] }
  0xbc   : > { %13828 = vmatpush3.bf16.msra.mxu1 %v15444_v19  ;;  %13649 = vmatprep.subr.bf16.mxu0 %v15445_v16  ;;  %v15486_v19 = vld [vmem:[%s19019_s1 + $0x1a0] sm:$0xff]   ;;  %v10897_v22 = vcombine.low %v10876_v15, %v16820_v18 }
  0xbd   : > { %13829 = vmatprep.subr.bf16.mxu1 %v15446_v20 }
  0xbe   : > { %v1276_v29 = vshll.u32 %v10897_v22, 16 }
  0xbf   : > { %13650 = vmatpush3.bf16.msra.mxu0 %v15445_v16  ;;  %v11125_v16 = vld [vmem:[%s16418_s9 + $0x3c] sm:$0xf] }
  0xc0   : > { %13830 = vmatpush3.bf16.msra.mxu1 %v15446_v20  ;;  %13651 = vmatprep.subr.bf16.mxu0 %v15447_v21  ;;  %v16827_v20 = vld [vmem:[%s16418_s9 + $0x40] sm:$0xf]  ;;  %v1278_v35 = vrot.slane %v1276_v29, 1  ;;  %v15526_v29 = vld [vmem:[%s19019_s1 + $0x218] sm:$0xff]  }
  0xc1   : > { %13831 = vmatprep.subr.bf16.mxu1 %v15448_v24 }
  0xc3   : > { %13652 = vmatpush3.bf16.msra.mxu0 %v15447_v21  ;;  %v15487_v21 = vld [vmem:[%s19019_s1 + $0x1a8] sm:$0xff]  }
  0xc4   : > { %13832 = vmatpush3.bf16.msra.mxu1 %v15448_v24  ;;  %13653 = vmatprep.subr.bf16.mxu0 %v15449_v25  ;;  %v16837_v24 = vld [vmem:[%s16418_s9 + $0x30] sm:$0xff]  }
  0xc5   : > { %13833 = vmatprep.subr.bf16.mxu1 %v15450_v26  ;;  %v1281_v30 = vshll.u32 %v16837_v24, 16 }
  0xc7   : > { %13654 = vmatpush3.bf16.msra.mxu0 %v15449_v25  ;;  %v1274_v25 = vshrl.u32 %v10897_v22, 16  ;;  %v15522_v22 = vld [vmem:[%s19019_s1 + $0x208] sm:$0xff]  }
  0xc8   : > { %13834 = vmatpush3.bf16.msra.mxu1 %v15450_v26  ;;  %13655 = vmatprep.subr.bf16.mxu0 %v15451_v27  ;;  %v11146_v26 = vcombine.low %v11125_v16, %v16827_v20 }
  0xc9   : > { %13835 = vmatprep.subr.bf16.mxu1 %v15452_v34 }
  0xca   : > { %v2553_v32 = vshll.u32 %v11146_v26, 16  ;;  %v2551_v36 = vshrl.u32 %v11146_v26, 16  ;;  %v15523_v26 = vld [vmem:[%s19019_s1 + $0x210] sm:$0xff]  }
  0xcb   : > { %13656 = vmatpush3.bf16.msra.mxu0 %v15451_v27  ;;  %v15489_v27 = vld [vmem:[%s19019_s1 + $0x1b0] sm:$0xff]  }
  0xcc   : > { %13836 = vmatpush3.bf16.msra.mxu1 %v15452_v34  ;;  %13661 = vmatprep.subr.bf16.mxu0 %v15455_v39  ;;  %v15492_v34 = vld [vmem:[%s19019_s1 + $0x1b8] sm:$0xff]   ;;  %v2555_v37 = vrot.slane %v2553_v32, 1  ;;  %v11191_v32 = vld [vmem:[%s16418_s9 + $0x28] sm:$0xf] }
  0xcd   : > { %13841 = vmatprep.subr.bf16.mxu1 %v15458_v42 }
  0xce   : > { %13658 = vmatmul.mubr.bf16.vlgmr.msra.gmra.mrb[0].mxu0 %v867_v45  ;;  %v1279_v45 = vor.u32 %v1278_v35, %v1274_v25  ;;  %v15528_v35 = vld [vmem:[%s19019_s1 + $0x220] sm:$0xff]  }
  0xcf   : > { %13662 = vmatpush3.bf16.msra.mxu0 %v15455_v39  ;;  %13838 = vmatmul.mubr.bf16.vlgmr.msra.gmra.mrb[0].mxu1 %v2147_v49  ;;  %v15494_v39 = vld [vmem:[%s19019_s1 + $0x1c0] sm:$0xff]  }
  0xd0   : > { %13842 = vmatpush3.bf16.msra.mxu1 %v15458_v42  ;;  %13663 = vmatprep.subr.bf16.mxu0 %v15461_v46  ;;  %v16864_v42 = vrot.slane %v1281_v30, 1 }
  0xd1   : > { %13843 = vmatprep.subr.bf16.mxu1 %v15462_v50  ;;  %13677 = vmatprep.mubr.bf16.mxu0 %v994_v51  ;;  %v15501_v51 = vld [vmem:[%s19019_s1 + $0x1d0] sm:$0xff]  }
  0xd2   : > { %13857 = vmatprep.mubr.bf16.mxu1 %v2273_v52  ;;  %v1284_v49 = vsel %vm326_vm0, %v1279_v45, %v16864_v42  ;;  %v15502_v52 = vld [vmem:[%s19019_s1 + $0x1d0] sm:$0xff]  }
  0xd3   : > { %13664 = vmatpush3.bf16.msra.mxu0 %v15461_v46  ;;  %v2556_v46 = vor.u32 %v2555_v37, %v2551_v36  ;;  %v11443_v36 = vld [vmem:[%s16418_s9 + $0x3c] sm:$0xf]  ;;  %v16978_v37 = vld [vmem:[%s16418_s9 + $0x40] sm:$0xf]  ;;  %v15531_v45 = vld [vmem:[%s19019_s1 + $0x230] sm:$0xff]  }
  0xd4   : > { %13844 = vmatpush3.bf16.msra.mxu1 %v15462_v50  ;;  %13665 = vmatprep.subr.bf16.mxu0 %v15463_v53 }
  0xd5   : > { %13845 = vmatprep.subr.bf16.mxu1 %v15464_v54  ;;  %v2561_v50 = vsel %vm326_vm0, %v2556_v46, %v16866_v43  ;;  %v15532_v46 = vld [vmem:[%s19019_s1 + $0x230] sm:$0xff]  }
  0xd7   : > { %13666 = vmatpush3.bf16.msra.mxu0 %v15463_v53  ;;  %v15503_v53 = vld [vmem:[%s19019_s1 + $0x1d8] sm:$0xff]  }
  0xd8   : > { %13846 = vmatpush3.bf16.msra.mxu1 %v15464_v54  ;;  %13667 = vmatprep.subr.bf16.mxu0 %v15465_v56  ;;  %v15504_v54 = vld [vmem:[%s19019_s1 + $0x1d8] sm:$0xff]  }
  0xd9   : > { %13847 = vmatprep.subr.bf16.mxu1 %v15466_v57 }
  0xdb   : > { %13668 = vmatpush3.bf16.msra.mxu0 %v15465_v56  ;;  %v15505_v56 = vld [vmem:[%s19019_s1 + $0x1e0] sm:$0xff]  }
  0xdc   : > { %13848 = vmatpush3.bf16.msra.mxu1 %v15466_v57  ;;  %13669 = vmatprep.subr.bf16.mxu0 %v15467_v58  ;;  %v15506_v57 = vld [vmem:[%s19019_s1 + $0x1e0] sm:$0xff]  }
  0xdd   : > { %13849 = vmatprep.subr.bf16.mxu1 %v15468_v59 }
  0xdf   : > { %13670 = vmatpush3.bf16.msra.mxu0 %v15467_v58  ;;  %v16898_v58 = vld [vmem:[%s16418_s9 + $0x38] ss:$0 sps:$4 sm:$0x11]  }
  0xe0   : > { %13850 = vmatpush3.bf16.msra.mxu1 %v15468_v59  ;;  %13671 = vmatprep.subr.bf16.mxu0 %v15469_v60  ;;  %v15507_v59 = vld [vmem:[%s19019_s1 + $0x1e8] sm:$0xff]   ;;  %v1420_v30 = vrot.slane %v16898_v58, 1 }
  0xe1   : > { %13851 = vmatprep.subr.bf16.mxu1 %v15470_v61 }
  0xe3   : > { %13672 = vmatpush3.bf16.msra.mxu0 %v15469_v60  ;;  %v15508_v60 = vld [vmem:[%s19019_s1 + $0x1e8] sm:$0xff]  }
  0xe4   : > { %13852 = vmatpush3.bf16.msra.mxu1 %v15470_v61  ;;  %13673 = vmatprep.subr.bf16.mxu0 %v15471_v62  ;;  %v1285_v61 = vshrl.u32 %v16837_v24, 16 }
  0xe5   : > { %13853 = vmatprep.subr.bf16.mxu1 %v15472_v63 }
  0xe7   : > { %13674 = vmatpush3.bf16.msra.mxu0 %v15471_v62  ;;  %v1289_v62 = vshll.u32 %v16898_v58, 16  ;;  %v15537_v58 = vld [vmem:[%s19019_s1 + $0x40] sm:$0xff]  }
  0xe8   : > { %13854 = vmatpush3.bf16.msra.mxu1 %v15472_v63  ;;  %13675 = vmatprep.subr.bf16.mxu0 %v15473_v0  ;;  %v15509_v63 = vld [vmem:[%s19019_s1 + $0x1f0] sm:$0xff]  }
  0xe9   : > { %13855 = vmatprep.subr.bf16.mxu1 %v15474_v1 }
  0xeb   : > { %13676 = vmatpush3.bf16.msra.mxu0 %v15473_v0  ;;  %v16912_v0 = vld [vmem:[%s16418_s9 + $0x4c] ss:$0 sps:$4 sm:$0x11]  }
  0xec   : > { %13856 = vmatpush3.bf16.msra.mxu1 %v15474_v1  ;;  %13681 = vmatprep.subr.bf16.mxu0 %v15476_v3  ;;  %v15510_v1 = vld [vmem:[%s19019_s1 + $0x1f0] sm:$0xff]  }
  0xed   : > { %13861 = vmatprep.subr.bf16.mxu1 %v15478_v5 }
  0xee   : > { %13678 = vmatmul.mubr.bf16.vlgmr.msra.gmra.mrb[0].mxu0 %v996_v6  ;;  %v1291_v6 = vrot.slane %v1289_v62, 1 }
  0xef   : > { %13682 = vmatpush3.bf16.msra.mxu0 %v15476_v3  ;;  %13858 = vmatmul.mubr.bf16.vlgmr.msra.gmra.mrb[0].mxu1 %v2275_v7  ;;  %v11157_v3 = vld [vmem:[%s16418_s9 + $0x3c] sm:$0xe]  ;;  %v2562_v7 = vshrl.u32 %v16848_v31, 16 }
  0xf0   : > { %13862 = vmatpush3.bf16.msra.mxu1 %v15478_v5  ;;  %13683 = vmatprep.subr.bf16.mxu0 %v15479_v8  ;;  %v15512_v5 = vld [vmem:[%s19019_s1 + $0x1f8] sm:$0xff]  }
  0xf1   : > { %13863 = vmatprep.subr.bf16.mxu1 %v15480_v9  ;;  %13697 = vmatprep.mubr.bf16.mxu0 %v15493_v10  ;;  %v11174_v10 = vcombine.low %v11157_v3, %v16827_v20  ;;  %v15540_v3 = vld [vmem:[%s19019_s1 + $0x48] sm:$0xff]  }
  0xf2   : > { %13877 = vmatprep.mubr.bf16.mxu1 %v15495_v11  ;;  %v1287_v11 = vor.u32 %v1285_v61, %v16864_v42  ;;  %v16991_v42 = vld [vmem:[%s16418_s9 + $0x30] sm:$0xff]  }
  0xf3   : > { %13684 = vmatpush3.bf16.msra.mxu0 %v15479_v8  ;;  %v2566_v8 = vshll.u32 %v16912_v0, 16 }
  0xf4   : > { %13864 = vmatpush3.bf16.msra.mxu1 %v15480_v9  ;;  %13685 = vmatprep.subr.bf16.mxu0 %v15481_v55  ;;  %v10925_v9 = vcombine.low %v10908_v2, %v16820_v18  ;;  %v2693_v18 = vrot.slane %v11174_v10, 1  ;;  %v1292_v16 = vsel %vm326_vm0, %v1287_v11, %v1291_v6  ;;  %v15539_v2 = vld [vmem:[%s19019_s1 + $0x48] sm:$0xff]   ;;  %v15543_v6 = vld [vmem:[%s19019_s1 + $0x58] sm:$0xff]  }
  0xf5   : > { %13865 = vmatprep.subr.bf16.mxu1 %v15482_v12  ;;  %v15547_v10 = vld [vmem:[%s19019_s1 + $0x68] sm:$0xff]  }
  0xf6   : > { %v1417_v15 = vrot.slane %v10925_v9, 1  ;;  %v15546_v9 = vld [vmem:[%s19019_s1 + $0x60] sm:$0xff]   ;;  %v15548_v11 = vld [vmem:[%s19019_s1 + $0x68] sm:$0xff]  }
  0xf7   : > { %13686 = vmatpush3.bf16.msra.mxu0 %v15481_v55  ;;  %v15515_v55 = vld [vmem:[%s19019_s1 + $0x200] sm:$0xff]  }
  0xf8   : > { %13866 = vmatpush3.bf16.msra.mxu1 %v15482_v12  ;;  %13687 = vmatprep.subr.bf16.mxu0 %v15483_v13  ;;  %v15518_v12 = vld [vmem:[%s19019_s1 + $0x200] sm:$0xff]  }
  0xf9   : > { %13867 = vmatprep.subr.bf16.mxu1 %v15484_v14 }
  0xfb   : > { %13688 = vmatpush3.bf16.msra.mxu0 %v15483_v13  ;;  %v2564_v13 = vor.u32 %v2562_v7, %v16866_v43  ;;  %v15544_v7 = vld [vmem:[%s19019_s1 + $0x58] sm:$0xff]  }
  0xfc   : > { %13868 = vmatpush3.bf16.msra.mxu1 %v15484_v14  ;;  %13689 = vmatprep.subr.bf16.mxu0 %v15485_v17  ;;  %v2568_v14 = vrot.slane %v2566_v8, 1  ;;  %v15545_v8 = vld [vmem:[%s19019_s1 + $0x60] sm:$0xff]  }
  0xfd   : > { %13869 = vmatprep.subr.bf16.mxu1 %v15486_v19 }
  0xfe   : > { %v2569_v20 = vsel %vm326_vm0, %v2564_v13, %v2568_v14  ;;  %v15549_v13 = vld [vmem:[%s19019_s1 + $0x70] sm:$0xff]  }
  0xff   : > { %13690 = vmatpush3.bf16.msra.mxu0 %v15485_v17  ;;  %v1418_v17 = vrot.slane %v16837_v24, 1  ;;  %v15550_v14 = vld [vmem:[%s19019_s1 + $0x70] sm:$0xff]  }
 0x100   : > { %13870 = vmatpush3.bf16.msra.mxu1 %v15486_v19  ;;  %13691 = vmatprep.subr.bf16.mxu0 %v15487_v21  ;;  %v2694_v19 = vrot.slane %v16848_v31, 1 }
 0x101   : > { %13871 = vmatprep.subr.bf16.mxu1 %v15488_v23 }
 0x102   : > { %v2695_v25 = vsel %vm566_vm1, %v2693_v18, %v2694_v19  ;;  %v15551_v18 = vld [vmem:[%s19019_s1 + $0x78] sm:$0xff]  }
 0x103   : > { %13692 = vmatpush3.bf16.msra.mxu0 %v15487_v21  ;;  %v15521_v21 = vld [vmem:[%s19019_s1 + $0x208] sm:$0xff]  }
 0x104   : > { %13872 = vmatpush3.bf16.msra.mxu1 %v15488_v23  ;;  %13693 = vmatprep.subr.bf16.mxu0 %v15489_v27  ;;  %v1419_v23 = vsel %vm566_vm1, %v1417_v15, %v1418_v17 }
 0x105   : > { %13873 = vmatprep.subr.bf16.mxu1 %v15490_v28 }
 0x107   : > { %13694 = vmatpush3.bf16.msra.mxu0 %v15489_v27  ;;  %v15524_v27 = vld [vmem:[%s19019_s1 + $0x210] sm:$0xff]  }
 0x108   : > { %13874 = vmatpush3.bf16.msra.mxu1 %v15490_v28  ;;  %13695 = vmatprep.subr.bf16.mxu0 %v15491_v33  ;;  %v15525_v28 = vld [vmem:[%s19019_s1 + $0x218] sm:$0xff]  }
 0x109   : > { %13875 = vmatprep.subr.bf16.mxu1 %v15492_v34 }
 0x10b   : > { %13696 = vmatpush3.bf16.msra.mxu0 %v15491_v33  ;;  %v16968_v33 = vld [vmem:[%s16418_s9 + $0x2c] sm:$0xf] }
 0x10c   : > { %13876 = vmatpush3.bf16.msra.mxu1 %v15492_v34  ;;  %13701 = vmatprep.subr.bf16.mxu0 %v15494_v39  ;;  %v15527_v34 = vld [vmem:[%s19019_s1 + $0x220] sm:$0xff]  }
 0x10d   : > { %13881 = vmatprep.subr.bf16.mxu1 %v15496_v40 }
 0x10e   : > { %13698 = vmatmul.mubr.bf16.vlgmr.msra.gmra.mrb[0].mxu0 %v15497_v41  ;;  %v2696_v41 = vrot.slane %v16912_v0, 1 }
 0x10f   : > { %13702 = vmatpush3.bf16.msra.mxu0 %v15494_v39  ;;  %13878 = vmatmul.mubr.bf16.vlgmr.msra.gmra.mrb[0].mxu1 %v15498_v44  ;;  %v16984_v39 = vcombine.low %v11191_v32, %v16968_v33  ;;  %v16995_v44 = vcombine.low %v11443_v36, %v16978_v37  ;;  %v15562_v32 = vld [vmem:[%s19019_s1 + $0x8] sm:$0xff]   ;;  %v15565_v36 = vld [vmem:[%s19019_s1 + $0x18] sm:$0xff]  }
 0x110   : > { %13882 = vmatpush3.bf16.msra.mxu1 %v15496_v40  ;;  %13703 = vmatprep.subr.bf16.mxu0 %v15499_v47  ;;  %v15530_v40 = vld [vmem:[%s19019_s1 + $0x228] sm:$0xff]  }
 0x111   : > { %13883 = vmatprep.subr.bf16.mxu1 %v15500_v48  ;;  %13717 = vmatprep.mubr.bf16.mxu0 %v1284_v49  ;;  %v2887_v43 = vshrl.u32 %v16984_v39, 16  ;;  %v17006_v49 = vld [vmem:[%s16418_s9 + $0x44] sm:$0xff]  }
 0x112   : > { %13897 = vmatprep.mubr.bf16.mxu1 %v2561_v50  ;;  %v4160_v50 = vshll.u32 %v16995_v44, 16 }
 0x113   : > { %13704 = vmatpush3.bf16.msra.mxu0 %v15499_v47  ;;  %v2889_v47 = vshll.u32 %v16984_v39, 16 }
 0x114   : > { %13884 = vmatpush3.bf16.msra.mxu1 %v15500_v48  ;;  %13705 = vmatprep.subr.bf16.mxu0 %v15501_v51  ;;  %v2894_v48 = vshll.u32 %v16991_v42, 16 }
 0x115   : > { %13885 = vmatprep.subr.bf16.mxu1 %v15502_v52 }
 0x117   : > { %13706 = vmatpush3.bf16.msra.mxu0 %v15501_v51  ;;  %v15533_v51 = vld [vmem:[%s19019_s1 + $0x238] sm:$0xff]  }
 0x118   : > { %13886 = vmatpush3.bf16.msra.mxu1 %v15502_v52  ;;  %13707 = vmatprep.subr.bf16.mxu0 %v15503_v53  ;;  %v15534_v52 = vld [vmem:[%s19019_s1 + $0x238] sm:$0xff]  }
 0x119   : > { %13887 = vmatprep.subr.bf16.mxu1 %v15504_v54 }
 0x11b   : > { %13708 = vmatpush3.bf16.msra.mxu0 %v15503_v53  ;;  %v2891_v53 = vrot.slane %v2889_v47, 1  ;;  %v11483_v47 = vld [vmem:[%s16418_s9 + $0x3c] sm:$0xe] }
 0x11c   : > { %13888 = vmatpush3.bf16.msra.mxu1 %v15504_v54  ;;  %13709 = vmatprep.subr.bf16.mxu0 %v15505_v56  ;;  %v4158_v54 = vshrl.u32 %v16995_v44, 16 }
 0x11d   : > { %13889 = vmatprep.subr.bf16.mxu1 %v15506_v57  ;;  %v2892_v62 = vor.u32 %v2891_v53, %v2887_v43  ;;  %v15570_v43 = vld [vmem:[%s19019_s1 + $0x28] sm:$0xff]   ;;  %v15575_v53 = vld [vmem:[%s19019_s1 + $0x80] sm:$0xff]  }
 0x11f   : > { %13710 = vmatpush3.bf16.msra.mxu0 %v15505_v56  ;;  %v4162_v56 = vrot.slane %v4160_v50, 1  ;;  %v15574_v50 = vld [vmem:[%s19019_s1 + $0x38] sm:$0xff]  }
 0x120   : > { %13890 = vmatpush3.bf16.msra.mxu1 %v15506_v57  ;;  %13711 = vmatprep.subr.bf16.mxu0 %v15507_v59  ;;  %v4165_v57 = vshll.u32 %v17006_v49, 16 }
 0x121   : > { %13891 = vmatprep.subr.bf16.mxu1 %v15508_v60  ;;  %v4163_v0 = vor.u32 %v4162_v56, %v4158_v54  ;;  %v15576_v54 = vld [vmem:[%s19019_s1 + $0x80] sm:$0xff]  }
 0x122   : > { %v17023_v61 = vrot.slane %v4165_v57, 1  ;;  %v3125_v57 = vrot.slane %v16991_v42, 1 }
 0x123   : > { %13712 = vmatpush3.bf16.msra.mxu0 %v15507_v59  ;;  %v15538_v59 = vld [vmem:[%s19019_s1 + $0x40] sm:$0xff]  }
 0x124   : > { %13892 = vmatpush3.bf16.msra.mxu1 %v15508_v60  ;;  %13713 = vmatprep.subr.bf16.mxu0 %v15509_v63  ;;  %v2896_v60 = vrot.slane %v2894_v48, 1  ;;  %v4168_v31 = vsel %vm326_vm0, %v4163_v0, %v17023_v61  ;;  %v15573_v48 = vld [vmem:[%s19019_s1 + $0x38] sm:$0xff]  }
 0x125   : > { %13893 = vmatprep.subr.bf16.mxu1 %v15510_v1  ;;  %v15582_v0 = vld [vmem:[%s19019_s1 + $0x98] sm:$0xff]  }
 0x126   : > { %v2897_v24 = vsel %vm326_vm0, %v2892_v62, %v2896_v60  ;;  %v15579_v62 = vld [vmem:[%s19019_s1 + $0x90] sm:$0xff]  }
 0x127   : > { %13714 = vmatpush3.bf16.msra.mxu0 %v15509_v63  ;;  %v1421_v63 = vsel %vm566_vm1, %v1418_v17, %v1420_v30  ;;  %v17076_v17 = vld [vmem:[%s16418_s9 + $0x4c] ss:$0 sps:$4 sm:$0x11]  }
 0x128   : > { %13894 = vmatpush3.bf16.msra.mxu1 %v15510_v1  ;;  %13715 = vmatprep.subr.bf16.mxu0 %v15511_v4  ;;  %v2697_v1 = vsel %vm566_vm1, %v2694_v19, %v2696_v41  ;;  %v4169_v19 = vshrl.u32 %v17006_v49, 16  ;;  %v15561_v30 = vld [vmem:[%s19019_s1 + $0x8] sm:$0xff]  }
 0x129   : > { %13895 = vmatprep.subr.bf16.mxu1 %v15512_v5  ;;  %v15569_v41 = vld [vmem:[%s19019_s1 + $0x28] sm:$0xff]  }
 0x12b   : > { %13716 = vmatpush3.bf16.msra.mxu0 %v15511_v4  ;;  %v15541_v4 = vld [vmem:[%s19019_s1 + $0x50] sm:$0xff]  }
 0x12c   : > { %13896 = vmatpush3.bf16.msra.mxu1 %v15512_v5  ;;  %13721 = vmatprep.subr.bf16.mxu0 %v15515_v55  ;;  %v15542_v5 = vld [vmem:[%s19019_s1 + $0x50] sm:$0xff]  }
 0x12d   : > { %13901 = vmatprep.subr.bf16.mxu1 %v15518_v12 }
 0x12e   : > { %13718 = vmatmul.mubr.bf16.vlgmr.msra.gmra.mrb[0].mxu0 %v1292_v16  ;;  %v4173_v16 = vshll.u32 %v17076_v17, 16 }
 0x12f   : > { %13722 = vmatpush3.bf16.msra.mxu0 %v15515_v55  ;;  %13898 = vmatmul.mubr.bf16.vlgmr.msra.gmra.mrb[0].mxu1 %v2569_v20  ;;  %v17065_v55 = vld [vmem:[%s16418_s9 + $0x38] ss:$0 sps:$4 sm:$0x11]  }
 0x130   : > { %13902 = vmatpush3.bf16.msra.mxu1 %v15518_v12  ;;  %13723 = vmatprep.subr.bf16.mxu0 %v15521_v21  ;;  %v2898_v12 = vshrl.u32 %v16991_v42, 16  ;;  %v2902_v15 = vshll.u32 %v17065_v55, 16  ;;  %v15552_v20 = vld [vmem:[%s19019_s1 + $0x78] sm:$0xff]  }
 0x131   : > { %13903 = vmatprep.subr.bf16.mxu1 %v15522_v22  ;;  %13737 = vmatprep.mubr.bf16.mxu0 %v1419_v23  ;;  %v15555_v23 = vld [vmem:[%s19019_s1] sm:$0xff]  }
 0x132   : > { %13917 = vmatprep.mubr.bf16.mxu1 %v2695_v25  ;;  %v4171_v25 = vor.u32 %v4169_v19, %v17023_v61  ;;  %v15600_v19 = vld [vmem:[%s19019_s1 + $0xd8] sm:$0xff]  }
 0x133   : > { %13724 = vmatpush3.bf16.msra.mxu0 %v15521_v21  ;;  %v2900_v21 = vor.u32 %v2898_v12, %v2896_v60 }
 0x134   : > { %13904 = vmatpush3.bf16.msra.mxu1 %v15522_v22  ;;  %13725 = vmatprep.subr.bf16.mxu0 %v15523_v26  ;;  %v2904_v22 = vrot.slane %v2902_v15, 1  ;;  %v15597_v15 = vld [vmem:[%s19019_s1 + $0xd0] sm:$0xff]  }
 0x135   : > { %13905 = vmatprep.subr.bf16.mxu1 %v15524_v27 }
 0x137   : > { %13726 = vmatpush3.bf16.msra.mxu0 %v15523_v26  ;;  %v4175_v26 = vrot.slane %v4173_v16, 1  ;;  %v15601_v16 = vld [vmem:[%s19019_s1 + $0xe0] sm:$0xff]  }
 0x138   : > { %13906 = vmatpush3.bf16.msra.mxu1 %v15524_v27  ;;  %13727 = vmatprep.subr.bf16.mxu0 %v15525_v28  ;;  %v15558_v27 = vld [vmem:[%s19019_s1] sm:$0xff]  }
 0x139   : > { %13907 = vmatprep.subr.bf16.mxu1 %v15526_v29 }
 0x13b   : > { %13728 = vmatpush3.bf16.msra.mxu0 %v15525_v28  ;;  %v2905_v28 = vsel %vm326_vm0, %v2900_v21, %v2904_v22  ;;  %v11287_v21 = vld [vmem:[%s16418_s9 + $0x3c] sm:$0xf]  ;;  %v17239_v22 = vld [vmem:[%s16418_s9 + $0x40] sm:$0xf] }
 0x13c   : > { %13908 = vmatpush3.bf16.msra.mxu1 %v15526_v29  ;;  %13729 = vmatprep.subr.bf16.mxu0 %v15527_v34  ;;  %v4176_v29 = vsel %vm326_vm0, %v4171_v25, %v4175_v26  ;;  %v17243_v25 = vld [vmem:[%s16418_s9 + $0x54] sm:$0xf]  ;;  %v15603_v26 = vld [vmem:[%s19019_s1 + $0xe8] sm:$0xff]  }
 0x13d   : > { %13909 = vmatprep.subr.bf16.mxu1 %v15528_v35 }
 0x13f   : > { %13730 = vmatpush3.bf16.msra.mxu0 %v15527_v34  ;;  %v15563_v34 = vld [vmem:[%s19019_s1 + $0x10] sm:$0xff]  }
 0x140   : > { %13910 = vmatpush3.bf16.msra.mxu1 %v15528_v35  ;;  %13731 = vmatprep.subr.bf16.mxu0 %v15529_v38  ;;  %v15564_v35 = vld [vmem:[%s19019_s1 + $0x10] sm:$0xff]  }
 0x141   : > { %13911 = vmatprep.subr.bf16.mxu1 %v15530_v40 }
 0x143   : > { %13732 = vmatpush3.bf16.msra.mxu0 %v15529_v38  ;;  %v15566_v38 = vld [vmem:[%s19019_s1 + $0x18] sm:$0xff]  }
 0x144   : > { %13912 = vmatpush3.bf16.msra.mxu1 %v15530_v40  ;;  %13733 = vmatprep.subr.bf16.mxu0 %v15531_v45  ;;  %v15568_v40 = vld [vmem:[%s19019_s1 + $0x20] sm:$0xff]  }
 0x145   : > { %13913 = vmatprep.subr.bf16.mxu1 %v15532_v46 }
 0x147   : > { %13734 = vmatpush3.bf16.msra.mxu0 %v15531_v45  ;;  %v15572_v45 = vld [vmem:[%s19019_s1 + $0x30] sm:$0xff]  }
 0x148   : > { %13914 = vmatpush3.bf16.msra.mxu1 %v15532_v46  ;;  %13735 = vmatprep.subr.bf16.mxu0 %v15533_v51  ;;  %v11231_v46 = vld [vmem:[%s16418_s9 + $0x28] sm:$0xe] }
 0x149   : > { %13915 = vmatprep.subr.bf16.mxu1 %v15534_v52 }
 0x14b   : > { %13736 = vmatpush3.bf16.msra.mxu0 %v15533_v51  ;;  %v11248_v51 = vcombine.low %v11231_v46, %v16968_v33  ;;  %v4396_v33 = vrot.slane %v17006_v49, 1 }
 0x14c   : > { %13916 = vmatpush3.bf16.msra.mxu1 %v15534_v52  ;;  %13921 = vmatprep.subr.bf16.mxu0 %v15537_v58  ;;  %v11500_v52 = vcombine.low %v11483_v47, %v16978_v37  ;;  %v15577_v37 = vld [vmem:[%s19019_s1 + $0x88] sm:$0xff]  }
 0x14d   : > { %14101 = vmatprep.subr.bf16.mxu1 %v15538_v59  ;;  %v3124_v56 = vrot.slane %v11248_v51, 1  ;;  %v15613_v51 = vld [vmem:[%s16418_s9 + $0x44] sm:$0xff]  }
 0x14e   : > { %13738 = vmatmul.mubr.bf16.vlgmr.msra.gmra.mrb[0].mxu0 %v1421_v63  ;;  %v15580_v63 = vld [vmem:[%s19019_s1 + $0x90] sm:$0xff]  }
 0x14f   : > { %13918 = vmatmul.mubr.bf16.vlgmr.msra.gmra.mrb[0].mxu1 %v2697_v1  ;;  %13922 = vmatpush3.bf16.msra.mxu0 %v15537_v58  ;;  %v4395_v58 = vrot.slane %v11500_v52, 1  ;;  %v3126_v60 = vsel %vm566_vm1, %v3124_v56, %v3125_v57  ;;  %v15583_v1 = vld [vmem:[%s19019_s1 + $0xa0] sm:$0xff]  }
 0x150   : > { %14102 = vmatpush3.bf16.msra.mxu1 %v15538_v59  ;;  %13923 = vmatprep.subr.bf16.mxu0 %v15539_v2  ;;  %v15578_v59 = vld [vmem:[%s19019_s1 + $0x88] sm:$0xff]  }
 0x151   : > { %14103 = vmatprep.subr.bf16.mxu1 %v15540_v3  ;;  %13937 = vmatprep.mubr.bf16.mxu0 %v2897_v24  ;;  %v4397_v61 = vsel %vm566_vm1, %v4395_v58, %v4396_v33  ;;  %v15586_v24 = vld [vmem:[%s19019_s1 + $0xa8] sm:$0xff]  }
 0x152   : > { %14117 = vmatprep.mubr.bf16.mxu1 %v4168_v31  ;;  %v15587_v31 = vld [vmem:[%s19019_s1 + $0xb0] sm:$0xff]   ;;  %v15615_v58 = vld [vmem:[%s19019_s1 + $0x108] sm:$0xff]  }
 0x153   : > { %13924 = vmatpush3.bf16.msra.mxu0 %v15539_v2  ;;  %v15584_v2 = vld [vmem:[%s19019_s1 + $0xa0] sm:$0xff]  }
 0x154   : > { %14104 = vmatpush3.bf16.msra.mxu1 %v15540_v3  ;;  %13925 = vmatprep.subr.bf16.mxu0 %v15541_v4  ;;  %v15585_v3 = vld [vmem:[%s19019_s1 + $0xa8] sm:$0xff]  }
 0x155   : > { %14105 = vmatprep.subr.bf16.mxu1 %v15542_v5 }
 0x157   : > { %13926 = vmatpush3.bf16.msra.mxu0 %v15541_v4  ;;  %v15588_v4 = vld [vmem:[%s19019_s1 + $0xb0] sm:$0xff]  }
 0x158   : > { %14106 = vmatpush3.bf16.msra.mxu1 %v15542_v5  ;;  %13927 = vmatprep.subr.bf16.mxu0 %v15543_v6  ;;  %v15589_v5 = vld [vmem:[%s19019_s1 + $0xb8] sm:$0xff]  }
 0x159   : > { %14107 = vmatprep.subr.bf16.mxu1 %v15544_v7 }
 0x15b   : > { %13928 = vmatpush3.bf16.msra.mxu0 %v15543_v6  ;;  %v15590_v6 = vld [vmem:[%s19019_s1 + $0xb8] sm:$0xff]  }
 0x15c   : > { %14108 = vmatpush3.bf16.msra.mxu1 %v15544_v7  ;;  %13929 = vmatprep.subr.bf16.mxu0 %v15545_v8  ;;  %v3127_v7 = vrot.slane %v17065_v55, 1 }
 0x15d   : > { %14109 = vmatprep.subr.bf16.mxu1 %v15546_v9 }
 0x15e   : > { %v3128_v55 = vsel %vm566_vm1, %v3125_v57, %v3127_v7 }
 0x15f   : > { %13930 = vmatpush3.bf16.msra.mxu0 %v15545_v8  ;;  %v4398_v8 = vrot.slane %v17076_v17, 1  ;;  %v15611_v17 = vld [vmem:[%s16418_s9 + $0x50] sm:$0xff]  }
 0x160   : > { %14110 = vmatpush3.bf16.msra.mxu1 %v15546_v9  ;;  %13931 = vmatprep.subr.bf16.mxu0 %v15547_v10  ;;  %v15592_v9 = vld [vmem:[%s19019_s1 + $0xc0] sm:$0xff]  }
 0x161   : > { %14111 = vmatprep.subr.bf16.mxu1 %v15548_v11  ;;  %v4399_v12 = vsel %vm566_vm1, %v4396_v33, %v4398_v8  ;;  %v15616_v33 = vld [vmem:[%s19019_s1 + $0x108] sm:$0xff]   ;;  %v11319_v8 = vld [vmem:[%s16418_s9 + $0x3c] sm:$0xe] }
 0x163   : > { %13932 = vmatpush3.bf16.msra.mxu0 %v15547_v10  ;;  %v15594_v10 = vld [vmem:[%s19019_s1 + $0xc0] sm:$0xff]  }
 0x164   : > { %14112 = vmatpush3.bf16.msra.mxu1 %v15548_v11  ;;  %13933 = vmatprep.subr.bf16.mxu0 %v15549_v13  ;;  %v15595_v11 = vld [vmem:[%s19019_s1 + $0xc8] sm:$0xff]  }
 0x165   : > { %14113 = vmatprep.subr.bf16.mxu1 %v15550_v14 }
 0x167   : > { %13934 = vmatpush3.bf16.msra.mxu0 %v15549_v13  ;;  %v15596_v13 = vld [vmem:[%s19019_s1 + $0xc8] sm:$0xff]  }
 0x168   : > { %14114 = vmatpush3.bf16.msra.mxu1 %v15550_v14  ;;  %13935 = vmatprep.subr.bf16.mxu0 %v15551_v18  ;;  %v15609_v14 = vld [vmem:[%s16418_s9 + $0x3c] sm:$0xff]  }
 0x169   : > { %14115 = vmatprep.subr.bf16.mxu1 %v15552_v20 }
 0x16b   : > { %13936 = vmatpush3.bf16.msra.mxu0 %v15551_v18  ;;  %v15599_v18 = vld [vmem:[%s19019_s1 + $0xd8] sm:$0xff]  }
 0x16c   : > { %14116 = vmatpush3.bf16.msra.mxu1 %v15552_v20  ;;  %13941 = vmatprep.subr.bf16.mxu0 %v15555_v23  ;;  %v15602_v20 = vld [vmem:[%s19019_s1 + $0xe0] sm:$0xff]  }
 0x16d   : > { %14121 = vmatprep.subr.bf16.mxu1 %v15558_v27 }
 0x16e   : > { %13938 = vmatmul.mubr.bf16.vlgmr.msra.gmra.mrb[4].mxu0 %v2905_v28  ;;  %v11308_v28 = vcombine.low %v11287_v21, %v17239_v22 }
 0x16f   : > { %13942 = vmatpush3.bf16.msra.mxu0 %v15555_v23  ;;  %14118 = vmatmul.mubr.bf16.vlgmr.msra.gmra.mrb[4].mxu1 %v4176_v29  ;;  %v11539_v23 = vld [vmem:[%s16418_s9 + $0x50] sm:$0xf] }
 0x170   : > { %14122 = vmatpush3.bf16.msra.mxu1 %v15558_v27  ;;  %13943 = vmatprep.subr.bf16.mxu0 %v15561_v30  ;;  %v15604_v27 = vld [vmem:[%s19019_s1 + $0xe8] sm:$0xff]   ;;  %v11560_v29 = vcombine.low %v11539_v23, %v17243_v25 }
 0x171   : > { %14123 = vmatprep.subr.bf16.mxu1 %v15562_v32  ;;  %13957 = vmatprep.mubr.bf16.mxu0 %v16984_v39  ;;  %v15567_v39 = vld [vmem:[%s19019_s1 + $0x20] sm:$0xff]  }
 0x172   : > { %14137 = vmatprep.mubr.bf16.mxu1 %v16995_v44  ;;  %v15571_v44 = vld [vmem:[%s19019_s1 + $0x30] sm:$0xff]  }
 0x173   : > { %13944 = vmatpush3.bf16.msra.mxu0 %v15561_v30  ;;  %v15605_v30 = vld [vmem:[%s19019_s1 + $0xf0] sm:$0xff]  }
 0x174   : > { %14124 = vmatpush3.bf16.msra.mxu1 %v15562_v32  ;;  %13945 = vmatprep.subr.bf16.mxu0 %v15563_v34  ;;  %v15606_v32 = vld [vmem:[%s19019_s1 + $0xf0] sm:$0xff]  }
 0x175   : > { %14125 = vmatprep.subr.bf16.mxu1 %v15564_v35 }
 0x177   : > { %13946 = vmatpush3.bf16.msra.mxu0 %v15563_v34  ;;  %v17260_v34 = vld [vmem:[%s16418_s9 + $0x44] sm:$0xff]  }
 0x178   : > { %14126 = vmatpush3.bf16.msra.mxu1 %v15564_v35  ;;  %13947 = vmatprep.subr.bf16.mxu0 %v15565_v36  ;;  %v3402_v35 = vshll.u32 %v11308_v28, 16 }
 0x179   : > { %14127 = vmatprep.subr.bf16.mxu1 %v15566_v38 }
 0x17b   : > { %13948 = vmatpush3.bf16.msra.mxu0 %v15565_v36  ;;  %v4673_v36 = vshll.u32 %v11560_v29, 16 }
 0x17c   : > { %14128 = vmatpush3.bf16.msra.mxu1 %v15566_v38  ;;  %13949 = vmatprep.subr.bf16.mxu0 %v15567_v39  ;;  %v17263_v38 = vld [vmem:[%s16418_s9 + $0x58] sm:$0xff]  }
 0x17d   : > { %14129 = vmatprep.subr.bf16.mxu1 %v15568_v40  ;;  %v4675_v46 = vrot.slane %v4673_v36, 1  ;;  %v4678_v47 = vshll.u32 %v17263_v38, 16  ;;  %v4682_v7 = vshrl.u32 %v17263_v38, 16  ;;  %v4814_v23 = vrot.slane %v17263_v38, 1  ;;  %v15642_v36 = vld [vmem:[%s19019_s1 + $0x158] sm:$0xff]   ;;  %v15643_v38 = vld [vmem:[%s19019_s1 + $0x160] sm:$0xff]  }
 0x17f   : > { %13950 = vmatpush3.bf16.msra.mxu0 %v15567_v39  ;;  %v15607_v39 = vld [vmem:[%s19019_s1 + $0xf8] sm:$0xff]   ;;  %v17283_v57 = vrot.slane %v4678_v47, 1 }
 0x180   : > { %14130 = vmatpush3.bf16.msra.mxu1 %v15568_v40  ;;  %13951 = vmatprep.subr.bf16.mxu0 %v15569_v41  ;;  %v15608_v40 = vld [vmem:[%s19019_s1 + $0xf8] sm:$0xff]  }
 0x181   : > { %14131 = vmatprep.subr.bf16.mxu1 %v15570_v43 }
 0x183   : > { %13952 = vmatpush3.bf16.msra.mxu0 %v15569_v41  ;;  %v3407_v41 = vshll.u32 %v17260_v34, 16 }
 0x184   : > { %14132 = vmatpush3.bf16.msra.mxu1 %v15570_v43  ;;  %13953 = vmatprep.subr.bf16.mxu0 %v15571_v44  ;;  %v3400_v43 = vshrl.u32 %v11308_v28, 16 }
 0x185   : > { %14133 = vmatprep.subr.bf16.mxu1 %v15572_v45 }
 0x187   : > { %13954 = vmatpush3.bf16.msra.mxu0 %v15571_v44  ;;  %v3404_v44 = vrot.slane %v3402_v35, 1  ;;  %v15641_v35 = vld [vmem:[%s19019_s1 + $0x158] sm:$0xff]  }
 0x188   : > { %14134 = vmatpush3.bf16.msra.mxu1 %v15572_v45  ;;  %13955 = vmatprep.subr.bf16.mxu0 %v15573_v48  ;;  %v4671_v45 = vshrl.u32 %v11560_v29, 16 }
 0x189   : > { %14135 = vmatprep.subr.bf16.mxu1 %v15574_v50  ;;  %v3405_v52 = vor.u32 %v3404_v44, %v3400_v43  ;;  %v15647_v43 = vld [vmem:[%s19019_s1 + $0x170] sm:$0xff]  }
 0x18a   : > { %v4676_v56 = vor.u32 %v4675_v46, %v4671_v45  ;;  %v15648_v44 = vld [vmem:[%s19019_s1 + $0x170] sm:$0xff]   ;;  %v15649_v45 = vld [vmem:[%s19019_s1 + $0x178] sm:$0xff]  }
 0x18b   : > { %13956 = vmatpush3.bf16.msra.mxu0 %v15573_v48  ;;  %v15610_v48 = vld [vmem:[%s19019_s1 + $0x100] sm:$0xff]   ;;  %v15650_v46 = vld [vmem:[%s19019_s1 + $0x178] sm:$0xff]  }
 0x18c   : > { %14136 = vmatpush3.bf16.msra.mxu1 %v15574_v50  ;;  %13961 = vmatprep.subr.bf16.mxu0 %v15575_v53  ;;  %v15612_v50 = vld [vmem:[%s19019_s1 + $0x100] sm:$0xff]  }
 0x18d   : > { %14141 = vmatprep.subr.bf16.mxu1 %v15576_v54 }
 0x18e   : > { %13958 = vmatmul.mubr.bf16.vlgmr.msra.gmra.mrb[4].mxu0 %v16991_v42  ;;  %v15581_v42 = vld [vmem:[%s19019_s1 + $0x98] sm:$0xff]  }
 0x18f   : > { %13962 = vmatpush3.bf16.msra.mxu0 %v15575_v53  ;;  %14138 = vmatmul.mubr.bf16.vlgmr.msra.gmra.mrb[4].mxu1 %v17006_v49  ;;  %v15598_v49 = vld [vmem:[%s19019_s1 + $0xd0] sm:$0xff]   ;;  %v17280_v53 = vrot.slane %v3407_v41, 1  ;;  %v15646_v41 = vld [vmem:[%s19019_s1 + $0x168] sm:$0xff]  }
 0x190   : > { %14142 = vmatpush3.bf16.msra.mxu1 %v15576_v54  ;;  %13963 = vmatprep.subr.bf16.mxu0 %v15577_v37  ;;  %v15614_v54 = vld [vmem:[%s16418_s9 + $0x58] sm:$0xff]  }
 0x191   : > { %14143 = vmatprep.subr.bf16.mxu1 %v15578_v59  ;;  %13977 = vmatprep.mubr.bf16.mxu0 %v3126_v60  ;;  %v15617_v60 = vld [vmem:[%s19019_s1 + $0x110] sm:$0xff]  }
 0x192   : > { %14157 = vmatprep.mubr.bf16.mxu1 %v4397_v61  ;;  %v15618_v61 = vld [vmem:[%s19019_s1 + $0x110] sm:$0xff]  }
 0x193   : > { %13964 = vmatpush3.bf16.msra.mxu0 %v15577_v37  ;;  %v3410_v37 = vsel %vm326_vm0, %v3405_v52, %v17280_v53 }
 0x194   : > { %14144 = vmatpush3.bf16.msra.mxu1 %v15578_v59  ;;  %13965 = vmatprep.subr.bf16.mxu0 %v15579_v62  ;;  %v4681_v59 = vsel %vm326_vm0, %v4676_v56, %v17283_v57  ;;  %v15656_v56 = vld [vmem:[%s19019_s1 + $0x188] sm:$0xff]  }
 0x195   : > { %14145 = vmatprep.subr.bf16.mxu1 %v15580_v63 }
 0x197   : > { %13966 = vmatpush3.bf16.msra.mxu0 %v15579_v62  ;;  %v15619_v62 = vld [vmem:[%s19019_s1 + $0x118] sm:$0xff]  }
 0x198   : > { %14146 = vmatpush3.bf16.msra.mxu1 %v15580_v63  ;;  %13967 = vmatprep.subr.bf16.mxu0 %v15581_v42  ;;  %v15620_v63 = vld [vmem:[%s19019_s1 + $0x118] sm:$0xff]  }
 0x199   : > { %14147 = vmatprep.subr.bf16.mxu1 %v15582_v0 }
 0x19b   : > { %13968 = vmatpush3.bf16.msra.mxu0 %v15581_v42  ;;  %v15621_v42 = vld [vmem:[%s19019_s1 + $0x120] sm:$0xff]  }
 0x19c   : > { %14148 = vmatpush3.bf16.msra.mxu1 %v15582_v0  ;;  %13969 = vmatprep.subr.bf16.mxu0 %v15583_v1  ;;  %v15622_v0 = vld [vmem:[%s19019_s1 + $0x120] sm:$0xff]  }
 0x19d   : > { %14149 = vmatprep.subr.bf16.mxu1 %v15584_v2 }
 0x19f   : > { %13970 = vmatpush3.bf16.msra.mxu0 %v15583_v1  ;;  %v15623_v1 = vld [vmem:[%s19019_s1 + $0x128] sm:$0xff]  }
 0x1a0   : > { %14150 = vmatpush3.bf16.msra.mxu1 %v15584_v2  ;;  %13971 = vmatprep.subr.bf16.mxu0 %v15585_v3  ;;  %v15624_v2 = vld [vmem:[%s19019_s1 + $0x128] sm:$0xff]  }
 0x1a1   : > { %14151 = vmatprep.subr.bf16.mxu1 %v15586_v24 }
 0x1a3   : > { %13972 = vmatpush3.bf16.msra.mxu0 %v15585_v3  ;;  %v17320_v3 = vld [vmem:[%s16418_s9 + $0x4c] ss:$0 sps:$4 sm:$0x11]  }
 0x1a4   : > { %14152 = vmatpush3.bf16.msra.mxu1 %v15586_v24  ;;  %13973 = vmatprep.subr.bf16.mxu0 %v15587_v31  ;;  %v3411_v24 = vshrl.u32 %v17260_v34, 16  ;;  %v3545_v47 = vrot.slane %v17320_v3, 1 }
 0x1a5   : > { %14153 = vmatprep.subr.bf16.mxu1 %v15588_v4 }
 0x1a7   : > { %13974 = vmatpush3.bf16.msra.mxu0 %v15587_v31  ;;  %v15625_v31 = vld [vmem:[%s19019_s1 + $0x130] sm:$0xff]  }
 0x1a8   : > { %14154 = vmatpush3.bf16.msra.mxu1 %v15588_v4  ;;  %13975 = vmatprep.subr.bf16.mxu0 %v15589_v5  ;;  %v17327_v4 = vld [vmem:[%s16418_s9 + $0x60] ss:$0 sps:$4 sm:$0x11]  }
 0x1a9   : > { %14155 = vmatprep.subr.bf16.mxu1 %v15590_v6 }
 0x1ab   : > { %13976 = vmatpush3.bf16.msra.mxu0 %v15589_v5  ;;  %v15626_v5 = vld [vmem:[%s19019_s1 + $0x130] sm:$0xff]  }
 0x1ac   : > { %14156 = vmatpush3.bf16.msra.mxu1 %v15590_v6  ;;  %13981 = vmatprep.subr.bf16.mxu0 %v15592_v9  ;;  %v3415_v6 = vshll.u32 %v17320_v3, 16  ;;  %v15664_v3 = vld [vmem:[%s19019_s1 + $0x1a8] sm:$0xff]  }
 0x1ad   : > { %14161 = vmatprep.subr.bf16.mxu1 %v15594_v10 }
 0x1ae   : > { %13978 = vmatmul.mubr.bf16.vlgmr.msra.gmra.mrb[4].mxu0 %v3128_v55  ;;  %v4686_v55 = vshll.u32 %v17327_v4, 16 }
 0x1af   : > { %13982 = vmatpush3.bf16.msra.mxu0 %v15592_v9  ;;  %14158 = vmatmul.mubr.bf16.vlgmr.msra.gmra.mrb[4].mxu1 %v4399_v12  ;;  %v15627_v9 = vld [vmem:[%s19019_s1 + $0x138] sm:$0xff]   ;;  %v11571_v12 = vld [vmem:[%s16418_s9 + $0x50] sm:$0xe] }
 0x1b0   : > { %14162 = vmatpush3.bf16.msra.mxu1 %v15594_v10  ;;  %13983 = vmatprep.subr.bf16.mxu0 %v15595_v11  ;;  %v15628_v10 = vld [vmem:[%s19019_s1 + $0x138] sm:$0xff]  }
 0x1b1   : > { %14163 = vmatprep.subr.bf16.mxu1 %v15596_v13  ;;  %13997 = vmatprep.mubr.bf16.mxu0 %v15609_v14  ;;  %v3413_v14 = vor.u32 %v3411_v24, %v17280_v53  ;;  %v17459_v24 = vld [vmem:[%s16418_s9 + $0x58] sm:$0xff]  }
 0x1b2   : > { %14177 = vmatprep.mubr.bf16.mxu1 %v15611_v17  ;;  %v15631_v17 = vld [vmem:[%s19019_s1 + $0x140] sm:$0xff]  }
 0x1b3   : > { %13984 = vmatpush3.bf16.msra.mxu0 %v15595_v11  ;;  %v3417_v11 = vrot.slane %v3415_v6, 1  ;;  %v15665_v6 = vld [vmem:[%s19019_s1 + $0x1b0] sm:$0xff]  }
 0x1b4   : > { %14164 = vmatpush3.bf16.msra.mxu1 %v15596_v13  ;;  %13985 = vmatprep.subr.bf16.mxu0 %v15597_v15  ;;  %v11336_v13 = vcombine.low %v11319_v8, %v17239_v22  ;;  %v15666_v8 = vld [vmem:[%s19019_s1 + $0x1b0] sm:$0xff]  }
 0x1b5   : > { %14165 = vmatprep.subr.bf16.mxu1 %v15598_v49  ;;  %v3418_v21 = vsel %vm326_vm0, %v3413_v14, %v3417_v11 }
 0x1b7   : > { %13986 = vmatpush3.bf16.msra.mxu0 %v15597_v15  ;;  %v11588_v15 = vcombine.low %v11571_v12, %v17243_v25 }
 0x1b8   : > { %14166 = vmatpush3.bf16.msra.mxu1 %v15598_v49  ;;  %13987 = vmatprep.subr.bf16.mxu0 %v15599_v18  ;;  %v15634_v49 = vld [vmem:[%s19019_s1 + $0x140] sm:$0xff]  }
 0x1b9   : > { %14167 = vmatprep.subr.bf16.mxu1 %v15600_v19  ;;  %v4813_v22 = vrot.slane %v11588_v15, 1 }
 0x1bb   : > { %13988 = vmatpush3.bf16.msra.mxu0 %v15599_v18  ;;  %v4684_v18 = vor.u32 %v4682_v7, %v17283_v57  ;;  %v4815_v29 = vsel %vm566_vm1, %v4813_v22, %v4814_v23  ;;  %v15669_v57 = vld [vmem:[%s16418_s9 + $0x50] sm:$0xff]   ;;  %v10934_v7 = vld [vmem:[%s19020_s2] ss:$0 sm:$0xff] }
 0x1bc   : > { %14168 = vmatpush3.bf16.msra.mxu1 %v15600_v19  ;;  %13989 = vmatprep.subr.bf16.mxu0 %v15601_v16  ;;  %v4688_v19 = vrot.slane %v4686_v55, 1 }
 0x1bd   : > { %14169 = vmatprep.subr.bf16.mxu1 %v15602_v20 }
 0x1be   : > { %v4689_v25 = vsel %vm326_vm0, %v4684_v18, %v4688_v19 }
 0x1bf   : > { %13990 = vmatpush3.bf16.msra.mxu0 %v15601_v16  ;;  %v3542_v16 = vrot.slane %v11336_v13, 1 }
 0x1c0   : > { %14170 = vmatpush3.bf16.msra.mxu1 %v15602_v20  ;;  %13991 = vmatprep.subr.bf16.mxu0 %v15603_v26  ;;  %v3543_v20 = vrot.slane %v17260_v34, 1  ;;  %v15657_v34 = vld [vmem:[%s19019_s1 + $0x190] sm:$0xff]  }
 0x1c1   : > { %14171 = vmatprep.subr.bf16.mxu1 %v15604_v27 }
 0x1c2   : > { %v3544_v28 = vsel %vm566_vm1, %v3542_v16, %v3543_v20  ;;  %v3546_v52 = vsel %vm566_vm1, %v3543_v20, %v3545_v47 }
 0x1c3   : > { %13992 = vmatpush3.bf16.msra.mxu0 %v15603_v26  ;;  %v15637_v26 = vld [vmem:[%s19019_s1 + $0x148] sm:$0xff]  }
 0x1c4   : > { %14172 = vmatpush3.bf16.msra.mxu1 %v15604_v27  ;;  %13993 = vmatprep.subr.bf16.mxu0 %v15605_v30  ;;  %v15638_v27 = vld [vmem:[%s19019_s1 + $0x148] sm:$0xff]  }
 0x1c5   : > { %14173 = vmatprep.subr.bf16.mxu1 %v15606_v32 }
 0x1c7   : > { %13994 = vmatpush3.bf16.msra.mxu0 %v15605_v30  ;;  %v15639_v30 = vld [vmem:[%s19019_s1 + $0x150] sm:$0xff]  }
 0x1c8   : > { %14174 = vmatpush3.bf16.msra.mxu1 %v15606_v32  ;;  %13995 = vmatprep.subr.bf16.mxu0 %v15607_v39  ;;  %v15640_v32 = vld [vmem:[%s19019_s1 + $0x150] sm:$0xff]  }
 0x1c9   : > { %14175 = vmatprep.subr.bf16.mxu1 %v15608_v40 }
 0x1cb   : > { %13996 = vmatpush3.bf16.msra.mxu0 %v15607_v39  ;;  %v15644_v39 = vld [vmem:[%s19019_s1 + $0x160] sm:$0xff]  }
 0x1cc   : > { %14176 = vmatpush3.bf16.msra.mxu1 %v15608_v40  ;;  %14001 = vmatprep.subr.bf16.mxu0 %v15610_v48  ;;  %v15645_v40 = vld [vmem:[%s19019_s1 + $0x168] sm:$0xff]  }
 0x1cd   : > { %14181 = vmatprep.subr.bf16.mxu1 %v15612_v50 }
 0x1ce   : > { %13998 = vmatmul.mubr.bf16.vlgmr.msra.gmra.mrb[4].mxu0 %v15613_v51  ;;  %v15654_v51 = vld [vmem:[%s19019_s1 + $0x180] sm:$0xff]  }
 0x1cf   : > { %14002 = vmatpush3.bf16.msra.mxu0 %v15610_v48  ;;  %14178 = vmatmul.mubr.bf16.vlgmr.msra.gmra.mrb[4].mxu1 %v15614_v54  ;;  %v15652_v48 = vld [vmem:[%s19019_s1 + $0x180] sm:$0xff]   ;;  %v15655_v54 = vld [vmem:[%s19019_s1 + $0x188] sm:$0xff]  }
 0x1d0   : > { %14182 = vmatpush3.bf16.msra.mxu1 %v15612_v50  ;;  %14003 = vmatprep.subr.bf16.mxu0 %v15615_v58  ;;  %v4816_v50 = vrot.slane %v17327_v4, 1 }
 0x1d1   : > { %14183 = vmatprep.subr.bf16.mxu1 %v15616_v33  ;;  %14017 = vmatprep.mubr.bf16.mxu0 %v3410_v37  ;;  %v15659_v37 = vld [vmem:[%s19019_s1 + $0x198] sm:$0xff]  }
 0x1d2   : > { %14197 = vmatprep.mubr.bf16.mxu1 %v4681_v59  ;;  %v4817_v53 = vsel %vm566_vm1, %v4814_v23, %v4816_v50  ;;  %v15660_v59 = vld [vmem:[%s19019_s1 + $0x198] sm:$0xff]  }
 0x1d3   : > { %14004 = vmatpush3.bf16.msra.mxu0 %v15615_v58  ;;  %v15671_v58 = vld [vmem:[%s16418_s9 + $0x64] sm:$0xff]  }
 0x1d4   : > { %14184 = vmatpush3.bf16.msra.mxu1 %v15616_v33  ;;  %14005 = vmatprep.subr.bf16.mxu0 %v15617_v60  ;;  %v15658_v33 = vld [vmem:[%s19019_s1 + $0x190] sm:$0xff]  }
 0x1d5   : > { %14185 = vmatprep.subr.bf16.mxu1 %v15618_v61 }
 0x1d7   : > { %14006 = vmatpush3.bf16.msra.mxu0 %v15617_v60  ;;  %v11377_v60 = vld [vmem:[%s16418_s9 + $0x50] sm:$0xf] }
 0x1d8   : > { %14186 = vmatpush3.bf16.msra.mxu1 %v15618_v61  ;;  %14007 = vmatprep.subr.bf16.mxu0 %v15619_v62  ;;  %v17437_v61 = vld [vmem:[%s16418_s9 + $0x54] sm:$0xf] }
 0x1d9   : > { %14187 = vmatprep.subr.bf16.mxu1 %v15620_v63 }
 0x1db   : > { %14008 = vmatpush3.bf16.msra.mxu0 %v15619_v62  ;;  %v15661_v62 = vld [vmem:[%s19019_s1 + $0x1a0] sm:$0xff]  }
 0x1dc   : > { %14188 = vmatpush3.bf16.msra.mxu1 %v15620_v63  ;;  %14009 = vmatprep.subr.bf16.mxu0 %v15621_v42  ;;  %v15662_v63 = vld [vmem:[%s19019_s1 + $0x1a0] sm:$0xff]  }
 0x1dd   : > { %14189 = vmatprep.subr.bf16.mxu1 %v15622_v0 }
 0x1df   : > { %14010 = vmatpush3.bf16.msra.mxu0 %v15621_v42  ;;  %v17446_v42 = vcombine.low %v11377_v60, %v17437_v61 }
 0x1e0   : > { %14190 = vmatpush3.bf16.msra.mxu1 %v15622_v0  ;;  %14011 = vmatprep.subr.bf16.mxu0 %v15623_v1  ;;  %v11629_v0 = vld [vmem:[%s16418_s9 + $0x64] sm:$0xf] }
 0x1e1   : > { %14191 = vmatprep.subr.bf16.mxu1 %v15624_v2 }
 0x1e3   : > { %14012 = vmatpush3.bf16.msra.mxu0 %v15623_v1  ;;  %v17450_v1 = vld [vmem:[%s16418_s9 + $0x68] sm:$0xf] }
 0x1e4   : > { %14192 = vmatpush3.bf16.msra.mxu1 %v15624_v2  ;;  %14013 = vmatprep.subr.bf16.mxu0 %v15625_v31  ;;  %v15663_v2 = vld [vmem:[%s19019_s1 + $0x1a8] sm:$0xff]   ;;  %v17463_v4 = vcombine.low %v11629_v0, %v17450_v1 }
 0x1e5   : > { %14193 = vmatprep.subr.bf16.mxu1 %v15626_v5 }
 0x1e6   : > { %v5095_v11 = vshll.u32 %v17463_v4, 16  ;;  %v5093_v22 = vshrl.u32 %v17463_v4, 16 }
 0x1e7   : > { %14014 = vmatpush3.bf16.msra.mxu0 %v15625_v31  ;;  %v3824_v31 = vshll.u32 %v17446_v42, 16 }
 0x1e8   : > { %14194 = vmatpush3.bf16.msra.mxu1 %v15626_v5  ;;  %14015 = vmatprep.subr.bf16.mxu0 %v15627_v9  ;;  %v17466_v5 = vld [vmem:[%s16418_s9 + $0x6c] sm:$0xff]   ;;  %v5097_v23 = vrot.slane %v5095_v11, 1 }
 0x1e9   : > { %14195 = vmatprep.subr.bf16.mxu1 %v15628_v10  ;;  %v5100_v55 = vshll.u32 %v17466_v5, 16  ;;  %v3826_v13 = vrot.slane %v3824_v31, 1 }
 0x1eb   : > { %14016 = vmatpush3.bf16.msra.mxu0 %v15627_v9  ;;  %v3822_v9 = vshrl.u32 %v17446_v42, 16  ;;  %v15677_v42 = vld [vmem:[%s19019_s1 + $0x1d0] sm:$0xff]  }
 0x1ec   : > { %14196 = vmatpush3.bf16.msra.mxu1 %v15628_v10  ;;  %14021 = vmatprep.subr.bf16.mxu0 %v15631_v17  ;;  %v3829_v10 = vshll.u32 %v17459_v24, 16 }
 0x1ed   : > { %14201 = vmatprep.subr.bf16.mxu1 %v15634_v49 }
 0x1ee   : > { %14018 = vmatmul.mubr.bf16.vlgmr.msra.gmra.mrb[4].mxu0 %v3418_v21  ;;  %v17496_v47 = vrot.slane %v3829_v10, 1  ;;  %v15681_v10 = vld [vmem:[%s19019_s1 + $0x1e0] sm:$0xff]  }
 0x1ef   : > { %14022 = vmatpush3.bf16.msra.mxu0 %v15631_v17  ;;  %14198 = vmatmul.mubr.bf16.vlgmr.msra.gmra.mrb[4].mxu1 %v4689_v25  ;;  %v15667_v17 = vld [vmem:[%s19019_s1 + $0x1b8] sm:$0xff]  }
 0x1f0   : > { %14202 = vmatpush3.bf16.msra.mxu1 %v15634_v49  ;;  %14023 = vmatprep.subr.bf16.mxu0 %v15637_v26 }
 0x1f1   : > { %14203 = vmatprep.subr.bf16.mxu1 %v15638_v27  ;;  %14037 = vmatprep.mubr.bf16.mxu0 %v3544_v28 }
 0x1f2   : > { %14217 = vmatprep.mubr.bf16.mxu1 %v4815_v29 }
 0x1f3   : > { %14024 = vmatpush3.bf16.msra.mxu0 %v15637_v26 }
 0x1f4   : > { %14204 = vmatpush3.bf16.msra.mxu1 %v15638_v27  ;;  %14025 = vmatprep.subr.bf16.mxu0 %v15639_v30 }
 0x1f5   : > { %14205 = vmatprep.subr.bf16.mxu1 %v15640_v32 }
 0x1f7   : > { %14026 = vmatpush3.bf16.msra.mxu0 %v15639_v30  ;;  %v15668_v30 = vld [vmem:[%s19019_s1 + $0x1b8] sm:$0xff]  }
 0x1f8   : > { %14206 = vmatpush3.bf16.msra.mxu1 %v15640_v32  ;;  %14027 = vmatprep.subr.bf16.mxu0 %v15641_v35 }
 0x1f9   : > { %14207 = vmatprep.subr.bf16.mxu1 %v15642_v36 }
 0x1fb   : > { %14028 = vmatpush3.bf16.msra.mxu0 %v15641_v35 }
 0x1fc   : > { %14208 = vmatpush3.bf16.msra.mxu1 %v15642_v36  ;;  %14029 = vmatprep.subr.bf16.mxu0 %v15643_v38 }
 0x1fd   : > { %14209 = vmatprep.subr.bf16.mxu1 %v15644_v39 }
 0x1ff   : > { %14030 = vmatpush3.bf16.msra.mxu0 %v15643_v38  ;;  %v15670_v38 = vld [vmem:[%s19019_s1 + $0x1c0] sm:$0xff]  }
 0x200   : > { %14210 = vmatpush3.bf16.msra.mxu1 %v15644_v39  ;;  %14031 = vmatprep.subr.bf16.mxu0 %v15645_v40 }
 0x201   : > { %14211 = vmatprep.subr.bf16.mxu1 %v15646_v41 }
 0x203   : > { %14032 = vmatpush3.bf16.msra.mxu0 %v15645_v40 }
 0x204   : > { %14212 = vmatpush3.bf16.msra.mxu1 %v15646_v41  ;;  %14033 = vmatprep.subr.bf16.mxu0 %v15647_v43 }
 0x205   : > { %14213 = vmatprep.subr.bf16.mxu1 %v15648_v44 }
 0x207   : > { %14034 = vmatpush3.bf16.msra.mxu0 %v15647_v43 }
 0x208   : > { %14214 = vmatpush3.bf16.msra.mxu1 %v15648_v44  ;;  %14035 = vmatprep.subr.bf16.mxu0 %v15649_v45 }
 0x209   : > { %14215 = vmatprep.subr.bf16.mxu1 %v15650_v46 }
 0x20b   : > { %14036 = vmatpush3.bf16.msra.mxu0 %v15649_v45  ;;  %v15672_v45 = vld [vmem:[%s19019_s1 + $0x1c0] sm:$0xff]  }
 0x20c   : > { %14216 = vmatpush3.bf16.msra.mxu1 %v15650_v46  ;;  %14041 = vmatprep.subr.bf16.mxu0 %v15652_v48  ;;  %v15673_v46 = vld [vmem:[%s16418_s9 + $0x58] sm:$0xff]  }
 0x20d   : > { %14221 = vmatprep.subr.bf16.mxu1 %v15654_v51 }
 0x20e   : > { %14038 = vmatmul.mubr.bf16.vlgmr.msra.gmra.mrb[4].mxu0 %v3546_v52 }
 0x20f   : > { %14042 = vmatpush3.bf16.msra.mxu0 %v15652_v48  ;;  %14218 = vmatmul.mubr.bf16.vlgmr.msra.gmra.mrb[4].mxu1 %v4817_v53  ;;  %v17498_v48 = vrot.slane %v5100_v55, 1  ;;  %v3827_v53 = vor.u32 %v3826_v13, %v3822_v9  ;;  %v17533_v13 = vld [vmem:[%s16418_s9 + $0x60] ss:$0 sps:$4 sm:$0x11]  }
 0x210   : > { %14222 = vmatpush3.bf16.msra.mxu1 %v15654_v51  ;;  %14043 = vmatprep.subr.bf16.mxu0 %v15655_v54  ;;  %v15674_v51 = vld [vmem:[%s16418_s9 + $0x6c] sm:$0xff]  }
 0x211   : > { %14223 = vmatprep.subr.bf16.mxu1 %v15656_v56  ;;  %14057 = vmatprep.mubr.bf16.mxu0 %v15669_v57 }
 0x212   : > { %14237 = vmatprep.mubr.bf16.mxu1 %v15671_v58  ;;  %v15675_v58 = vld [vmem:[%s19019_s1 + $0x1c8] sm:$0xff]  }
 0x213   : > { %14044 = vmatpush3.bf16.msra.mxu0 %v15655_v54 }
 0x214   : > { %14224 = vmatpush3.bf16.msra.mxu1 %v15656_v56  ;;  %14045 = vmatprep.subr.bf16.mxu0 %v15657_v34  ;;  %v5098_v56 = vor.u32 %v5097_v23, %v5093_v22  ;;  %v11661_v22 = vld [vmem:[%s16418_s9 + $0x64] sm:$0xe]  ;;  %v15687_v23 = vld [vmem:[%s19019_s1 + $0x1f8] sm:$0xff]  }
 0x215   : > { %14225 = vmatprep.subr.bf16.mxu1 %v15658_v33 }
 0x217   : > { %14046 = vmatpush3.bf16.msra.mxu0 %v15657_v34 }
 0x218   : > { %14226 = vmatpush3.bf16.msra.mxu1 %v15658_v33  ;;  %14047 = vmatprep.subr.bf16.mxu0 %v15659_v37  ;;  %v15676_v33 = vld [vmem:[%s19019_s1 + $0x1c8] sm:$0xff]  }
 0x219   : > { %14227 = vmatprep.subr.bf16.mxu1 %v15660_v59 }
 0x21b   : > { %14048 = vmatpush3.bf16.msra.mxu0 %v15659_v37 }
 0x21c   : > { %14228 = vmatpush3.bf16.msra.mxu1 %v15660_v59  ;;  %14049 = vmatprep.subr.bf16.mxu0 %v15661_v62  ;;  %v3832_v59 = vsel %vm326_vm0, %v3827_v53, %v17496_v47  ;;  %v15702_v53 = vld [vmem:[%s19019_s1 + $0x218] sm:$0xff]  }
 0x21d   : > { %14229 = vmatprep.subr.bf16.mxu1 %v15662_v63 }
 0x21f   : > { %14050 = vmatpush3.bf16.msra.mxu0 %v15661_v62  ;;  %v5103_v62 = vsel %vm326_vm0, %v5098_v56, %v17498_v48  ;;  %v15704_v56 = vld [vmem:[%s19019_s1 + $0x220] sm:$0xff]  }
 0x220   : > { %14230 = vmatpush3.bf16.msra.mxu1 %v15662_v63  ;;  %14051 = vmatprep.subr.bf16.mxu0 %v15663_v2 }
 0x221   : > { %v13739_v12 = vpop.f32.mrb[0].mxu0  ;;  %14231 = vmatprep.subr.bf16.mxu1 %v15664_v3 }
 0x222   : > { %v13919_v14 = vpop.f32.mrb[0].mxu1  ;;  %v1506_v15 = vpop.f32.mrb[1].mxu0  ;;  %v1533_v19 = vadd.f32 %v13739_v12, %v10934_v7  ;;  %v15682_v12 = vld [vmem:[%s19019_s1 + $0x1e0] sm:$0xff]  }
 0x223   : > { %v2782_v49 = vpop.f32.mrb[1].mxu1  ;;  %v13740_v18 = vpop.f32.mrb[2].mxu0  ;;  %14052 = vmatpush3.bf16.msra.mxu0 %v15663_v2  ;;  %v2803_v25 = vadd.f32 %v13919_v14, %v10934_v7  ;;  %v1531_v26 = vadd.f32 %v10934_v7, %v1506_v15  ;;  %v15678_v2 = vld [vmem:[%s19019_s1 + $0x1d0] sm:$0xff]   ;;  %v15683_v15 = vld [vmem:[%s19019_s1 + $0x1e8] sm:$0xff]  }
 0x224   : > { %v1534_v16 = vadd.f32 %v13740_v18, %v10934_v7  ;;  %v13920_v20 = vpop.f32.mrb[2].mxu1  ;;  %14232 = vmatpush3.bf16.msra.mxu1 %v15664_v3  ;;  %v1509_v21 = vpop.f32.mrb[3].mxu0  ;;  %14053 = vmatprep.subr.bf16.mxu0 %v15665_v6  ;;  %v2801_v32 = vadd.f32 %v10934_v7, %v2782_v49  ;;  %v3833_v49 = vshrl.u32 %v17459_v24, 16  ;;  %v3837_v18 = vshll.u32 %v17533_v13, 16 }
 0x225   : > { %v2804_v27 = vadd.f32 %v13920_v20, %v10934_v7  ;;  %v1532_v28 = vadd.f32 %v10934_v7, %v1509_v21  ;;  %v2785_v29 = vpop.f32.mrb[3].mxu1  ;;  %14233 = vmatprep.subr.bf16.mxu1 %v15666_v8  ;;  %v15686_v20 = vld [vmem:[%s19019_s1 + $0x1f0] sm:$0xff]  }
 0x226   : > { %v12754_v35 = vpack.c.bf16 %v1534_v16, %v1533_v19  ;;  %v2802_v36 = vadd.f32 %v10934_v7, %v2785_v29  ;;  %v11409_v21 = vld [vmem:[%s16418_s9 + $0x50] sm:$0xe] }
 0x227   : > { %v12764_v39 = vpack.c.bf16 %v2804_v27, %v2803_v25  ;;  %v1535_v40 = vadd.f32 %v1532_v28, %v1531_v26  ;;  %v12749_v41 = vpack.c.bf16 %v1532_v28, %v1531_v26  ;;  %14054 = vmatpush3.bf16.msra.mxu0 %v15665_v6  ;;  %v15679_v6 = vld [vmem:[%s19019_s1 + $0x1d8] sm:$0xff]   ;;  %v3839_v26 = vrot.slane %v3837_v18, 1 }
 0x228   : > { %12826 = vst [vmem:[%s16380_s24 + $0x8] sm:$0xff] %v12754_v35   ;;  %v2805_v43 = vadd.f32 %v2802_v36, %v2801_v32  ;;  %v12759_v44 = vpack.c.bf16 %v2802_v36, %v2801_v32  ;;  %14234 = vmatpush3.bf16.msra.mxu1 %v15666_v8  ;;  %14055 = vmatprep.subr.bf16.mxu0 %v15667_v17  ;;  %v15680_v8 = vld [vmem:[%s19019_s1 + $0x1d8] sm:$0xff]   ;;  %v15691_v35 = vld [vmem:[%s19019_s1 + $0x200] sm:$0xff]  }
 0x229   : > { %12828 = vst [vmem:[%s16380_s24 + $0x18] sm:$0xff] %v12764_v39   ;;  %v1536_v50 = vadd.f32 %v1535_v40, %v1533_v19  ;;  %12750 = vst [vmem:[%s16380_s24] sm:$0xff] %v12749_v41   ;;  %14235 = vmatprep.subr.bf16.mxu1 %v15668_v30  ;;  %v15685_v19 = vld [vmem:[%s19019_s1 + $0x1f0] sm:$0xff]   ;;  %v11426_v29 = vcombine.low %v11409_v21, %v17437_v61  ;;  %v3835_v32 = vor.u32 %v3833_v49, %v17496_v47  ;;  %v15694_v36 = vld [vmem:[%s19019_s1 + $0x200] sm:$0xff]  }
 0x22a   : > { %v2806_v52 = vadd.f32 %v2805_v43, %v2803_v25  ;;  %12827 = vst [vmem:[%s16380_s24 + $0x10] sm:$0xff] %v12759_v44   ;;  %v15688_v25 = vld [vmem:[%s19019_s1 + $0x1f8] sm:$0xff]   ;;  %v5236_v41 = vrot.slane %v17466_v5, 1 }
 0x22b   : > { %v1537_v54 = vadd.f32 %v1536_v50, %v1534_v16  ;;  %14056 = vmatpush3.bf16.msra.mxu0 %v15667_v17  ;;  %v15684_v17 = vld [vmem:[%s19019_s1 + $0x1e8] sm:$0xff]   ;;  %v17549_v16 = vld [vmem:[%s16418_s9 + $0x74] ss:$0 sps:$4 sm:$0x11]   ;;  %v3964_v61 = vrot.slane %v11426_v29, 1  ;;  %v3840_v43 = vsel %vm326_vm0, %v3835_v32, %v3839_v26  ;;  %v15721_v29 = vld [vmem:[%s19019_s1 + $0x60] sm:$0xff]  }
 0x22c   : > { %v2807_v57 = vadd.f32 %v2806_v52, %v2804_v27  ;;  %14236 = vmatpush3.bf16.msra.mxu1 %v15668_v30  ;;  %14061 = vmatprep.subr.bf16.mxu0 %v15670_v38  ;;  %v5104_v27 = vshrl.u32 %v17466_v5, 16  ;;  %v5108_v28 = vshll.u32 %v17549_v16, 16  ;;  %v11678_v30 = vcombine.low %v11661_v22, %v17450_v1  ;;  %v15699_v50 = vld [vmem:[%s19019_s1 + $0x210] sm:$0xff]   ;;  %v15701_v52 = vld [vmem:[%s19019_s1 + $0x218] sm:$0xff]   ;;  %v15715_v22 = vld [vmem:[%s19019_s1 + $0x48] sm:$0xff]  }
 0x22d   : > { %v1538_v34 = vrot.slane %v1537_v54, 4  ;;  %14241 = vmatprep.subr.bf16.mxu1 %v15672_v45  ;;  %v3965_v1 = vrot.slane %v17459_v24, 1  ;;  %v15718_v26 = vld [vmem:[%s19019_s1 + $0x50] sm:$0xff]   ;;  %v15723_v32 = vld [vmem:[%s19019_s1 + $0x68] sm:$0xff]  }
 0x22e   : > { %v2808_v37 = vrot.slane %v2807_v57, 4  ;;  %14058 = vmatmul.mubr.bf16.vlgmr.msra.gmra.mrb[4].mxu0 %v15673_v46  ;;  %v5110_v39 = vrot.slane %v5108_v28, 1  ;;  %v5235_v40 = vrot.slane %v11678_v30, 1  ;;  %v15698_v46 = vld [vmem:[%s19019_s1 + $0x208] sm:$0xff]   ;;  %v15720_v28 = vld [vmem:[%s19019_s1 + $0x58] sm:$0xff]   ;;  %v15722_v30 = vld [vmem:[%s19019_s1 + $0x60] sm:$0xff]  }
 0x22f   : > { %v1539_v60 = vadd.f32 %v1538_v34, %v1537_v54  ;;  %14062 = vmatpush3.bf16.msra.mxu0 %v15670_v38  ;;  %14238 = vmatmul.mubr.bf16.vlgmr.msra.gmra.mrb[4].mxu1 %v15674_v51  ;;  %v5106_v38 = vor.u32 %v5104_v27, %v17498_v48  ;;  %v3966_v47 = vsel %vm566_vm1, %v3964_v61, %v3965_v1  ;;  %v15700_v51 = vld [vmem:[%s19019_s1 + $0x210] sm:$0xff]   ;;  %v15703_v54 = vld [vmem:[%s19019_s1 + $0x220] sm:$0xff]   ;;  %v15719_v27 = vld [vmem:[%s19019_s1 + $0x58] sm:$0xff]  }
 0x230   : > { %v2809_v63 = vadd.f32 %v2808_v37, %v2807_v57  ;;  %14242 = vmatpush3.bf16.msra.mxu1 %v15672_v45  ;;  %14063 = vmatprep.subr.bf16.mxu0 %v15675_v58  ;;  %v15697_v45 = vld [vmem:[%s19019_s1 + $0x208] sm:$0xff]   ;;  %v5237_v48 = vsel %vm566_vm1, %v5235_v40, %v5236_v41  ;;  %v11695_v57 = vld [vmem:[%s16418_s9 + $0x50] sm:$0xf]  ;;  %v11947_v34 = vld [vmem:[%s16418_s9 + $0x64] sm:$0xf] }
 0x231   : > { %v1540_v0 = vrot.slane %v1539_v60, 2  ;;  %14243 = vmatprep.subr.bf16.mxu1 %v15676_v33  ;;  %14077 = vmatprep.mubr.bf16.mxu0 %v3832_v59  ;;  %v5111_v44 = vsel %vm326_vm0, %v5106_v38, %v5110_v39  ;;  %v15705_v37 = vld [vmem:[%s19019_s1 + $0x228] sm:$0xff]   ;;  %v17705_v38 = vld [vmem:[%s16418_s9 + $0x74] ss:$0 sps:$4 sm:$0x11]  }
 0x232   : > { %v2810_v3 = vrot.slane %v2809_v63, 2  ;;  %14257 = vmatprep.mubr.bf16.mxu1 %v5103_v62  ;;  %v15706_v59 = vld [vmem:[%s19019_s1 + $0x228] sm:$0xff]   ;;  %v5238_v62 = vrot.slane %v17549_v16, 1  ;;  %v15725_v39 = vld [vmem:[%s19019_s1 + $0x70] sm:$0xff]  }
 0x233   : > { %v1541_v31 = vadd.f32 %v1540_v0, %v1539_v60  ;;  %14064 = vmatpush3.bf16.msra.mxu0 %v15675_v58  ;;  %v17610_v58 = vld [vmem:[%s16418_s9 + $0x54] sm:$0xf]  ;;  %v3967_v60 = vrot.slane %v17533_v13, 1 }
 0x234   : > { %v2811_v4 = vadd.f32 %v2810_v3, %v2809_v63  ;;  %14244 = vmatpush3.bf16.msra.mxu1 %v15676_v33  ;;  %14065 = vmatprep.subr.bf16.mxu0 %v15677_v42  ;;  %v17614_v33 = vld [vmem:[%s16418_s9 + $0x68] sm:$0xf]  ;;  %v17625_v63 = vcombine.low %v11695_v57, %v17610_v58  ;;  %v15707_v3 = vld [vmem:[%s19019_s1 + $0x230] sm:$0xff]   ;;  %v5239_v21 = vsel %vm566_vm1, %v5236_v41, %v5238_v62  ;;  %v15727_v41 = vld [vmem:[%s19019_s1 + $0x78] sm:$0xff]  }
 0x235   : > { %v1542_v7 = vrot.slane %v1541_v31, 1  ;;  %14245 = vmatprep.subr.bf16.mxu1 %v15678_v2  ;;  %v17631_v0 = vcombine.low %v11947_v34, %v17614_v33  ;;  %v3968_v16 = vsel %vm566_vm1, %v3965_v1, %v3967_v60  ;;  %v15726_v61 = vld [vmem:[%s19019_s1 + $0x70] sm:$0xff]   ;;  %v15738_v57 = vld [vmem:[%s19019_s1 + $0x8] sm:$0xff]   ;;  %v15742_v60 = vld [vmem:[%s19019_s1 + $0x18] sm:$0xff]  }
 0x236   : > { %v2812_v9 = vrot.slane %v2811_v4, 1  ;;  %v15739_v34 = vld [vmem:[%s19019_s1 + $0x10] sm:$0xff]   ;;  %v15743_v62 = vld [vmem:[%s19019_s1 + $0x20] sm:$0xff]  }
 0x237   : > { %v1543_v11 = vadd.f32 %v1542_v7, %v1541_v31  ;;  %14066 = vmatpush3.bf16.msra.mxu0 %v15677_v42  ;;  %v17628_v42 = vld [vmem:[%s16418_s9 + $0x58] sm:$0xff]   ;;  %v15708_v31 = vld [vmem:[%s19019_s1 + $0x230] sm:$0xff]   ;;  %v6702_v7 = vshll.u32 %v17631_v0, 16 }
 0x238   : > { %v2813_v55 = vadd.f32 %v2812_v9, %v2811_v4  ;;  %14246 = vmatpush3.bf16.msra.mxu1 %v15678_v2  ;;  %14067 = vmatprep.subr.bf16.mxu0 %v15679_v6  ;;  %v17634_v2 = vld [vmem:[%s16418_s9 + $0x6c] sm:$0xff]   ;;  %v5431_v4 = vshll.u32 %v17625_v63, 16  ;;  %v15709_v9 = vld [vmem:[%s19019_s1 + $0x238] sm:$0xff]   ;;  %v5440_v1 = vshrl.u32 %v17628_v42, 16 }
 0x239   : > { %14247 = vmatprep.subr.bf16.mxu1 %v15680_v8  ;;  %v6704_v13 = vrot.slane %v6702_v7, 1  ;;  %v15749_v7 = vld [vmem:[%s19019_s1 + $0x38] sm:$0xff]  }
 0x23a   : > { %v17535_v14 = vadd.f32 %v2813_v55, %v1543_v11  ;;  %v5429_v11 = vshrl.u32 %v17625_v63, 16  ;;  %v5433_v55 = vrot.slane %v5431_v4, 1  ;;  %v15748_v4 = vld [vmem:[%s19019_s1 + $0x30] sm:$0xff]  }
 0x23b   : > { %14068 = vmatpush3.bf16.msra.mxu0 %v15679_v6  ;;  %v5436_v6 = vshll.u32 %v17628_v42, 16 }
 0x23c   : > { %14248 = vmatpush3.bf16.msra.mxu1 %v15680_v8  ;;  %14069 = vmatprep.subr.bf16.mxu0 %v15681_v10  ;;  %v6707_v8 = vshll.u32 %v17634_v2, 16 }
 0x23d   : > { %14249 = vmatprep.subr.bf16.mxu1 %v15682_v12  ;;  %v5438_v49 = vrot.slane %v5436_v6, 1  ;;  %v11735_v6 = vld [vmem:[%s16418_s9 + $0x50] sm:$0xe] }
 0x23e   : > { %v17660_v18 = vrot.slane %v6707_v8, 1  ;;  %v11987_v8 = vld [vmem:[%s16418_s9 + $0x64] sm:$0xe] }
 0x23f   : > { %14070 = vmatpush3.bf16.msra.mxu0 %v15681_v10  ;;  %v15710_v10 = vld [vmem:[%s19019_s1 + $0x238] sm:$0xff]  }
 0x240   : > { %14250 = vmatpush3.bf16.msra.mxu1 %v15682_v12  ;;  %14071 = vmatprep.subr.bf16.mxu0 %v15683_v15  ;;  %v6700_v12 = vshrl.u32 %v17631_v0, 16 }
 0x241   : > { %14251 = vmatprep.subr.bf16.mxu1 %v15684_v17 }
 0x243   : > { %14072 = vmatpush3.bf16.msra.mxu0 %v15683_v15  ;;  %v15713_v15 = vld [vmem:[%s19019_s1 + $0x40] sm:$0xff]  }
 0x244   : > { %14252 = vmatpush3.bf16.msra.mxu1 %v15684_v17  ;;  %14073 = vmatprep.subr.bf16.mxu0 %v15685_v19  ;;  %v15714_v17 = vld [vmem:[%s19019_s1 + $0x40] sm:$0xff]  }
 0x245   : > { %14253 = vmatprep.subr.bf16.mxu1 %v15686_v20 }
 0x247   : > { %14074 = vmatpush3.bf16.msra.mxu0 %v15685_v19  ;;  %v5434_v19 = vor.u32 %v5433_v55, %v5429_v11  ;;  %v12004_v11 = vcombine.low %v11987_v8, %v17614_v33  ;;  %v15751_v55 = vld [vmem:[%s19019_s1 + $0x80] sm:$0xff]   ;;  %v15753_v33 = vld [vmem:[%s19019_s1 + $0x88] sm:$0xff]  }
 0x248   : > { %14254 = vmatpush3.bf16.msra.mxu1 %v15686_v20  ;;  %14075 = vmatprep.subr.bf16.mxu0 %v15687_v23  ;;  %v6705_v20 = vor.u32 %v6704_v13, %v6700_v12  ;;  %v15752_v12 = vld [vmem:[%s19019_s1 + $0x80] sm:$0xff]  }
 0x249   : > { %14255 = vmatprep.subr.bf16.mxu1 %v15688_v25  ;;  %v5439_v24 = vsel %vm326_vm0, %v5434_v19, %v5438_v49 }
 0x24a   : > { %v6710_v5 = vsel %vm326_vm0, %v6705_v20, %v17660_v18  ;;  %v15756_v20 = vld [vmem:[%s19019_s1 + $0x90] sm:$0xff]  }
 0x24b   : > { %14076 = vmatpush3.bf16.msra.mxu0 %v15687_v23  ;;  %v15716_v23 = vld [vmem:[%s19019_s1 + $0x48] sm:$0xff]  }
 0x24c   : > { %14256 = vmatpush3.bf16.msra.mxu1 %v15688_v25  ;;  %14081 = vmatprep.subr.bf16.mxu0 %v15691_v35  ;;  %v15717_v25 = vld [vmem:[%s19019_s1 + $0x50] sm:$0xff]  }
 0x24d   : > { %14261 = vmatprep.subr.bf16.mxu1 %v15694_v36 }
 0x24e   : > { %14078 = vmatmul.mubr.bf16.vlgmr.msra.gmra.mrb[4].mxu0 %v3840_v43  ;;  %v6711_v43 = vshrl.u32 %v17634_v2, 16 }
 0x24f   : > { %14082 = vmatpush3.bf16.msra.mxu0 %v15691_v35  ;;  %14258 = vmatmul.mubr.bf16.vlgmr.msra.gmra.mrb[4].mxu1 %v5111_v44  ;;  %v15724_v35 = vld [vmem:[%s19019_s1 + $0x68] sm:$0xff]   ;;  %v6715_v44 = vshll.u32 %v17705_v38, 16 }
 0x250   : > { %14262 = vmatpush3.bf16.msra.mxu1 %v15694_v36  ;;  %14083 = vmatprep.subr.bf16.mxu0 %v15697_v45  ;;  %v17702_v36 = vld [vmem:[%s16418_s9 + $0x60] ss:$0 sps:$4 sm:$0x11]  }
 0x251   : > { %14263 = vmatprep.subr.bf16.mxu1 %v15698_v46  ;;  %14097 = vmatprep.mubr.bf16.mxu0 %v3966_v47  ;;  %v5444_v40 = vshll.u32 %v17702_v36, 16 }
 0x252   : > { %14277 = vmatprep.mubr.bf16.mxu1 %v5237_v48  ;;  %v15731_v48 = vld [vmem:[%s19019_s1] sm:$0xff]  }
 0x253   : > { %14084 = vmatpush3.bf16.msra.mxu0 %v15697_v45  ;;  %v15728_v45 = vld [vmem:[%s19019_s1 + $0x78] sm:$0xff]   ;;  %v5446_v47 = vrot.slane %v5444_v40, 1  ;;  %v15773_v40 = vld [vmem:[%s19019_s1 + $0xd0] sm:$0xff]  }
 0x254   : > { %14264 = vmatpush3.bf16.msra.mxu1 %v15698_v46  ;;  %14085 = vmatprep.subr.bf16.mxu0 %v15699_v50  ;;  %v5442_v46 = vor.u32 %v5440_v1, %v5438_v49  ;;  %v15754_v49 = vld [vmem:[%s19019_s1 + $0x88] sm:$0xff]   ;;  %v15787_v1 = vld [vmem:[%s16418_s9 + $0x78] sm:$0xff]  }
 0x255   : > { %14265 = vmatprep.subr.bf16.mxu1 %v15700_v51 }
 0x257   : > { %14086 = vmatpush3.bf16.msra.mxu0 %v15699_v50  ;;  %v6713_v50 = vor.u32 %v6711_v43, %v17660_v18  ;;  %v15775_v43 = vld [vmem:[%s19019_s1 + $0xd8] sm:$0xff]  }
 0x258   : > { %14266 = vmatpush3.bf16.msra.mxu1 %v15700_v51  ;;  %14087 = vmatprep.subr.bf16.mxu0 %v15701_v52  ;;  %v6717_v51 = vrot.slane %v6715_v44, 1  ;;  %v15776_v44 = vld [vmem:[%s19019_s1 + $0xd8] sm:$0xff]  }
 0x259   : > { %14267 = vmatprep.subr.bf16.mxu1 %v15702_v53 }
 0x25b   : > { %14088 = vmatpush3.bf16.msra.mxu0 %v15701_v52  ;;  %v15734_v52 = vld [vmem:[%s19019_s1] sm:$0xff]  }
 0x25c   : > { %14268 = vmatpush3.bf16.msra.mxu1 %v15702_v53  ;;  %14089 = vmatprep.subr.bf16.mxu0 %v15703_v54  ;;  %v5447_v53 = vsel %vm326_vm0, %v5442_v46, %v5446_v47  ;;  %v15778_v46 = vld [vmem:[%s19019_s1 + $0xe0] sm:$0xff]  }
 0x25d   : > { %14269 = vmatprep.subr.bf16.mxu1 %v15704_v56  ;;  %v11791_v47 = vld [vmem:[%s16418_s9 + $0x64] sm:$0xf] }
 0x25f   : > { %14090 = vmatpush3.bf16.msra.mxu0 %v15703_v54  ;;  %v6718_v54 = vsel %vm326_vm0, %v6713_v50, %v6717_v51  ;;  %v15779_v50 = vld [vmem:[%s19019_s1 + $0xe8] sm:$0xff]   ;;  %v12043_v51 = vld [vmem:[%s16418_s9 + $0x78] sm:$0xf] }
 0x260   : > { %14270 = vmatpush3.bf16.msra.mxu1 %v15704_v56  ;;  %14091 = vmatprep.subr.bf16.mxu0 %v15705_v37  ;;  %v15737_v56 = vld [vmem:[%s19019_s1 + $0x8] sm:$0xff]  }
 0x261   : > { %14271 = vmatprep.subr.bf16.mxu1 %v15706_v59 }
 0x263   : > { %14092 = vmatpush3.bf16.msra.mxu0 %v15705_v37  ;;  %v15740_v37 = vld [vmem:[%s19019_s1 + $0x10] sm:$0xff]  }
 0x264   : > { %14272 = vmatpush3.bf16.msra.mxu1 %v15706_v59  ;;  %14093 = vmatprep.subr.bf16.mxu0 %v15707_v3  ;;  %v15741_v59 = vld [vmem:[%s19019_s1 + $0x18] sm:$0xff]  }
 0x265   : > { %14273 = vmatprep.subr.bf16.mxu1 %v15708_v31 }
 0x267   : > { %14094 = vmatpush3.bf16.msra.mxu0 %v15707_v3  ;;  %v15746_v3 = vld [vmem:[%s19019_s1 + $0x28] sm:$0xff]  }
 0x268   : > { %14274 = vmatpush3.bf16.msra.mxu1 %v15708_v31  ;;  %14095 = vmatprep.subr.bf16.mxu0 %v15709_v9  ;;  %v15747_v31 = vld [vmem:[%s19019_s1 + $0x30] sm:$0xff]  }
 0x269   : > { %14275 = vmatprep.subr.bf16.mxu1 %v15710_v10 }
 0x26b   : > { %14096 = vmatpush3.bf16.msra.mxu0 %v15709_v9  ;;  %v15750_v9 = vld [vmem:[%s19019_s1 + $0x38] sm:$0xff]  }
 0x26c   : > { %14276 = vmatpush3.bf16.msra.mxu1 %v15710_v10  ;;  %14281 = vmatprep.subr.bf16.mxu0 %v15713_v15  ;;  %v11752_v10 = vcombine.low %v11735_v6, %v17610_v58  ;;  %v6938_v58 = vrot.slane %v17634_v2, 1 }
 0x26d   : > { %14461 = vmatprep.subr.bf16.mxu1 %v15714_v17 }
 0x26e   : > { %14098 = vmatmul.mubr.bf16.vlgmr.msra.gmra.mrb[4].mxu0 %v3968_v16  ;;  %v5666_v13 = vrot.slane %v11752_v10, 1  ;;  %v15755_v16 = vld [vmem:[%s19019_s1 + $0x90] sm:$0xff]   ;;  %v15788_v10 = vld [vmem:[%s19019_s1 + $0x100] sm:$0xff]  }
 0x26f   : > { %14278 = vmatmul.mubr.bf16.vlgmr.msra.gmra.mrb[4].mxu1 %v5239_v21  ;;  %14282 = vmatpush3.bf16.msra.mxu0 %v15713_v15  ;;  %v5667_v15 = vrot.slane %v17628_v42, 1  ;;  %v15759_v21 = vld [vmem:[%s19019_s1 + $0xa0] sm:$0xff]  }
 0x270   : > { %14462 = vmatpush3.bf16.msra.mxu1 %v15714_v17  ;;  %14283 = vmatprep.subr.bf16.mxu0 %v15715_v22  ;;  %v6937_v17 = vrot.slane %v12004_v11, 1  ;;  %v15789_v11 = vld [vmem:[%s16418_s9 + $0x6c] sm:$0xff]  }
 0x271   : > { %14463 = vmatprep.subr.bf16.mxu1 %v15716_v23  ;;  %14297 = vmatprep.mubr.bf16.mxu0 %v5439_v24  ;;  %v5668_v18 = vsel %vm566_vm1, %v5666_v13, %v5667_v15  ;;  %v15762_v24 = vld [vmem:[%s19019_s1 + $0xa8] sm:$0xff]   ;;  %v15790_v13 = vld [vmem:[%s16418_s9 + $0x80] sm:$0xff]  }
 0x272   : > { %14477 = vmatprep.mubr.bf16.mxu1 %v6710_v5  ;;  %v6939_v19 = vsel %vm566_vm1, %v6937_v17, %v6938_v58  ;;  %v15763_v5 = vld [vmem:[%s19019_s1 + $0xb0] sm:$0xff]  }
 0x273   : > { %14284 = vmatpush3.bf16.msra.mxu0 %v15715_v22  ;;  %v15760_v22 = vld [vmem:[%s19019_s1 + $0xa0] sm:$0xff]  }
 0x274   : > { %14464 = vmatpush3.bf16.msra.mxu1 %v15716_v23  ;;  %14285 = vmatprep.subr.bf16.mxu0 %v15717_v25  ;;  %v15761_v23 = vld [vmem:[%s19019_s1 + $0xa8] sm:$0xff]  }
 0x275   : > { %14465 = vmatprep.subr.bf16.mxu1 %v15718_v26 }
 0x277   : > { %14286 = vmatpush3.bf16.msra.mxu0 %v15717_v25  ;;  %v15764_v25 = vld [vmem:[%s19019_s1 + $0xb0] sm:$0xff]  }
 0x278   : > { %14466 = vmatpush3.bf16.msra.mxu1 %v15718_v26  ;;  %14287 = vmatprep.subr.bf16.mxu0 %v15719_v27  ;;  %v15765_v26 = vld [vmem:[%s19019_s1 + $0xb8] sm:$0xff]  }
 0x279   : > { %14467 = vmatprep.subr.bf16.mxu1 %v15720_v28 }
 0x27b   : > { %14288 = vmatpush3.bf16.msra.mxu0 %v15719_v27  ;;  %v15766_v27 = vld [vmem:[%s19019_s1 + $0xb8] sm:$0xff]  }
 0x27c   : > { %14468 = vmatpush3.bf16.msra.mxu1 %v15720_v28  ;;  %14289 = vmatprep.subr.bf16.mxu0 %v15721_v29  ;;  %v5669_v28 = vrot.slane %v17702_v36, 1 }
 0x27d   : > { %14469 = vmatprep.subr.bf16.mxu1 %v15722_v30 }
 0x27f   : > { %14290 = vmatpush3.bf16.msra.mxu0 %v15721_v29  ;;  %v15768_v29 = vld [vmem:[%s19019_s1 + $0xc0] sm:$0xff]  }
 0x280   : > { %14470 = vmatpush3.bf16.msra.mxu1 %v15722_v30  ;;  %14291 = vmatprep.subr.bf16.mxu0 %v15723_v32  ;;  %v6940_v30 = vrot.slane %v17705_v38, 1  ;;  %v15772_v38 = vld [vmem:[%s19019_s1 + $0xc8] sm:$0xff]  }
 0x281   : > { %14471 = vmatprep.subr.bf16.mxu1 %v15724_v35 }
 0x282   : > { %v6941_v36 = vsel %vm566_vm1, %v6938_v58, %v6940_v30  ;;  %v15791_v58 = vld [vmem:[%s19019_s1 + $0x108] sm:$0xff]   ;;  %v15803_v30 = vld [vmem:[%s19019_s1 + $0x138] sm:$0xff]  }
 0x283   : > { %14292 = vmatpush3.bf16.msra.mxu0 %v15723_v32  ;;  %v15770_v32 = vld [vmem:[%s19019_s1 + $0xc0] sm:$0xff]  }
 0x284   : > { %14472 = vmatpush3.bf16.msra.mxu1 %v15724_v35  ;;  %14293 = vmatprep.subr.bf16.mxu0 %v15725_v39  ;;  %v5670_v35 = vsel %vm566_vm1, %v5667_v15, %v5669_v28 }
 0x285   : > { %14473 = vmatprep.subr.bf16.mxu1 %v15726_v61 }
 0x287   : > { %14294 = vmatpush3.bf16.msra.mxu0 %v15725_v39  ;;  %v15771_v39 = vld [vmem:[%s19019_s1 + $0xc8] sm:$0xff]  }
 0x288   : > { %14474 = vmatpush3.bf16.msra.mxu1 %v15726_v61  ;;  %14295 = vmatprep.subr.bf16.mxu0 %v15727_v41  ;;  %v15785_v61 = vld [vmem:[%s16418_s9 + $0x64] sm:$0xff]  }
 0x289   : > { %14475 = vmatprep.subr.bf16.mxu1 %v15728_v45 }
 0x28b   : > { %14296 = vmatpush3.bf16.msra.mxu0 %v15727_v41  ;;  %v15774_v41 = vld [vmem:[%s19019_s1 + $0xd0] sm:$0xff]  }
 0x28c   : > { %14476 = vmatpush3.bf16.msra.mxu1 %v15728_v45  ;;  %14301 = vmatprep.subr.bf16.mxu0 %v15731_v48  ;;  %v15777_v45 = vld [vmem:[%s19019_s1 + $0xe0] sm:$0xff]  }
 0x28d   : > { %14481 = vmatprep.subr.bf16.mxu1 %v15734_v52 }
 0x28e   : > { %14298 = vmatmul.mubr.bf16.vlgmr.msra.gmra.mrb[8].mxu0 %v5447_v53  ;;  %v15780_v53 = vld [vmem:[%s19019_s1 + $0xe8] sm:$0xff]  }
 0x28f   : > { %14302 = vmatpush3.bf16.msra.mxu0 %v15731_v48  ;;  %14478 = vmatmul.mubr.bf16.vlgmr.msra.gmra.mrb[8].mxu1 %v6718_v54  ;;  %v17872_v48 = vld [vmem:[%s16418_s9 + $0x68] sm:$0xf] }
 0x290   : > { %14482 = vmatpush3.bf16.msra.mxu1 %v15734_v52  ;;  %14303 = vmatprep.subr.bf16.mxu0 %v15737_v56  ;;  %v17879_v52 = vld [vmem:[%s16418_s9 + $0x7c] sm:$0xf]  ;;  %v11812_v54 = vcombine.low %v11791_v47, %v17872_v48 }
 0x291   : > { %14483 = vmatprep.subr.bf16.mxu1 %v15738_v57  ;;  %14317 = vmatprep.mubr.bf16.mxu0 %v17625_v63  ;;  %v15744_v63 = vld [vmem:[%s19019_s1 + $0x20] sm:$0xff]  }
 0x292   : > { %14497 = vmatprep.mubr.bf16.mxu1 %v17631_v0  ;;  %v15745_v0 = vld [vmem:[%s19019_s1 + $0x28] sm:$0xff]  }
 0x293   : > { %14304 = vmatpush3.bf16.msra.mxu0 %v15737_v56  ;;  %v12064_v56 = vcombine.low %v12043_v51, %v17879_v52 }
 0x294   : > { %14484 = vmatpush3.bf16.msra.mxu1 %v15738_v57  ;;  %14305 = vmatprep.subr.bf16.mxu0 %v15739_v34  ;;  %v15781_v57 = vld [vmem:[%s19019_s1 + $0xf0] sm:$0xff]  }
 0x295   : > { %14485 = vmatprep.subr.bf16.mxu1 %v15740_v37  ;;  %v7213_v6 = vshrl.u32 %v12064_v56, 16 }
 0x297   : > { %14306 = vmatpush3.bf16.msra.mxu0 %v15739_v34  ;;  %v15782_v34 = vld [vmem:[%s19019_s1 + $0xf0] sm:$0xff]  }
 0x298   : > { %14486 = vmatpush3.bf16.msra.mxu1 %v15740_v37  ;;  %14307 = vmatprep.subr.bf16.mxu0 %v15741_v59  ;;  %v17893_v37 = vld [vmem:[%s16418_s9 + $0x6c] sm:$0xff]  }
 0x299   : > { %14487 = vmatprep.subr.bf16.mxu1 %v15742_v60  ;;  %v6085_v47 = vrot.slane %v17893_v37, 1 }
 0x29b   : > { %14308 = vmatpush3.bf16.msra.mxu0 %v15741_v59  ;;  %v5944_v59 = vshll.u32 %v11812_v54, 16 }
 0x29c   : > { %14488 = vmatpush3.bf16.msra.mxu1 %v15742_v60  ;;  %14309 = vmatprep.subr.bf16.mxu0 %v15743_v62  ;;  %v17896_v60 = vld [vmem:[%s16418_s9 + $0x80] sm:$0xff]  }
 0x29d   : > { %14489 = vmatprep.subr.bf16.mxu1 %v15744_v63  ;;  %v7220_v8 = vshll.u32 %v17896_v60, 16  ;;  %v7356_v51 = vrot.slane %v17896_v60, 1 }
 0x29f   : > { %14310 = vmatpush3.bf16.msra.mxu0 %v15743_v62  ;;  %v7215_v62 = vshll.u32 %v12064_v56, 16  ;;  %v17914_v17 = vrot.slane %v7220_v8, 1  ;;  %v15826_v8 = vld [vmem:[%s19019_s1 + $0x178] sm:$0xff]  }
 0x2a0   : > { %14490 = vmatpush3.bf16.msra.mxu1 %v15744_v63  ;;  %14311 = vmatprep.subr.bf16.mxu0 %v15745_v0  ;;  %v15783_v63 = vld [vmem:[%s19019_s1 + $0xf8] sm:$0xff]  }
 0x2a1   : > { %14491 = vmatprep.subr.bf16.mxu1 %v15746_v3 }
 0x2a3   : > { %14312 = vmatpush3.bf16.msra.mxu0 %v15745_v0  ;;  %v15784_v0 = vld [vmem:[%s19019_s1 + $0xf8] sm:$0xff]  }
 0x2a4   : > { %14492 = vmatpush3.bf16.msra.mxu1 %v15746_v3  ;;  %14313 = vmatprep.subr.bf16.mxu0 %v15747_v31  ;;  %v5942_v3 = vshrl.u32 %v11812_v54, 16  ;;  %v15814_v54 = vld [vmem:[%s19019_s1 + $0x148] sm:$0xff]  }
 0x2a5   : > { %14493 = vmatprep.subr.bf16.mxu1 %v15748_v4 }
 0x2a7   : > { %14314 = vmatpush3.bf16.msra.mxu0 %v15747_v31  ;;  %v5946_v31 = vrot.slane %v5944_v59, 1  ;;  %v15816_v59 = vld [vmem:[%s19019_s1 + $0x150] sm:$0xff]  }
 0x2a8   : > { %14494 = vmatpush3.bf16.msra.mxu1 %v15748_v4  ;;  %14315 = vmatprep.subr.bf16.mxu0 %v15749_v7  ;;  %v5949_v4 = vshll.u32 %v17893_v37, 16 }
 0x2a9   : > { %14495 = vmatprep.subr.bf16.mxu1 %v15750_v9 }
 0x2ab   : > { %14316 = vmatpush3.bf16.msra.mxu0 %v15749_v7  ;;  %v7217_v7 = vrot.slane %v7215_v62, 1  ;;  %v15818_v62 = vld [vmem:[%s19019_s1 + $0x158] sm:$0xff]  }
 0x2ac   : > { %14496 = vmatpush3.bf16.msra.mxu1 %v15750_v9  ;;  %14321 = vmatprep.subr.bf16.mxu0 %v15751_v55  ;;  %v15786_v9 = vld [vmem:[%s19019_s1 + $0x100] sm:$0xff]  }
 0x2ad   : > { %14501 = vmatprep.subr.bf16.mxu1 %v15752_v12  ;;  %v7218_v15 = vor.u32 %v7217_v7, %v7213_v6  ;;  %v15824_v6 = vld [vmem:[%s19019_s1 + $0x170] sm:$0xff]   ;;  %v15825_v7 = vld [vmem:[%s19019_s1 + $0x178] sm:$0xff]  }
 0x2ae   : > { %14318 = vmatmul.mubr.bf16.vlgmr.msra.gmra.mrb[8].mxu0 %v17628_v42  ;;  %v15757_v42 = vld [vmem:[%s19019_s1 + $0x98] sm:$0xff]  }
 0x2af   : > { %14322 = vmatpush3.bf16.msra.mxu0 %v15751_v55  ;;  %14498 = vmatmul.mubr.bf16.vlgmr.msra.gmra.mrb[8].mxu1 %v17634_v2  ;;  %v15758_v2 = vld [vmem:[%s19019_s1 + $0x98] sm:$0xff]   ;;  %v5947_v55 = vor.u32 %v5946_v31, %v5942_v3  ;;  %v15821_v3 = vld [vmem:[%s19019_s1 + $0x168] sm:$0xff]  }
 0x2b0   : > { %14502 = vmatpush3.bf16.msra.mxu1 %v15752_v12  ;;  %14323 = vmatprep.subr.bf16.mxu0 %v15753_v33  ;;  %v5951_v12 = vrot.slane %v5949_v4, 1  ;;  %v15822_v31 = vld [vmem:[%s19019_s1 + $0x168] sm:$0xff]   ;;  %v15823_v4 = vld [vmem:[%s19019_s1 + $0x170] sm:$0xff]  }
 0x2b1   : > { %14503 = vmatprep.subr.bf16.mxu1 %v15754_v49  ;;  %14337 = vmatprep.mubr.bf16.mxu0 %v5668_v18  ;;  %v7223_v18 = vsel %vm326_vm0, %v7218_v15, %v17914_v17  ;;  %v15831_v15 = vld [vmem:[%s19019_s1 + $0x188] sm:$0xff]  }
 0x2b2   : > { %14517 = vmatprep.mubr.bf16.mxu1 %v6939_v19  ;;  %v15793_v19 = vld [vmem:[%s19019_s1 + $0x110] sm:$0xff]  }
 0x2b3   : > { %14324 = vmatpush3.bf16.msra.mxu0 %v15753_v33  ;;  %v15792_v33 = vld [vmem:[%s19019_s1 + $0x108] sm:$0xff]  }
 0x2b4   : > { %14504 = vmatpush3.bf16.msra.mxu1 %v15754_v49  ;;  %14325 = vmatprep.subr.bf16.mxu0 %v15755_v16  ;;  %v5952_v49 = vsel %vm326_vm0, %v5947_v55, %v5951_v12  ;;  %v15830_v55 = vld [vmem:[%s19019_s1 + $0x180] sm:$0xff]  }
 0x2b5   : > { %14505 = vmatprep.subr.bf16.mxu1 %v15756_v20 }
 0x2b7   : > { %14326 = vmatpush3.bf16.msra.mxu0 %v15755_v16  ;;  %v15794_v16 = vld [vmem:[%s19019_s1 + $0x110] sm:$0xff]  }
 0x2b8   : > { %14506 = vmatpush3.bf16.msra.mxu1 %v15756_v20  ;;  %14327 = vmatprep.subr.bf16.mxu0 %v15757_v42  ;;  %v15795_v20 = vld [vmem:[%s19019_s1 + $0x118] sm:$0xff]  }
 0x2b9   : > { %14507 = vmatprep.subr.bf16.mxu1 %v15758_v2 }
 0x2bb   : > { %14328 = vmatpush3.bf16.msra.mxu0 %v15757_v42  ;;  %v15796_v42 = vld [vmem:[%s19019_s1 + $0x118] sm:$0xff]  }
 0x2bc   : > { %14508 = vmatpush3.bf16.msra.mxu1 %v15758_v2  ;;  %14329 = vmatprep.subr.bf16.mxu0 %v15759_v21  ;;  %v15797_v2 = vld [vmem:[%s19019_s1 + $0x120] sm:$0xff]  }
 0x2bd   : > { %14509 = vmatprep.subr.bf16.mxu1 %v15760_v22 }
 0x2bf   : > { %14330 = vmatpush3.bf16.msra.mxu0 %v15759_v21  ;;  %v15798_v21 = vld [vmem:[%s19019_s1 + $0x120] sm:$0xff]  }
 0x2c0   : > { %14510 = vmatpush3.bf16.msra.mxu1 %v15760_v22  ;;  %14331 = vmatprep.subr.bf16.mxu0 %v15761_v23  ;;  %v15799_v22 = vld [vmem:[%s19019_s1 + $0x128] sm:$0xff]  }
 0x2c1   : > { %14511 = vmatprep.subr.bf16.mxu1 %v15762_v24 }
 0x2c3   : > { %14332 = vmatpush3.bf16.msra.mxu0 %v15761_v23  ;;  %v15800_v23 = vld [vmem:[%s19019_s1 + $0x128] sm:$0xff]  }
 0x2c4   : > { %14512 = vmatpush3.bf16.msra.mxu1 %v15762_v24  ;;  %14333 = vmatprep.subr.bf16.mxu0 %v15763_v5  ;;  %v17950_v24 = vld [vmem:[%s16418_s9 + $0x74] ss:$0 sps:$4 sm:$0x11]  }
 0x2c5   : > { %14513 = vmatprep.subr.bf16.mxu1 %v15764_v25  ;;  %v5957_v28 = vshll.u32 %v17950_v24, 16 }
 0x2c7   : > { %14334 = vmatpush3.bf16.msra.mxu0 %v15763_v5  ;;  %v15801_v5 = vld [vmem:[%s19019_s1 + $0x130] sm:$0xff]  }
 0x2c8   : > { %14514 = vmatpush3.bf16.msra.mxu1 %v15764_v25  ;;  %14335 = vmatprep.subr.bf16.mxu0 %v15765_v26  ;;  %v17956_v25 = vld [vmem:[%s16418_s9 + $0x88] ss:$0 sps:$4 sm:$0x11]  }
 0x2c9   : > { %14515 = vmatprep.subr.bf16.mxu1 %v15766_v27 }
 0x2cb   : > { %14336 = vmatpush3.bf16.msra.mxu0 %v15765_v26  ;;  %v15802_v26 = vld [vmem:[%s19019_s1 + $0x130] sm:$0xff]  }
 0x2cc   : > { %14516 = vmatpush3.bf16.msra.mxu1 %v15766_v27  ;;  %14341 = vmatprep.subr.bf16.mxu0 %v15768_v29  ;;  %v5953_v27 = vshrl.u32 %v17893_v37, 16  ;;  %v15833_v37 = vld [vmem:[%s19019_s1 + $0x190] sm:$0xff]  }
 0x2cd   : > { %14521 = vmatprep.subr.bf16.mxu1 %v15770_v32 }
 0x2ce   : > { %14338 = vmatmul.mubr.bf16.vlgmr.msra.gmra.mrb[8].mxu0 %v5670_v35  ;;  %v7228_v35 = vshll.u32 %v17956_v25, 16 }
 0x2cf   : > { %14342 = vmatpush3.bf16.msra.mxu0 %v15768_v29  ;;  %14518 = vmatmul.mubr.bf16.vlgmr.msra.gmra.mrb[8].mxu1 %v6941_v36  ;;  %v11823_v29 = vld [vmem:[%s16418_s9 + $0x64] sm:$0xe]  ;;  %v12075_v36 = vld [vmem:[%s16418_s9 + $0x78] sm:$0xe] }
 0x2d0   : > { %14522 = vmatpush3.bf16.msra.mxu1 %v15770_v32  ;;  %14343 = vmatprep.subr.bf16.mxu0 %v15771_v39  ;;  %v7224_v32 = vshrl.u32 %v17896_v60, 16  ;;  %v15817_v60 = vld [vmem:[%s19019_s1 + $0x158] sm:$0xff]  }
 0x2d1   : > { %14523 = vmatprep.subr.bf16.mxu1 %v15772_v38  ;;  %14357 = vmatprep.mubr.bf16.mxu0 %v15785_v61  ;;  %v5955_v61 = vor.u32 %v5953_v27, %v5951_v12  ;;  %v18094_v27 = vld [vmem:[%s16418_s9 + $0x94] sm:$0xff]  }
 0x2d2   : > { %14537 = vmatprep.mubr.bf16.mxu1 %v15787_v1  ;;  %v5959_v1 = vrot.slane %v5957_v28, 1  ;;  %v15841_v28 = vld [vmem:[%s19019_s1 + $0x1b0] sm:$0xff]  }
 0x2d3   : > { %14344 = vmatpush3.bf16.msra.mxu0 %v15771_v39  ;;  %v15804_v39 = vld [vmem:[%s19019_s1 + $0x138] sm:$0xff]  }
 0x2d4   : > { %14524 = vmatpush3.bf16.msra.mxu1 %v15772_v38  ;;  %14345 = vmatprep.subr.bf16.mxu0 %v15773_v40  ;;  %v11840_v38 = vcombine.low %v11823_v29, %v17872_v48  ;;  %v5960_v48 = vsel %vm326_vm0, %v5955_v61, %v5959_v1 }
 0x2d5   : > { %14525 = vmatprep.subr.bf16.mxu1 %v15774_v41 }
 0x2d7   : > { %14346 = vmatpush3.bf16.msra.mxu0 %v15773_v40  ;;  %v12092_v40 = vcombine.low %v12075_v36, %v17879_v52 }
 0x2d8   : > { %14526 = vmatpush3.bf16.msra.mxu1 %v15774_v41  ;;  %14347 = vmatprep.subr.bf16.mxu0 %v15775_v43  ;;  %v15807_v41 = vld [vmem:[%s19019_s1 + $0x140] sm:$0xff]  }
 0x2d9   : > { %14527 = vmatprep.subr.bf16.mxu1 %v15776_v44 }
 0x2db   : > { %14348 = vmatpush3.bf16.msra.mxu0 %v15775_v43  ;;  %v7226_v43 = vor.u32 %v7224_v32, %v17914_v17  ;;  %v15832_v17 = vld [vmem:[%s19019_s1 + $0x188] sm:$0xff]   ;;  %v15842_v32 = vld [vmem:[%s19019_s1 + $0x1b0] sm:$0xff]  }
 0x2dc   : > { %14528 = vmatpush3.bf16.msra.mxu1 %v15776_v44  ;;  %14349 = vmatprep.subr.bf16.mxu0 %v15777_v45  ;;  %v7230_v44 = vrot.slane %v7228_v35, 1 }
 0x2dd   : > { %14529 = vmatprep.subr.bf16.mxu1 %v15778_v46 }
 0x2de   : > { %v7231_v52 = vsel %vm326_vm0, %v7226_v43, %v7230_v44 }
 0x2df   : > { %14350 = vmatpush3.bf16.msra.mxu0 %v15777_v45  ;;  %v15810_v45 = vld [vmem:[%s19019_s1 + $0x140] sm:$0xff]  }
 0x2e0   : > { %14530 = vmatpush3.bf16.msra.mxu1 %v15778_v46  ;;  %14351 = vmatprep.subr.bf16.mxu0 %v15779_v50  ;;  %v6084_v46 = vrot.slane %v11840_v38, 1 }
 0x2e1   : > { %14531 = vmatprep.subr.bf16.mxu1 %v15780_v53 }
 0x2e2   : > { %v6086_v56 = vsel %vm566_vm1, %v6084_v46, %v6085_v47 }
 0x2e3   : > { %14352 = vmatpush3.bf16.msra.mxu0 %v15779_v50  ;;  %v7355_v50 = vrot.slane %v12092_v40, 1  ;;  %v7642_v40 = vshll.u32 %v18094_v27, 16 }
 0x2e4   : > { %14532 = vmatpush3.bf16.msra.mxu1 %v15780_v53  ;;  %14353 = vmatprep.subr.bf16.mxu0 %v15781_v57  ;;  %v15813_v53 = vld [vmem:[%s19019_s1 + $0x148] sm:$0xff]  }
 0x2e5   : > { %14533 = vmatprep.subr.bf16.mxu1 %v15782_v34 }
 0x2e7   : > { %14354 = vmatpush3.bf16.msra.mxu0 %v15781_v57  ;;  %v7357_v57 = vsel %vm566_vm1, %v7355_v50, %v7356_v51 }
 0x2e8   : > { %14534 = vmatpush3.bf16.msra.mxu1 %v15782_v34  ;;  %14355 = vmatprep.subr.bf16.mxu0 %v15783_v63  ;;  %v15815_v34 = vld [vmem:[%s19019_s1 + $0x150] sm:$0xff]  }
 0x2e9   : > { %14535 = vmatprep.subr.bf16.mxu1 %v15784_v0 }
 0x2eb   : > { %14356 = vmatpush3.bf16.msra.mxu0 %v15783_v63  ;;  %v15819_v63 = vld [vmem:[%s19019_s1 + $0x160] sm:$0xff]  }
 0x2ec   : > { %14536 = vmatpush3.bf16.msra.mxu1 %v15784_v0  ;;  %14361 = vmatprep.subr.bf16.mxu0 %v15786_v9  ;;  %v15820_v0 = vld [vmem:[%s19019_s1 + $0x160] sm:$0xff]  }
 0x2ed   : > { %14541 = vmatprep.subr.bf16.mxu1 %v15788_v10 }
 0x2ee   : > { %14358 = vmatmul.mubr.bf16.vlgmr.msra.gmra.mrb[8].mxu0 %v15789_v11  ;;  %v7358_v11 = vrot.slane %v17956_v25, 1  ;;  %v18088_v25 = vld [vmem:[%s16418_s9 + $0x80] sm:$0xff]  }
 0x2ef   : > { %14362 = vmatpush3.bf16.msra.mxu0 %v15786_v9  ;;  %14538 = vmatmul.mubr.bf16.vlgmr.msra.gmra.mrb[8].mxu1 %v15790_v13  ;;  %v6087_v9 = vrot.slane %v17950_v24, 1  ;;  %v18082_v24 = vld [vmem:[%s16418_s9 + $0x90] sm:$0xf]  ;;  %v6371_v61 = vshll.u32 %v18088_v25, 16 }
 0x2f0   : > { %14542 = vmatpush3.bf16.msra.mxu1 %v15788_v10  ;;  %14363 = vmatprep.subr.bf16.mxu0 %v15791_v58  ;;  %v15828_v10 = vld [vmem:[%s19019_s1 + $0x180] sm:$0xff]   ;;  %v7359_v13 = vsel %vm566_vm1, %v7356_v51, %v7358_v11 }
 0x2f1   : > { %14543 = vmatprep.subr.bf16.mxu1 %v15792_v33  ;;  %14377 = vmatprep.mubr.bf16.mxu0 %v5952_v49  ;;  %v6088_v12 = vsel %vm566_vm1, %v6085_v47, %v6087_v9  ;;  %v15834_v49 = vld [vmem:[%s19019_s1 + $0x190] sm:$0xff]   ;;  %v15843_v47 = vld [vmem:[%s19019_s1 + $0x1b8] sm:$0xff]   ;;  %v15848_v9 = vld [vmem:[%s19019_s1 + $0x1c0] sm:$0xff]  }
 0x2f2   : > { %14557 = vmatprep.mubr.bf16.mxu1 %v7223_v18  ;;  %v15835_v18 = vld [vmem:[%s19019_s1 + $0x198] sm:$0xff]   ;;  %v15849_v11 = vld [vmem:[%s16418_s9 + $0x80] sm:$0xff]  }
 0x2f3   : > { %14364 = vmatpush3.bf16.msra.mxu0 %v15791_v58  ;;  %v15845_v58 = vld [vmem:[%s16418_s9 + $0x78] sm:$0xff]  }
 0x2f4   : > { %14544 = vmatpush3.bf16.msra.mxu1 %v15792_v33  ;;  %14365 = vmatprep.subr.bf16.mxu0 %v15793_v19  ;;  %v15847_v33 = vld [vmem:[%s16418_s9 + $0x8c] sm:$0xff]  }
 0x2f5   : > { %14545 = vmatprep.subr.bf16.mxu1 %v15794_v16 }
 0x2f7   : > { %14366 = vmatpush3.bf16.msra.mxu0 %v15793_v19  ;;  %v15836_v19 = vld [vmem:[%s19019_s1 + $0x198] sm:$0xff]  }
 0x2f8   : > { %14546 = vmatpush3.bf16.msra.mxu1 %v15794_v16  ;;  %14367 = vmatprep.subr.bf16.mxu0 %v15795_v20  ;;  %v15837_v16 = vld [vmem:[%s19019_s1 + $0x1a0] sm:$0xff]  }
 0x2f9   : > { %14547 = vmatprep.subr.bf16.mxu1 %v15796_v42 }
 0x2fb   : > { %14368 = vmatpush3.bf16.msra.mxu0 %v15795_v20  ;;  %v15838_v20 = vld [vmem:[%s19019_s1 + $0x1a0] sm:$0xff]  }
 0x2fc   : > { %14548 = vmatpush3.bf16.msra.mxu1 %v15796_v42  ;;  %14369 = vmatprep.subr.bf16.mxu0 %v15797_v2  ;;  %v11881_v42 = vld [vmem:[%s16418_s9 + $0x78] sm:$0xf] }
 0x2fd   : > { %14549 = vmatprep.subr.bf16.mxu1 %v15798_v21 }
 0x2ff   : > { %14370 = vmatpush3.bf16.msra.mxu0 %v15797_v2  ;;  %v18072_v2 = vld [vmem:[%s16418_s9 + $0x7c] sm:$0xf] }
 0x300   : > { %14550 = vmatpush3.bf16.msra.mxu1 %v15798_v21  ;;  %14371 = vmatprep.subr.bf16.mxu0 %v15799_v22  ;;  %v15839_v21 = vld [vmem:[%s19019_s1 + $0x1a8] sm:$0xff]  }
 0x301   : > { %14551 = vmatprep.subr.bf16.mxu1 %v15800_v23 }
 0x303   : > { %14372 = vmatpush3.bf16.msra.mxu0 %v15799_v22  ;;  %v18078_v22 = vcombine.low %v11881_v42, %v18072_v2 }
 0x304   : > { %14552 = vmatpush3.bf16.msra.mxu1 %v15800_v23  ;;  %14373 = vmatprep.subr.bf16.mxu0 %v15801_v5  ;;  %v12133_v23 = vld [vmem:[%s16418_s9 + $0x8c] sm:$0xf] }
 0x305   : > { %14553 = vmatprep.subr.bf16.mxu1 %v15802_v26  ;;  %v6366_v29 = vshll.u32 %v18078_v22, 16 }
 0x307   : > { %14374 = vmatpush3.bf16.msra.mxu0 %v15801_v5  ;;  %v15840_v5 = vld [vmem:[%s19019_s1 + $0x1a8] sm:$0xff]   ;;  %v6368_v50 = vrot.slane %v6366_v29, 1 }
 0x308   : > { %14554 = vmatpush3.bf16.msra.mxu1 %v15802_v26  ;;  %14375 = vmatprep.subr.bf16.mxu0 %v15803_v30  ;;  %v18091_v26 = vcombine.low %v12133_v23, %v18082_v24 }
 0x309   : > { %14555 = vmatprep.subr.bf16.mxu1 %v15804_v39 }
 0x30a   : > { %v7637_v1 = vshll.u32 %v18091_v26, 16 }
 0x30b   : > { %14376 = vmatpush3.bf16.msra.mxu0 %v15803_v30 }
 0x30c   : > { %14556 = vmatpush3.bf16.msra.mxu1 %v15804_v39  ;;  %14381 = vmatprep.subr.bf16.mxu0 %v15807_v41 }
 0x30d   : > { %14561 = vmatprep.subr.bf16.mxu1 %v15810_v45 }
 0x30e   : > { %14378 = vmatmul.mubr.bf16.vlgmr.msra.gmra.mrb[8].mxu0 %v5960_v48  ;;  %v6364_v48 = vshrl.u32 %v18078_v22, 16  ;;  %v15853_v22 = vld [vmem:[%s19019_s1 + $0x1d0] sm:$0xff]  }
 0x30f   : > { %14382 = vmatpush3.bf16.msra.mxu0 %v15807_v41  ;;  %14558 = vmatmul.mubr.bf16.vlgmr.msra.gmra.mrb[8].mxu1 %v7231_v52  ;;  %v16065_v41 = vld [vmem:[%s19020_s2] ss:$0 sm:$0xff] }
 0x310   : > { %14562 = vmatpush3.bf16.msra.mxu1 %v15810_v45  ;;  %14383 = vmatprep.subr.bf16.mxu0 %v15813_v53 }
 0x311   : > { %14563 = vmatprep.subr.bf16.mxu1 %v15814_v54  ;;  %14397 = vmatprep.mubr.bf16.mxu0 %v6086_v56 }
 0x312   : > { %14577 = vmatprep.mubr.bf16.mxu1 %v7357_v57  ;;  %v15844_v57 = vld [vmem:[%s19019_s1 + $0x1b8] sm:$0xff]  }
 0x313   : > { %14384 = vmatpush3.bf16.msra.mxu0 %v15813_v53 }
 0x314   : > { %14564 = vmatpush3.bf16.msra.mxu1 %v15814_v54  ;;  %14385 = vmatprep.subr.bf16.mxu0 %v15815_v34 }
 0x315   : > { %14565 = vmatprep.subr.bf16.mxu1 %v15816_v59 }
 0x317   : > { %14386 = vmatpush3.bf16.msra.mxu0 %v15815_v34 }
 0x318   : > { %14566 = vmatpush3.bf16.msra.mxu1 %v15816_v59  ;;  %14387 = vmatprep.subr.bf16.mxu0 %v15817_v60 }
 0x319   : > { %14567 = vmatprep.subr.bf16.mxu1 %v15818_v62 }
 0x31b   : > { %14388 = vmatpush3.bf16.msra.mxu0 %v15817_v60 }
 0x31c   : > { %14568 = vmatpush3.bf16.msra.mxu1 %v15818_v62  ;;  %14389 = vmatprep.subr.bf16.mxu0 %v15819_v63  ;;  %v7635_v62 = vshrl.u32 %v18091_v26, 16 }
 0x31d   : > { %14569 = vmatprep.subr.bf16.mxu1 %v15820_v0 }
 0x31f   : > { %14390 = vmatpush3.bf16.msra.mxu0 %v15819_v63 }
 0x320   : > { %14570 = vmatpush3.bf16.msra.mxu1 %v15820_v0  ;;  %14391 = vmatprep.subr.bf16.mxu0 %v15821_v3 }
 0x321   : > { %14571 = vmatprep.subr.bf16.mxu1 %v15822_v31 }
 0x323   : > { %14392 = vmatpush3.bf16.msra.mxu0 %v15821_v3 }
 0x324   : > { %14572 = vmatpush3.bf16.msra.mxu1 %v15822_v31  ;;  %14393 = vmatprep.subr.bf16.mxu0 %v15823_v4  ;;  %v7639_v31 = vrot.slane %v7637_v1, 1 }
 0x325   : > { %14573 = vmatprep.subr.bf16.mxu1 %v15824_v6 }
 0x327   : > { %14394 = vmatpush3.bf16.msra.mxu0 %v15823_v4 }
 0x328   : > { %14574 = vmatpush3.bf16.msra.mxu1 %v15824_v6  ;;  %14395 = vmatprep.subr.bf16.mxu0 %v15825_v7 }
 0x329   : > { %14575 = vmatprep.subr.bf16.mxu1 %v15826_v8 }
 0x32b   : > { %14396 = vmatpush3.bf16.msra.mxu0 %v15825_v7  ;;  %v15846_v7 = vld [vmem:[%s19019_s1 + $0x1c0] sm:$0xff]  }
 0x32c   : > { %14576 = vmatpush3.bf16.msra.mxu1 %v15826_v8  ;;  %14401 = vmatprep.subr.bf16.mxu0 %v15828_v10 }
 0x32d   : > { %14581 = vmatprep.subr.bf16.mxu1 %v15830_v55 }
 0x32e   : > { %14398 = vmatmul.mubr.bf16.vlgmr.msra.gmra.mrb[8].mxu0 %v6088_v12  ;;  %v18128_v12 = vrot.slane %v6371_v61, 1 }
 0x32f   : > { %14402 = vmatpush3.bf16.msra.mxu0 %v15828_v10  ;;  %14578 = vmatmul.mubr.bf16.vlgmr.msra.gmra.mrb[8].mxu1 %v7359_v13 }
 0x330   : > { %14582 = vmatpush3.bf16.msra.mxu1 %v15830_v55  ;;  %14403 = vmatprep.subr.bf16.mxu0 %v15831_v15  ;;  %v6369_v55 = vor.u32 %v6368_v50, %v6364_v48  ;;  %v6375_v48 = vshrl.u32 %v18088_v25, 16 }
 0x331   : > { %14583 = vmatprep.subr.bf16.mxu1 %v15832_v17  ;;  %14417 = vmatprep.mubr.bf16.mxu0 %v15845_v58  ;;  %v18131_v58 = vrot.slane %v7642_v40, 1  ;;  %v15858_v40 = vld [vmem:[%s19019_s1 + $0x1e0] sm:$0xff]  }
 0x332   : > { %14597 = vmatprep.mubr.bf16.mxu1 %v15847_v33 }
 0x333   : > { %14404 = vmatpush3.bf16.msra.mxu0 %v15831_v15  ;;  %v15850_v15 = vld [vmem:[%s16418_s9 + $0x94] sm:$0xff]  }
 0x334   : > { %14584 = vmatpush3.bf16.msra.mxu1 %v15832_v17  ;;  %14405 = vmatprep.subr.bf16.mxu0 %v15833_v37  ;;  %v7640_v17 = vor.u32 %v7639_v31, %v7635_v62 }
 0x335   : > { %14585 = vmatprep.subr.bf16.mxu1 %v15834_v49 }
 0x336   : > { %v7645_v42 = vsel %vm326_vm0, %v7640_v17, %v18131_v58  ;;  %v15878_v17 = vld [vmem:[%s19019_s1 + $0x218] sm:$0xff]  }
 0x337   : > { %14406 = vmatpush3.bf16.msra.mxu0 %v15833_v37  ;;  %v15851_v37 = vld [vmem:[%s19019_s1 + $0x1c8] sm:$0xff]  }
 0x338   : > { %14586 = vmatpush3.bf16.msra.mxu1 %v15834_v49  ;;  %14407 = vmatprep.subr.bf16.mxu0 %v15835_v18 }
 0x339   : > { %14587 = vmatprep.subr.bf16.mxu1 %v15836_v19 }
 0x33b   : > { %14408 = vmatpush3.bf16.msra.mxu0 %v15835_v18  ;;  %v15852_v18 = vld [vmem:[%s19019_s1 + $0x1c8] sm:$0xff]  }
 0x33c   : > { %14588 = vmatpush3.bf16.msra.mxu1 %v15836_v19  ;;  %14409 = vmatprep.subr.bf16.mxu0 %v15837_v16 }
 0x33d   : > { %14589 = vmatprep.subr.bf16.mxu1 %v15838_v20 }
 0x33f   : > { %14410 = vmatpush3.bf16.msra.mxu0 %v15837_v16  ;;  %v6374_v16 = vsel %vm326_vm0, %v6369_v55, %v18128_v12 }
 0x340   : > { %14590 = vmatpush3.bf16.msra.mxu1 %v15838_v20  ;;  %14411 = vmatprep.subr.bf16.mxu0 %v15839_v21 }
 0x341   : > { %v14099_v30 = vpop.f32.mrb[4].mxu0  ;;  %14591 = vmatprep.subr.bf16.mxu1 %v15840_v5 }
 0x342   : > { %v14279_v35 = vpop.f32.mrb[4].mxu1  ;;  %v4053_v36 = vpop.f32.mrb[5].mxu0  ;;  %v4074_v43 = vadd.f32 %v16065_v41, %v14099_v30  ;;  %v15855_v30 = vld [vmem:[%s19019_s1 + $0x1d8] sm:$0xff]  }
 0x343   : > { %v5324_v39 = vpop.f32.mrb[5].mxu1  ;;  %v14100_v38 = vpop.f32.mrb[6].mxu0  ;;  %14412 = vmatpush3.bf16.msra.mxu0 %v15839_v21  ;;  %v5345_v51 = vadd.f32 %v16065_v41, %v14279_v35  ;;  %v4072_v52 = vadd.f32 %v16065_v41, %v4053_v36  ;;  %v15856_v35 = vld [vmem:[%s19019_s1 + $0x1d8] sm:$0xff]  }
 0x344   : > { %v4075_v44 = vadd.f32 %v16065_v41, %v14100_v38  ;;  %v14280_v45 = vpop.f32.mrb[6].mxu1  ;;  %14592 = vmatpush3.bf16.msra.mxu1 %v15840_v5  ;;  %v4056_v46 = vpop.f32.mrb[7].mxu0  ;;  %14413 = vmatprep.subr.bf16.mxu0 %v15841_v28  ;;  %v5343_v34 = vadd.f32 %v16065_v41, %v5324_v39  ;;  %v15854_v5 = vld [vmem:[%s19019_s1 + $0x1d0] sm:$0xff]   ;;  %v15857_v38 = vld [vmem:[%s19019_s1 + $0x1e0] sm:$0xff]  }
 0x345   : > { %v5346_v53 = vadd.f32 %v16065_v41, %v14280_v45  ;;  %v4073_v54 = vadd.f32 %v16065_v41, %v4056_v46  ;;  %v5327_v56 = vpop.f32.mrb[7].mxu1  ;;  %14593 = vmatprep.subr.bf16.mxu1 %v15842_v32  ;;  %v15861_v45 = vld [vmem:[%s19019_s1 + $0x1f0] sm:$0xff]   ;;  %v18177_v46 = vld [vmem:[%s16418_s9 + $0x9c] ss:$0 sps:$4 sm:$0x11]  }
 0x346   : > { %v12774_v59 = vpack.c.bf16 %v4075_v44, %v4074_v43  ;;  %v5344_v60 = vadd.f32 %v16065_v41, %v5327_v56  ;;  %v12165_v56 = vld [vmem:[%s16418_s9 + $0x8c] sm:$0xe] }
 0x347   : > { %v12784_v63 = vpack.c.bf16 %v5346_v53, %v5345_v51  ;;  %v4076_v0 = vadd.f32 %v4073_v54, %v4072_v52  ;;  %v12769_v3 = vpack.c.bf16 %v4073_v54, %v4072_v52  ;;  %14414 = vmatpush3.bf16.msra.mxu0 %v15841_v28  ;;  %v15863_v52 = vld [vmem:[%s19019_s1 + $0x1f8] sm:$0xff]   ;;  %v7650_v54 = vshll.u32 %v18177_v46, 16 }
 0x348   : > { %12830 = vst [vmem:[%s16380_s24 + $0x28] sm:$0xff] %v12774_v59   ;;  %v5347_v4 = vadd.f32 %v5344_v60, %v5343_v34  ;;  %v12779_v6 = vpack.c.bf16 %v5344_v60, %v5343_v34  ;;  %14594 = vmatpush3.bf16.msra.mxu1 %v15842_v32  ;;  %14415 = vmatprep.subr.bf16.mxu0 %v15843_v47 }
 0x349   : > { %12832 = vst [vmem:[%s16380_s24 + $0x38] sm:$0xff] %v12784_v63   ;;  %v4077_v8 = vadd.f32 %v4076_v0, %v4074_v43  ;;  %12829 = vst [vmem:[%s16380_s24 + $0x20] sm:$0xff] %v12769_v3   ;;  %14595 = vmatprep.subr.bf16.mxu1 %v15844_v57  ;;  %v15859_v43 = vld [vmem:[%s19019_s1 + $0x1e8] sm:$0xff]   ;;  %v6377_v59 = vor.u32 %v6375_v48, %v18128_v12  ;;  %v12182_v62 = vcombine.low %v12165_v56, %v18082_v24  ;;  %v15867_v63 = vld [vmem:[%s19019_s1 + $0x200] sm:$0xff]  }
 0x34a   : > { %v5348_v10 = vadd.f32 %v5347_v4, %v5345_v51  ;;  %12831 = vst [vmem:[%s16380_s24 + $0x30] sm:$0xff] %v12779_v6   ;;  %v11913_v51 = vld [vmem:[%s16418_s9 + $0x78] sm:$0xe]  ;;  %v7652_v3 = vrot.slane %v7650_v54, 1  ;;  %v6507_v4 = vrot.slane %v18088_v25, 1  ;;  %v15875_v12 = vld [vmem:[%s19019_s1 + $0x210] sm:$0xff]  }
 0x34b   : > { %v4078_v13 = vadd.f32 %v4077_v8, %v4075_v44  ;;  %14416 = vmatpush3.bf16.msra.mxu0 %v15843_v47  ;;  %v18171_v44 = vld [vmem:[%s16418_s9 + $0x88] ss:$0 sps:$4 sm:$0x11]   ;;  %v15862_v47 = vld [vmem:[%s19019_s1 + $0x1f0] sm:$0xff]   ;;  %v11930_v34 = vcombine.low %v11913_v51, %v18072_v2  ;;  %v15870_v2 = vld [vmem:[%s19019_s1 + $0x200] sm:$0xff]   ;;  %v7777_v6 = vrot.slane %v12182_v62, 1 }
 0x34c   : > { %v5349_v33 = vadd.f32 %v5348_v10, %v5346_v53  ;;  %14596 = vmatpush3.bf16.msra.mxu1 %v15844_v57  ;;  %14421 = vmatprep.subr.bf16.mxu0 %v15846_v7  ;;  %v6379_v50 = vshll.u32 %v18171_v44, 16  ;;  %v7646_v53 = vshrl.u32 %v18094_v27, 16  ;;  %v15864_v57 = vld [vmem:[%s19019_s1 + $0x1f8] sm:$0xff]   ;;  %v15874_v10 = vld [vmem:[%s19019_s1 + $0x208] sm:$0xff]   ;;  %v15894_v56 = vld [vmem:[%s19019_s1 + $0x50] sm:$0xff]  }
 0x34d   : > { %v4079_v49 = vrot.slane %v4078_v13, 4  ;;  %14601 = vmatprep.subr.bf16.mxu1 %v15848_v9  ;;  %v6506_v31 = vrot.slane %v11930_v34, 1  ;;  %v15896_v34 = vld [vmem:[%s19019_s1 + $0x58] sm:$0xff]   ;;  %v15899_v62 = vld [vmem:[%s19019_s1 + $0x68] sm:$0xff]  }
 0x34e   : > { %v5350_v19 = vrot.slane %v5349_v33, 4  ;;  %14418 = vmatmul.mubr.bf16.vlgmr.msra.gmra.mrb[8].mxu0 %v15849_v11  ;;  %v6381_v60 = vrot.slane %v6379_v50, 1  ;;  %v7648_v0 = vor.u32 %v7646_v53, %v18131_v58  ;;  %v15879_v58 = vld [vmem:[%s19019_s1 + $0x220] sm:$0xff]   ;;  %v15892_v53 = vld [vmem:[%s19019_s1 + $0x48] sm:$0xff]  }
 0x34f   : > { %v4080_v20 = vadd.f32 %v4079_v49, %v4078_v13  ;;  %14422 = vmatpush3.bf16.msra.mxu0 %v15846_v7  ;;  %14598 = vmatmul.mubr.bf16.vlgmr.msra.gmra.mrb[8].mxu1 %v15850_v15  ;;  %v7778_v7 = vrot.slane %v18094_v27, 1  ;;  %v6508_v11 = vsel %vm566_vm1, %v6506_v31, %v6507_v4  ;;  %v15876_v13 = vld [vmem:[%s19019_s1 + $0x210] sm:$0xff]   ;;  %v15877_v15 = vld [vmem:[%s19019_s1 + $0x218] sm:$0xff]  }
 0x350   : > { %v5351_v21 = vadd.f32 %v5350_v19, %v5349_v33  ;;  %14602 = vmatpush3.bf16.msra.mxu1 %v15848_v9  ;;  %14423 = vmatprep.subr.bf16.mxu0 %v15851_v37  ;;  %v6382_v24 = vsel %vm326_vm0, %v6377_v59, %v6381_v60  ;;  %v7653_v8 = vsel %vm326_vm0, %v7648_v0, %v7652_v3  ;;  %v15873_v9 = vld [vmem:[%s19019_s1 + $0x208] sm:$0xff]   ;;  %v15880_v33 = vld [vmem:[%s19019_s1 + $0x220] sm:$0xff]   ;;  %v18240_v49 = vld [vmem:[%s16418_s9 + $0x7c] sm:$0xf] }
 0x351   : > { %v4081_v23 = vrot.slane %v4080_v20, 2  ;;  %14603 = vmatprep.subr.bf16.mxu1 %v15852_v18  ;;  %14437 = vmatprep.mubr.bf16.mxu0 %v6374_v16  ;;  %v7779_v55 = vsel %vm566_vm1, %v7777_v6, %v7778_v7  ;;  %v12451_v19 = vld [vmem:[%s16418_s9 + $0x8c] sm:$0xf]  ;;  %v18247_v16 = vld [vmem:[%s16418_s9 + $0x90] sm:$0xf]  ;;  %v15897_v59 = vld [vmem:[%s19019_s1 + $0x60] sm:$0xff]  }
 0x352   : > { %v5352_v26 = vrot.slane %v5351_v21, 2  ;;  %14617 = vmatprep.mubr.bf16.mxu1 %v7645_v42  ;;  %v15893_v27 = vld [vmem:[%s19019_s1 + $0x50] sm:$0xff]   ;;  %v15898_v60 = vld [vmem:[%s19019_s1 + $0x60] sm:$0xff]   ;;  %v18329_v0 = vld [vmem:[%s16418_s9 + $0x88] ss:$0 sps:$4 sm:$0x11]  }
 0x353   : > { %v4082_v28 = vadd.f32 %v4081_v23, %v4080_v20  ;;  %14424 = vmatpush3.bf16.msra.mxu0 %v15851_v37  ;;  %v12199_v37 = vld [vmem:[%s16418_s9 + $0x78] sm:$0xf]  ;;  %v15882_v20 = vld [vmem:[%s19019_s1 + $0x228] sm:$0xff]   ;;  %v15884_v23 = vld [vmem:[%s19019_s1 + $0x230] sm:$0xff]  }
 0x354   : > { %v5353_v29 = vadd.f32 %v5352_v26, %v5351_v21  ;;  %14604 = vmatpush3.bf16.msra.mxu1 %v15852_v18  ;;  %14425 = vmatprep.subr.bf16.mxu0 %v15853_v22  ;;  %v15881_v18 = vld [vmem:[%s19019_s1 + $0x228] sm:$0xff]   ;;  %v18253_v42 = vcombine.low %v12199_v37, %v18240_v49  ;;  %v18256_v21 = vcombine.low %v12451_v19, %v18247_v16  ;;  %v15901_v3 = vld [vmem:[%s19019_s1 + $0x70] sm:$0xff]   ;;  %v15903_v6 = vld [vmem:[%s19019_s1 + $0x78] sm:$0xff]  }
 0x355   : > { %v4083_v32 = vrot.slane %v4082_v28, 1  ;;  %14605 = vmatprep.subr.bf16.mxu1 %v15854_v5  ;;  %v15902_v31 = vld [vmem:[%s19019_s1 + $0x70] sm:$0xff]   ;;  %v15914_v37 = vld [vmem:[%s19019_s1 + $0x8] sm:$0xff]  }
 0x356   : > { %v5354_v36 = vrot.slane %v5353_v29, 1  ;;  %v7973_v26 = vshll.u32 %v18253_v42, 16  ;;  %v15916_v19 = vld [vmem:[%s19019_s1 + $0x10] sm:$0xff]  }
 0x357   : > { %v4084_v39 = vadd.f32 %v4083_v32, %v4082_v28  ;;  %14426 = vmatpush3.bf16.msra.mxu0 %v15853_v22  ;;  %v15883_v22 = vld [vmem:[%s19019_s1 + $0x230] sm:$0xff]   ;;  %v15886_v32 = vld [vmem:[%s19019_s1 + $0x238] sm:$0xff]  }
 0x358   : > { %14606 = vmatpush3.bf16.msra.mxu1 %v15854_v5  ;;  %14427 = vmatprep.subr.bf16.mxu0 %v15855_v30  ;;  %v5355_v1 = vadd.f32 %v5354_v36, %v5353_v29  ;;  %v18265_v5 = vld [vmem:[%s16418_s9 + $0x80] sm:$0xff]   ;;  %v18269_v28 = vld [vmem:[%s16418_s9 + $0x94] sm:$0xff]   ;;  %v9244_v29 = vshll.u32 %v18256_v21, 16  ;;  %v7975_v36 = vrot.slane %v7973_v26, 1  ;;  %v15922_v26 = vld [vmem:[%s19019_s1 + $0x28] sm:$0xff]  }
 0x359   : > { %v4085_v61 = vadd.f32 %v4084_v39, %v17535_v14  ;;  %14607 = vmatprep.subr.bf16.mxu1 %v15856_v35  ;;  %v15860_v14 = vld [vmem:[%s19019_s1 + $0x1e8] sm:$0xff]   ;;  %v7978_v39 = vshll.u32 %v18265_v5, 16 }
 0x35b   : > { %v18162_v41 = vadd.f32 %v5355_v1, %v4085_v61  ;;  %14428 = vmatpush3.bf16.msra.mxu0 %v15855_v30  ;;  %v15885_v30 = vld [vmem:[%s19019_s1 + $0x238] sm:$0xff]   ;;  %v9242_v61 = vshrl.u32 %v18256_v21, 16  ;;  %v9246_v1 = vrot.slane %v9244_v29, 1  ;;  %v15923_v29 = vld [vmem:[%s19019_s1 + $0x30] sm:$0xff]  }
 0x35c   : > { %14608 = vmatpush3.bf16.msra.mxu1 %v15856_v35  ;;  %14429 = vmatprep.subr.bf16.mxu0 %v15857_v38  ;;  %v7971_v35 = vshrl.u32 %v18253_v42, 16 }
 0x35d   : > { %14609 = vmatprep.subr.bf16.mxu1 %v15858_v40  ;;  %v9247_v50 = vor.u32 %v9246_v1, %v9242_v61  ;;  %v15927_v1 = vld [vmem:[%s19019_s1 + $0x80] sm:$0xff]  }
 0x35f   : > { %14430 = vmatpush3.bf16.msra.mxu0 %v15857_v38  ;;  %v6509_v38 = vrot.slane %v18171_v44, 1  ;;  %v7980_v44 = vrot.slane %v7978_v39, 1  ;;  %v15926_v39 = vld [vmem:[%s19019_s1 + $0x38] sm:$0xff]  }
 0x360   : > { %14610 = vmatpush3.bf16.msra.mxu1 %v15858_v40  ;;  %14431 = vmatprep.subr.bf16.mxu0 %v15859_v43  ;;  %v9249_v40 = vshll.u32 %v18269_v28, 16 }
 0x361   : > { %14611 = vmatprep.subr.bf16.mxu1 %v15860_v14  ;;  %v6510_v48 = vsel %vm566_vm1, %v6507_v4, %v6509_v38  ;;  %v7982_v4 = vshrl.u32 %v18265_v5, 16 }
 0x362   : > { %v9251_v51 = vrot.slane %v9249_v40, 1  ;;  %v15928_v40 = vld [vmem:[%s19019_s1 + $0x80] sm:$0xff]  }
 0x363   : > { %14432 = vmatpush3.bf16.msra.mxu0 %v15859_v43  ;;  %v7780_v43 = vrot.slane %v18177_v46, 1 }
 0x364   : > { %14612 = vmatpush3.bf16.msra.mxu1 %v15860_v14  ;;  %14433 = vmatprep.subr.bf16.mxu0 %v15861_v45  ;;  %v15889_v14 = vld [vmem:[%s19019_s1 + $0x40] sm:$0xff]   ;;  %v9252_v54 = vsel %vm326_vm0, %v9247_v50, %v9251_v51  ;;  %v15931_v50 = vld [vmem:[%s19019_s1 + $0x90] sm:$0xff]  }
 0x365   : > { %14613 = vmatprep.subr.bf16.mxu1 %v15862_v47  ;;  %v7781_v46 = vsel %vm566_vm1, %v7778_v7, %v7780_v43  ;;  %v9253_v7 = vshrl.u32 %v18269_v28, 16 }
 0x367   : > { %14434 = vmatpush3.bf16.msra.mxu0 %v15861_v45  ;;  %v15890_v45 = vld [vmem:[%s19019_s1 + $0x40] sm:$0xff]  }
 0x368   : > { %14614 = vmatpush3.bf16.msra.mxu1 %v15862_v47  ;;  %14435 = vmatprep.subr.bf16.mxu0 %v15863_v52  ;;  %v7976_v47 = vor.u32 %v7975_v36, %v7971_v35  ;;  %v15925_v35 = vld [vmem:[%s19019_s1 + $0x38] sm:$0xff]   ;;  %v12491_v36 = vld [vmem:[%s16418_s9 + $0x8c] sm:$0xe] }
 0x369   : > { %14615 = vmatprep.subr.bf16.mxu1 %v15864_v57  ;;  %v12508_v61 = vcombine.low %v12491_v36, %v18247_v16  ;;  %v15929_v16 = vld [vmem:[%s19019_s1 + $0x88] sm:$0xff]  }
 0x36a   : > { %v7981_v25 = vsel %vm326_vm0, %v7976_v47, %v7980_v44  ;;  %v15930_v47 = vld [vmem:[%s19019_s1 + $0x88] sm:$0xff]  }
 0x36b   : > { %14436 = vmatpush3.bf16.msra.mxu0 %v15863_v52  ;;  %v15891_v52 = vld [vmem:[%s19019_s1 + $0x48] sm:$0xff]  }
 0x36c   : > { %14616 = vmatpush3.bf16.msra.mxu1 %v15864_v57  ;;  %14441 = vmatprep.subr.bf16.mxu0 %v15867_v63  ;;  %v15895_v57 = vld [vmem:[%s19019_s1 + $0x58] sm:$0xff]  }
 0x36d   : > { %14621 = vmatprep.subr.bf16.mxu1 %v15870_v2 }
 0x36e   : > { %14438 = vmatmul.mubr.bf16.vlgmr.msra.gmra.mrb[8].mxu0 %v6382_v24  ;;  %v7986_v24 = vshll.u32 %v18329_v0, 16 }
 0x36f   : > { %14442 = vmatpush3.bf16.msra.mxu0 %v15867_v63  ;;  %14618 = vmatmul.mubr.bf16.vlgmr.msra.gmra.mrb[8].mxu1 %v7653_v8  ;;  %v15900_v63 = vld [vmem:[%s19019_s1 + $0x68] sm:$0xff]  }
 0x370   : > { %14622 = vmatpush3.bf16.msra.mxu1 %v15870_v2  ;;  %14443 = vmatprep.subr.bf16.mxu0 %v15873_v9  ;;  %v18335_v2 = vld [vmem:[%s16418_s9 + $0x9c] ss:$0 sps:$4 sm:$0x11]  }
 0x371   : > { %14623 = vmatprep.subr.bf16.mxu1 %v15874_v10  ;;  %14457 = vmatprep.mubr.bf16.mxu0 %v6508_v11  ;;  %v9257_v8 = vshll.u32 %v18335_v2, 16  ;;  %v7988_v11 = vrot.slane %v7986_v24, 1  ;;  %v15949_v24 = vld [vmem:[%s19019_s1 + $0xd0] sm:$0xff]  }
 0x372   : > { %14637 = vmatprep.mubr.bf16.mxu1 %v7779_v55  ;;  %v15907_v55 = vld [vmem:[%s19019_s1] sm:$0xff]  }
 0x373   : > { %14444 = vmatpush3.bf16.msra.mxu0 %v15873_v9  ;;  %v15904_v9 = vld [vmem:[%s19019_s1 + $0x78] sm:$0xff]  }
 0x374   : > { %14624 = vmatpush3.bf16.msra.mxu1 %v15874_v10  ;;  %14445 = vmatprep.subr.bf16.mxu0 %v15875_v12  ;;  %v7984_v10 = vor.u32 %v7982_v4, %v7980_v44  ;;  %v15963_v4 = vld [vmem:[%s16418_s9 + $0xa0] sm:$0xff]  }
 0x375   : > { %14625 = vmatprep.subr.bf16.mxu1 %v15876_v13 }
 0x377   : > { %14446 = vmatpush3.bf16.msra.mxu0 %v15875_v12  ;;  %v9255_v12 = vor.u32 %v9253_v7, %v9251_v51  ;;  %v15932_v51 = vld [vmem:[%s19019_s1 + $0x90] sm:$0xff]   ;;  %v15951_v7 = vld [vmem:[%s19019_s1 + $0xd8] sm:$0xff]  }
 0x378   : > { %14626 = vmatpush3.bf16.msra.mxu1 %v15876_v13  ;;  %14447 = vmatprep.subr.bf16.mxu0 %v15877_v15  ;;  %v9259_v13 = vrot.slane %v9257_v8, 1  ;;  %v15952_v8 = vld [vmem:[%s19019_s1 + $0xd8] sm:$0xff]  }
 0x379   : > { %14627 = vmatprep.subr.bf16.mxu1 %v15878_v17 }
 0x37b   : > { %14448 = vmatpush3.bf16.msra.mxu0 %v15877_v15  ;;  %v15910_v15 = vld [vmem:[%s19019_s1] sm:$0xff]  }
 0x37c   : > { %14628 = vmatpush3.bf16.msra.mxu1 %v15878_v17  ;;  %14449 = vmatprep.subr.bf16.mxu0 %v15879_v58  ;;  %v7989_v17 = vsel %vm326_vm0, %v7984_v10, %v7988_v11  ;;  %v15954_v10 = vld [vmem:[%s19019_s1 + $0xe0] sm:$0xff]   ;;  %v12295_v11 = vld [vmem:[%s16418_s9 + $0x8c] sm:$0xf] }
 0x37d   : > { %14629 = vmatprep.subr.bf16.mxu1 %v15880_v33 }
 0x37f   : > { %14450 = vmatpush3.bf16.msra.mxu0 %v15879_v58  ;;  %v9260_v58 = vsel %vm326_vm0, %v9255_v12, %v9259_v13  ;;  %v15955_v12 = vld [vmem:[%s19019_s1 + $0xe8] sm:$0xff]   ;;  %v12547_v13 = vld [vmem:[%s16418_s9 + $0xa0] sm:$0xf] }
 0x380   : > { %14630 = vmatpush3.bf16.msra.mxu1 %v15880_v33  ;;  %14451 = vmatprep.subr.bf16.mxu0 %v15881_v18  ;;  %v15913_v33 = vld [vmem:[%s19019_s1 + $0x8] sm:$0xff]  }
 0x381   : > { %14631 = vmatprep.subr.bf16.mxu1 %v15882_v20 }
 0x383   : > { %14452 = vmatpush3.bf16.msra.mxu0 %v15881_v18  ;;  %v15915_v18 = vld [vmem:[%s19019_s1 + $0x10] sm:$0xff]  }
 0x384   : > { %14632 = vmatpush3.bf16.msra.mxu1 %v15882_v20  ;;  %14453 = vmatprep.subr.bf16.mxu0 %v15883_v22  ;;  %v15917_v20 = vld [vmem:[%s19019_s1 + $0x18] sm:$0xff]  }
 0x385   : > { %14633 = vmatprep.subr.bf16.mxu1 %v15884_v23 }
 0x387   : > { %14454 = vmatpush3.bf16.msra.mxu0 %v15883_v22  ;;  %v15918_v22 = vld [vmem:[%s19019_s1 + $0x18] sm:$0xff]  }
 0x388   : > { %14634 = vmatpush3.bf16.msra.mxu1 %v15884_v23  ;;  %14455 = vmatprep.subr.bf16.mxu0 %v15885_v30  ;;  %v15921_v23 = vld [vmem:[%s19019_s1 + $0x28] sm:$0xff]  }
 0x389   : > { %14635 = vmatprep.subr.bf16.mxu1 %v15886_v32 }
 0x38b   : > { %14456 = vmatpush3.bf16.msra.mxu0 %v15885_v30  ;;  %v15924_v30 = vld [vmem:[%s19019_s1 + $0x30] sm:$0xff]  }
 0x38c   : > { %14636 = vmatpush3.bf16.msra.mxu1 %v15886_v32  ;;  %14641 = vmatprep.subr.bf16.mxu0 %v15889_v14  ;;  %v12239_v32 = vld [vmem:[%s16418_s9 + $0x78] sm:$0xe] }
 0x38d   : > { %14821 = vmatprep.subr.bf16.mxu1 %v15890_v45  ;;  %v12256_v38 = vcombine.low %v12239_v32, %v18240_v49  ;;  %v9480_v49 = vrot.slane %v18269_v28, 1 }
 0x38e   : > { %14458 = vmatmul.mubr.bf16.vlgmr.msra.gmra.mrb[8].mxu0 %v6510_v48 }
 0x38f   : > { %14638 = vmatmul.mubr.bf16.vlgmr.msra.gmra.mrb[8].mxu1 %v7781_v46  ;;  %14642 = vmatpush3.bf16.msra.mxu0 %v15889_v14  ;;  %v8208_v43 = vrot.slane %v12256_v38, 1  ;;  %v8209_v14 = vrot.slane %v18265_v5, 1  ;;  %v15935_v46 = vld [vmem:[%s19019_s1 + $0xa0] sm:$0xff]  }
 0x390   : > { %14822 = vmatpush3.bf16.msra.mxu1 %v15890_v45  ;;  %14643 = vmatprep.subr.bf16.mxu0 %v15891_v52  ;;  %v9479_v45 = vrot.slane %v12508_v61, 1  ;;  %v15964_v38 = vld [vmem:[%s19019_s1 + $0x100] sm:$0xff]   ;;  %v15965_v61 = vld [vmem:[%s16418_s9 + $0x94] sm:$0xff]  }
 0x391   : > { %14823 = vmatprep.subr.bf16.mxu1 %v15892_v53  ;;  %14657 = vmatprep.mubr.bf16.mxu0 %v7981_v25  ;;  %v8210_v44 = vsel %vm566_vm1, %v8208_v43, %v8209_v14  ;;  %v15938_v25 = vld [vmem:[%s19019_s1 + $0xa8] sm:$0xff]  }
 0x392   : > { %14837 = vmatprep.mubr.bf16.mxu1 %v9252_v54  ;;  %v9481_v48 = vsel %vm566_vm1, %v9479_v45, %v9480_v49  ;;  %v15939_v54 = vld [vmem:[%s19019_s1 + $0xb0] sm:$0xff]   ;;  %v15966_v43 = vld [vmem:[%s16418_s9 + $0xa8] sm:$0xff]  }
 0x393   : > { %14644 = vmatpush3.bf16.msra.mxu0 %v15891_v52  ;;  %v15936_v52 = vld [vmem:[%s19019_s1 + $0xa0] sm:$0xff]  }
 0x394   : > { %14824 = vmatpush3.bf16.msra.mxu1 %v15892_v53  ;;  %14645 = vmatprep.subr.bf16.mxu0 %v15893_v27  ;;  %v15937_v53 = vld [vmem:[%s19019_s1 + $0xa8] sm:$0xff]  }
 0x395   : > { %14825 = vmatprep.subr.bf16.mxu1 %v15894_v56 }
 0x397   : > { %14646 = vmatpush3.bf16.msra.mxu0 %v15893_v27  ;;  %v15940_v27 = vld [vmem:[%s19019_s1 + $0xb0] sm:$0xff]  }
 0x398   : > { %14826 = vmatpush3.bf16.msra.mxu1 %v15894_v56  ;;  %14647 = vmatprep.subr.bf16.mxu0 %v15895_v57  ;;  %v15941_v56 = vld [vmem:[%s19019_s1 + $0xb8] sm:$0xff]  }
 0x399   : > { %14827 = vmatprep.subr.bf16.mxu1 %v15896_v34 }
 0x39b   : > { %14648 = vmatpush3.bf16.msra.mxu0 %v15895_v57  ;;  %v15942_v57 = vld [vmem:[%s19019_s1 + $0xb8] sm:$0xff]  }
 0x39c   : > { %14828 = vmatpush3.bf16.msra.mxu1 %v15896_v34  ;;  %14649 = vmatprep.subr.bf16.mxu0 %v15897_v59  ;;  %v8211_v34 = vrot.slane %v18329_v0, 1 }
 0x39d   : > { %14829 = vmatprep.subr.bf16.mxu1 %v15898_v60 }
 0x39f   : > { %14650 = vmatpush3.bf16.msra.mxu0 %v15897_v59  ;;  %v15944_v59 = vld [vmem:[%s19019_s1 + $0xc0] sm:$0xff]  }
 0x3a0   : > { %14830 = vmatpush3.bf16.msra.mxu1 %v15898_v60  ;;  %14651 = vmatprep.subr.bf16.mxu0 %v15899_v62  ;;  %v9482_v60 = vrot.slane %v18335_v2, 1  ;;  %v15948_v2 = vld [vmem:[%s19019_s1 + $0xc8] sm:$0xff]  }
 0x3a1   : > { %14831 = vmatprep.subr.bf16.mxu1 %v15900_v63 }
 0x3a2   : > { %v9483_v0 = vsel %vm566_vm1, %v9480_v49, %v9482_v60  ;;  %v15967_v49 = vld [vmem:[%s19019_s1 + $0x108] sm:$0xff]   ;;  %v15979_v60 = vld [vmem:[%s19019_s1 + $0x138] sm:$0xff]  }
 0x3a3   : > { %14652 = vmatpush3.bf16.msra.mxu0 %v15899_v62  ;;  %v15946_v62 = vld [vmem:[%s19019_s1 + $0xc0] sm:$0xff]  }
 0x3a4   : > { %14832 = vmatpush3.bf16.msra.mxu1 %v15900_v63  ;;  %14653 = vmatprep.subr.bf16.mxu0 %v15901_v3  ;;  %v8212_v63 = vsel %vm566_vm1, %v8209_v14, %v8211_v34 }
 0x3a5   : > { %14833 = vmatprep.subr.bf16.mxu1 %v15902_v31 }
 0x3a7   : > { %14654 = vmatpush3.bf16.msra.mxu0 %v15901_v3  ;;  %v15947_v3 = vld [vmem:[%s19019_s1 + $0xc8] sm:$0xff]  }
 0x3a8   : > { %14834 = vmatpush3.bf16.msra.mxu1 %v15902_v31  ;;  %14655 = vmatprep.subr.bf16.mxu0 %v15903_v6  ;;  %v15961_v31 = vld [vmem:[%s16418_s9 + $0x8c] sm:$0xff]  }
 0x3a9   : > { %14835 = vmatprep.subr.bf16.mxu1 %v15904_v9 }
 0x3ab   : > { %14656 = vmatpush3.bf16.msra.mxu0 %v15903_v6  ;;  %v15950_v6 = vld [vmem:[%s19019_s1 + $0xd0] sm:$0xff]  }
 0x3ac   : > { %14836 = vmatpush3.bf16.msra.mxu1 %v15904_v9  ;;  %14661 = vmatprep.subr.bf16.mxu0 %v15907_v55  ;;  %v15953_v9 = vld [vmem:[%s19019_s1 + $0xe0] sm:$0xff]  }
 0x3ad   : > { %14841 = vmatprep.subr.bf16.mxu1 %v15910_v15 }
 0x3ae   : > { %14658 = vmatmul.mubr.bf16.vlgmr.msra.gmra.mrb[12].mxu0 %v7989_v17  ;;  %v15956_v17 = vld [vmem:[%s19019_s1 + $0xe8] sm:$0xff]  }
 0x3af   : > { %14662 = vmatpush3.bf16.msra.mxu0 %v15907_v55  ;;  %14838 = vmatmul.mubr.bf16.vlgmr.msra.gmra.mrb[12].mxu1 %v9260_v58  ;;  %v18498_v55 = vld [vmem:[%s16418_s9 + $0x90] sm:$0xf] }
 0x3b0   : > { %14842 = vmatpush3.bf16.msra.mxu1 %v15910_v15  ;;  %14663 = vmatprep.subr.bf16.mxu0 %v15913_v33  ;;  %v18505_v15 = vld [vmem:[%s16418_s9 + $0xa4] sm:$0xf]  ;;  %v12316_v58 = vcombine.low %v12295_v11, %v18498_v55 }
 0x3b1   : > { %14843 = vmatprep.subr.bf16.mxu1 %v15914_v37  ;;  %14677 = vmatprep.mubr.bf16.mxu0 %v18253_v42  ;;  %v15919_v42 = vld [vmem:[%s19019_s1 + $0x20] sm:$0xff]  }
 0x3b2   : > { %14857 = vmatprep.mubr.bf16.mxu1 %v18256_v21  ;;  %v15920_v21 = vld [vmem:[%s19019_s1 + $0x20] sm:$0xff]  }
 0x3b3   : > { %14664 = vmatpush3.bf16.msra.mxu0 %v15913_v33  ;;  %v12568_v33 = vcombine.low %v12547_v13, %v18505_v15 }
 0x3b4   : > { %14844 = vmatpush3.bf16.msra.mxu1 %v15914_v37  ;;  %14665 = vmatprep.subr.bf16.mxu0 %v15915_v18  ;;  %v15957_v37 = vld [vmem:[%s19019_s1 + $0xf0] sm:$0xff]  }
 0x3b5   : > { %14845 = vmatprep.subr.bf16.mxu1 %v15916_v19  ;;  %v9755_v32 = vshrl.u32 %v12568_v33, 16 }
 0x3b7   : > { %14666 = vmatpush3.bf16.msra.mxu0 %v15915_v18  ;;  %v15958_v18 = vld [vmem:[%s19019_s1 + $0xf0] sm:$0xff]  }
 0x3b8   : > { %14846 = vmatpush3.bf16.msra.mxu1 %v15916_v19  ;;  %14667 = vmatprep.subr.bf16.mxu0 %v15917_v20  ;;  %v18519_v19 = vld [vmem:[%s16418_s9 + $0x94] sm:$0xff]  }
 0x3b9   : > { %14847 = vmatprep.subr.bf16.mxu1 %v15918_v22  ;;  %v8627_v11 = vrot.slane %v18519_v19, 1 }
 0x3bb   : > { %14668 = vmatpush3.bf16.msra.mxu0 %v15917_v20  ;;  %v8486_v20 = vshll.u32 %v12316_v58, 16 }
 0x3bc   : > { %14848 = vmatpush3.bf16.msra.mxu1 %v15918_v22  ;;  %14669 = vmatprep.subr.bf16.mxu0 %v15919_v42  ;;  %v18522_v22 = vld [vmem:[%s16418_s9 + $0xa8] sm:$0xff]  }
 0x3bd   : > { %14849 = vmatprep.subr.bf16.mxu1 %v15920_v21  ;;  %v9762_v36 = vshll.u32 %v18522_v22, 16  ;;  %v9898_v13 = vrot.slane %v18522_v22, 1 }
 0x3bf   : > { %14670 = vmatpush3.bf16.msra.mxu0 %v15919_v42  ;;  %v9757_v42 = vshll.u32 %v12568_v33, 16  ;;  %v18540_v45 = vrot.slane %v9762_v36, 1  ;;  %v16002_v36 = vld [vmem:[%s19019_s1 + $0x178] sm:$0xff]  }
 0x3c0   : > { %14850 = vmatpush3.bf16.msra.mxu1 %v15920_v21  ;;  %14671 = vmatprep.subr.bf16.mxu0 %v15921_v23  ;;  %v15959_v21 = vld [vmem:[%s19019_s1 + $0xf8] sm:$0xff]  }
 0x3c1   : > { %14851 = vmatprep.subr.bf16.mxu1 %v15922_v26 }
 0x3c3   : > { %14672 = vmatpush3.bf16.msra.mxu0 %v15921_v23  ;;  %v15960_v23 = vld [vmem:[%s19019_s1 + $0xf8] sm:$0xff]  }
 0x3c4   : > { %14852 = vmatpush3.bf16.msra.mxu1 %v15922_v26  ;;  %14673 = vmatprep.subr.bf16.mxu0 %v15923_v29  ;;  %v8484_v26 = vshrl.u32 %v12316_v58, 16  ;;  %v15990_v58 = vld [vmem:[%s19019_s1 + $0x148] sm:$0xff]  }
 0x3c5   : > { %14853 = vmatprep.subr.bf16.mxu1 %v15924_v30 }
 0x3c7   : > { %14674 = vmatpush3.bf16.msra.mxu0 %v15923_v29  ;;  %v8488_v29 = vrot.slane %v8486_v20, 1  ;;  %v15992_v20 = vld [vmem:[%s19019_s1 + $0x150] sm:$0xff]  }
 0x3c8   : > { %14854 = vmatpush3.bf16.msra.mxu1 %v15924_v30  ;;  %14675 = vmatprep.subr.bf16.mxu0 %v15925_v35  ;;  %v8491_v30 = vshll.u32 %v18519_v19, 16 }
 0x3c9   : > { %14855 = vmatprep.subr.bf16.mxu1 %v15926_v39 }
 0x3cb   : > { %14676 = vmatpush3.bf16.msra.mxu0 %v15925_v35  ;;  %v9759_v35 = vrot.slane %v9757_v42, 1  ;;  %v15994_v42 = vld [vmem:[%s19019_s1 + $0x158] sm:$0xff]  }
 0x3cc   : > { %14856 = vmatpush3.bf16.msra.mxu1 %v15926_v39  ;;  %14681 = vmatprep.subr.bf16.mxu0 %v15927_v1  ;;  %v15962_v39 = vld [vmem:[%s19019_s1 + $0x100] sm:$0xff]  }
 0x3cd   : > { %14861 = vmatprep.subr.bf16.mxu1 %v15928_v40  ;;  %v9760_v14 = vor.u32 %v9759_v35, %v9755_v32  ;;  %v16000_v32 = vld [vmem:[%s19019_s1 + $0x170] sm:$0xff]   ;;  %v16001_v35 = vld [vmem:[%s19019_s1 + $0x178] sm:$0xff]  }
 0x3ce   : > { %14678 = vmatmul.mubr.bf16.vlgmr.msra.gmra.mrb[12].mxu0 %v18265_v5  ;;  %v15933_v5 = vld [vmem:[%s19019_s1 + $0x98] sm:$0xff]  }
 0x3cf   : > { %14682 = vmatpush3.bf16.msra.mxu0 %v15927_v1  ;;  %14858 = vmatmul.mubr.bf16.vlgmr.msra.gmra.mrb[12].mxu1 %v18269_v28  ;;  %v15934_v28 = vld [vmem:[%s19019_s1 + $0x98] sm:$0xff]   ;;  %v8489_v1 = vor.u32 %v8488_v29, %v8484_v26  ;;  %v15997_v26 = vld [vmem:[%s19019_s1 + $0x168] sm:$0xff]  }
 0x3d0   : > { %14862 = vmatpush3.bf16.msra.mxu1 %v15928_v40  ;;  %14683 = vmatprep.subr.bf16.mxu0 %v15929_v16  ;;  %v8493_v40 = vrot.slane %v8491_v30, 1  ;;  %v15998_v29 = vld [vmem:[%s19019_s1 + $0x168] sm:$0xff]   ;;  %v15999_v30 = vld [vmem:[%s19019_s1 + $0x170] sm:$0xff]  }
 0x3d1   : > { %14863 = vmatprep.subr.bf16.mxu1 %v15930_v47  ;;  %14697 = vmatprep.mubr.bf16.mxu0 %v8210_v44  ;;  %v9765_v44 = vsel %vm326_vm0, %v9760_v14, %v18540_v45  ;;  %v16007_v14 = vld [vmem:[%s19019_s1 + $0x188] sm:$0xff]  }
 0x3d2   : > { %14877 = vmatprep.mubr.bf16.mxu1 %v9481_v48  ;;  %v15969_v48 = vld [vmem:[%s19019_s1 + $0x110] sm:$0xff]  }
 0x3d3   : > { %14684 = vmatpush3.bf16.msra.mxu0 %v15929_v16  ;;  %v15968_v16 = vld [vmem:[%s19019_s1 + $0x108] sm:$0xff]  }
 0x3d4   : > { %14864 = vmatpush3.bf16.msra.mxu1 %v15930_v47  ;;  %14685 = vmatprep.subr.bf16.mxu0 %v15931_v50  ;;  %v8494_v47 = vsel %vm326_vm0, %v8489_v1, %v8493_v40  ;;  %v16006_v1 = vld [vmem:[%s19019_s1 + $0x180] sm:$0xff]  }
 0x3d5   : > { %14865 = vmatprep.subr.bf16.mxu1 %v15932_v51 }
 0x3d7   : > { %14686 = vmatpush3.bf16.msra.mxu0 %v15931_v50  ;;  %v15970_v50 = vld [vmem:[%s19019_s1 + $0x110] sm:$0xff]  }
 0x3d8   : > { %14866 = vmatpush3.bf16.msra.mxu1 %v15932_v51  ;;  %14687 = vmatprep.subr.bf16.mxu0 %v15933_v5  ;;  %v15971_v51 = vld [vmem:[%s19019_s1 + $0x118] sm:$0xff]  }
 0x3d9   : > { %14867 = vmatprep.subr.bf16.mxu1 %v15934_v28 }
 0x3db   : > { %14688 = vmatpush3.bf16.msra.mxu0 %v15933_v5  ;;  %v15972_v5 = vld [vmem:[%s19019_s1 + $0x118] sm:$0xff]  }
 0x3dc   : > { %14868 = vmatpush3.bf16.msra.mxu1 %v15934_v28  ;;  %14689 = vmatprep.subr.bf16.mxu0 %v15935_v46  ;;  %v15973_v28 = vld [vmem:[%s19019_s1 + $0x120] sm:$0xff]  }
 0x3dd   : > { %14869 = vmatprep.subr.bf16.mxu1 %v15936_v52 }
 0x3df   : > { %14690 = vmatpush3.bf16.msra.mxu0 %v15935_v46  ;;  %v15974_v46 = vld [vmem:[%s19019_s1 + $0x120] sm:$0xff]  }
 0x3e0   : > { %14870 = vmatpush3.bf16.msra.mxu1 %v15936_v52  ;;  %14691 = vmatprep.subr.bf16.mxu0 %v15937_v53  ;;  %v15975_v52 = vld [vmem:[%s19019_s1 + $0x128] sm:$0xff]  }
 0x3e1   : > { %14871 = vmatprep.subr.bf16.mxu1 %v15938_v25 }
 0x3e3   : > { %14692 = vmatpush3.bf16.msra.mxu0 %v15937_v53  ;;  %v15976_v53 = vld [vmem:[%s19019_s1 + $0x128] sm:$0xff]  }
 0x3e4   : > { %14872 = vmatpush3.bf16.msra.mxu1 %v15938_v25  ;;  %14693 = vmatprep.subr.bf16.mxu0 %v15939_v54  ;;  %v18576_v25 = vld [vmem:[%s16418_s9 + $0x9c] ss:$0 sps:$4 sm:$0x11]  }
 0x3e5   : > { %14873 = vmatprep.subr.bf16.mxu1 %v15940_v27  ;;  %v8499_v34 = vshll.u32 %v18576_v25, 16 }
 0x3e7   : > { %14694 = vmatpush3.bf16.msra.mxu0 %v15939_v54  ;;  %v15977_v54 = vld [vmem:[%s19019_s1 + $0x130] sm:$0xff]  }
 0x3e8   : > { %14874 = vmatpush3.bf16.msra.mxu1 %v15940_v27  ;;  %14695 = vmatprep.subr.bf16.mxu0 %v15941_v56  ;;  %v18582_v27 = vld [vmem:[%s16418_s9 + $0xb0] ss:$0 sps:$4 sm:$0x11]  }
 0x3e9   : > { %14875 = vmatprep.subr.bf16.mxu1 %v15942_v57 }
 0x3eb   : > { %14696 = vmatpush3.bf16.msra.mxu0 %v15941_v56  ;;  %v15978_v56 = vld [vmem:[%s19019_s1 + $0x130] sm:$0xff]  }
 0x3ec   : > { %14876 = vmatpush3.bf16.msra.mxu1 %v15942_v57  ;;  %14701 = vmatprep.subr.bf16.mxu0 %v15944_v59  ;;  %v8495_v57 = vshrl.u32 %v18519_v19, 16  ;;  %v16009_v19 = vld [vmem:[%s19019_s1 + $0x190] sm:$0xff]  }
 0x3ed   : > { %14881 = vmatprep.subr.bf16.mxu1 %v15946_v62 }
 0x3ee   : > { %14698 = vmatmul.mubr.bf16.vlgmr.msra.gmra.mrb[12].mxu0 %v8212_v63  ;;  %v9770_v63 = vshll.u32 %v18582_v27, 16 }
 0x3ef   : > { %14702 = vmatpush3.bf16.msra.mxu0 %v15944_v59  ;;  %14878 = vmatmul.mubr.bf16.vlgmr.msra.gmra.mrb[12].mxu1 %v9483_v0  ;;  %v12327_v59 = vld [vmem:[%s16418_s9 + $0x8c] sm:$0xe]  ;;  %v12579_v0 = vld [vmem:[%s16418_s9 + $0xa0] sm:$0xe] }
 0x3f0   : > { %14882 = vmatpush3.bf16.msra.mxu1 %v15946_v62  ;;  %14703 = vmatprep.subr.bf16.mxu0 %v15947_v3  ;;  %v9766_v62 = vshrl.u32 %v18522_v22, 16  ;;  %v15993_v22 = vld [vmem:[%s19019_s1 + $0x158] sm:$0xff]  }
 0x3f1   : > { %14883 = vmatprep.subr.bf16.mxu1 %v15948_v2  ;;  %14717 = vmatprep.mubr.bf16.mxu0 %v15961_v31  ;;  %v8497_v31 = vor.u32 %v8495_v57, %v8493_v40  ;;  %v18720_v57 = vld [vmem:[%s16418_s9 + $0xbc] sm:$0xff]  }
 0x3f2   : > { %14897 = vmatprep.mubr.bf16.mxu1 %v15963_v4  ;;  %v8501_v4 = vrot.slane %v8499_v34, 1  ;;  %v16017_v34 = vld [vmem:[%s19019_s1 + $0x1b0] sm:$0xff]  }
 0x3f3   : > { %14704 = vmatpush3.bf16.msra.mxu0 %v15947_v3  ;;  %v15980_v3 = vld [vmem:[%s19019_s1 + $0x138] sm:$0xff]  }
 0x3f4   : > { %14884 = vmatpush3.bf16.msra.mxu1 %v15948_v2  ;;  %14705 = vmatprep.subr.bf16.mxu0 %v15949_v24  ;;  %v12344_v2 = vcombine.low %v12327_v59, %v18498_v55  ;;  %v8502_v55 = vsel %vm326_vm0, %v8497_v31, %v8501_v4 }
 0x3f5   : > { %14885 = vmatprep.subr.bf16.mxu1 %v15950_v6 }
 0x3f7   : > { %14706 = vmatpush3.bf16.msra.mxu0 %v15949_v24  ;;  %v12596_v24 = vcombine.low %v12579_v0, %v18505_v15 }
 0x3f8   : > { %14886 = vmatpush3.bf16.msra.mxu1 %v15950_v6  ;;  %14707 = vmatprep.subr.bf16.mxu0 %v15951_v7  ;;  %v15983_v6 = vld [vmem:[%s19019_s1 + $0x140] sm:$0xff]  }
 0x3f9   : > { %14887 = vmatprep.subr.bf16.mxu1 %v15952_v8 }
 0x3fb   : > { %14708 = vmatpush3.bf16.msra.mxu0 %v15951_v7  ;;  %v9768_v7 = vor.u32 %v9766_v62, %v18540_v45  ;;  %v16008_v45 = vld [vmem:[%s19019_s1 + $0x188] sm:$0xff]   ;;  %v16018_v62 = vld [vmem:[%s19019_s1 + $0x1b0] sm:$0xff]  }
 0x3fc   : > { %14888 = vmatpush3.bf16.msra.mxu1 %v15952_v8  ;;  %14709 = vmatprep.subr.bf16.mxu0 %v15953_v9  ;;  %v9772_v8 = vrot.slane %v9770_v63, 1 }
 0x3fd   : > { %14889 = vmatprep.subr.bf16.mxu1 %v15954_v10 }
 0x3fe   : > { %v9773_v15 = vsel %vm326_vm0, %v9768_v7, %v9772_v8 }
 0x3ff   : > { %14710 = vmatpush3.bf16.msra.mxu0 %v15953_v9  ;;  %v15986_v9 = vld [vmem:[%s19019_s1 + $0x140] sm:$0xff]  }
 0x400   : > { %14890 = vmatpush3.bf16.msra.mxu1 %v15954_v10  ;;  %14711 = vmatprep.subr.bf16.mxu0 %v15955_v12  ;;  %v8626_v10 = vrot.slane %v12344_v2, 1 }
 0x401   : > { %14891 = vmatprep.subr.bf16.mxu1 %v15956_v17 }
 0x402   : > { %v8628_v33 = vsel %vm566_vm1, %v8626_v10, %v8627_v11 }
 0x403   : > { %14712 = vmatpush3.bf16.msra.mxu0 %v15955_v12  ;;  %v9897_v12 = vrot.slane %v12596_v24, 1  ;;  %v10184_v24 = vshll.u32 %v18720_v57, 16 }
 0x404   : > { %14892 = vmatpush3.bf16.msra.mxu1 %v15956_v17  ;;  %14713 = vmatprep.subr.bf16.mxu0 %v15957_v37  ;;  %v15989_v17 = vld [vmem:[%s19019_s1 + $0x148] sm:$0xff]  }
 0x405   : > { %14893 = vmatprep.subr.bf16.mxu1 %v15958_v18 }
 0x407   : > { %14714 = vmatpush3.bf16.msra.mxu0 %v15957_v37  ;;  %v9899_v37 = vsel %vm566_vm1, %v9897_v12, %v9898_v13 }
 0x408   : > { %14894 = vmatpush3.bf16.msra.mxu1 %v15958_v18  ;;  %14715 = vmatprep.subr.bf16.mxu0 %v15959_v21  ;;  %v15991_v18 = vld [vmem:[%s19019_s1 + $0x150] sm:$0xff]  }
 0x409   : > { %14895 = vmatprep.subr.bf16.mxu1 %v15960_v23 }
 0x40b   : > { %14716 = vmatpush3.bf16.msra.mxu0 %v15959_v21  ;;  %v15995_v21 = vld [vmem:[%s19019_s1 + $0x160] sm:$0xff]  }
 0x40c   : > { %14896 = vmatpush3.bf16.msra.mxu1 %v15960_v23  ;;  %14721 = vmatprep.subr.bf16.mxu0 %v15962_v39  ;;  %v15996_v23 = vld [vmem:[%s19019_s1 + $0x160] sm:$0xff]  }
 0x40d   : > { %14901 = vmatprep.subr.bf16.mxu1 %v15964_v38 }
 0x40e   : > { %14718 = vmatmul.mubr.bf16.vlgmr.msra.gmra.mrb[12].mxu0 %v15965_v61  ;;  %v9900_v61 = vrot.slane %v18582_v27, 1  ;;  %v18714_v27 = vld [vmem:[%s16418_s9 + $0xa8] sm:$0xff]  }
 0x40f   : > { %14722 = vmatpush3.bf16.msra.mxu0 %v15962_v39  ;;  %14898 = vmatmul.mubr.bf16.vlgmr.msra.gmra.mrb[12].mxu1 %v15966_v43  ;;  %v8629_v39 = vrot.slane %v18576_v25, 1  ;;  %v18708_v25 = vld [vmem:[%s16418_s9 + $0xb8] sm:$0xf]  ;;  %v8913_v31 = vshll.u32 %v18714_v27, 16 }
 0x410   : > { %14902 = vmatpush3.bf16.msra.mxu1 %v15964_v38  ;;  %14723 = vmatprep.subr.bf16.mxu0 %v15967_v49  ;;  %v16004_v38 = vld [vmem:[%s19019_s1 + $0x180] sm:$0xff]   ;;  %v9901_v43 = vsel %vm566_vm1, %v9898_v13, %v9900_v61  ;;  %v16025_v61 = vld [vmem:[%s16418_s9 + $0xa8] sm:$0xff]  }
 0x411   : > { %14903 = vmatprep.subr.bf16.mxu1 %v15968_v16  ;;  %14737 = vmatprep.mubr.bf16.mxu0 %v8494_v47  ;;  %v8630_v40 = vsel %vm566_vm1, %v8627_v11, %v8629_v39  ;;  %v16010_v47 = vld [vmem:[%s19019_s1 + $0x190] sm:$0xff]   ;;  %v16019_v11 = vld [vmem:[%s19019_s1 + $0x1b8] sm:$0xff]   ;;  %v16024_v39 = vld [vmem:[%s19019_s1 + $0x1c0] sm:$0xff]  }
 0x412   : > { %14917 = vmatprep.mubr.bf16.mxu1 %v9765_v44  ;;  %v16011_v44 = vld [vmem:[%s19019_s1 + $0x198] sm:$0xff]  }
 0x413   : > { %14724 = vmatpush3.bf16.msra.mxu0 %v15967_v49  ;;  %v16021_v49 = vld [vmem:[%s16418_s9 + $0xa0] sm:$0xff]  }
 0x414   : > { %14904 = vmatpush3.bf16.msra.mxu1 %v15968_v16  ;;  %14725 = vmatprep.subr.bf16.mxu0 %v15969_v48  ;;  %v16023_v16 = vld [vmem:[%s16418_s9 + $0xb4] sm:$0xff]  }
 0x415   : > { %14905 = vmatprep.subr.bf16.mxu1 %v15970_v50 }
 0x417   : > { %14726 = vmatpush3.bf16.msra.mxu0 %v15969_v48  ;;  %v16012_v48 = vld [vmem:[%s19019_s1 + $0x198] sm:$0xff]  }
 0x418   : > { %14906 = vmatpush3.bf16.msra.mxu1 %v15970_v50  ;;  %14727 = vmatprep.subr.bf16.mxu0 %v15971_v51  ;;  %v16013_v50 = vld [vmem:[%s19019_s1 + $0x1a0] sm:$0xff]  }
 0x419   : > { %14907 = vmatprep.subr.bf16.mxu1 %v15972_v5 }
 0x41b   : > { %14728 = vmatpush3.bf16.msra.mxu0 %v15971_v51  ;;  %v16014_v51 = vld [vmem:[%s19019_s1 + $0x1a0] sm:$0xff]  }
 0x41c   : > { %14908 = vmatpush3.bf16.msra.mxu1 %v15972_v5  ;;  %14729 = vmatprep.subr.bf16.mxu0 %v15973_v28  ;;  %v12385_v5 = vld [vmem:[%s16418_s9 + $0xa0] sm:$0xf] }
 0x41d   : > { %14909 = vmatprep.subr.bf16.mxu1 %v15974_v46 }
 0x41f   : > { %14730 = vmatpush3.bf16.msra.mxu0 %v15973_v28  ;;  %v18698_v28 = vld [vmem:[%s16418_s9 + $0xa4] sm:$0xf] }
 0x420   : > { %14910 = vmatpush3.bf16.msra.mxu1 %v15974_v46  ;;  %14731 = vmatprep.subr.bf16.mxu0 %v15975_v52  ;;  %v16015_v46 = vld [vmem:[%s19019_s1 + $0x1a8] sm:$0xff]  }
 0x421   : > { %14911 = vmatprep.subr.bf16.mxu1 %v15976_v53 }
 0x423   : > { %14732 = vmatpush3.bf16.msra.mxu0 %v15975_v52  ;;  %v18704_v52 = vcombine.low %v12385_v5, %v18698_v28 }
 0x424   : > { %14912 = vmatpush3.bf16.msra.mxu1 %v15976_v53  ;;  %14733 = vmatprep.subr.bf16.mxu0 %v15977_v54  ;;  %v12637_v53 = vld [vmem:[%s16418_s9 + $0xb4] sm:$0xf] }
 0x425   : > { %14913 = vmatprep.subr.bf16.mxu1 %v15978_v56  ;;  %v8908_v59 = vshll.u32 %v18704_v52, 16 }
 0x427   : > { %14734 = vmatpush3.bf16.msra.mxu0 %v15977_v54  ;;  %v16016_v54 = vld [vmem:[%s19019_s1 + $0x1a8] sm:$0xff]   ;;  %v8910_v12 = vrot.slane %v8908_v59, 1 }
 0x428   : > { %14914 = vmatpush3.bf16.msra.mxu1 %v15978_v56  ;;  %14735 = vmatprep.subr.bf16.mxu0 %v15979_v60  ;;  %v18717_v56 = vcombine.low %v12637_v53, %v18708_v25 }
 0x429   : > { %14915 = vmatprep.subr.bf16.mxu1 %v15980_v3 }
 0x42a   : > { %v10179_v4 = vshll.u32 %v18717_v56, 16 }
 0x42b   : > { %14736 = vmatpush3.bf16.msra.mxu0 %v15979_v60 }
 0x42c   : > { %14916 = vmatpush3.bf16.msra.mxu1 %v15980_v3  ;;  %14741 = vmatprep.subr.bf16.mxu0 %v15983_v6 }
 0x42d   : > { %14921 = vmatprep.subr.bf16.mxu1 %v15986_v9 }
 0x42e   : > { %14738 = vmatmul.mubr.bf16.vlgmr.msra.gmra.mrb[12].mxu0 %v8502_v55  ;;  %v8906_v55 = vshrl.u32 %v18704_v52, 16  ;;  %v16029_v52 = vld [vmem:[%s19019_s1 + $0x1d0] sm:$0xff]  }
 0x42f   : > { %14742 = vmatpush3.bf16.msra.mxu0 %v15983_v6  ;;  %14918 = vmatmul.mubr.bf16.vlgmr.msra.gmra.mrb[12].mxu1 %v9773_v15  ;;  %v18735_v6 = vld [vmem:[%s19020_s2] ss:$0 sm:$0xff] }
 0x430   : > { %14922 = vmatpush3.bf16.msra.mxu1 %v15986_v9  ;;  %14743 = vmatprep.subr.bf16.mxu0 %v15989_v17 }
 0x431   : > { %14923 = vmatprep.subr.bf16.mxu1 %v15990_v58  ;;  %14757 = vmatprep.mubr.bf16.mxu0 %v8628_v33 }
 0x432   : > { %14937 = vmatprep.mubr.bf16.mxu1 %v9899_v37  ;;  %v16020_v37 = vld [vmem:[%s19019_s1 + $0x1b8] sm:$0xff]  }
 0x433   : > { %14744 = vmatpush3.bf16.msra.mxu0 %v15989_v17 }
 0x434   : > { %14924 = vmatpush3.bf16.msra.mxu1 %v15990_v58  ;;  %14745 = vmatprep.subr.bf16.mxu0 %v15991_v18 }
 0x435   : > { %14925 = vmatprep.subr.bf16.mxu1 %v15992_v20 }
 0x437   : > { %14746 = vmatpush3.bf16.msra.mxu0 %v15991_v18 }
 0x438   : > { %14926 = vmatpush3.bf16.msra.mxu1 %v15992_v20  ;;  %14747 = vmatprep.subr.bf16.mxu0 %v15993_v22 }
 0x439   : > { %14927 = vmatprep.subr.bf16.mxu1 %v15994_v42 }
 0x43b   : > { %14748 = vmatpush3.bf16.msra.mxu0 %v15993_v22 }
 0x43c   : > { %14928 = vmatpush3.bf16.msra.mxu1 %v15994_v42  ;;  %14749 = vmatprep.subr.bf16.mxu0 %v15995_v21  ;;  %v10177_v42 = vshrl.u32 %v18717_v56, 16 }
 0x43d   : > { %14929 = vmatprep.subr.bf16.mxu1 %v15996_v23 }
 0x43f   : > { %14750 = vmatpush3.bf16.msra.mxu0 %v15995_v21 }
 0x440   : > { %14930 = vmatpush3.bf16.msra.mxu1 %v15996_v23  ;;  %14751 = vmatprep.subr.bf16.mxu0 %v15997_v26 }
 0x441   : > { %14931 = vmatprep.subr.bf16.mxu1 %v15998_v29 }
 0x443   : > { %14752 = vmatpush3.bf16.msra.mxu0 %v15997_v26 }
 0x444   : > { %14932 = vmatpush3.bf16.msra.mxu1 %v15998_v29  ;;  %14753 = vmatprep.subr.bf16.mxu0 %v15999_v30  ;;  %v10181_v29 = vrot.slane %v10179_v4, 1  ;;  %v16034_v4 = vld [vmem:[%s19019_s1 + $0x1e0] sm:$0xff]  }
 0x445   : > { %14933 = vmatprep.subr.bf16.mxu1 %v16000_v32 }
 0x447   : > { %14754 = vmatpush3.bf16.msra.mxu0 %v15999_v30 }
 0x448   : > { %14934 = vmatpush3.bf16.msra.mxu1 %v16000_v32  ;;  %14755 = vmatprep.subr.bf16.mxu0 %v16001_v35 }
 0x449   : > { %14935 = vmatprep.subr.bf16.mxu1 %v16002_v36 }
 0x44b   : > { %14756 = vmatpush3.bf16.msra.mxu0 %v16001_v35  ;;  %v16022_v35 = vld [vmem:[%s19019_s1 + $0x1c0] sm:$0xff]  }
 0x44c   : > { %14936 = vmatpush3.bf16.msra.mxu1 %v16002_v36  ;;  %14761 = vmatprep.subr.bf16.mxu0 %v16004_v38 }
 0x44d   : > { %14941 = vmatprep.subr.bf16.mxu1 %v16006_v1 }
 0x44e   : > { %14758 = vmatmul.mubr.bf16.vlgmr.msra.gmra.mrb[12].mxu0 %v8630_v40  ;;  %v18764_v40 = vrot.slane %v8913_v31, 1 }
 0x44f   : > { %14762 = vmatpush3.bf16.msra.mxu0 %v16004_v38  ;;  %14938 = vmatmul.mubr.bf16.vlgmr.msra.gmra.mrb[12].mxu1 %v9901_v43 }
 0x450   : > { %14942 = vmatpush3.bf16.msra.mxu1 %v16006_v1  ;;  %14763 = vmatprep.subr.bf16.mxu0 %v16007_v14  ;;  %v8911_v1 = vor.u32 %v8910_v12, %v8906_v55  ;;  %v16038_v55 = vld [vmem:[%s19019_s1 + $0x1f0] sm:$0xff]   ;;  %v8917_v12 = vshrl.u32 %v18714_v27, 16 }
 0x451   : > { %14943 = vmatprep.subr.bf16.mxu1 %v16008_v45  ;;  %14777 = vmatprep.mubr.bf16.mxu0 %v16021_v49  ;;  %v18767_v49 = vrot.slane %v10184_v24, 1 }
 0x452   : > { %14957 = vmatprep.mubr.bf16.mxu1 %v16023_v16 }
 0x453   : > { %14764 = vmatpush3.bf16.msra.mxu0 %v16007_v14  ;;  %v16026_v14 = vld [vmem:[%s16418_s9 + $0xbc] sm:$0xff]  }
 0x454   : > { %14944 = vmatpush3.bf16.msra.mxu1 %v16008_v45  ;;  %14765 = vmatprep.subr.bf16.mxu0 %v16009_v19  ;;  %v10182_v45 = vor.u32 %v10181_v29, %v10177_v42 }
 0x455   : > { %14945 = vmatprep.subr.bf16.mxu1 %v16010_v47 }
 0x456   : > { %v10187_v5 = vsel %vm326_vm0, %v10182_v45, %v18767_v49  ;;  %v16055_v45 = vld [vmem:[%s19019_s1 + $0x220] sm:$0xff]  }
 0x457   : > { %14766 = vmatpush3.bf16.msra.mxu0 %v16009_v19  ;;  %v16027_v19 = vld [vmem:[%s19019_s1 + $0x1c8] sm:$0xff]  }
 0x458   : > { %14946 = vmatpush3.bf16.msra.mxu1 %v16010_v47  ;;  %14767 = vmatprep.subr.bf16.mxu0 %v16011_v44 }
 0x459   : > { %14947 = vmatprep.subr.bf16.mxu1 %v16012_v48 }
 0x45b   : > { %14768 = vmatpush3.bf16.msra.mxu0 %v16011_v44  ;;  %v16028_v44 = vld [vmem:[%s19019_s1 + $0x1c8] sm:$0xff]  }
 0x45c   : > { %14948 = vmatpush3.bf16.msra.mxu1 %v16012_v48  ;;  %14769 = vmatprep.subr.bf16.mxu0 %v16013_v50 }
 0x45d   : > { %14949 = vmatprep.subr.bf16.mxu1 %v16014_v51 }
 0x45f   : > { %14770 = vmatpush3.bf16.msra.mxu0 %v16013_v50  ;;  %v8916_v50 = vsel %vm326_vm0, %v8911_v1, %v18764_v40  ;;  %v16051_v1 = vld [vmem:[%s19019_s1 + $0x210] sm:$0xff]  }
 0x460   : > { %14950 = vmatpush3.bf16.msra.mxu1 %v16014_v51  ;;  %14771 = vmatprep.subr.bf16.mxu0 %v16015_v46 }
 0x461   : > { %v14459_v60 = vpop.f32.mrb[8].mxu0  ;;  %14951 = vmatprep.subr.bf16.mxu1 %v16016_v54 }
 0x462   : > { %v14639_v63 = vpop.f32.mrb[8].mxu1  ;;  %v6595_v0 = vpop.f32.mrb[9].mxu0  ;;  %v6616_v7 = vadd.f32 %v18735_v6, %v14459_v60  ;;  %v16031_v60 = vld [vmem:[%s19019_s1 + $0x1d8] sm:$0xff]  }
 0x463   : > { %v7866_v3 = vpop.f32.mrb[9].mxu1  ;;  %v14460_v2 = vpop.f32.mrb[10].mxu0  ;;  %14772 = vmatpush3.bf16.msra.mxu0 %v16015_v46  ;;  %v7887_v13 = vadd.f32 %v18735_v6, %v14639_v63  ;;  %v6614_v15 = vadd.f32 %v18735_v6, %v6595_v0  ;;  %v16032_v63 = vld [vmem:[%s19019_s1 + $0x1d8] sm:$0xff]  }
 0x464   : > { %v6617_v8 = vadd.f32 %v18735_v6, %v14460_v2  ;;  %v14640_v9 = vpop.f32.mrb[10].mxu1  ;;  %14952 = vmatpush3.bf16.msra.mxu1 %v16016_v54  ;;  %v6598_v10 = vpop.f32.mrb[11].mxu0  ;;  %14773 = vmatprep.subr.bf16.mxu0 %v16017_v34  ;;  %v7885_v18 = vadd.f32 %v18735_v6, %v7866_v3  ;;  %v16030_v54 = vld [vmem:[%s19019_s1 + $0x1d0] sm:$0xff]   ;;  %v16033_v2 = vld [vmem:[%s19019_s1 + $0x1e0] sm:$0xff]  }
 0x465   : > { %v7888_v17 = vadd.f32 %v18735_v6, %v14640_v9  ;;  %v6615_v58 = vadd.f32 %v18735_v6, %v6598_v10  ;;  %v7869_v33 = vpop.f32.mrb[11].mxu1  ;;  %14953 = vmatprep.subr.bf16.mxu1 %v16018_v62  ;;  %v16036_v9 = vld [vmem:[%s19019_s1 + $0x1e8] sm:$0xff]   ;;  %v18807_v10 = vld [vmem:[%s16418_s9 + $0xb0] ss:$0 sps:$4 sm:$0x11]  }
 0x466   : > { %v12794_v20 = vpack.c.bf16 %v6617_v8, %v6616_v7  ;;  %v7886_v22 = vadd.f32 %v18735_v6, %v7869_v33 }
 0x467   : > { %v12804_v21 = vpack.c.bf16 %v7888_v17, %v7887_v13  ;;  %v6618_v23 = vadd.f32 %v6615_v58, %v6614_v15  ;;  %v12789_v26 = vpack.c.bf16 %v6615_v58, %v6614_v15  ;;  %14774 = vmatpush3.bf16.msra.mxu0 %v16017_v34  ;;  %v12417_v15 = vld [vmem:[%s16418_s9 + $0xa0] sm:$0xe]  ;;  %v10188_v58 = vshrl.u32 %v18720_v57, 16 }
 0x468   : > { %12834 = vst [vmem:[%s16380_s24 + $0x48] sm:$0xff] %v12794_v20   ;;  %v7889_v30 = vadd.f32 %v7886_v22, %v7885_v18  ;;  %v12799_v32 = vpack.c.bf16 %v7886_v22, %v7885_v18  ;;  %14954 = vmatpush3.bf16.msra.mxu1 %v16018_v62  ;;  %14775 = vmatprep.subr.bf16.mxu0 %v16019_v11  ;;  %v16040_v18 = vld [vmem:[%s19019_s1 + $0x1f8] sm:$0xff]  }
 0x469   : > { %12836 = vst [vmem:[%s16380_s24 + $0x58] sm:$0xff] %v12804_v21   ;;  %v6619_v36 = vadd.f32 %v6618_v23, %v6616_v7  ;;  %12833 = vst [vmem:[%s16380_s24 + $0x40] sm:$0xff] %v12789_v26   ;;  %14955 = vmatprep.subr.bf16.mxu1 %v16020_v37  ;;  %v12434_v20 = vcombine.low %v12417_v15, %v18698_v28  ;;  %v8919_v22 = vor.u32 %v8917_v12, %v18764_v40  ;;  %v16043_v23 = vld [vmem:[%s19019_s1 + $0x200] sm:$0xff]   ;;  %v16052_v40 = vld [vmem:[%s19019_s1 + $0x210] sm:$0xff]  }
 0x46a   : > { %v7890_v38 = vadd.f32 %v7889_v30, %v7887_v13  ;;  %12835 = vst [vmem:[%s16380_s24 + $0x50] sm:$0xff] %v12799_v32   ;;  %v8921_v13 = vshll.u32 %v18807_v10, 16  ;;  %v10190_v26 = vor.u32 %v10188_v58, %v18767_v49  ;;  %v16046_v28 = vld [vmem:[%s19019_s1 + $0x200] sm:$0xff]   ;;  %v9049_v32 = vrot.slane %v18714_v27, 1 }
 0x46b   : > { %v6620_v43 = vadd.f32 %v6619_v36, %v6617_v8  ;;  %14776 = vmatpush3.bf16.msra.mxu0 %v16019_v11  ;;  %v16035_v8 = vld [vmem:[%s19019_s1 + $0x1e8] sm:$0xff]   ;;  %v18813_v11 = vld [vmem:[%s16418_s9 + $0xc4] ss:$0 sps:$4 sm:$0x11]   ;;  %v9048_v30 = vrot.slane %v12434_v20, 1  ;;  %v10320_v36 = vrot.slane %v18720_v57, 1 }
 0x46c   : > { %v7891_v16 = vadd.f32 %v7890_v38, %v7888_v17  ;;  %14956 = vmatpush3.bf16.msra.mxu1 %v16020_v37  ;;  %14781 = vmatprep.subr.bf16.mxu0 %v16022_v35  ;;  %v16039_v17 = vld [vmem:[%s19019_s1 + $0x1f8] sm:$0xff]   ;;  %v10192_v33 = vshll.u32 %v18813_v11, 16  ;;  %v12669_v37 = vld [vmem:[%s16418_s9 + $0xb4] sm:$0xe]  ;;  %v8923_v42 = vrot.slane %v8921_v13, 1  ;;  %v16049_v38 = vld [vmem:[%s19019_s1 + $0x208] sm:$0xff]  }
 0x46d   : > { %v6621_v47 = vrot.slane %v6620_v43, 4  ;;  %14961 = vmatprep.subr.bf16.mxu1 %v16024_v39  ;;  %v12686_v21 = vcombine.low %v12669_v37, %v18708_v25  ;;  %v9050_v27 = vsel %vm566_vm1, %v9048_v30, %v9049_v32  ;;  %v16056_v49 = vld [vmem:[%s19019_s1 + $0x220] sm:$0xff]   ;;  %s12745_s9 = sshll.u32 %s16201_s21, 5 }
 0x46e   : > { %v7892_v48 = vrot.slane %v7891_v16, 4  ;;  %14778 = vmatmul.mubr.bf16.vlgmr.msra.gmra.mrb[12].mxu0 %v16025_v61  ;;  %v10194_v29 = vrot.slane %v10192_v33, 1  ;;  %v8924_v25 = vsel %vm326_vm0, %v8919_v22, %v8923_v42  ;;  %v16050_v61 = vld [vmem:[%s19019_s1 + $0x208] sm:$0xff]   ;;  %s10485_s8 = sadd.s32 %s12745_s9, %s12707_s30  ;;  %s16220_s9 = smov [#allocation2]  }
 0x46f   : > { %v6622_v51 = vadd.f32 %v6621_v47, %v6620_v43  ;;  %14782 = vmatpush3.bf16.msra.mxu0 %v16022_v35  ;;  %14958 = vmatmul.mubr.bf16.vlgmr.msra.gmra.mrb[12].mxu1 %v16026_v14  ;;  %v10319_v35 = vrot.slane %v12686_v21, 1  ;;  %v16053_v43 = vld [vmem:[%s19019_s1 + $0x218] sm:$0xff]   ;;  %v16059_v47 = vld [vmem:[%s19019_s1 + $0x230] sm:$0xff]   ;;  %s12708_s21 = sshll.u32 %s10485_s8, 6  ;;  %s16071_s8 = sshll.u32 %s16220_s9, 4  ;;  %s16072_s8 = int_to_ptr.vmem [resolvable:$false] %s16071_s8 }
 0x470   : > { %v7893_v46 = vadd.f32 %v7892_v48, %v7891_v16  ;;  %14962 = vmatpush3.bf16.msra.mxu1 %v16024_v39  ;;  %14783 = vmatprep.subr.bf16.mxu0 %v16027_v19  ;;  %v10195_v39 = vsel %vm326_vm0, %v10190_v26, %v10194_v29  ;;  %v16054_v14 = vld [vmem:[%s19019_s1 + $0x218] sm:$0xff]   ;;  %v16057_v16 = vld [vmem:[%s19019_s1 + $0x228] sm:$0xff]   ;;  %s18911_s6 = scalar_lea.hbm %s19021_s3, %s12708_s21  ;;  %s16073_s21 = scalar_lea.vmem %s16072_s8, 4096 }
 0x471   : > { %v6623_v53 = vrot.slane %v6622_v51, 2  ;;  %14963 = vmatprep.subr.bf16.mxu1 %v16028_v44  ;;  %14797 = vmatprep.mubr.bf16.mxu0 %v8916_v50  ;;  %v10321_v57 = vsel %vm566_vm1, %v10319_v35, %v10320_v36  ;;  %v16061_v48 = vld [vmem:[%s19019_s1 + $0x238] sm:$0xff]   ;;  %p16074_p10 = scmp.lt.s32.totalorder %s18905_s28, %s16072_s8  ;;  %p16075_p11 = scmp.lt.s32.totalorder %s16073_s21, %s16067_s29 }
 0x472   : > { %v7894_v56 = vrot.slane %v7893_v46, 2  ;;  %14977 = vmatprep.mubr.bf16.mxu1 %v10187_v5  ;;  %v16062_v50 = vld [vmem:[%s19019_s1 + $0x238] sm:$0xff]   ;;  %v10322_v5 = vrot.slane %v18813_v11, 1 }
 0x473   : > { %v6624_v34 = vadd.f32 %v6623_v53, %v6622_v51  ;;  %14784 = vmatpush3.bf16.msra.mxu0 %v16027_v19  ;;  %v16058_v19 = vld [vmem:[%s19019_s1 + $0x228] sm:$0xff]   ;;  %v9051_v51 = vrot.slane %v18807_v10, 1  ;;  %p16076_p0 = por %p16075_p11, %p16074_p10 }
 0x474   : > { %v7895_v59 = vadd.f32 %v7894_v56, %v7893_v46  ;;  %14964 = vmatpush3.bf16.msra.mxu1 %v16028_v44  ;;  %14785 = vmatprep.subr.bf16.mxu0 %v16029_v52  ;;  %v16060_v44 = vld [vmem:[%s19019_s1 + $0x230] sm:$0xff]  }
 0x475   : > { %v6625_v62 = vrot.slane %v6624_v34, 1  ;;  %14965 = vmatprep.subr.bf16.mxu1 %v16030_v54  ;;  %v9052_v46 = vsel %vm566_vm1, %v9049_v32, %v9051_v51  ;;  %p16077_p1 = pnand %p16076_p0, %p16070_p9 }
 0x476   : > { %v7896_v0 = vrot.slane %v7895_v59, 1 }
 0x477   : > { %v6626_v3 = vadd.f32 %v6625_v62, %v6624_v34  ;;  %14786 = vmatpush3.bf16.msra.mxu0 %v16029_v52  ;;  %v10323_v52 = vsel %vm566_vm1, %v10320_v36, %v10322_v5 }
 0x478   : > { %14966 = vmatpush3.bf16.msra.mxu1 %v16030_v54  ;;  %14787 = vmatprep.subr.bf16.mxu0 %v16031_v60  ;;  %v7897_v31 = vadd.f32 %v7896_v0, %v7895_v59 }
 0x479   : > { %14967 = vmatprep.subr.bf16.mxu1 %v16032_v63  ;;  %v6627_v24 = vadd.f32 %v6626_v3, %v18162_v41  ;;  %v16037_v41 = vld [vmem:[%s19019_s1 + $0x1f0] sm:$0xff]  }
 0x47b   : > { %14788 = vmatpush3.bf16.msra.mxu0 %v16031_v60  ;;  %v18798_v7 = vadd.f32 %v7897_v31, %v6627_v24 }
 0x47c   : > { %14968 = vmatpush3.bf16.msra.mxu1 %v16032_v63  ;;  %14789 = vmatprep.subr.bf16.mxu0 %v16033_v2 }
 0x47d   : > { %14969 = vmatprep.subr.bf16.mxu1 %v16034_v4 }
 0x47f   : > { %14790 = vmatpush3.bf16.msra.mxu0 %v16033_v2 }
 0x480   : > { %14970 = vmatpush3.bf16.msra.mxu1 %v16034_v4  ;;  %14791 = vmatprep.subr.bf16.mxu0 %v16035_v8 }
 0x481   : > { %14971 = vmatprep.subr.bf16.mxu1 %v16036_v9 }
 0x483   : > { %14792 = vmatpush3.bf16.msra.mxu0 %v16035_v8 }
 0x484   : > { %14972 = vmatpush3.bf16.msra.mxu1 %v16036_v9  ;;  %14793 = vmatprep.subr.bf16.mxu0 %v16037_v41 }
 0x485   : > { %14973 = vmatprep.subr.bf16.mxu1 %v16038_v55 }
 0x487   : > { %14794 = vmatpush3.bf16.msra.mxu0 %v16037_v41 }
 0x488   : > { %14974 = vmatpush3.bf16.msra.mxu1 %v16038_v55  ;;  %14795 = vmatprep.subr.bf16.mxu0 %v16039_v17 }
 0x489   : > { %14975 = vmatprep.subr.bf16.mxu1 %v16040_v18 }
 0x48b   : > { %14796 = vmatpush3.bf16.msra.mxu0 %v16039_v17 }
 0x48c   : > { %14976 = vmatpush3.bf16.msra.mxu1 %v16040_v18  ;;  %14801 = vmatprep.subr.bf16.mxu0 %v16043_v23 }
 0x48d   : > { %14981 = vmatprep.subr.bf16.mxu1 %v16046_v28 }
 0x48e   : > { %14798 = vmatmul.mubr.bf16.vlgmr.msra.gmra.mrb[12].mxu0 %v8924_v25 }
 0x48f   : > { %14802 = vmatpush3.bf16.msra.mxu0 %v16043_v23  ;;  %14978 = vmatmul.mubr.bf16.vlgmr.msra.gmra.mrb[12].mxu1 %v10195_v39 }
 0x490   : > { %14982 = vmatpush3.bf16.msra.mxu1 %v16046_v28  ;;  %14803 = vmatprep.subr.bf16.mxu0 %v16049_v38 }
 0x491   : > { %14983 = vmatprep.subr.bf16.mxu1 %v16050_v61  ;;  %14817 = vmatprep.mubr.bf16.mxu0 %v9050_v27 }
 0x492   : > { %14997 = vmatprep.mubr.bf16.mxu1 %v10321_v57 }
 0x493   : > { %14804 = vmatpush3.bf16.msra.mxu0 %v16049_v38 }
 0x494   : > { %14984 = vmatpush3.bf16.msra.mxu1 %v16050_v61  ;;  %14805 = vmatprep.subr.bf16.mxu0 %v16051_v1 }
 0x495   : > { %14985 = vmatprep.subr.bf16.mxu1 %v16052_v40 }
 0x497   : > { %14806 = vmatpush3.bf16.msra.mxu0 %v16051_v1 }
 0x498   : > { %14986 = vmatpush3.bf16.msra.mxu1 %v16052_v40  ;;  %14807 = vmatprep.subr.bf16.mxu0 %v16053_v43 }
 0x499   : > { %14987 = vmatprep.subr.bf16.mxu1 %v16054_v14 }
 0x49b   : > { %14808 = vmatpush3.bf16.msra.mxu0 %v16053_v43 }
 0x49c   : > { %14988 = vmatpush3.bf16.msra.mxu1 %v16054_v14  ;;  %14809 = vmatprep.subr.bf16.mxu0 %v16055_v45 }
 0x49d   : > { %14989 = vmatprep.subr.bf16.mxu1 %v16056_v49 }
 0x49f   : > { %14810 = vmatpush3.bf16.msra.mxu0 %v16055_v45 }
 0x4a0   : > { %14990 = vmatpush3.bf16.msra.mxu1 %v16056_v49  ;;  %14811 = vmatprep.subr.bf16.mxu0 %v16057_v16 }
 0x4a1   : > { %14991 = vmatprep.subr.bf16.mxu1 %v16058_v19 }
 0x4a3   : > { %14812 = vmatpush3.bf16.msra.mxu0 %v16057_v16 }
 0x4a4   : > { %14992 = vmatpush3.bf16.msra.mxu1 %v16058_v19  ;;  %14813 = vmatprep.subr.bf16.mxu0 %v16059_v47 }
 0x4a5   : > { %14993 = vmatprep.subr.bf16.mxu1 %v16060_v44 }
 0x4a7   : > { %14814 = vmatpush3.bf16.msra.mxu0 %v16059_v47 }
 0x4a8   : > { %14994 = vmatpush3.bf16.msra.mxu1 %v16060_v44  ;;  %14815 = vmatprep.subr.bf16.mxu0 %v16061_v48 }
 0x4a9   : > { %14995 = vmatprep.subr.bf16.mxu1 %v16062_v50 }
 0x4ab   : > { %14816 = vmatpush3.bf16.msra.mxu0 %v16061_v48 }
 0x4ac   : > { %14996 = vmatpush3.bf16.msra.mxu1 %v16062_v50 }
 0x4ae   : > { %14818 = vmatmul.mubr.bf16.vlgmr.msra.gmra.mrb[12].mxu0 %v9052_v46 }
 0x4af   : > { %14998 = vmatmul.mubr.bf16.vlgmr.msra.gmra.mrb[12].mxu1 %v10323_v52 }
 0x581   : > { %v14819_v53 = vpop.f32.mrb[12].mxu0 }
 0x582   : > { %v14999_v54 = vpop.f32.mrb[12].mxu1  ;;  %v9137_v56 = vpop.f32.mrb[13].mxu0  ;;  %v9158_v60 = vadd.f32 %v18735_v6, %v14819_v53 }
 0x583   : > { %v10408_v34 = vpop.f32.mrb[13].mxu1  ;;  %v14820_v59 = vpop.f32.mrb[14].mxu0  ;;  %v10429_v3 = vadd.f32 %v18735_v6, %v14999_v54  ;;  %v9156_v2 = vadd.f32 %v18735_v6, %v9137_v56 }
 0x584   : > { %v9159_v62 = vadd.f32 %v18735_v6, %v14820_v59  ;;  %v15000_v63 = vpop.f32.mrb[14].mxu1  ;;  %v9140_v0 = vpop.f32.mrb[15].mxu0  ;;  %v10427_v8 = vadd.f32 %v18735_v6, %v10408_v34 }
 0x585   : > { %v10430_v31 = vadd.f32 %v18735_v6, %v15000_v63  ;;  %v9157_v4 = vadd.f32 %v18735_v6, %v9140_v0  ;;  %v10411_v24 = vpop.f32.mrb[15].mxu1 }
 0x586   : > { %v12814_v9 = vpack.c.bf16 %v9159_v62, %v9158_v60  ;;  %v10428_v10 = vadd.f32 %v18735_v6, %v10411_v24 }
 0x587   : > { %v12824_v41 = vpack.c.bf16 %v10430_v31, %v10429_v3  ;;  %v9160_v11 = vadd.f32 %v9157_v4, %v9156_v2  ;;  %v12809_v55 = vpack.c.bf16 %v9157_v4, %v9156_v2 }
 0x588   : > { %12838 = vst [vmem:[%s16380_s24 + $0x68] sm:$0xff] %v12814_v9   ;;  %v10431_v12 = vadd.f32 %v10428_v10, %v10427_v8  ;;  %v12819_v13 = vpack.c.bf16 %v10428_v10, %v10427_v8 }
 0x589   : > { %12840 = vst [vmem:[%s16380_s24 + $0x78] sm:$0xff] %v12824_v41   ;;  %v9161_v15 = vadd.f32 %v9160_v11, %v9158_v60  ;;  %12837 = vst [vmem:[%s16380_s24 + $0x60] sm:$0xff] %v12809_v55  }
 0x58a   : > { %v10432_v6 = vadd.f32 %v10431_v12, %v10429_v3  ;;  %12839 = vst [vmem:[%s16380_s24 + $0x70] sm:$0xff] %v12819_v13  }
 0x58b   : > { %v9162_v17 = vadd.f32 %v9161_v15, %v9159_v62 }
 0x58c   : > { %16080 = shalt.err (!%p16077_p1)
}
 0x58d   : > { %s16081_s24 = scalar_lea.hbm %s18911_s6, 2048  ;;  %s16085_s26 = scalar_lea.hbm %s19021_s3, 16384 }
 0x58e   : > { %p16082_p4 = scmp.ne.s32.totalorder %s18911_s6, %s16081_s24  ;;  %p16086_p6 = scmp.lt.u32.totalorder %s18911_s6, %s19021_s3 }
 0x58f   : > { %p16087_p8 = scmp.lt.u32.totalorder %s16085_s26, %s16081_s24  ;;  %p16089_p10 = scmp.lt.u32.totalorder %s16081_s24, %s18911_s6 }
 0x590   : > { %p16083_p2 = pnand %p16082_p4, %p16322_p3 }
 0x591   : > { %p16088_p9 = por %p16087_p8, %p16086_p6 }
 0x592   : > { %p16084_p5 = pneg %p16083_p2 }
 0x593   : > { %p16090_p11 = por %p16089_p10, %p16088_p9 }
 0x595   : > { %p16091_p0 = pnand %p16090_p11, %p16084_p5 }
 0x597   : > { %16094 = shalt.err (!%p16091_p0)
}
 0x598   : > { %s16221_s29 = smov 64   ;;  %s16222_s21 = smov 4   ;;  %v10433_v58 = vadd.f32 %v10432_v6, %v10430_v31  ;;  %v9163_v33 = vrot.slane %v9162_v17, 4  ;;  %v10462_v25 = vld [vmem:[%s16382_s23] sm:$0x1] }
 0x599   : > { %15258 = dma.vmem_to_hbm [thread:$0]  (%p16322_p3), %s18905_s28, 2048, %s18911_s6, %s18918_s12, %s16221_s29, %s16221_s29, %s16222_s21  }
 0x59a   : > { %v10434_v37 = vrot.slane %v10433_v58, 4  ;;  %v9164_v18 = vadd.f32 %v9163_v33, %v9162_v17  ;;  %s10505_s7 = sshll.u32 %s16382_s23, 4  ;;  %s18950_s12 = scalar_lea.hbm %s19022_s4, %s12707_s30  ;;  %s18952_s7 = int_to_ptr.vmem [resolvable:$true] %s10505_s7 }
 0x59b   : > { %s19041_s24 = sand.u32 1, %s16181_s16   ;;  %s16095_s5 = scalar_lea.vmem %s18952_s7, 128 }
 0x59c   : > { %v10435_v20 = vadd.f32 %v10434_v37, %v10433_v58  ;;  %v9165_v22 = vrot.slane %v9164_v18, 2  ;;  %s10471_s11 = scalar_lea.sflag [#allocation5], %s19041_s24  ;;  %p16096_p3 = scmp.ne.s32.totalorder %s18952_s7, %s16095_s5 }
 0x59d   : > { %s16223_s26 = smov [#allocation4]  }
 0x59e   : > { %v10436_v42 = vrot.slane %v10435_v20, 2  ;;  %v9166_v21 = vadd.f32 %v9165_v22, %v9164_v18  ;;  %p16097_p1 = pnand %p16096_p3, %p16349_p12  ;;  %s16099_s22 = sshll.u32 %s16223_s26, 4  ;;  %s16100_s22 = int_to_ptr.vmem [resolvable:$false] %s16099_s22 }
 0x59f   : > { %s16101_s9 = scalar_lea.vmem %s16100_s22, 256  ;;  %p16102_p2 = scmp.lt.s32.totalorder %s18952_s7, %s16100_s22 }
 0x5a0   : > { %v10437_v23 = vadd.f32 %v10436_v42, %v10435_v20  ;;  %v9167_v26 = vrot.slane %v9166_v21, 1  ;;  %p16098_p4 = pneg %p16097_p1  ;;  %p16103_p5 = scmp.lt.s32.totalorder %s16101_s9, %s16095_s5 }
 0x5a2   : > { %v10438_v29 = vrot.slane %v10437_v23, 1  ;;  %v9168_v28 = vadd.f32 %v9167_v26, %v9166_v21  ;;  %p16104_p6 = por %p16103_p5, %p16102_p2 }
 0x5a4   : > { %v9169_v30 = vadd.f32 %v9168_v28, %v18798_v7  ;;  %v10439_v32 = vadd.f32 %v10438_v29, %v10437_v23  ;;  %p16105_p8 = pnand %p16104_p6, %p16098_p4 }
 0x5a6   : > { %v10440_v35 = vadd.f32 %v10439_v32, %v9169_v30 }
 0x5a8   : > { %v10463_v36 = vadd.f32 %v10462_v25, %v10440_v35 }
 0x5aa   : > { %10464 = vst [vmem:[%s16382_s23] sm:$0x1] %v10463_v36 }
 0x5ab   : > { %16108 = shalt.err (!%p16105_p8)
}
 0x5ac   : > { %s16109_s23 = scalar_lea.hbm %s18950_s12, 128  ;;  %s16113_s29 = scalar_lea.hbm %s19022_s4, 256 }
 0x5ad   : > { %p16110_p9 = scmp.ne.s32.totalorder %s18950_s12, %s16109_s23  ;;  %p16114_p0 = scmp.lt.u32.totalorder %s18950_s12, %s19022_s4 }
 0x5ae   : > { %p16115_p3 = scmp.lt.u32.totalorder %s16113_s29, %s16109_s23  ;;  %p16117_p4 = scmp.lt.u32.totalorder %s16109_s23, %s18950_s12 }
 0x5af   : > { %p16111_p10 = pnand %p16110_p9, %p16349_p12 }
 0x5b0   : > { %p16116_p1 = por %p16115_p3, %p16114_p0 }
 0x5b1   : > { %p16112_p11 = pneg %p16111_p10 }
 0x5b2   : > { %p16118_p2 = por %p16117_p4, %p16116_p1 }
 0x5b4   : > { %p16119_p5 = pnand %p16118_p2, %p16112_p11 }
 0x5b6   : > { %16122 = shalt.err (!%p16119_p5)
}
 0x5b7   : > { %15259 = dma.vmem_to_hbm [thread:$0]  (%p16349_p12), %s18952_s7, 128, %s18950_s12, %s10471_s11  }
 0x5b8 PF: > { %p15269_p6 = scmp.ge.s32.totalorder %s16217_s25, 2  ;;  %s10517_s6 = sand.u32 1, %s16189_s18  }
 0x5b9   : > { %s10518_s24 = scalar_lea.sflag [#allocation3], %s10517_s6 }
 0x5ba   : > { %p15263_p8 = pnand %p15269_p6, %p16337_p7 }
 0x5bc   : > { %16168 = dma.done.wait (!%p15263_p8), %s10518_s24, 2048  }
 0x5bd   : > { %16170 = vsyncadd (!%p15263_p8), %s10518_s24, 4294965248  ;;  %s10526_s5 = sand.u32 1, %s16177_s15   ;;  %p15266_p9 = pnand %p15269_p6, %p16361_p13 }
 0x5be   : > { %s10527_s13 = scalar_lea.sflag [#allocation5], %s10526_s5 }
 0x5bf   : > { %16172 = dma.done.wait (!%p15266_p9), %s10527_s13, 128  }
 0x5c0   : > { %16174 = vsyncadd (!%p15266_p9), %s10527_s13, 4294967168  ;;  %s21_s25 = sadd.s32 1, %s16217_s25   ;;  %s19042_s10 = sld [smem:[#allocation12_spill]] }
 0x5c1   : > { %p18_p12 = scmp.ge.s32.totalorder %s21_s25, 10   ;;  %s19043_s21 = sld [smem:[#allocation8_spill]] }
 0x5c2   : > { %s19044_s22 = sld [smem:[#allocation9_spill]]  ;;  %s19045_s23 = sld [smem:[#allocation10_spill]] }
 0x5c3   : > { %s19046_s24 = sld [smem:[#allocation11_spill]]  ;;  %s19047_s15 = smov %s16181_s16 }
 0x5c4   : > { %s19048_s16 = smov %s16185_s17  ;;  %s19049_s17 = smov %s16354_s14 }
 0x5c5   : > { %s19050_s18 = smov %s16193_s19  ;;  %s19051_s19 = smov %s16197_s20 }
 0x5c6   : > { %s19052_s20 = smov %s19042_s10  ;;  %20 = sbr.rel (!%p18_p12) target bundleno = 9 (0x9), region = 119 }
 0x5cd   :  { %10532 = vsyncpa [#allocation3], 1 }
 0x5ce   :  { %10534 = vsyncpa [#allocation3 + $0x1], 1 }
 0x5cf   :  { %10535 = vsyncpa [#allocation5], 1 }
 0x5d0   :  { %10537 = vsyncpa [#allocation5 + $0x1], 1 }

</bundles_post_ra>
